<compile_context>
chip_gen: v6e
topology: v6e:2x2x1
jax: 0.10.0
libtpu: 0.0.40
codegen_flags: <defaults>
</compile_context>

<pallas_src>
import math
from functools import partial

import jax
import jax.numpy as jnp
import numpy as np
from jax.experimental import pallas as pl
from jax.experimental.pallas import tpu as pltpu

# ---- GPT hyper-parameters (defaults of the PyTorch spec) --------------------
VOCAB = 10        # src_vocab_len
MAX_SEQ = 5       # max_seq_len (context length)
N_LAYERS = 6      # n_decoders
N_HEADS = 5
EMB = 10          # embedding_dim
FF_MULT = 4
FF = FF_MULT * EMB
D_HEAD = EMB // N_HEADS
D2 = 2 * EMB
EPS = 1e-5        # torch.nn.LayerNorm default
NEG_BIG = -1e30   # finite "masked" bias


def _align8(n):
    return int((n + 7) & ~7)


# ---- per-layer matrix slab layout (L, _WBIG_ROWS, _WBIG_COLS), 8-row aligned --
_WF1_OFF = 0                              # (EMB, FF)
_WF2_OFF = _align8(_WF1_OFF + EMB)        # (FF, EMB)
_WO_OFF = _align8(_WF2_OFF + FF)          # (2*EMB, EMB): rows [0:EMB)=0, rows [EMB:2EMB)=Wo
_WQ_OFF = _align8(_WO_OFF + D2)           # (EMB, 2*EMB): cols [0:EMB)=Wq*scale, rest 0
_WKV_OFF = _align8(_WQ_OFF + EMB)         # (EMB, 2*EMB): [Wk | Wv]
_WBIG_ROWS = _align8(_WKV_OFF + EMB)
_WBIG_COLS = max(FF, D2)

# ---- per-layer vector slab rows (L, 9, 1, _WBIG_COLS) ------------------------
_G1, _B1, _BQ, _BKV, _BO, _G2, _B2, _BF1, _BF2 = range(9)


def _layernorm(x, gamma, beta):
    mu = jnp.mean(x, axis=-1, keepdims=True)
    var = jnp.mean((x - mu) ** 2, axis=-1, keepdims=True)   # biased, like torch
    return (x - mu) * jax.lax.rsqrt(var + EPS) * gamma + beta


def _erf_approx(x):
    # Abramowitz & Stegun 7.1.26, |error| <= 1.5e-7; uses only exp/div/mul,
    # which are guaranteed to lower in Mosaic (lax.erf is not relied upon).
    a1, a2, a3, a4, a5 = (0.254829592, -0.284496736, 1.421413741,
                          -1.453152027, 1.061405429)
    p = 0.3275911
    ax = jnp.abs(x)
    t = 1.0 / (1.0 + p * ax)
    poly = ((((a5 * t + a4) * t + a3) * t + a2) * t + a1) * t
    y = 1.0 - poly * jnp.exp(-ax * ax)
    return jnp.where(x >= 0.0, y, -y)


def _gelu_exact(x):
    # torch.nn.GELU() default = exact erf-based GELU
    return 0.5 * x * (1.0 + _erf_approx(x * (1.0 / math.sqrt(2.0))))


# ------------------------------- kernel --------------------------------------
def gpt_kernel(ids_ref, wbig_ref, vecs_ref, const_ref, out_ref, *,
               co, batch, seq):
    f32, bf16 = jnp.float32, jnp.bfloat16
    D, V, F, H = EMB, VOCAB, FF, N_HEADS
    BS = batch * seq
    HBS = H * BS

    # ---- hoisted constants (loaded & cast once, before the layer loop) -----
    emb = const_ref[co["emb"]:co["emb"] + V, :D].astype(bf16)          # (V, D)
    pos = const_ref[co["pos"]:co["pos"] + BS, :D]                      # (BS, D)
    wpred = const_ref[co["wpred"]:co["wpred"] + D, :V].astype(bf16)    # (D, V)
    lnf_g = const_ref[co["lnf_g"]:co["lnf_g"] + 1, :D]                 # (1, D)
    lnf_b = const_ref[co["lnf_b"]:co["lnf_b"] + 1, :D]                 # (1, D)
    bpred = const_ref[co["bpred"]:co["bpred"] + 1, :V]                 # (1, V)
    rep = const_ref[co["rep"]:co["rep"] + HBS, :BS].astype(bf16)       # (HBS, BS)
    rept = const_ref[co["rept"]:co["rept"] + BS, :HBS].astype(bf16)    # (BS, HBS)
    qmask = const_ref[co["qmask"]:co["qmask"] + HBS, :D2]              # (HBS, 2D)
    vmask = const_ref[co["vmask"]:co["vmask"] + HBS, :D2]              # (HBS, 2D)
    bias = const_ref[co["bias"]:co["bias"] + HBS, :BS]                 # (HBS, BS)

    # ---- token embedding (one-hot matmul) + positional encodings -----------
    ids = ids_ref[...]                                                 # (BS, 1) i32
    vocab_iota = jax.lax.broadcasted_iota(jnp.int32, (BS, V), 1)
    onehot = (ids == vocab_iota).astype(bf16)                          # exact 0/1
    x = jnp.dot(onehot, emb, preferred_element_type=f32) + pos         # (BS, D)

    # ---- decoder stack (static unroll over 6 layers) ------------------------
    for l in range(N_LAYERS):
        wq = wbig_ref[l, _WQ_OFF:_WQ_OFF + D, :D2].astype(bf16)        # (D, 2D)
        wkv = wbig_ref[l, _WKV_OFF:_WKV_OFF + D, :D2].astype(bf16)     # (D, 2D)
        wo = wbig_ref[l, _WO_OFF:_WO_OFF + D2, :D].astype(bf16)        # (2D, D)
        wf1 = wbig_ref[l, _WF1_OFF:_WF1_OFF + D, :F].astype(bf16)      # (D, F)
        wf2 = wbig_ref[l, _WF2_OFF:_WF2_OFF + F, :D].astype(bf16)      # (F, D)

        g1 = vecs_ref[l, _G1][:, :D]
        b1 = vecs_ref[l, _B1][:, :D]
        bq = vecs_ref[l, _BQ][:, :D2]
        bkv = vecs_ref[l, _BKV][:, :D2]
        bo = vecs_ref[l, _BO][:, :D]
        g2 = vecs_ref[l, _G2][:, :D]
        b2 = vecs_ref[l, _B2][:, :D]
        bf1 = vecs_ref[l, _BF1][:, :F]
        bf2 = vecs_ref[l, _BF2][:, :D]

        # -- multi-head self-attention (1/sqrt(d_head) folded into Wq/bq) ----
        n1 = _layernorm(x, g1, b1)
        n1b = n1.astype(bf16)
        q = jnp.dot(n1b, wq, preferred_element_type=f32) + bq          # (BS, 2D)
        kv = jnp.dot(n1b, wkv, preferred_element_type=f32) + bkv       # (BS, 2D) = [K|V]
        kvb = kv.astype(bf16)

        # head-stack Q along sublanes (replication matmul) + per-head lane mask
        q_stk = jnp.dot(rep, q.astype(bf16),
                        preferred_element_type=f32) * qmask            # (HBS, 2D)
        # one score matmul for all heads (V lanes of kv killed by qmask zeros)
        s = jax.lax.dot_general(q_stk.astype(bf16), kvb,
                                (((1,), (1,)), ((), ())),
                                preferred_element_type=f32) + bias     # (HBS, BS)
        m = jnp.max(s, axis=-1, keepdims=True)
        e = jnp.exp(s - m)
        p = e * pl.reciprocal(jnp.sum(e, axis=-1, keepdims=True), approx=True)
        # one probs@V matmul for all heads; V output sits in lanes [D, 2D)
        ctx_stk = jnp.dot(p.astype(bf16), kvb,
                          preferred_element_type=f32)                  # (HBS, 2D)
        # fold the head stack back (mask selects each head's V lanes)
        ctx = jnp.dot(rept, (ctx_stk * vmask).astype(bf16),
                      preferred_element_type=f32)                      # (BS, 2D)
        x = x + jnp.dot(ctx.astype(bf16), wo, preferred_element_type=f32) + bo

        # -- feed-forward: Linear -> GELU -> Linear ---------------------------
        n2 = _layernorm(x, g2, b2)
        h1 = jnp.dot(n2.astype(bf16), wf1, preferred_element_type=f32) + bf1
        h1 = _gelu_exact(h1)
        x = x + jnp.dot(h1.astype(bf16), wf2, preferred_element_type=f32) + bf2

    # ---- final LayerNorm + prediction head ----------------------------------
    xn = _layernorm(x, lnf_g, lnf_b)
    out_ref[...] = (jnp.dot(xn.astype(bf16), wpred, preferred_element_type=f32)
                    + bpred)


def gpt_forward(ids, packed):
    """Full GPT forward: (B, S) int32 token ids -> (B, S, VOCAB) f32 logits."""
    B, S = ids.shape
    BS = B * S
    ids2d = ids.reshape(BS, 1).astype(jnp.int32)
    vmem = pl.BlockSpec(memory_space=pltpu.MemorySpace.VMEM)
    logits = pl.pallas_call(
        partial(gpt_kernel, co=packed["offs"], batch=B, seq=S),
        out_shape=jax.ShapeDtypeStruct((BS, VOCAB), jnp.float32),
        in_specs=[vmem] * 4,
        out_specs=vmem,
    )(ids2d, packed["wbig"], packed["vecs"], packed["const"])
    return logits.reshape(B, S, VOCAB)


# --------------------------- parameters / packing ----------------------------
def sinusoidal_pe(seq_len, dim):
    # TODO(synk): the spec's PositionalEncoding class is not provided; a fixed
    # sinusoidal table is used consistently for both kernel and reference.
    pos = np.arange(seq_len, dtype=np.float32)[:, None]
    i = np.arange(dim, dtype=np.float32)[None, :]
    angle = pos / np.power(10000.0, (2.0 * np.floor(i / 2.0)) / dim)
    pe = np.where((np.arange(dim)[None, :] % 2) == 0, np.sin(angle), np.cos(angle))
    return pe.astype(np.float32)


def init_gpt_params(key):
    """Torch-default init: Embedding ~ N(0,1); Linear ~ U(+-1/sqrt(fan_in))."""
    D, F, V, L = EMB, FF, VOCAB, N_LAYERS
    keys = jax.random.split(key, L + 2)

    def linear(k, fan_in, fan_out):
        k1, k2 = jax.random.split(k)
        bound = 1.0 / math.sqrt(fan_in)
        w = jax.random.uniform(k1, (fan_in, fan_out), jnp.float32, -bound, bound)
        b = jax.random.uniform(k2, (fan_out,), jnp.float32, -bound, bound)
        return w, b

    layers = []
    for l in range(L):
        lk = jax.random.split(keys[l], 6)
        wq, bq = linear(lk[0], D, D)
        wk, bk = linear(lk[1], D, D)
        wv, bv = linear(lk[2], D, D)
        wo, bo = linear(lk[3], D, D)
        wf1, bf1 = linear(lk[4], D, F)
        wf2, bf2 = linear(lk[5], F, D)
        layers.append(dict(
            g1=jnp.ones((D,), jnp.float32), b1=jnp.zeros((D,), jnp.float32),
            wq=wq, bq=bq, wk=wk, bk=bk, wv=wv, bv=bv, wo=wo, bo=bo,
            g2=jnp.ones((D,), jnp.float32), b2=jnp.zeros((D,), jnp.float32),
            wf1=wf1, bf1=bf1, wf2=wf2, bf2=bf2))

    emb = jax.random.normal(keys[L], (V, D), jnp.float32)
    wpred, bpred = linear(keys[L + 1], D, V)
    return dict(emb=emb, layers=layers,
                lnf_g=jnp.ones((D,), jnp.float32),
                lnf_b=jnp.zeros((D,), jnp.float32),
                wpred=wpred, bpred=bpred)


def _build_const_slab(entries):
    """Pack a list of (name, 2-D array) into one f32 slab with 8-aligned row
    offsets and a shared (max) column width.  Returns (slab, offsets)."""
    width = max(int(np.asarray(a).shape[1]) for _, a in entries)
    offs, cursor, blocks = {}, 0, []
    for name, arr in entries:
        arr = np.asarray(arr, np.float32)
        cursor = _align8(cursor)
        offs[name] = cursor
        blocks.append((cursor, arr))
        cursor += arr.shape[0]
    total = _align8(cursor)
    slab = np.zeros((total, width), np.float32)
    for off, arr in blocks:
        slab[off:off + arr.shape[0], :arr.shape[1]] = arr
    return slab, offs


def pack_params(params, pe, batch, seq):
    """Pack all weights + derived constants into 3 f32 slabs (few DMA descriptors)."""
    D, F, V, L, H, dh = EMB, FF, VOCAB, N_LAYERS, N_HEADS, D_HEAD
    BS = batch * seq
    HBS = H * BS
    scale = 1.0 / math.sqrt(dh)

    wbig = np.zeros((L, _WBIG_ROWS, _WBIG_COLS), np.float32)
    vecs = np.zeros((L, 9, 1, _WBIG_COLS), np.float32)
    for l, p in enumerate(params["layers"]):
        wbig[l, _WF1_OFF:_WF1_OFF + D, :F] = np.asarray(p["wf1"])
        wbig[l, _WF2_OFF:_WF2_OFF + F, :D] = np.asarray(p["wf2"])
        wbig[l, _WO_OFF + D:_WO_OFF + 2 * D, :D] = np.asarray(p["wo"])   # rows [D:2D)
        wbig[l, _WQ_OFF:_WQ_OFF + D, :D] = np.asarray(p["wq"]) * scale   # fold 1/sqrt(dh)
        wbig[l, _WKV_OFF:_WKV_OFF + D, :D] = np.asarray(p["wk"])
        wbig[l, _WKV_OFF:_WKV_OFF + D, D:2 * D] = np.asarray(p["wv"])
        vecs[l, _G1, 0, :D] = np.asarray(p["g1"])
        vecs[l, _B1, 0, :D] = np.asarray(p["b1"])
        vecs[l, _BQ, 0, :D] = np.asarray(p["bq"]) * scale
        vecs[l, _BKV, 0, :D] = np.asarray(p["bk"])
        vecs[l, _BKV, 0, D:2 * D] = np.asarray(p["bv"])
        vecs[l, _BO, 0, :D] = np.asarray(p["bo"])
        vecs[l, _G2, 0, :D] = np.asarray(p["g2"])
        vecs[l, _B2, 0, :D] = np.asarray(p["b2"])
        vecs[l, _BF1, 0, :F] = np.asarray(p["bf1"])
        vecs[l, _BF2, 0, :D] = np.asarray(p["bf2"])

    # ---- derived constants for the head-stacked attention -------------------
    pos = np.tile(np.asarray(pe)[:seq], (batch, 1))                    # (BS, D)
    posn = np.tile(np.arange(seq, dtype=np.int64), batch)              # (BS,)
    i_idx = np.arange(BS)[:, None]
    j_idx = np.arange(BS)[None, :]
    diff = i_idx - j_idx
    allowed = (diff >= 0) & (diff <= posn[:, None])                    # causal + same batch
    bias = np.where(allowed, 0.0, NEG_BIG).astype(np.float32)          # (BS, BS)
    bias_stk = np.tile(bias, (H, 1))                                   # (HBS, BS)

    rep = np.zeros((HBS, BS), np.float32)                              # row r -> row r % BS
    rep[np.arange(HBS), np.arange(HBS) % BS] = 1.0
    rept = np.ascontiguousarray(rep.T)                                 # (BS, HBS)

    lanes = np.arange(D2)[None, :]
    h_row = (np.arange(HBS) // BS)[:, None]
    qmask = ((lanes >= h_row * dh) & (lanes < (h_row + 1) * dh)).astype(np.float32)
    vmask = ((lanes >= D + h_row * dh) & (lanes < D + (h_row + 1) * dh)).astype(np.float32)

    slab, offs = _build_const_slab([
        ("emb", np.asarray(params["emb"])),
        ("pos", pos),
        ("wpred", np.asarray(params["wpred"])),
        ("lnf_g", np.asarray(params["lnf_g"])[None, :]),
        ("lnf_b", np.asarray(params["lnf_b"])[None, :]),
        ("bpred", np.asarray(params["bpred"])[None, :]),
        ("rep", rep),
        ("rept", rept),
        ("qmask", qmask),
        ("vmask", vmask),
        ("bias", bias_stk),
    ])

    return dict(
        wbig=jnp.asarray(wbig),
        vecs=jnp.asarray(vecs),
        const=jnp.asarray(slab),
        offs=offs,
    )


# ------------------------------- reference -----------------------------------
def reference_forward(ids, params, pe):
    """Plain-JAX replica of GPT.forward (eval mode, standard causal mask), f32."""
    D, H, dh = EMB, N_HEADS, D_HEAD
    B, S = ids.shape

    def ln(y, g, b):
        mu = y.mean(-1, keepdims=True)
        var = ((y - mu) ** 2).mean(-1, keepdims=True)
        return (y - mu) / jnp.sqrt(var + EPS) * g + b

    with jax.default_matmul_precision("highest"):
        x = params["emb"][ids] + pe[None, :S, :]
        causal = jnp.triu(jnp.ones((S, S), bool), k=1)
        for p in params["layers"]:
            n1 = ln(x, p["g1"], p["b1"])
            q = (n1 @ p["wq"] + p["bq"]).reshape(B, S, H, dh).transpose(0, 2, 1, 3)
            k = (n1 @ p["wk"] + p["bk"]).reshape(B, S, H, dh).transpose(0, 2, 1, 3)
            v = (n1 @ p["wv"] + p["bv"]).reshape(B, S, H, dh).transpose(0, 2, 1, 3)
            s = jnp.einsum("bhqd,bhkd->bhqk", q, k) / math.sqrt(dh)
            s = jnp.where(causal[None, None], -jnp.inf, s)
            a = jax.nn.softmax(s, axis=-1)
            ctx = jnp.einsum("bhqk,bhkd->bhqd", a, v).transpose(0, 2, 1, 3).reshape(B, S, D)
            x = x + ctx @ p["wo"] + p["bo"]
            n2 = ln(x, p["g2"], p["b2"])
            h1 = n2 @ p["wf1"] + p["bf1"]
            h1 = 0.5 * h1 * (1.0 + jax.lax.erf(h1 / math.sqrt(2.0)))
            x = x + h1 @ p["wf2"] + p["bf2"]

        xn = ln(x, params["lnf_g"], params["lnf_b"])
        return xn @ params["wpred"] + params["bpred"]


# --------------------------------- main ---------------------------------------
if __name__ == "__main__":
    B, S = 2, MAX_SEQ            # (batch_size, seq_len) = (2, 5) token indices
    key = jax.random.PRNGKey(0)
    k_ids, k_par = jax.random.split(key)
    ids = jax.random.randint(k_ids, (B, S), 0, VOCAB, dtype=jnp.int32)

    params = init_gpt_params(k_par)
    pe = sinusoidal_pe(MAX_SEQ, EMB)
    packed = pack_params(params, pe, B, S)

    logits = jax.block_until_ready(gpt_forward(ids, packed))
    assert logits.shape == (B, S, VOCAB)

    ref = jax.block_until_ready(reference_forward(ids, params, jnp.asarray(pe)))
    # Kernel uses single-pass bf16 MXU operands (f32 accumulation) + approx EUP
    # reciprocal per the performance review; the reference is exact f32, hence
    # the 5e-2 tolerance (structural bugs would show up as O(1) mismatches).
    np.testing.assert_allclose(np.asarray(logits), np.asarray(ref),
                               atol=5e-2, rtol=5e-2)
    print("KERNEL_OK")
</pallas_src>

<mosaic_0001>
module attributes {stable_mosaic.version = 11 : i64} {
  func.func @gpt_kernel(%arg0: memref<10x1xi32, #tpu.memory_space<vmem>>, %arg1: memref<6x112x40xf32, #tpu.memory_space<vmem>>, %arg2: memref<6x9x1x40xf32, #tpu.memory_space<vmem>>, %arg3: memref<312x50xf32, #tpu.memory_space<vmem>>, %arg4: memref<10x10xf32, #tpu.memory_space<vmem>>) attributes {dimension_semantics = [], scalar_prefetch = 0 : i64, scratch_operands = 0 : i64, tpu.core_type = #tpu.core_type<tc>} {
    %c0 = arith.constant 0 : index
    %c0_0 = arith.constant 0 : index
    %0 = vector.load %arg3[%c0, %c0_0] : memref<312x50xf32, #tpu.memory_space<vmem>>, vector<10x10xf32>
    %1 = arith.truncf %0 : vector<10x10xf32> to vector<10x10xbf16>
    %c16 = arith.constant 16 : index
    %c0_1 = arith.constant 0 : index
    %2 = vector.load %arg3[%c16, %c0_1] : memref<312x50xf32, #tpu.memory_space<vmem>>, vector<10x10xf32>
    %c32 = arith.constant 32 : index
    %c0_2 = arith.constant 0 : index
    %3 = vector.load %arg3[%c32, %c0_2] : memref<312x50xf32, #tpu.memory_space<vmem>>, vector<10x10xf32>
    %4 = arith.truncf %3 : vector<10x10xf32> to vector<10x10xbf16>
    %c48 = arith.constant 48 : index
    %c0_3 = arith.constant 0 : index
    %5 = vector.load %arg3[%c48, %c0_3] : memref<312x50xf32, #tpu.memory_space<vmem>>, vector<1x10xf32>
    %c56 = arith.constant 56 : index
    %c0_4 = arith.constant 0 : index
    %6 = vector.load %arg3[%c56, %c0_4] : memref<312x50xf32, #tpu.memory_space<vmem>>, vector<1x10xf32>
    %c64 = arith.constant 64 : index
    %c0_5 = arith.constant 0 : index
    %7 = vector.load %arg3[%c64, %c0_5] : memref<312x50xf32, #tpu.memory_space<vmem>>, vector<1x10xf32>
    %c72 = arith.constant 72 : index
    %c0_6 = arith.constant 0 : index
    %8 = vector.load %arg3[%c72, %c0_6] : memref<312x50xf32, #tpu.memory_space<vmem>>, vector<50x10xf32>
    %9 = arith.truncf %8 : vector<50x10xf32> to vector<50x10xbf16>
    %c128 = arith.constant 128 : index
    %c0_7 = arith.constant 0 : index
    %10 = vector.load %arg3[%c128, %c0_7] : memref<312x50xf32, #tpu.memory_space<vmem>>, vector<10x50xf32>
    %11 = arith.truncf %10 : vector<10x50xf32> to vector<10x50xbf16>
    %c144 = arith.constant 144 : index
    %c0_8 = arith.constant 0 : index
    %12 = vector.load %arg3[%c144, %c0_8] : memref<312x50xf32, #tpu.memory_space<vmem>>, vector<50x20xf32>
    %c200 = arith.constant 200 : index
    %c0_9 = arith.constant 0 : index
    %13 = vector.load %arg3[%c200, %c0_9] : memref<312x50xf32, #tpu.memory_space<vmem>>, vector<50x20xf32>
    %c256 = arith.constant 256 : index
    %c0_10 = arith.constant 0 : index
    %14 = vector.load %arg3[%c256, %c0_10] : memref<312x50xf32, #tpu.memory_space<vmem>>, vector<50x10xf32>
    %c0_11 = arith.constant 0 : index
    %c0_12 = arith.constant 0 : index
    %15 = vector.load %arg0[%c0_11, %c0_12] : memref<10x1xi32, #tpu.memory_space<vmem>>, vector<10x1xi32>
    %16 = tpu.iota {dimensions = array<i32: 1>} : vector<10x10xi32>
    %17 = vector.broadcast %15 : vector<10x1xi32> to vector<10x10xi32>
    %18 = arith.cmpi eq, %17, %16 : vector<10x10xi32>
    %19 = arith.extui %18 : vector<10x10xi1> to vector<10x10xi32>
    %20 = arith.sitofp %19 : vector<10x10xi32> to vector<10x10xf32>
    %21 = arith.truncf %20 : vector<10x10xf32> to vector<10x10xbf16>
    %cst = arith.constant dense<0.000000e+00> : vector<10x10xf32>
    %22 = tpu.matmul %21, %1, %cst {dimension_numbers = #tpu.dot_dimension_numbers<[1], [0], [0], [1], [0, 0, 1, 1], [], []>} : vector<10x10xbf16>, vector<10x10xbf16>, vector<10x10xf32> -> vector<10x10xf32>
    %23 = arith.addf %22, %2 : vector<10x10xf32>
    %c0_13 = arith.constant 0 : index
    %c80 = arith.constant 80 : index
    %c0_14 = arith.constant 0 : index
    %24 = vector.load %arg1[%c0_13, %c80, %c0_14] : memref<6x112x40xf32, #tpu.memory_space<vmem>>, vector<1x10x20xf32>
    %25 = vector.shape_cast %24 : vector<1x10x20xf32> to vector<10x20xf32>
    %26 = arith.truncf %25 : vector<10x20xf32> to vector<10x20xbf16>
    %c0_15 = arith.constant 0 : index
    %c96 = arith.constant 96 : index
    %c0_16 = arith.constant 0 : index
    %27 = vector.load %arg1[%c0_15, %c96, %c0_16] : memref<6x112x40xf32, #tpu.memory_space<vmem>>, vector<1x10x20xf32>
    %28 = vector.shape_cast %27 : vector<1x10x20xf32> to vector<10x20xf32>
    %29 = arith.truncf %28 : vector<10x20xf32> to vector<10x20xbf16>
    %c0_17 = arith.constant 0 : index
    %c56_18 = arith.constant 56 : index
    %c0_19 = arith.constant 0 : index
    %30 = vector.load %arg1[%c0_17, %c56_18, %c0_19] : memref<6x112x40xf32, #tpu.memory_space<vmem>>, vector<1x20x10xf32>
    %31 = vector.shape_cast %30 : vector<1x20x10xf32> to vector<20x10xf32>
    %32 = arith.truncf %31 : vector<20x10xf32> to vector<20x10xbf16>
    %c0_20 = arith.constant 0 : index
    %c0_21 = arith.constant 0 : index
    %c0_22 = arith.constant 0 : index
    %33 = vector.load %arg1[%c0_20, %c0_21, %c0_22] : memref<6x112x40xf32, #tpu.memory_space<vmem>>, vector<1x10x40xf32>
    %34 = vector.shape_cast %33 : vector<1x10x40xf32> to vector<10x40xf32>
    %35 = arith.truncf %34 : vector<10x40xf32> to vector<10x40xbf16>
    %c0_23 = arith.constant 0 : index
    %c16_24 = arith.constant 16 : index
    %c0_25 = arith.constant 0 : index
    %36 = vector.load %arg1[%c0_23, %c16_24, %c0_25] : memref<6x112x40xf32, #tpu.memory_space<vmem>>, vector<1x40x10xf32>
    %37 = vector.shape_cast %36 : vector<1x40x10xf32> to vector<40x10xf32>
    %38 = arith.truncf %37 : vector<40x10xf32> to vector<40x10xbf16>
    %c0_26 = arith.constant 0 : index
    %c0_27 = arith.constant 0 : index
    %c0_28 = arith.constant 0 : index
    %c0_29 = arith.constant 0 : index
    %39 = vector.load %arg2[%c0_26, %c0_27, %c0_28, %c0_29] : memref<6x9x1x40xf32, #tpu.memory_space<vmem>>, vector<1x1x1x40xf32>
    %40 = vector.shape_cast %39 : vector<1x1x1x40xf32> to vector<1x40xf32>
    %41 = vector.extract_strided_slice %40 {offsets = [0, 0], sizes = [1, 10], strides = [1, 1]} : vector<1x40xf32> to vector<1x10xf32>
    %c0_30 = arith.constant 0 : index
    %c1 = arith.constant 1 : index
    %c0_31 = arith.constant 0 : index
    %c0_32 = arith.constant 0 : index
    %42 = vector.load %arg2[%c0_30, %c1, %c0_31, %c0_32] : memref<6x9x1x40xf32, #tpu.memory_space<vmem>>, vector<1x1x1x40xf32>
    %43 = vector.shape_cast %42 : vector<1x1x1x40xf32> to vector<1x40xf32>
    %44 = vector.extract_strided_slice %43 {offsets = [0, 0], sizes = [1, 10], strides = [1, 1]} : vector<1x40xf32> to vector<1x10xf32>
    %c0_33 = arith.constant 0 : index
    %c2 = arith.constant 2 : index
    %c0_34 = arith.constant 0 : index
    %c0_35 = arith.constant 0 : index
    %45 = vector.load %arg2[%c0_33, %c2, %c0_34, %c0_35] : memref<6x9x1x40xf32, #tpu.memory_space<vmem>>, vector<1x1x1x40xf32>
    %46 = vector.shape_cast %45 : vector<1x1x1x40xf32> to vector<1x40xf32>
    %47 = vector.extract_strided_slice %46 {offsets = [0, 0], sizes = [1, 20], strides = [1, 1]} : vector<1x40xf32> to vector<1x20xf32>
    %c0_36 = arith.constant 0 : index
    %c3 = arith.constant 3 : index
    %c0_37 = arith.constant 0 : index
    %c0_38 = arith.constant 0 : index
    %48 = vector.load %arg2[%c0_36, %c3, %c0_37, %c0_38] : memref<6x9x1x40xf32, #tpu.memory_space<vmem>>, vector<1x1x1x40xf32>
    %49 = vector.shape_cast %48 : vector<1x1x1x40xf32> to vector<1x40xf32>
    %50 = vector.extract_strided_slice %49 {offsets = [0, 0], sizes = [1, 20], strides = [1, 1]} : vector<1x40xf32> to vector<1x20xf32>
    %c0_39 = arith.constant 0 : index
    %c4 = arith.constant 4 : index
    %c0_40 = arith.constant 0 : index
    %c0_41 = arith.constant 0 : index
    %51 = vector.load %arg2[%c0_39, %c4, %c0_40, %c0_41] : memref<6x9x1x40xf32, #tpu.memory_space<vmem>>, vector<1x1x1x40xf32>
    %52 = vector.shape_cast %51 : vector<1x1x1x40xf32> to vector<1x40xf32>
    %53 = vector.extract_strided_slice %52 {offsets = [0, 0], sizes = [1, 10], strides = [1, 1]} : vector<1x40xf32> to vector<1x10xf32>
    %c0_42 = arith.constant 0 : index
    %c5 = arith.constant 5 : index
    %c0_43 = arith.constant 0 : index
    %c0_44 = arith.constant 0 : index
    %54 = vector.load %arg2[%c0_42, %c5, %c0_43, %c0_44] : memref<6x9x1x40xf32, #tpu.memory_space<vmem>>, vector<1x1x1x40xf32>
    %55 = vector.shape_cast %54 : vector<1x1x1x40xf32> to vector<1x40xf32>
    %56 = vector.extract_strided_slice %55 {offsets = [0, 0], sizes = [1, 10], strides = [1, 1]} : vector<1x40xf32> to vector<1x10xf32>
    %c0_45 = arith.constant 0 : index
    %c6 = arith.constant 6 : index
    %c0_46 = arith.constant 0 : index
    %c0_47 = arith.constant 0 : index
    %57 = vector.load %arg2[%c0_45, %c6, %c0_46, %c0_47] : memref<6x9x1x40xf32, #tpu.memory_space<vmem>>, vector<1x1x1x40xf32>
    %58 = vector.shape_cast %57 : vector<1x1x1x40xf32> to vector<1x40xf32>
    %59 = vector.extract_strided_slice %58 {offsets = [0, 0], sizes = [1, 10], strides = [1, 1]} : vector<1x40xf32> to vector<1x10xf32>
    %c0_48 = arith.constant 0 : index
    %c7 = arith.constant 7 : index
    %c0_49 = arith.constant 0 : index
    %c0_50 = arith.constant 0 : index
    %60 = vector.load %arg2[%c0_48, %c7, %c0_49, %c0_50] : memref<6x9x1x40xf32, #tpu.memory_space<vmem>>, vector<1x1x1x40xf32>
    %61 = vector.shape_cast %60 : vector<1x1x1x40xf32> to vector<1x40xf32>
    %c0_51 = arith.constant 0 : index
    %c8 = arith.constant 8 : index
    %c0_52 = arith.constant 0 : index
    %c0_53 = arith.constant 0 : index
    %62 = vector.load %arg2[%c0_51, %c8, %c0_52, %c0_53] : memref<6x9x1x40xf32, #tpu.memory_space<vmem>>, vector<1x1x1x40xf32>
    %63 = vector.shape_cast %62 : vector<1x1x1x40xf32> to vector<1x40xf32>
    %64 = vector.extract_strided_slice %63 {offsets = [0, 0], sizes = [1, 10], strides = [1, 1]} : vector<1x40xf32> to vector<1x10xf32>
    %cst_54 = arith.constant dense<0.000000e+00> : vector<10xf32>
    %65 = vector.multi_reduction <add>, %23, %cst_54 [1] : vector<10x10xf32> to vector<10xf32>
    %66 = vector.shape_cast %65 : vector<10xf32> to vector<10x1xf32>
    %cst_55 = arith.constant 1.000000e+01 : f32
    %67 = vector.broadcast %cst_55 : f32 to vector<10x1xf32>
    %68 = arith.divf %66, %67 : vector<10x1xf32>
    %69 = vector.broadcast %68 : vector<10x1xf32> to vector<10x10xf32>
    %70 = arith.subf %23, %69 : vector<10x10xf32>
    %71 = arith.mulf %70, %70 : vector<10x10xf32>
    %cst_56 = arith.constant dense<0.000000e+00> : vector<10xf32>
    %72 = vector.multi_reduction <add>, %71, %cst_56 [1] : vector<10x10xf32> to vector<10xf32>
    %73 = vector.shape_cast %72 : vector<10xf32> to vector<10x1xf32>
    %cst_57 = arith.constant 1.000000e+01 : f32
    %74 = vector.broadcast %cst_57 : f32 to vector<10x1xf32>
    %75 = arith.divf %73, %74 : vector<10x1xf32>
    %76 = vector.broadcast %68 : vector<10x1xf32> to vector<10x10xf32>
    %77 = arith.subf %23, %76 : vector<10x10xf32>
    %cst_58 = arith.constant 9.99999974E-6 : f32
    %78 = vector.broadcast %cst_58 : f32 to vector<10x1xf32>
    %79 = arith.addf %75, %78 : vector<10x1xf32>
    %80 = math.rsqrt %79 : vector<10x1xf32>
    %81 = vector.broadcast %80 : vector<10x1xf32> to vector<10x10xf32>
    %82 = arith.mulf %77, %81 : vector<10x10xf32>
    %83 = vector.broadcast %41 : vector<1x10xf32> to vector<10x10xf32>
    %84 = arith.mulf %82, %83 : vector<10x10xf32>
    %85 = vector.broadcast %44 : vector<1x10xf32> to vector<10x10xf32>
    %86 = arith.addf %84, %85 : vector<10x10xf32>
    %87 = arith.truncf %86 : vector<10x10xf32> to vector<10x10xbf16>
    %cst_59 = arith.constant dense<0.000000e+00> : vector<10x20xf32>
    %88 = tpu.matmul %87, %26, %cst_59 {dimension_numbers = #tpu.dot_dimension_numbers<[1], [0], [0], [1], [0, 0, 1, 1], [], []>} : vector<10x10xbf16>, vector<10x20xbf16>, vector<10x20xf32> -> vector<10x20xf32>
    %89 = vector.broadcast %47 : vector<1x20xf32> to vector<10x20xf32>
    %90 = arith.addf %88, %89 : vector<10x20xf32>
    %cst_60 = arith.constant dense<0.000000e+00> : vector<10x20xf32>
    %91 = tpu.matmul %87, %29, %cst_60 {dimension_numbers = #tpu.dot_dimension_numbers<[1], [0], [0], [1], [0, 0, 1, 1], [], []>} : vector<10x10xbf16>, vector<10x20xbf16>, vector<10x20xf32> -> vector<10x20xf32>
    %92 = vector.broadcast %50 : vector<1x20xf32> to vector<10x20xf32>
    %93 = arith.addf %91, %92 : vector<10x20xf32>
    %94 = arith.truncf %93 : vector<10x20xf32> to vector<10x20xbf16>
    %95 = arith.truncf %90 : vector<10x20xf32> to vector<10x20xbf16>
    %cst_61 = arith.constant dense<0.000000e+00> : vector<50x20xf32>
    %96 = tpu.matmul %9, %95, %cst_61 {dimension_numbers = #tpu.dot_dimension_numbers<[1], [0], [0], [1], [0, 0, 1, 1], [], []>} : vector<50x10xbf16>, vector<10x20xbf16>, vector<50x20xf32> -> vector<50x20xf32>
    %97 = arith.mulf %96, %12 : vector<50x20xf32>
    %98 = arith.truncf %97 : vector<50x20xf32> to vector<50x20xbf16>
    %cst_62 = arith.constant dense<0.000000e+00> : vector<50x10xf32>
    %99 = tpu.matmul %98, %94, %cst_62 {dimension_numbers = #tpu.dot_dimension_numbers<[1], [1], [0], [0], [0, 0, 1, 0], [], []>} : vector<50x20xbf16>, vector<10x20xbf16>, vector<50x10xf32> -> vector<50x10xf32>
    %100 = arith.addf %99, %14 : vector<50x10xf32>
    %cst_63 = arith.constant dense<0xFF800000> : vector<50xf32>
    %101 = vector.multi_reduction <maximumf>, %100, %cst_63 [1] : vector<50x10xf32> to vector<50xf32>
    %102 = vector.shape_cast %101 : vector<50xf32> to vector<50x1xf32>
    %103 = vector.broadcast %102 : vector<50x1xf32> to vector<50x10xf32>
    %104 = arith.subf %100, %103 : vector<50x10xf32>
    %105 = math.exp %104 : vector<50x10xf32>
    %cst_64 = arith.constant dense<0.000000e+00> : vector<50xf32>
    %106 = vector.multi_reduction <add>, %105, %cst_64 [1] : vector<50x10xf32> to vector<50xf32>
    %107 = vector.shape_cast %106 : vector<50xf32> to vector<50x1xf32>
    %108 = tpu.reciprocal %107 {approx = true} : vector<50x1xf32> -> vector<50x1xf32>
    %109 = vector.broadcast %108 : vector<50x1xf32> to vector<50x10xf32>
    %110 = arith.mulf %105, %109 : vector<50x10xf32>
    %111 = arith.truncf %110 : vector<50x10xf32> to vector<50x10xbf16>
    %cst_65 = arith.constant dense<0.000000e+00> : vector<50x20xf32>
    %112 = tpu.matmul %111, %94, %cst_65 {dimension_numbers = #tpu.dot_dimension_numbers<[1], [0], [0], [1], [0, 0, 1, 1], [], []>} : vector<50x10xbf16>, vector<10x20xbf16>, vector<50x20xf32> -> vector<50x20xf32>
    %113 = arith.mulf %112, %13 : vector<50x20xf32>
    %114 = arith.truncf %113 : vector<50x20xf32> to vector<50x20xbf16>
    %cst_66 = arith.constant dense<0.000000e+00> : vector<10x20xf32>
    %115 = tpu.matmul %11, %114, %cst_66 {dimension_numbers = #tpu.dot_dimension_numbers<[1], [0], [0], [1], [0, 0, 1, 1], [], []>} : vector<10x50xbf16>, vector<50x20xbf16>, vector<10x20xf32> -> vector<10x20xf32>
    %116 = arith.truncf %115 : vector<10x20xf32> to vector<10x20xbf16>
    %cst_67 = arith.constant dense<0.000000e+00> : vector<10x10xf32>
    %117 = tpu.matmul %116, %32, %cst_67 {dimension_numbers = #tpu.dot_dimension_numbers<[1], [0], [0], [1], [0, 0, 1, 1], [], []>} : vector<10x20xbf16>, vector<20x10xbf16>, vector<10x10xf32> -> vector<10x10xf32>
    %118 = arith.addf %23, %117 : vector<10x10xf32>
    %119 = vector.broadcast %53 : vector<1x10xf32> to vector<10x10xf32>
    %120 = arith.addf %118, %119 : vector<10x10xf32>
    %cst_68 = arith.constant dense<0.000000e+00> : vector<10xf32>
    %121 = vector.multi_reduction <add>, %120, %cst_68 [1] : vector<10x10xf32> to vector<10xf32>
    %122 = vector.shape_cast %121 : vector<10xf32> to vector<10x1xf32>
    %cst_69 = arith.constant 1.000000e+01 : f32
    %123 = vector.broadcast %cst_69 : f32 to vector<10x1xf32>
    %124 = arith.divf %122, %123 : vector<10x1xf32>
    %125 = vector.broadcast %124 : vector<10x1xf32> to vector<10x10xf32>
    %126 = arith.subf %120, %125 : vector<10x10xf32>
    %127 = arith.mulf %126, %126 : vector<10x10xf32>
    %cst_70 = arith.constant dense<0.000000e+00> : vector<10xf32>
    %128 = vector.multi_reduction <add>, %127, %cst_70 [1] : vector<10x10xf32> to vector<10xf32>
    %129 = vector.shape_cast %128 : vector<10xf32> to vector<10x1xf32>
    %cst_71 = arith.constant 1.000000e+01 : f32
    %130 = vector.broadcast %cst_71 : f32 to vector<10x1xf32>
    %131 = arith.divf %129, %130 : vector<10x1xf32>
    %132 = vector.broadcast %124 : vector<10x1xf32> to vector<10x10xf32>
    %133 = arith.subf %120, %132 : vector<10x10xf32>
    %cst_72 = arith.constant 9.99999974E-6 : f32
    %134 = vector.broadcast %cst_72 : f32 to vector<10x1xf32>
    %135 = arith.addf %131, %134 : vector<10x1xf32>
    %136 = math.rsqrt %135 : vector<10x1xf32>
    %137 = vector.broadcast %136 : vector<10x1xf32> to vector<10x10xf32>
    %138 = arith.mulf %133, %137 : vector<10x10xf32>
    %139 = vector.broadcast %56 : vector<1x10xf32> to vector<10x10xf32>
    %140 = arith.mulf %138, %139 : vector<10x10xf32>
    %141 = vector.broadcast %59 : vector<1x10xf32> to vector<10x10xf32>
    %142 = arith.addf %140, %141 : vector<10x10xf32>
    %143 = arith.truncf %142 : vector<10x10xf32> to vector<10x10xbf16>
    %cst_73 = arith.constant dense<0.000000e+00> : vector<10x40xf32>
    %144 = tpu.matmul %143, %35, %cst_73 {dimension_numbers = #tpu.dot_dimension_numbers<[1], [0], [0], [1], [0, 0, 1, 1], [], []>} : vector<10x10xbf16>, vector<10x40xbf16>, vector<10x40xf32> -> vector<10x40xf32>
    %145 = vector.broadcast %61 : vector<1x40xf32> to vector<10x40xf32>
    %146 = arith.addf %144, %145 : vector<10x40xf32>
    %cst_74 = arith.constant 5.000000e-01 : f32
    %147 = vector.broadcast %cst_74 : f32 to vector<10x40xf32>
    %148 = arith.mulf %147, %146 : vector<10x40xf32>
    %cst_75 = arith.constant 0.707106769 : f32
    %149 = vector.broadcast %cst_75 : f32 to vector<10x40xf32>
    %150 = arith.mulf %146, %149 : vector<10x40xf32>
    %151 = math.absf %150 : vector<10x40xf32>
    %cst_76 = arith.constant 0.327591091 : f32
    %152 = vector.broadcast %cst_76 : f32 to vector<10x40xf32>
    %153 = arith.mulf %152, %151 : vector<10x40xf32>
    %cst_77 = arith.constant 1.000000e+00 : f32
    %154 = vector.broadcast %cst_77 : f32 to vector<10x40xf32>
    %155 = arith.addf %154, %153 : vector<10x40xf32>
    %cst_78 = arith.constant 1.000000e+00 : f32
    %156 = vector.broadcast %cst_78 : f32 to vector<10x40xf32>
    %157 = arith.divf %156, %155 : vector<10x40xf32>
    %cst_79 = arith.constant 1.06140542 : f32
    %158 = vector.broadcast %cst_79 : f32 to vector<10x40xf32>
    %159 = arith.mulf %158, %157 : vector<10x40xf32>
    %cst_80 = arith.constant -1.45315206 : f32
    %160 = vector.broadcast %cst_80 : f32 to vector<10x40xf32>
    %161 = arith.addf %159, %160 : vector<10x40xf32>
    %162 = arith.mulf %161, %157 : vector<10x40xf32>
    %cst_81 = arith.constant 1.42141378 : f32
    %163 = vector.broadcast %cst_81 : f32 to vector<10x40xf32>
    %164 = arith.addf %162, %163 : vector<10x40xf32>
    %165 = arith.mulf %164, %157 : vector<10x40xf32>
    %cst_82 = arith.constant -0.284496725 : f32
    %166 = vector.broadcast %cst_82 : f32 to vector<10x40xf32>
    %167 = arith.addf %165, %166 : vector<10x40xf32>
    %168 = arith.mulf %167, %157 : vector<10x40xf32>
    %cst_83 = arith.constant 0.254829586 : f32
    %169 = vector.broadcast %cst_83 : f32 to vector<10x40xf32>
    %170 = arith.addf %168, %169 : vector<10x40xf32>
    %171 = arith.mulf %170, %157 : vector<10x40xf32>
    %cst_84 = arith.constant 0.000000e+00 : f32
    %172 = vector.broadcast %cst_84 : f32 to vector<10x40xf32>
    %173 = arith.subf %172, %151 : vector<10x40xf32>
    %174 = arith.mulf %173, %151 : vector<10x40xf32>
    %175 = math.exp %174 : vector<10x40xf32>
    %176 = arith.mulf %171, %175 : vector<10x40xf32>
    %cst_85 = arith.constant 1.000000e+00 : f32
    %177 = vector.broadcast %cst_85 : f32 to vector<10x40xf32>
    %178 = arith.subf %177, %176 : vector<10x40xf32>
    %cst_86 = arith.constant 0.000000e+00 : f32
    %179 = vector.broadcast %cst_86 : f32 to vector<10x40xf32>
    %180 = arith.cmpf oge, %150, %179 : vector<10x40xf32>
    %cst_87 = arith.constant 0.000000e+00 : f32
    %181 = vector.broadcast %cst_87 : f32 to vector<10x40xf32>
    %182 = arith.subf %181, %178 : vector<10x40xf32>
    %183 = arith.select %180, %178, %182 : vector<10x40xi1>, vector<10x40xf32>
    %cst_88 = arith.constant 1.000000e+00 : f32
    %184 = vector.broadcast %cst_88 : f32 to vector<10x40xf32>
    %185 = arith.addf %184, %183 : vector<10x40xf32>
    %186 = arith.mulf %148, %185 : vector<10x40xf32>
    %187 = arith.truncf %186 : vector<10x40xf32> to vector<10x40xbf16>
    %cst_89 = arith.constant dense<0.000000e+00> : vector<10x10xf32>
    %188 = tpu.matmul %187, %38, %cst_89 {dimension_numbers = #tpu.dot_dimension_numbers<[1], [0], [0], [1], [0, 0, 1, 1], [], []>} : vector<10x40xbf16>, vector<40x10xbf16>, vector<10x10xf32> -> vector<10x10xf32>
    %189 = arith.addf %120, %188 : vector<10x10xf32>
    %190 = vector.broadcast %64 : vector<1x10xf32> to vector<10x10xf32>
    %191 = arith.addf %189, %190 : vector<10x10xf32>
    %c1_90 = arith.constant 1 : index
    %c80_91 = arith.constant 80 : index
    %c0_92 = arith.constant 0 : index
    %192 = vector.load %arg1[%c1_90, %c80_91, %c0_92] : memref<6x112x40xf32, #tpu.memory_space<vmem>>, vector<1x10x20xf32>
    %193 = vector.shape_cast %192 : vector<1x10x20xf32> to vector<10x20xf32>
    %194 = arith.truncf %193 : vector<10x20xf32> to vector<10x20xbf16>
    %c1_93 = arith.constant 1 : index
    %c96_94 = arith.constant 96 : index
    %c0_95 = arith.constant 0 : index
    %195 = vector.load %arg1[%c1_93, %c96_94, %c0_95] : memref<6x112x40xf32, #tpu.memory_space<vmem>>, vector<1x10x20xf32>
    %196 = vector.shape_cast %195 : vector<1x10x20xf32> to vector<10x20xf32>
    %197 = arith.truncf %196 : vector<10x20xf32> to vector<10x20xbf16>
    %c1_96 = arith.constant 1 : index
    %c56_97 = arith.constant 56 : index
    %c0_98 = arith.constant 0 : index
    %198 = vector.load %arg1[%c1_96, %c56_97, %c0_98] : memref<6x112x40xf32, #tpu.memory_space<vmem>>, vector<1x20x10xf32>
    %199 = vector.shape_cast %198 : vector<1x20x10xf32> to vector<20x10xf32>
    %200 = arith.truncf %199 : vector<20x10xf32> to vector<20x10xbf16>
    %c1_99 = arith.constant 1 : index
    %c0_100 = arith.constant 0 : index
    %c0_101 = arith.constant 0 : index
    %201 = vector.load %arg1[%c1_99, %c0_100, %c0_101] : memref<6x112x40xf32, #tpu.memory_space<vmem>>, vector<1x10x40xf32>
    %202 = vector.shape_cast %201 : vector<1x10x40xf32> to vector<10x40xf32>
    %203 = arith.truncf %202 : vector<10x40xf32> to vector<10x40xbf16>
    %c1_102 = arith.constant 1 : index
    %c16_103 = arith.constant 16 : index
    %c0_104 = arith.constant 0 : index
    %204 = vector.load %arg1[%c1_102, %c16_103, %c0_104] : memref<6x112x40xf32, #tpu.memory_space<vmem>>, vector<1x40x10xf32>
    %205 = vector.shape_cast %204 : vector<1x40x10xf32> to vector<40x10xf32>
    %206 = arith.truncf %205 : vector<40x10xf32> to vector<40x10xbf16>
    %c1_105 = arith.constant 1 : index
    %c0_106 = arith.constant 0 : index
    %c0_107 = arith.constant 0 : index
    %c0_108 = arith.constant 0 : index
    %207 = vector.load %arg2[%c1_105, %c0_106, %c0_107, %c0_108] : memref<6x9x1x40xf32, #tpu.memory_space<vmem>>, vector<1x1x1x40xf32>
    %208 = vector.shape_cast %207 : vector<1x1x1x40xf32> to vector<1x40xf32>
    %209 = vector.extract_strided_slice %208 {offsets = [0, 0], sizes = [1, 10], strides = [1, 1]} : vector<1x40xf32> to vector<1x10xf32>
    %c1_109 = arith.constant 1 : index
    %c1_110 = arith.constant 1 : index
    %c0_111 = arith.constant 0 : index
    %c0_112 = arith.constant 0 : index
    %210 = vector.load %arg2[%c1_109, %c1_110, %c0_111, %c0_112] : memref<6x9x1x40xf32, #tpu.memory_space<vmem>>, vector<1x1x1x40xf32>
    %211 = vector.shape_cast %210 : vector<1x1x1x40xf32> to vector<1x40xf32>
    %212 = vector.extract_strided_slice %211 {offsets = [0, 0], sizes = [1, 10], strides = [1, 1]} : vector<1x40xf32> to vector<1x10xf32>
    %c1_113 = arith.constant 1 : index
    %c2_114 = arith.constant 2 : index
    %c0_115 = arith.constant 0 : index
    %c0_116 = arith.constant 0 : index
    %213 = vector.load %arg2[%c1_113, %c2_114, %c0_115, %c0_116] : memref<6x9x1x40xf32, #tpu.memory_space<vmem>>, vector<1x1x1x40xf32>
    %214 = vector.shape_cast %213 : vector<1x1x1x40xf32> to vector<1x40xf32>
    %215 = vector.extract_strided_slice %214 {offsets = [0, 0], sizes = [1, 20], strides = [1, 1]} : vector<1x40xf32> to vector<1x20xf32>
    %c1_117 = arith.constant 1 : index
    %c3_118 = arith.constant 3 : index
    %c0_119 = arith.constant 0 : index
    %c0_120 = arith.constant 0 : index
    %216 = vector.load %arg2[%c1_117, %c3_118, %c0_119, %c0_120] : memref<6x9x1x40xf32, #tpu.memory_space<vmem>>, vector<1x1x1x40xf32>
    %217 = vector.shape_cast %216 : vector<1x1x1x40xf32> to vector<1x40xf32>
    %218 = vector.extract_strided_slice %217 {offsets = [0, 0], sizes = [1, 20], strides = [1, 1]} : vector<1x40xf32> to vector<1x20xf32>
    %c1_121 = arith.constant 1 : index
    %c4_122 = arith.constant 4 : index
    %c0_123 = arith.constant 0 : index
    %c0_124 = arith.constant 0 : index
    %219 = vector.load %arg2[%c1_121, %c4_122, %c0_123, %c0_124] : memref<6x9x1x40xf32, #tpu.memory_space<vmem>>, vector<1x1x1x40xf32>
    %220 = vector.shape_cast %219 : vector<1x1x1x40xf32> to vector<1x40xf32>
    %221 = vector.extract_strided_slice %220 {offsets = [0, 0], sizes = [1, 10], strides = [1, 1]} : vector<1x40xf32> to vector<1x10xf32>
    %c1_125 = arith.constant 1 : index
    %c5_126 = arith.constant 5 : index
    %c0_127 = arith.constant 0 : index
    %c0_128 = arith.constant 0 : index
    %222 = vector.load %arg2[%c1_125, %c5_126, %c0_127, %c0_128] : memref<6x9x1x40xf32, #tpu.memory_space<vmem>>, vector<1x1x1x40xf32>
    %223 = vector.shape_cast %222 : vector<1x1x1x40xf32> to vector<1x40xf32>
    %224 = vector.extract_strided_slice %223 {offsets = [0, 0], sizes = [1, 10], strides = [1, 1]} : vector<1x40xf32> to vector<1x10xf32>
    %c1_129 = arith.constant 1 : index
    %c6_130 = arith.constant 6 : index
    %c0_131 = arith.constant 0 : index
    %c0_132 = arith.constant 0 : index
    %225 = vector.load %arg2[%c1_129, %c6_130, %c0_131, %c0_132] : memref<6x9x1x40xf32, #tpu.memory_space<vmem>>, vector<1x1x1x40xf32>
    %226 = vector.shape_cast %225 : vector<1x1x1x40xf32> to vector<1x40xf32>
    %227 = vector.extract_strided_slice %226 {offsets = [0, 0], sizes = [1, 10], strides = [1, 1]} : vector<1x40xf32> to vector<1x10xf32>
    %c1_133 = arith.constant 1 : index
    %c7_134 = arith.constant 7 : index
    %c0_135 = arith.constant 0 : index
    %c0_136 = arith.constant 0 : index
    %228 = vector.load %arg2[%c1_133, %c7_134, %c0_135, %c0_136] : memref<6x9x1x40xf32, #tpu.memory_space<vmem>>, vector<1x1x1x40xf32>
    %229 = vector.shape_cast %228 : vector<1x1x1x40xf32> to vector<1x40xf32>
    %c1_137 = arith.constant 1 : index
    %c8_138 = arith.constant 8 : index
    %c0_139 = arith.constant 0 : index
    %c0_140 = arith.constant 0 : index
    %230 = vector.load %arg2[%c1_137, %c8_138, %c0_139, %c0_140] : memref<6x9x1x40xf32, #tpu.memory_space<vmem>>, vector<1x1x1x40xf32>
    %231 = vector.shape_cast %230 : vector<1x1x1x40xf32> to vector<1x40xf32>
    %232 = vector.extract_strided_slice %231 {offsets = [0, 0], sizes = [1, 10], strides = [1, 1]} : vector<1x40xf32> to vector<1x10xf32>
    %cst_141 = arith.constant dense<0.000000e+00> : vector<10xf32>
    %233 = vector.multi_reduction <add>, %191, %cst_141 [1] : vector<10x10xf32> to vector<10xf32>
    %234 = vector.shape_cast %233 : vector<10xf32> to vector<10x1xf32>
    %cst_142 = arith.constant 1.000000e+01 : f32
    %235 = vector.broadcast %cst_142 : f32 to vector<10x1xf32>
    %236 = arith.divf %234, %235 : vector<10x1xf32>
    %237 = vector.broadcast %236 : vector<10x1xf32> to vector<10x10xf32>
    %238 = arith.subf %191, %237 : vector<10x10xf32>
    %239 = arith.mulf %238, %238 : vector<10x10xf32>
    %cst_143 = arith.constant dense<0.000000e+00> : vector<10xf32>
    %240 = vector.multi_reduction <add>, %239, %cst_143 [1] : vector<10x10xf32> to vector<10xf32>
    %241 = vector.shape_cast %240 : vector<10xf32> to vector<10x1xf32>
    %cst_144 = arith.constant 1.000000e+01 : f32
    %242 = vector.broadcast %cst_144 : f32 to vector<10x1xf32>
    %243 = arith.divf %241, %242 : vector<10x1xf32>
    %244 = vector.broadcast %236 : vector<10x1xf32> to vector<10x10xf32>
    %245 = arith.subf %191, %244 : vector<10x10xf32>
    %cst_145 = arith.constant 9.99999974E-6 : f32
    %246 = vector.broadcast %cst_145 : f32 to vector<10x1xf32>
    %247 = arith.addf %243, %246 : vector<10x1xf32>
    %248 = math.rsqrt %247 : vector<10x1xf32>
    %249 = vector.broadcast %248 : vector<10x1xf32> to vector<10x10xf32>
    %250 = arith.mulf %245, %249 : vector<10x10xf32>
    %251 = vector.broadcast %209 : vector<1x10xf32> to vector<10x10xf32>
    %252 = arith.mulf %250, %251 : vector<10x10xf32>
    %253 = vector.broadcast %212 : vector<1x10xf32> to vector<10x10xf32>
    %254 = arith.addf %252, %253 : vector<10x10xf32>
    %255 = arith.truncf %254 : vector<10x10xf32> to vector<10x10xbf16>
    %cst_146 = arith.constant dense<0.000000e+00> : vector<10x20xf32>
    %256 = tpu.matmul %255, %194, %cst_146 {dimension_numbers = #tpu.dot_dimension_numbers<[1], [0], [0], [1], [0, 0, 1, 1], [], []>} : vector<10x10xbf16>, vector<10x20xbf16>, vector<10x20xf32> -> vector<10x20xf32>
    %257 = vector.broadcast %215 : vector<1x20xf32> to vector<10x20xf32>
    %258 = arith.addf %256, %257 : vector<10x20xf32>
    %cst_147 = arith.constant dense<0.000000e+00> : vector<10x20xf32>
    %259 = tpu.matmul %255, %197, %cst_147 {dimension_numbers = #tpu.dot_dimension_numbers<[1], [0], [0], [1], [0, 0, 1, 1], [], []>} : vector<10x10xbf16>, vector<10x20xbf16>, vector<10x20xf32> -> vector<10x20xf32>
    %260 = vector.broadcast %218 : vector<1x20xf32> to vector<10x20xf32>
    %261 = arith.addf %259, %260 : vector<10x20xf32>
    %262 = arith.truncf %261 : vector<10x20xf32> to vector<10x20xbf16>
    %263 = arith.truncf %258 : vector<10x20xf32> to vector<10x20xbf16>
    %cst_148 = arith.constant dense<0.000000e+00> : vector<50x20xf32>
    %264 = tpu.matmul %9, %263, %cst_148 {dimension_numbers = #tpu.dot_dimension_numbers<[1], [0], [0], [1], [0, 0, 1, 1], [], []>} : vector<50x10xbf16>, vector<10x20xbf16>, vector<50x20xf32> -> vector<50x20xf32>
    %265 = arith.mulf %264, %12 : vector<50x20xf32>
    %266 = arith.truncf %265 : vector<50x20xf32> to vector<50x20xbf16>
    %cst_149 = arith.constant dense<0.000000e+00> : vector<50x10xf32>
    %267 = tpu.matmul %266, %262, %cst_149 {dimension_numbers = #tpu.dot_dimension_numbers<[1], [1], [0], [0], [0, 0, 1, 0], [], []>} : vector<50x20xbf16>, vector<10x20xbf16>, vector<50x10xf32> -> vector<50x10xf32>
    %268 = arith.addf %267, %14 : vector<50x10xf32>
    %cst_150 = arith.constant dense<0xFF800000> : vector<50xf32>
    %269 = vector.multi_reduction <maximumf>, %268, %cst_150 [1] : vector<50x10xf32> to vector<50xf32>
    %270 = vector.shape_cast %269 : vector<50xf32> to vector<50x1xf32>
    %271 = vector.broadcast %270 : vector<50x1xf32> to vector<50x10xf32>
    %272 = arith.subf %268, %271 : vector<50x10xf32>
    %273 = math.exp %272 : vector<50x10xf32>
    %cst_151 = arith.constant dense<0.000000e+00> : vector<50xf32>
    %274 = vector.multi_reduction <add>, %273, %cst_151 [1] : vector<50x10xf32> to vector<50xf32>
    %275 = vector.shape_cast %274 : vector<50xf32> to vector<50x1xf32>
    %276 = tpu.reciprocal %275 {approx = true} : vector<50x1xf32> -> vector<50x1xf32>
    %277 = vector.broadcast %276 : vector<50x1xf32> to vector<50x10xf32>
    %278 = arith.mulf %273, %277 : vector<50x10xf32>
    %279 = arith.truncf %278 : vector<50x10xf32> to vector<50x10xbf16>
    %cst_152 = arith.constant dense<0.000000e+00> : vector<50x20xf32>
    %280 = tpu.matmul %279, %262, %cst_152 {dimension_numbers = #tpu.dot_dimension_numbers<[1], [0], [0], [1], [0, 0, 1, 1], [], []>} : vector<50x10xbf16>, vector<10x20xbf16>, vector<50x20xf32> -> vector<50x20xf32>
    %281 = arith.mulf %280, %13 : vector<50x20xf32>
    %282 = arith.truncf %281 : vector<50x20xf32> to vector<50x20xbf16>
    %cst_153 = arith.constant dense<0.000000e+00> : vector<10x20xf32>
    %283 = tpu.matmul %11, %282, %cst_153 {dimension_numbers = #tpu.dot_dimension_numbers<[1], [0], [0], [1], [0, 0, 1, 1], [], []>} : vector<10x50xbf16>, vector<50x20xbf16>, vector<10x20xf32> -> vector<10x20xf32>
    %284 = arith.truncf %283 : vector<10x20xf32> to vector<10x20xbf16>
    %cst_154 = arith.constant dense<0.000000e+00> : vector<10x10xf32>
    %285 = tpu.matmul %284, %200, %cst_154 {dimension_numbers = #tpu.dot_dimension_numbers<[1], [0], [0], [1], [0, 0, 1, 1], [], []>} : vector<10x20xbf16>, vector<20x10xbf16>, vector<10x10xf32> -> vector<10x10xf32>
    %286 = arith.addf %191, %285 : vector<10x10xf32>
    %287 = vector.broadcast %221 : vector<1x10xf32> to vector<10x10xf32>
    %288 = arith.addf %286, %287 : vector<10x10xf32>
    %cst_155 = arith.constant dense<0.000000e+00> : vector<10xf32>
    %289 = vector.multi_reduction <add>, %288, %cst_155 [1] : vector<10x10xf32> to vector<10xf32>
    %290 = vector.shape_cast %289 : vector<10xf32> to vector<10x1xf32>
    %cst_156 = arith.constant 1.000000e+01 : f32
    %291 = vector.broadcast %cst_156 : f32 to vector<10x1xf32>
    %292 = arith.divf %290, %291 : vector<10x1xf32>
    %293 = vector.broadcast %292 : vector<10x1xf32> to vector<10x10xf32>
    %294 = arith.subf %288, %293 : vector<10x10xf32>
    %295 = arith.mulf %294, %294 : vector<10x10xf32>
    %cst_157 = arith.constant dense<0.000000e+00> : vector<10xf32>
    %296 = vector.multi_reduction <add>, %295, %cst_157 [1] : vector<10x10xf32> to vector<10xf32>
    %297 = vector.shape_cast %296 : vector<10xf32> to vector<10x1xf32>
    %cst_158 = arith.constant 1.000000e+01 : f32
    %298 = vector.broadcast %cst_158 : f32 to vector<10x1xf32>
    %299 = arith.divf %297, %298 : vector<10x1xf32>
    %300 = vector.broadcast %292 : vector<10x1xf32> to vector<10x10xf32>
    %301 = arith.subf %288, %300 : vector<10x10xf32>
    %cst_159 = arith.constant 9.99999974E-6 : f32
    %302 = vector.broadcast %cst_159 : f32 to vector<10x1xf32>
    %303 = arith.addf %299, %302 : vector<10x1xf32>
    %304 = math.rsqrt %303 : vector<10x1xf32>
    %305 = vector.broadcast %304 : vector<10x1xf32> to vector<10x10xf32>
    %306 = arith.mulf %301, %305 : vector<10x10xf32>
    %307 = vector.broadcast %224 : vector<1x10xf32> to vector<10x10xf32>
    %308 = arith.mulf %306, %307 : vector<10x10xf32>
    %309 = vector.broadcast %227 : vector<1x10xf32> to vector<10x10xf32>
    %310 = arith.addf %308, %309 : vector<10x10xf32>
    %311 = arith.truncf %310 : vector<10x10xf32> to vector<10x10xbf16>
    %cst_160 = arith.constant dense<0.000000e+00> : vector<10x40xf32>
    %312 = tpu.matmul %311, %203, %cst_160 {dimension_numbers = #tpu.dot_dimension_numbers<[1], [0], [0], [1], [0, 0, 1, 1], [], []>} : vector<10x10xbf16>, vector<10x40xbf16>, vector<10x40xf32> -> vector<10x40xf32>
    %313 = vector.broadcast %229 : vector<1x40xf32> to vector<10x40xf32>
    %314 = arith.addf %312, %313 : vector<10x40xf32>
    %cst_161 = arith.constant 5.000000e-01 : f32
    %315 = vector.broadcast %cst_161 : f32 to vector<10x40xf32>
    %316 = arith.mulf %315, %314 : vector<10x40xf32>
    %cst_162 = arith.constant 0.707106769 : f32
    %317 = vector.broadcast %cst_162 : f32 to vector<10x40xf32>
    %318 = arith.mulf %314, %317 : vector<10x40xf32>
    %319 = math.absf %318 : vector<10x40xf32>
    %cst_163 = arith.constant 0.327591091 : f32
    %320 = vector.broadcast %cst_163 : f32 to vector<10x40xf32>
    %321 = arith.mulf %320, %319 : vector<10x40xf32>
    %cst_164 = arith.constant 1.000000e+00 : f32
    %322 = vector.broadcast %cst_164 : f32 to vector<10x40xf32>
    %323 = arith.addf %322, %321 : vector<10x40xf32>
    %cst_165 = arith.constant 1.000000e+00 : f32
    %324 = vector.broadcast %cst_165 : f32 to vector<10x40xf32>
    %325 = arith.divf %324, %323 : vector<10x40xf32>
    %cst_166 = arith.constant 1.06140542 : f32
    %326 = vector.broadcast %cst_166 : f32 to vector<10x40xf32>
    %327 = arith.mulf %326, %325 : vector<10x40xf32>
    %cst_167 = arith.constant -1.45315206 : f32
    %328 = vector.broadcast %cst_167 : f32 to vector<10x40xf32>
    %329 = arith.addf %327, %328 : vector<10x40xf32>
    %330 = arith.mulf %329, %325 : vector<10x40xf32>
    %cst_168 = arith.constant 1.42141378 : f32
    %331 = vector.broadcast %cst_168 : f32 to vector<10x40xf32>
    %332 = arith.addf %330, %331 : vector<10x40xf32>
    %333 = arith.mulf %332, %325 : vector<10x40xf32>
    %cst_169 = arith.constant -0.284496725 : f32
    %334 = vector.broadcast %cst_169 : f32 to vector<10x40xf32>
    %335 = arith.addf %333, %334 : vector<10x40xf32>
    %336 = arith.mulf %335, %325 : vector<10x40xf32>
    %cst_170 = arith.constant 0.254829586 : f32
    %337 = vector.broadcast %cst_170 : f32 to vector<10x40xf32>
    %338 = arith.addf %336, %337 : vector<10x40xf32>
    %339 = arith.mulf %338, %325 : vector<10x40xf32>
    %cst_171 = arith.constant 0.000000e+00 : f32
    %340 = vector.broadcast %cst_171 : f32 to vector<10x40xf32>
    %341 = arith.subf %340, %319 : vector<10x40xf32>
    %342 = arith.mulf %341, %319 : vector<10x40xf32>
    %343 = math.exp %342 : vector<10x40xf32>
    %344 = arith.mulf %339, %343 : vector<10x40xf32>
    %cst_172 = arith.constant 1.000000e+00 : f32
    %345 = vector.broadcast %cst_172 : f32 to vector<10x40xf32>
    %346 = arith.subf %345, %344 : vector<10x40xf32>
    %cst_173 = arith.constant 0.000000e+00 : f32
    %347 = vector.broadcast %cst_173 : f32 to vector<10x40xf32>
    %348 = arith.cmpf oge, %318, %347 : vector<10x40xf32>
    %cst_174 = arith.constant 0.000000e+00 : f32
    %349 = vector.broadcast %cst_174 : f32 to vector<10x40xf32>
    %350 = arith.subf %349, %346 : vector<10x40xf32>
    %351 = arith.select %348, %346, %350 : vector<10x40xi1>, vector<10x40xf32>
    %cst_175 = arith.constant 1.000000e+00 : f32
    %352 = vector.broadcast %cst_175 : f32 to vector<10x40xf32>
    %353 = arith.addf %352, %351 : vector<10x40xf32>
    %354 = arith.mulf %316, %353 : vector<10x40xf32>
    %355 = arith.truncf %354 : vector<10x40xf32> to vector<10x40xbf16>
    %cst_176 = arith.constant dense<0.000000e+00> : vector<10x10xf32>
    %356 = tpu.matmul %355, %206, %cst_176 {dimension_numbers = #tpu.dot_dimension_numbers<[1], [0], [0], [1], [0, 0, 1, 1], [], []>} : vector<10x40xbf16>, vector<40x10xbf16>, vector<10x10xf32> -> vector<10x10xf32>
    %357 = arith.addf %288, %356 : vector<10x10xf32>
    %358 = vector.broadcast %232 : vector<1x10xf32> to vector<10x10xf32>
    %359 = arith.addf %357, %358 : vector<10x10xf32>
    %c2_177 = arith.constant 2 : index
    %c80_178 = arith.constant 80 : index
    %c0_179 = arith.constant 0 : index
    %360 = vector.load %arg1[%c2_177, %c80_178, %c0_179] : memref<6x112x40xf32, #tpu.memory_space<vmem>>, vector<1x10x20xf32>
    %361 = vector.shape_cast %360 : vector<1x10x20xf32> to vector<10x20xf32>
    %362 = arith.truncf %361 : vector<10x20xf32> to vector<10x20xbf16>
    %c2_180 = arith.constant 2 : index
    %c96_181 = arith.constant 96 : index
    %c0_182 = arith.constant 0 : index
    %363 = vector.load %arg1[%c2_180, %c96_181, %c0_182] : memref<6x112x40xf32, #tpu.memory_space<vmem>>, vector<1x10x20xf32>
    %364 = vector.shape_cast %363 : vector<1x10x20xf32> to vector<10x20xf32>
    %365 = arith.truncf %364 : vector<10x20xf32> to vector<10x20xbf16>
    %c2_183 = arith.constant 2 : index
    %c56_184 = arith.constant 56 : index
    %c0_185 = arith.constant 0 : index
    %366 = vector.load %arg1[%c2_183, %c56_184, %c0_185] : memref<6x112x40xf32, #tpu.memory_space<vmem>>, vector<1x20x10xf32>
    %367 = vector.shape_cast %366 : vector<1x20x10xf32> to vector<20x10xf32>
    %368 = arith.truncf %367 : vector<20x10xf32> to vector<20x10xbf16>
    %c2_186 = arith.constant 2 : index
    %c0_187 = arith.constant 0 : index
    %c0_188 = arith.constant 0 : index
    %369 = vector.load %arg1[%c2_186, %c0_187, %c0_188] : memref<6x112x40xf32, #tpu.memory_space<vmem>>, vector<1x10x40xf32>
    %370 = vector.shape_cast %369 : vector<1x10x40xf32> to vector<10x40xf32>
    %371 = arith.truncf %370 : vector<10x40xf32> to vector<10x40xbf16>
    %c2_189 = arith.constant 2 : index
    %c16_190 = arith.constant 16 : index
    %c0_191 = arith.constant 0 : index
    %372 = vector.load %arg1[%c2_189, %c16_190, %c0_191] : memref<6x112x40xf32, #tpu.memory_space<vmem>>, vector<1x40x10xf32>
    %373 = vector.shape_cast %372 : vector<1x40x10xf32> to vector<40x10xf32>
    %374 = arith.truncf %373 : vector<40x10xf32> to vector<40x10xbf16>
    %c2_192 = arith.constant 2 : index
    %c0_193 = arith.constant 0 : index
    %c0_194 = arith.constant 0 : index
    %c0_195 = arith.constant 0 : index
    %375 = vector.load %arg2[%c2_192, %c0_193, %c0_194, %c0_195] : memref<6x9x1x40xf32, #tpu.memory_space<vmem>>, vector<1x1x1x40xf32>
    %376 = vector.shape_cast %375 : vector<1x1x1x40xf32> to vector<1x40xf32>
    %377 = vector.extract_strided_slice %376 {offsets = [0, 0], sizes = [1, 10], strides = [1, 1]} : vector<1x40xf32> to vector<1x10xf32>
    %c2_196 = arith.constant 2 : index
    %c1_197 = arith.constant 1 : index
    %c0_198 = arith.constant 0 : index
    %c0_199 = arith.constant 0 : index
    %378 = vector.load %arg2[%c2_196, %c1_197, %c0_198, %c0_199] : memref<6x9x1x40xf32, #tpu.memory_space<vmem>>, vector<1x1x1x40xf32>
    %379 = vector.shape_cast %378 : vector<1x1x1x40xf32> to vector<1x40xf32>
    %380 = vector.extract_strided_slice %379 {offsets = [0, 0], sizes = [1, 10], strides = [1, 1]} : vector<1x40xf32> to vector<1x10xf32>
    %c2_200 = arith.constant 2 : index
    %c2_201 = arith.constant 2 : index
    %c0_202 = arith.constant 0 : index
    %c0_203 = arith.constant 0 : index
    %381 = vector.load %arg2[%c2_200, %c2_201, %c0_202, %c0_203] : memref<6x9x1x40xf32, #tpu.memory_space<vmem>>, vector<1x1x1x40xf32>
    %382 = vector.shape_cast %381 : vector<1x1x1x40xf32> to vector<1x40xf32>
    %383 = vector.extract_strided_slice %382 {offsets = [0, 0], sizes = [1, 20], strides = [1, 1]} : vector<1x40xf32> to vector<1x20xf32>
    %c2_204 = arith.constant 2 : index
    %c3_205 = arith.constant 3 : index
    %c0_206 = arith.constant 0 : index
    %c0_207 = arith.constant 0 : index
    %384 = vector.load %arg2[%c2_204, %c3_205, %c0_206, %c0_207] : memref<6x9x1x40xf32, #tpu.memory_space<vmem>>, vector<1x1x1x40xf32>
    %385 = vector.shape_cast %384 : vector<1x1x1x40xf32> to vector<1x40xf32>
    %386 = vector.extract_strided_slice %385 {offsets = [0, 0], sizes = [1, 20], strides = [1, 1]} : vector<1x40xf32> to vector<1x20xf32>
    %c2_208 = arith.constant 2 : index
    %c4_209 = arith.constant 4 : index
    %c0_210 = arith.constant 0 : index
    %c0_211 = arith.constant 0 : index
    %387 = vector.load %arg2[%c2_208, %c4_209, %c0_210, %c0_211] : memref<6x9x1x40xf32, #tpu.memory_space<vmem>>, vector<1x1x1x40xf32>
    %388 = vector.shape_cast %387 : vector<1x1x1x40xf32> to vector<1x40xf32>
    %389 = vector.extract_strided_slice %388 {offsets = [0, 0], sizes = [1, 10], strides = [1, 1]} : vector<1x40xf32> to vector<1x10xf32>
    %c2_212 = arith.constant 2 : index
    %c5_213 = arith.constant 5 : index
    %c0_214 = arith.constant 0 : index
    %c0_215 = arith.constant 0 : index
    %390 = vector.load %arg2[%c2_212, %c5_213, %c0_214, %c0_215] : memref<6x9x1x40xf32, #tpu.memory_space<vmem>>, vector<1x1x1x40xf32>
    %391 = vector.shape_cast %390 : vector<1x1x1x40xf32> to vector<1x40xf32>
    %392 = vector.extract_strided_slice %391 {offsets = [0, 0], sizes = [1, 10], strides = [1, 1]} : vector<1x40xf32> to vector<1x10xf32>
    %c2_216 = arith.constant 2 : index
    %c6_217 = arith.constant 6 : index
    %c0_218 = arith.constant 0 : index
    %c0_219 = arith.constant 0 : index
    %393 = vector.load %arg2[%c2_216, %c6_217, %c0_218, %c0_219] : memref<6x9x1x40xf32, #tpu.memory_space<vmem>>, vector<1x1x1x40xf32>
    %394 = vector.shape_cast %393 : vector<1x1x1x40xf32> to vector<1x40xf32>
    %395 = vector.extract_strided_slice %394 {offsets = [0, 0], sizes = [1, 10], strides = [1, 1]} : vector<1x40xf32> to vector<1x10xf32>
    %c2_220 = arith.constant 2 : index
    %c7_221 = arith.constant 7 : index
    %c0_222 = arith.constant 0 : index
    %c0_223 = arith.constant 0 : index
    %396 = vector.load %arg2[%c2_220, %c7_221, %c0_222, %c0_223] : memref<6x9x1x40xf32, #tpu.memory_space<vmem>>, vector<1x1x1x40xf32>
    %397 = vector.shape_cast %396 : vector<1x1x1x40xf32> to vector<1x40xf32>
    %c2_224 = arith.constant 2 : index
    %c8_225 = arith.constant 8 : index
    %c0_226 = arith.constant 0 : index
    %c0_227 = arith.constant 0 : index
    %398 = vector.load %arg2[%c2_224, %c8_225, %c0_226, %c0_227] : memref<6x9x1x40xf32, #tpu.memory_space<vmem>>, vector<1x1x1x40xf32>
    %399 = vector.shape_cast %398 : vector<1x1x1x40xf32> to vector<1x40xf32>
    %400 = vector.extract_strided_slice %399 {offsets = [0, 0], sizes = [1, 10], strides = [1, 1]} : vector<1x40xf32> to vector<1x10xf32>
    %cst_228 = arith.constant dense<0.000000e+00> : vector<10xf32>
    %401 = vector.multi_reduction <add>, %359, %cst_228 [1] : vector<10x10xf32> to vector<10xf32>
    %402 = vector.shape_cast %401 : vector<10xf32> to vector<10x1xf32>
    %cst_229 = arith.constant 1.000000e+01 : f32
    %403 = vector.broadcast %cst_229 : f32 to vector<10x1xf32>
    %404 = arith.divf %402, %403 : vector<10x1xf32>
    %405 = vector.broadcast %404 : vector<10x1xf32> to vector<10x10xf32>
    %406 = arith.subf %359, %405 : vector<10x10xf32>
    %407 = arith.mulf %406, %406 : vector<10x10xf32>
    %cst_230 = arith.constant dense<0.000000e+00> : vector<10xf32>
    %408 = vector.multi_reduction <add>, %407, %cst_230 [1] : vector<10x10xf32> to vector<10xf32>
    %409 = vector.shape_cast %408 : vector<10xf32> to vector<10x1xf32>
    %cst_231 = arith.constant 1.000000e+01 : f32
    %410 = vector.broadcast %cst_231 : f32 to vector<10x1xf32>
    %411 = arith.divf %409, %410 : vector<10x1xf32>
    %412 = vector.broadcast %404 : vector<10x1xf32> to vector<10x10xf32>
    %413 = arith.subf %359, %412 : vector<10x10xf32>
    %cst_232 = arith.constant 9.99999974E-6 : f32
    %414 = vector.broadcast %cst_232 : f32 to vector<10x1xf32>
    %415 = arith.addf %411, %414 : vector<10x1xf32>
    %416 = math.rsqrt %415 : vector<10x1xf32>
    %417 = vector.broadcast %416 : vector<10x1xf32> to vector<10x10xf32>
    %418 = arith.mulf %413, %417 : vector<10x10xf32>
    %419 = vector.broadcast %377 : vector<1x10xf32> to vector<10x10xf32>
    %420 = arith.mulf %418, %419 : vector<10x10xf32>
    %421 = vector.broadcast %380 : vector<1x10xf32> to vector<10x10xf32>
    %422 = arith.addf %420, %421 : vector<10x10xf32>
    %423 = arith.truncf %422 : vector<10x10xf32> to vector<10x10xbf16>
    %cst_233 = arith.constant dense<0.000000e+00> : vector<10x20xf32>
    %424 = tpu.matmul %423, %362, %cst_233 {dimension_numbers = #tpu.dot_dimension_numbers<[1], [0], [0], [1], [0, 0, 1, 1], [], []>} : vector<10x10xbf16>, vector<10x20xbf16>, vector<10x20xf32> -> vector<10x20xf32>
    %425 = vector.broadcast %383 : vector<1x20xf32> to vector<10x20xf32>
    %426 = arith.addf %424, %425 : vector<10x20xf32>
    %cst_234 = arith.constant dense<0.000000e+00> : vector<10x20xf32>
    %427 = tpu.matmul %423, %365, %cst_234 {dimension_numbers = #tpu.dot_dimension_numbers<[1], [0], [0], [1], [0, 0, 1, 1], [], []>} : vector<10x10xbf16>, vector<10x20xbf16>, vector<10x20xf32> -> vector<10x20xf32>
    %428 = vector.broadcast %386 : vector<1x20xf32> to vector<10x20xf32>
    %429 = arith.addf %427, %428 : vector<10x20xf32>
    %430 = arith.truncf %429 : vector<10x20xf32> to vector<10x20xbf16>
    %431 = arith.truncf %426 : vector<10x20xf32> to vector<10x20xbf16>
    %cst_235 = arith.constant dense<0.000000e+00> : vector<50x20xf32>
    %432 = tpu.matmul %9, %431, %cst_235 {dimension_numbers = #tpu.dot_dimension_numbers<[1], [0], [0], [1], [0, 0, 1, 1], [], []>} : vector<50x10xbf16>, vector<10x20xbf16>, vector<50x20xf32> -> vector<50x20xf32>
    %433 = arith.mulf %432, %12 : vector<50x20xf32>
    %434 = arith.truncf %433 : vector<50x20xf32> to vector<50x20xbf16>
    %cst_236 = arith.constant dense<0.000000e+00> : vector<50x10xf32>
    %435 = tpu.matmul %434, %430, %cst_236 {dimension_numbers = #tpu.dot_dimension_numbers<[1], [1], [0], [0], [0, 0, 1, 0], [], []>} : vector<50x20xbf16>, vector<10x20xbf16>, vector<50x10xf32> -> vector<50x10xf32>
    %436 = arith.addf %435, %14 : vector<50x10xf32>
    %cst_237 = arith.constant dense<0xFF800000> : vector<50xf32>
    %437 = vector.multi_reduction <maximumf>, %436, %cst_237 [1] : vector<50x10xf32> to vector<50xf32>
    %438 = vector.shape_cast %437 : vector<50xf32> to vector<50x1xf32>
    %439 = vector.broadcast %438 : vector<50x1xf32> to vector<50x10xf32>
    %440 = arith.subf %436, %439 : vector<50x10xf32>
    %441 = math.exp %440 : vector<50x10xf32>
    %cst_238 = arith.constant dense<0.000000e+00> : vector<50xf32>
    %442 = vector.multi_reduction <add>, %441, %cst_238 [1] : vector<50x10xf32> to vector<50xf32>
    %443 = vector.shape_cast %442 : vector<50xf32> to vector<50x1xf32>
    %444 = tpu.reciprocal %443 {approx = true} : vector<50x1xf32> -> vector<50x1xf32>
    %445 = vector.broadcast %444 : vector<50x1xf32> to vector<50x10xf32>
    %446 = arith.mulf %441, %445 : vector<50x10xf32>
    %447 = arith.truncf %446 : vector<50x10xf32> to vector<50x10xbf16>
    %cst_239 = arith.constant dense<0.000000e+00> : vector<50x20xf32>
    %448 = tpu.matmul %447, %430, %cst_239 {dimension_numbers = #tpu.dot_dimension_numbers<[1], [0], [0], [1], [0, 0, 1, 1], [], []>} : vector<50x10xbf16>, vector<10x20xbf16>, vector<50x20xf32> -> vector<50x20xf32>
    %449 = arith.mulf %448, %13 : vector<50x20xf32>
    %450 = arith.truncf %449 : vector<50x20xf32> to vector<50x20xbf16>
    %cst_240 = arith.constant dense<0.000000e+00> : vector<10x20xf32>
    %451 = tpu.matmul %11, %450, %cst_240 {dimension_numbers = #tpu.dot_dimension_numbers<[1], [0], [0], [1], [0, 0, 1, 1], [], []>} : vector<10x50xbf16>, vector<50x20xbf16>, vector<10x20xf32> -> vector<10x20xf32>
    %452 = arith.truncf %451 : vector<10x20xf32> to vector<10x20xbf16>
    %cst_241 = arith.constant dense<0.000000e+00> : vector<10x10xf32>
    %453 = tpu.matmul %452, %368, %cst_241 {dimension_numbers = #tpu.dot_dimension_numbers<[1], [0], [0], [1], [0, 0, 1, 1], [], []>} : vector<10x20xbf16>, vector<20x10xbf16>, vector<10x10xf32> -> vector<10x10xf32>
    %454 = arith.addf %359, %453 : vector<10x10xf32>
    %455 = vector.broadcast %389 : vector<1x10xf32> to vector<10x10xf32>
    %456 = arith.addf %454, %455 : vector<10x10xf32>
    %cst_242 = arith.constant dense<0.000000e+00> : vector<10xf32>
    %457 = vector.multi_reduction <add>, %456, %cst_242 [1] : vector<10x10xf32> to vector<10xf32>
    %458 = vector.shape_cast %457 : vector<10xf32> to vector<10x1xf32>
    %cst_243 = arith.constant 1.000000e+01 : f32
    %459 = vector.broadcast %cst_243 : f32 to vector<10x1xf32>
    %460 = arith.divf %458, %459 : vector<10x1xf32>
    %461 = vector.broadcast %460 : vector<10x1xf32> to vector<10x10xf32>
    %462 = arith.subf %456, %461 : vector<10x10xf32>
    %463 = arith.mulf %462, %462 : vector<10x10xf32>
    %cst_244 = arith.constant dense<0.000000e+00> : vector<10xf32>
    %464 = vector.multi_reduction <add>, %463, %cst_244 [1] : vector<10x10xf32> to vector<10xf32>
    %465 = vector.shape_cast %464 : vector<10xf32> to vector<10x1xf32>
    %cst_245 = arith.constant 1.000000e+01 : f32
    %466 = vector.broadcast %cst_245 : f32 to vector<10x1xf32>
    %467 = arith.divf %465, %466 : vector<10x1xf32>
    %468 = vector.broadcast %460 : vector<10x1xf32> to vector<10x10xf32>
    %469 = arith.subf %456, %468 : vector<10x10xf32>
    %cst_246 = arith.constant 9.99999974E-6 : f32
    %470 = vector.broadcast %cst_246 : f32 to vector<10x1xf32>
    %471 = arith.addf %467, %470 : vector<10x1xf32>
    %472 = math.rsqrt %471 : vector<10x1xf32>
    %473 = vector.broadcast %472 : vector<10x1xf32> to vector<10x10xf32>
    %474 = arith.mulf %469, %473 : vector<10x10xf32>
    %475 = vector.broadcast %392 : vector<1x10xf32> to vector<10x10xf32>
    %476 = arith.mulf %474, %475 : vector<10x10xf32>
    %477 = vector.broadcast %395 : vector<1x10xf32> to vector<10x10xf32>
    %478 = arith.addf %476, %477 : vector<10x10xf32>
    %479 = arith.truncf %478 : vector<10x10xf32> to vector<10x10xbf16>
    %cst_247 = arith.constant dense<0.000000e+00> : vector<10x40xf32>
    %480 = tpu.matmul %479, %371, %cst_247 {dimension_numbers = #tpu.dot_dimension_numbers<[1], [0], [0], [1], [0, 0, 1, 1], [], []>} : vector<10x10xbf16>, vector<10x40xbf16>, vector<10x40xf32> -> vector<10x40xf32>
    %481 = vector.broadcast %397 : vector<1x40xf32> to vector<10x40xf32>
    %482 = arith.addf %480, %481 : vector<10x40xf32>
    %cst_248 = arith.constant 5.000000e-01 : f32
    %483 = vector.broadcast %cst_248 : f32 to vector<10x40xf32>
    %484 = arith.mulf %483, %482 : vector<10x40xf32>
    %cst_249 = arith.constant 0.707106769 : f32
    %485 = vector.broadcast %cst_249 : f32 to vector<10x40xf32>
    %486 = arith.mulf %482, %485 : vector<10x40xf32>
    %487 = math.absf %486 : vector<10x40xf32>
    %cst_250 = arith.constant 0.327591091 : f32
    %488 = vector.broadcast %cst_250 : f32 to vector<10x40xf32>
    %489 = arith.mulf %488, %487 : vector<10x40xf32>
    %cst_251 = arith.constant 1.000000e+00 : f32
    %490 = vector.broadcast %cst_251 : f32 to vector<10x40xf32>
    %491 = arith.addf %490, %489 : vector<10x40xf32>
    %cst_252 = arith.constant 1.000000e+00 : f32
    %492 = vector.broadcast %cst_252 : f32 to vector<10x40xf32>
    %493 = arith.divf %492, %491 : vector<10x40xf32>
    %cst_253 = arith.constant 1.06140542 : f32
    %494 = vector.broadcast %cst_253 : f32 to vector<10x40xf32>
    %495 = arith.mulf %494, %493 : vector<10x40xf32>
    %cst_254 = arith.constant -1.45315206 : f32
    %496 = vector.broadcast %cst_254 : f32 to vector<10x40xf32>
    %497 = arith.addf %495, %496 : vector<10x40xf32>
    %498 = arith.mulf %497, %493 : vector<10x40xf32>
    %cst_255 = arith.constant 1.42141378 : f32
    %499 = vector.broadcast %cst_255 : f32 to vector<10x40xf32>
    %500 = arith.addf %498, %499 : vector<10x40xf32>
    %501 = arith.mulf %500, %493 : vector<10x40xf32>
    %cst_256 = arith.constant -0.284496725 : f32
    %502 = vector.broadcast %cst_256 : f32 to vector<10x40xf32>
    %503 = arith.addf %501, %502 : vector<10x40xf32>
    %504 = arith.mulf %503, %493 : vector<10x40xf32>
    %cst_257 = arith.constant 0.254829586 : f32
    %505 = vector.broadcast %cst_257 : f32 to vector<10x40xf32>
    %506 = arith.addf %504, %505 : vector<10x40xf32>
    %507 = arith.mulf %506, %493 : vector<10x40xf32>
    %cst_258 = arith.constant 0.000000e+00 : f32
    %508 = vector.broadcast %cst_258 : f32 to vector<10x40xf32>
    %509 = arith.subf %508, %487 : vector<10x40xf32>
    %510 = arith.mulf %509, %487 : vector<10x40xf32>
    %511 = math.exp %510 : vector<10x40xf32>
    %512 = arith.mulf %507, %511 : vector<10x40xf32>
    %cst_259 = arith.constant 1.000000e+00 : f32
    %513 = vector.broadcast %cst_259 : f32 to vector<10x40xf32>
    %514 = arith.subf %513, %512 : vector<10x40xf32>
    %cst_260 = arith.constant 0.000000e+00 : f32
    %515 = vector.broadcast %cst_260 : f32 to vector<10x40xf32>
    %516 = arith.cmpf oge, %486, %515 : vector<10x40xf32>
    %cst_261 = arith.constant 0.000000e+00 : f32
    %517 = vector.broadcast %cst_261 : f32 to vector<10x40xf32>
    %518 = arith.subf %517, %514 : vector<10x40xf32>
    %519 = arith.select %516, %514, %518 : vector<10x40xi1>, vector<10x40xf32>
    %cst_262 = arith.constant 1.000000e+00 : f32
    %520 = vector.broadcast %cst_262 : f32 to vector<10x40xf32>
    %521 = arith.addf %520, %519 : vector<10x40xf32>
    %522 = arith.mulf %484, %521 : vector<10x40xf32>
    %523 = arith.truncf %522 : vector<10x40xf32> to vector<10x40xbf16>
    %cst_263 = arith.constant dense<0.000000e+00> : vector<10x10xf32>
    %524 = tpu.matmul %523, %374, %cst_263 {dimension_numbers = #tpu.dot_dimension_numbers<[1], [0], [0], [1], [0, 0, 1, 1], [], []>} : vector<10x40xbf16>, vector<40x10xbf16>, vector<10x10xf32> -> vector<10x10xf32>
    %525 = arith.addf %456, %524 : vector<10x10xf32>
    %526 = vector.broadcast %400 : vector<1x10xf32> to vector<10x10xf32>
    %527 = arith.addf %525, %526 : vector<10x10xf32>
    %c3_264 = arith.constant 3 : index
    %c80_265 = arith.constant 80 : index
    %c0_266 = arith.constant 0 : index
    %528 = vector.load %arg1[%c3_264, %c80_265, %c0_266] : memref<6x112x40xf32, #tpu.memory_space<vmem>>, vector<1x10x20xf32>
    %529 = vector.shape_cast %528 : vector<1x10x20xf32> to vector<10x20xf32>
    %530 = arith.truncf %529 : vector<10x20xf32> to vector<10x20xbf16>
    %c3_267 = arith.constant 3 : index
    %c96_268 = arith.constant 96 : index
    %c0_269 = arith.constant 0 : index
    %531 = vector.load %arg1[%c3_267, %c96_268, %c0_269] : memref<6x112x40xf32, #tpu.memory_space<vmem>>, vector<1x10x20xf32>
    %532 = vector.shape_cast %531 : vector<1x10x20xf32> to vector<10x20xf32>
    %533 = arith.truncf %532 : vector<10x20xf32> to vector<10x20xbf16>
    %c3_270 = arith.constant 3 : index
    %c56_271 = arith.constant 56 : index
    %c0_272 = arith.constant 0 : index
    %534 = vector.load %arg1[%c3_270, %c56_271, %c0_272] : memref<6x112x40xf32, #tpu.memory_space<vmem>>, vector<1x20x10xf32>
    %535 = vector.shape_cast %534 : vector<1x20x10xf32> to vector<20x10xf32>
    %536 = arith.truncf %535 : vector<20x10xf32> to vector<20x10xbf16>
    %c3_273 = arith.constant 3 : index
    %c0_274 = arith.constant 0 : index
    %c0_275 = arith.constant 0 : index
    %537 = vector.load %arg1[%c3_273, %c0_274, %c0_275] : memref<6x112x40xf32, #tpu.memory_space<vmem>>, vector<1x10x40xf32>
    %538 = vector.shape_cast %537 : vector<1x10x40xf32> to vector<10x40xf32>
    %539 = arith.truncf %538 : vector<10x40xf32> to vector<10x40xbf16>
    %c3_276 = arith.constant 3 : index
    %c16_277 = arith.constant 16 : index
    %c0_278 = arith.constant 0 : index
    %540 = vector.load %arg1[%c3_276, %c16_277, %c0_278] : memref<6x112x40xf32, #tpu.memory_space<vmem>>, vector<1x40x10xf32>
    %541 = vector.shape_cast %540 : vector<1x40x10xf32> to vector<40x10xf32>
    %542 = arith.truncf %541 : vector<40x10xf32> to vector<40x10xbf16>
    %c3_279 = arith.constant 3 : index
    %c0_280 = arith.constant 0 : index
    %c0_281 = arith.constant 0 : index
    %c0_282 = arith.constant 0 : index
    %543 = vector.load %arg2[%c3_279, %c0_280, %c0_281, %c0_282] : memref<6x9x1x40xf32, #tpu.memory_space<vmem>>, vector<1x1x1x40xf32>
    %544 = vector.shape_cast %543 : vector<1x1x1x40xf32> to vector<1x40xf32>
    %545 = vector.extract_strided_slice %544 {offsets = [0, 0], sizes = [1, 10], strides = [1, 1]} : vector<1x40xf32> to vector<1x10xf32>
    %c3_283 = arith.constant 3 : index
    %c1_284 = arith.constant 1 : index
    %c0_285 = arith.constant 0 : index
    %c0_286 = arith.constant 0 : index
    %546 = vector.load %arg2[%c3_283, %c1_284, %c0_285, %c0_286] : memref<6x9x1x40xf32, #tpu.memory_space<vmem>>, vector<1x1x1x40xf32>
    %547 = vector.shape_cast %546 : vector<1x1x1x40xf32> to vector<1x40xf32>
    %548 = vector.extract_strided_slice %547 {offsets = [0, 0], sizes = [1, 10], strides = [1, 1]} : vector<1x40xf32> to vector<1x10xf32>
    %c3_287 = arith.constant 3 : index
    %c2_288 = arith.constant 2 : index
    %c0_289 = arith.constant 0 : index
    %c0_290 = arith.constant 0 : index
    %549 = vector.load %arg2[%c3_287, %c2_288, %c0_289, %c0_290] : memref<6x9x1x40xf32, #tpu.memory_space<vmem>>, vector<1x1x1x40xf32>
    %550 = vector.shape_cast %549 : vector<1x1x1x40xf32> to vector<1x40xf32>
    %551 = vector.extract_strided_slice %550 {offsets = [0, 0], sizes = [1, 20], strides = [1, 1]} : vector<1x40xf32> to vector<1x20xf32>
    %c3_291 = arith.constant 3 : index
    %c3_292 = arith.constant 3 : index
    %c0_293 = arith.constant 0 : index
    %c0_294 = arith.constant 0 : index
    %552 = vector.load %arg2[%c3_291, %c3_292, %c0_293, %c0_294] : memref<6x9x1x40xf32, #tpu.memory_space<vmem>>, vector<1x1x1x40xf32>
    %553 = vector.shape_cast %552 : vector<1x1x1x40xf32> to vector<1x40xf32>
    %554 = vector.extract_strided_slice %553 {offsets = [0, 0], sizes = [1, 20], strides = [1, 1]} : vector<1x40xf32> to vector<1x20xf32>
    %c3_295 = arith.constant 3 : index
    %c4_296 = arith.constant 4 : index
    %c0_297 = arith.constant 0 : index
    %c0_298 = arith.constant 0 : index
    %555 = vector.load %arg2[%c3_295, %c4_296, %c0_297, %c0_298] : memref<6x9x1x40xf32, #tpu.memory_space<vmem>>, vector<1x1x1x40xf32>
    %556 = vector.shape_cast %555 : vector<1x1x1x40xf32> to vector<1x40xf32>
    %557 = vector.extract_strided_slice %556 {offsets = [0, 0], sizes = [1, 10], strides = [1, 1]} : vector<1x40xf32> to vector<1x10xf32>
    %c3_299 = arith.constant 3 : index
    %c5_300 = arith.constant 5 : index
    %c0_301 = arith.constant 0 : index
    %c0_302 = arith.constant 0 : index
    %558 = vector.load %arg2[%c3_299, %c5_300, %c0_301, %c0_302] : memref<6x9x1x40xf32, #tpu.memory_space<vmem>>, vector<1x1x1x40xf32>
    %559 = vector.shape_cast %558 : vector<1x1x1x40xf32> to vector<1x40xf32>
    %560 = vector.extract_strided_slice %559 {offsets = [0, 0], sizes = [1, 10], strides = [1, 1]} : vector<1x40xf32> to vector<1x10xf32>
    %c3_303 = arith.constant 3 : index
    %c6_304 = arith.constant 6 : index
    %c0_305 = arith.constant 0 : index
    %c0_306 = arith.constant 0 : index
    %561 = vector.load %arg2[%c3_303, %c6_304, %c0_305, %c0_306] : memref<6x9x1x40xf32, #tpu.memory_space<vmem>>, vector<1x1x1x40xf32>
    %562 = vector.shape_cast %561 : vector<1x1x1x40xf32> to vector<1x40xf32>
    %563 = vector.extract_strided_slice %562 {offsets = [0, 0], sizes = [1, 10], strides = [1, 1]} : vector<1x40xf32> to vector<1x10xf32>
    %c3_307 = arith.constant 3 : index
    %c7_308 = arith.constant 7 : index
    %c0_309 = arith.constant 0 : index
    %c0_310 = arith.constant 0 : index
    %564 = vector.load %arg2[%c3_307, %c7_308, %c0_309, %c0_310] : memref<6x9x1x40xf32, #tpu.memory_space<vmem>>, vector<1x1x1x40xf32>
    %565 = vector.shape_cast %564 : vector<1x1x1x40xf32> to vector<1x40xf32>
    %c3_311 = arith.constant 3 : index
    %c8_312 = arith.constant 8 : index
    %c0_313 = arith.constant 0 : index
    %c0_314 = arith.constant 0 : index
    %566 = vector.load %arg2[%c3_311, %c8_312, %c0_313, %c0_314] : memref<6x9x1x40xf32, #tpu.memory_space<vmem>>, vector<1x1x1x40xf32>
    %567 = vector.shape_cast %566 : vector<1x1x1x40xf32> to vector<1x40xf32>
    %568 = vector.extract_strided_slice %567 {offsets = [0, 0], sizes = [1, 10], strides = [1, 1]} : vector<1x40xf32> to vector<1x10xf32>
    %cst_315 = arith.constant dense<0.000000e+00> : vector<10xf32>
    %569 = vector.multi_reduction <add>, %527, %cst_315 [1] : vector<10x10xf32> to vector<10xf32>
    %570 = vector.shape_cast %569 : vector<10xf32> to vector<10x1xf32>
    %cst_316 = arith.constant 1.000000e+01 : f32
    %571 = vector.broadcast %cst_316 : f32 to vector<10x1xf32>
    %572 = arith.divf %570, %571 : vector<10x1xf32>
    %573 = vector.broadcast %572 : vector<10x1xf32> to vector<10x10xf32>
    %574 = arith.subf %527, %573 : vector<10x10xf32>
    %575 = arith.mulf %574, %574 : vector<10x10xf32>
    %cst_317 = arith.constant dense<0.000000e+00> : vector<10xf32>
    %576 = vector.multi_reduction <add>, %575, %cst_317 [1] : vector<10x10xf32> to vector<10xf32>
    %577 = vector.shape_cast %576 : vector<10xf32> to vector<10x1xf32>
    %cst_318 = arith.constant 1.000000e+01 : f32
    %578 = vector.broadcast %cst_318 : f32 to vector<10x1xf32>
    %579 = arith.divf %577, %578 : vector<10x1xf32>
    %580 = vector.broadcast %572 : vector<10x1xf32> to vector<10x10xf32>
    %581 = arith.subf %527, %580 : vector<10x10xf32>
    %cst_319 = arith.constant 9.99999974E-6 : f32
    %582 = vector.broadcast %cst_319 : f32 to vector<10x1xf32>
    %583 = arith.addf %579, %582 : vector<10x1xf32>
    %584 = math.rsqrt %583 : vector<10x1xf32>
    %585 = vector.broadcast %584 : vector<10x1xf32> to vector<10x10xf32>
    %586 = arith.mulf %581, %585 : vector<10x10xf32>
    %587 = vector.broadcast %545 : vector<1x10xf32> to vector<10x10xf32>
    %588 = arith.mulf %586, %587 : vector<10x10xf32>
    %589 = vector.broadcast %548 : vector<1x10xf32> to vector<10x10xf32>
    %590 = arith.addf %588, %589 : vector<10x10xf32>
    %591 = arith.truncf %590 : vector<10x10xf32> to vector<10x10xbf16>
    %cst_320 = arith.constant dense<0.000000e+00> : vector<10x20xf32>
    %592 = tpu.matmul %591, %530, %cst_320 {dimension_numbers = #tpu.dot_dimension_numbers<[1], [0], [0], [1], [0, 0, 1, 1], [], []>} : vector<10x10xbf16>, vector<10x20xbf16>, vector<10x20xf32> -> vector<10x20xf32>
    %593 = vector.broadcast %551 : vector<1x20xf32> to vector<10x20xf32>
    %594 = arith.addf %592, %593 : vector<10x20xf32>
    %cst_321 = arith.constant dense<0.000000e+00> : vector<10x20xf32>
    %595 = tpu.matmul %591, %533, %cst_321 {dimension_numbers = #tpu.dot_dimension_numbers<[1], [0], [0], [1], [0, 0, 1, 1], [], []>} : vector<10x10xbf16>, vector<10x20xbf16>, vector<10x20xf32> -> vector<10x20xf32>
    %596 = vector.broadcast %554 : vector<1x20xf32> to vector<10x20xf32>
    %597 = arith.addf %595, %596 : vector<10x20xf32>
    %598 = arith.truncf %597 : vector<10x20xf32> to vector<10x20xbf16>
    %599 = arith.truncf %594 : vector<10x20xf32> to vector<10x20xbf16>
    %cst_322 = arith.constant dense<0.000000e+00> : vector<50x20xf32>
    %600 = tpu.matmul %9, %599, %cst_322 {dimension_numbers = #tpu.dot_dimension_numbers<[1], [0], [0], [1], [0, 0, 1, 1], [], []>} : vector<50x10xbf16>, vector<10x20xbf16>, vector<50x20xf32> -> vector<50x20xf32>
    %601 = arith.mulf %600, %12 : vector<50x20xf32>
    %602 = arith.truncf %601 : vector<50x20xf32> to vector<50x20xbf16>
    %cst_323 = arith.constant dense<0.000000e+00> : vector<50x10xf32>
    %603 = tpu.matmul %602, %598, %cst_323 {dimension_numbers = #tpu.dot_dimension_numbers<[1], [1], [0], [0], [0, 0, 1, 0], [], []>} : vector<50x20xbf16>, vector<10x20xbf16>, vector<50x10xf32> -> vector<50x10xf32>
    %604 = arith.addf %603, %14 : vector<50x10xf32>
    %cst_324 = arith.constant dense<0xFF800000> : vector<50xf32>
    %605 = vector.multi_reduction <maximumf>, %604, %cst_324 [1] : vector<50x10xf32> to vector<50xf32>
    %606 = vector.shape_cast %605 : vector<50xf32> to vector<50x1xf32>
    %607 = vector.broadcast %606 : vector<50x1xf32> to vector<50x10xf32>
    %608 = arith.subf %604, %607 : vector<50x10xf32>
    %609 = math.exp %608 : vector<50x10xf32>
    %cst_325 = arith.constant dense<0.000000e+00> : vector<50xf32>
    %610 = vector.multi_reduction <add>, %609, %cst_325 [1] : vector<50x10xf32> to vector<50xf32>
    %611 = vector.shape_cast %610 : vector<50xf32> to vector<50x1xf32>
    %612 = tpu.reciprocal %611 {approx = true} : vector<50x1xf32> -> vector<50x1xf32>
    %613 = vector.broadcast %612 : vector<50x1xf32> to vector<50x10xf32>
    %614 = arith.mulf %609, %613 : vector<50x10xf32>
    %615 = arith.truncf %614 : vector<50x10xf32> to vector<50x10xbf16>
    %cst_326 = arith.constant dense<0.000000e+00> : vector<50x20xf32>
    %616 = tpu.matmul %615, %598, %cst_326 {dimension_numbers = #tpu.dot_dimension_numbers<[1], [0], [0], [1], [0, 0, 1, 1], [], []>} : vector<50x10xbf16>, vector<10x20xbf16>, vector<50x20xf32> -> vector<50x20xf32>
    %617 = arith.mulf %616, %13 : vector<50x20xf32>
    %618 = arith.truncf %617 : vector<50x20xf32> to vector<50x20xbf16>
    %cst_327 = arith.constant dense<0.000000e+00> : vector<10x20xf32>
    %619 = tpu.matmul %11, %618, %cst_327 {dimension_numbers = #tpu.dot_dimension_numbers<[1], [0], [0], [1], [0, 0, 1, 1], [], []>} : vector<10x50xbf16>, vector<50x20xbf16>, vector<10x20xf32> -> vector<10x20xf32>
    %620 = arith.truncf %619 : vector<10x20xf32> to vector<10x20xbf16>
    %cst_328 = arith.constant dense<0.000000e+00> : vector<10x10xf32>
    %621 = tpu.matmul %620, %536, %cst_328 {dimension_numbers = #tpu.dot_dimension_numbers<[1], [0], [0], [1], [0, 0, 1, 1], [], []>} : vector<10x20xbf16>, vector<20x10xbf16>, vector<10x10xf32> -> vector<10x10xf32>
    %622 = arith.addf %527, %621 : vector<10x10xf32>
    %623 = vector.broadcast %557 : vector<1x10xf32> to vector<10x10xf32>
    %624 = arith.addf %622, %623 : vector<10x10xf32>
    %cst_329 = arith.constant dense<0.000000e+00> : vector<10xf32>
    %625 = vector.multi_reduction <add>, %624, %cst_329 [1] : vector<10x10xf32> to vector<10xf32>
    %626 = vector.shape_cast %625 : vector<10xf32> to vector<10x1xf32>
    %cst_330 = arith.constant 1.000000e+01 : f32
    %627 = vector.broadcast %cst_330 : f32 to vector<10x1xf32>
    %628 = arith.divf %626, %627 : vector<10x1xf32>
    %629 = vector.broadcast %628 : vector<10x1xf32> to vector<10x10xf32>
    %630 = arith.subf %624, %629 : vector<10x10xf32>
    %631 = arith.mulf %630, %630 : vector<10x10xf32>
    %cst_331 = arith.constant dense<0.000000e+00> : vector<10xf32>
    %632 = vector.multi_reduction <add>, %631, %cst_331 [1] : vector<10x10xf32> to vector<10xf32>
    %633 = vector.shape_cast %632 : vector<10xf32> to vector<10x1xf32>
    %cst_332 = arith.constant 1.000000e+01 : f32
    %634 = vector.broadcast %cst_332 : f32 to vector<10x1xf32>
    %635 = arith.divf %633, %634 : vector<10x1xf32>
    %636 = vector.broadcast %628 : vector<10x1xf32> to vector<10x10xf32>
    %637 = arith.subf %624, %636 : vector<10x10xf32>
    %cst_333 = arith.constant 9.99999974E-6 : f32
    %638 = vector.broadcast %cst_333 : f32 to vector<10x1xf32>
    %639 = arith.addf %635, %638 : vector<10x1xf32>
    %640 = math.rsqrt %639 : vector<10x1xf32>
    %641 = vector.broadcast %640 : vector<10x1xf32> to vector<10x10xf32>
    %642 = arith.mulf %637, %641 : vector<10x10xf32>
    %643 = vector.broadcast %560 : vector<1x10xf32> to vector<10x10xf32>
    %644 = arith.mulf %642, %643 : vector<10x10xf32>
    %645 = vector.broadcast %563 : vector<1x10xf32> to vector<10x10xf32>
    %646 = arith.addf %644, %645 : vector<10x10xf32>
    %647 = arith.truncf %646 : vector<10x10xf32> to vector<10x10xbf16>
    %cst_334 = arith.constant dense<0.000000e+00> : vector<10x40xf32>
    %648 = tpu.matmul %647, %539, %cst_334 {dimension_numbers = #tpu.dot_dimension_numbers<[1], [0], [0], [1], [0, 0, 1, 1], [], []>} : vector<10x10xbf16>, vector<10x40xbf16>, vector<10x40xf32> -> vector<10x40xf32>
    %649 = vector.broadcast %565 : vector<1x40xf32> to vector<10x40xf32>
    %650 = arith.addf %648, %649 : vector<10x40xf32>
    %cst_335 = arith.constant 5.000000e-01 : f32
    %651 = vector.broadcast %cst_335 : f32 to vector<10x40xf32>
    %652 = arith.mulf %651, %650 : vector<10x40xf32>
    %cst_336 = arith.constant 0.707106769 : f32
    %653 = vector.broadcast %cst_336 : f32 to vector<10x40xf32>
    %654 = arith.mulf %650, %653 : vector<10x40xf32>
    %655 = math.absf %654 : vector<10x40xf32>
    %cst_337 = arith.constant 0.327591091 : f32
    %656 = vector.broadcast %cst_337 : f32 to vector<10x40xf32>
    %657 = arith.mulf %656, %655 : vector<10x40xf32>
    %cst_338 = arith.constant 1.000000e+00 : f32
    %658 = vector.broadcast %cst_338 : f32 to vector<10x40xf32>
    %659 = arith.addf %658, %657 : vector<10x40xf32>
    %cst_339 = arith.constant 1.000000e+00 : f32
    %660 = vector.broadcast %cst_339 : f32 to vector<10x40xf32>
    %661 = arith.divf %660, %659 : vector<10x40xf32>
    %cst_340 = arith.constant 1.06140542 : f32
    %662 = vector.broadcast %cst_340 : f32 to vector<10x40xf32>
    %663 = arith.mulf %662, %661 : vector<10x40xf32>
    %cst_341 = arith.constant -1.45315206 : f32
    %664 = vector.broadcast %cst_341 : f32 to vector<10x40xf32>
    %665 = arith.addf %663, %664 : vector<10x40xf32>
    %666 = arith.mulf %665, %661 : vector<10x40xf32>
    %cst_342 = arith.constant 1.42141378 : f32
    %667 = vector.broadcast %cst_342 : f32 to vector<10x40xf32>
    %668 = arith.addf %666, %667 : vector<10x40xf32>
    %669 = arith.mulf %668, %661 : vector<10x40xf32>
    %cst_343 = arith.constant -0.284496725 : f32
    %670 = vector.broadcast %cst_343 : f32 to vector<10x40xf32>
    %671 = arith.addf %669, %670 : vector<10x40xf32>
    %672 = arith.mulf %671, %661 : vector<10x40xf32>
    %cst_344 = arith.constant 0.254829586 : f32
    %673 = vector.broadcast %cst_344 : f32 to vector<10x40xf32>
    %674 = arith.addf %672, %673 : vector<10x40xf32>
    %675 = arith.mulf %674, %661 : vector<10x40xf32>
    %cst_345 = arith.constant 0.000000e+00 : f32
    %676 = vector.broadcast %cst_345 : f32 to vector<10x40xf32>
    %677 = arith.subf %676, %655 : vector<10x40xf32>
    %678 = arith.mulf %677, %655 : vector<10x40xf32>
    %679 = math.exp %678 : vector<10x40xf32>
    %680 = arith.mulf %675, %679 : vector<10x40xf32>
    %cst_346 = arith.constant 1.000000e+00 : f32
    %681 = vector.broadcast %cst_346 : f32 to vector<10x40xf32>
    %682 = arith.subf %681, %680 : vector<10x40xf32>
    %cst_347 = arith.constant 0.000000e+00 : f32
    %683 = vector.broadcast %cst_347 : f32 to vector<10x40xf32>
    %684 = arith.cmpf oge, %654, %683 : vector<10x40xf32>
    %cst_348 = arith.constant 0.000000e+00 : f32
    %685 = vector.broadcast %cst_348 : f32 to vector<10x40xf32>
    %686 = arith.subf %685, %682 : vector<10x40xf32>
    %687 = arith.select %684, %682, %686 : vector<10x40xi1>, vector<10x40xf32>
    %cst_349 = arith.constant 1.000000e+00 : f32
    %688 = vector.broadcast %cst_349 : f32 to vector<10x40xf32>
    %689 = arith.addf %688, %687 : vector<10x40xf32>
    %690 = arith.mulf %652, %689 : vector<10x40xf32>
    %691 = arith.truncf %690 : vector<10x40xf32> to vector<10x40xbf16>
    %cst_350 = arith.constant dense<0.000000e+00> : vector<10x10xf32>
    %692 = tpu.matmul %691, %542, %cst_350 {dimension_numbers = #tpu.dot_dimension_numbers<[1], [0], [0], [1], [0, 0, 1, 1], [], []>} : vector<10x40xbf16>, vector<40x10xbf16>, vector<10x10xf32> -> vector<10x10xf32>
    %693 = arith.addf %624, %692 : vector<10x10xf32>
    %694 = vector.broadcast %568 : vector<1x10xf32> to vector<10x10xf32>
    %695 = arith.addf %693, %694 : vector<10x10xf32>
    %c4_351 = arith.constant 4 : index
    %c80_352 = arith.constant 80 : index
    %c0_353 = arith.constant 0 : index
    %696 = vector.load %arg1[%c4_351, %c80_352, %c0_353] : memref<6x112x40xf32, #tpu.memory_space<vmem>>, vector<1x10x20xf32>
    %697 = vector.shape_cast %696 : vector<1x10x20xf32> to vector<10x20xf32>
    %698 = arith.truncf %697 : vector<10x20xf32> to vector<10x20xbf16>
    %c4_354 = arith.constant 4 : index
    %c96_355 = arith.constant 96 : index
    %c0_356 = arith.constant 0 : index
    %699 = vector.load %arg1[%c4_354, %c96_355, %c0_356] : memref<6x112x40xf32, #tpu.memory_space<vmem>>, vector<1x10x20xf32>
    %700 = vector.shape_cast %699 : vector<1x10x20xf32> to vector<10x20xf32>
    %701 = arith.truncf %700 : vector<10x20xf32> to vector<10x20xbf16>
    %c4_357 = arith.constant 4 : index
    %c56_358 = arith.constant 56 : index
    %c0_359 = arith.constant 0 : index
    %702 = vector.load %arg1[%c4_357, %c56_358, %c0_359] : memref<6x112x40xf32, #tpu.memory_space<vmem>>, vector<1x20x10xf32>
    %703 = vector.shape_cast %702 : vector<1x20x10xf32> to vector<20x10xf32>
    %704 = arith.truncf %703 : vector<20x10xf32> to vector<20x10xbf16>
    %c4_360 = arith.constant 4 : index
    %c0_361 = arith.constant 0 : index
    %c0_362 = arith.constant 0 : index
    %705 = vector.load %arg1[%c4_360, %c0_361, %c0_362] : memref<6x112x40xf32, #tpu.memory_space<vmem>>, vector<1x10x40xf32>
    %706 = vector.shape_cast %705 : vector<1x10x40xf32> to vector<10x40xf32>
    %707 = arith.truncf %706 : vector<10x40xf32> to vector<10x40xbf16>
    %c4_363 = arith.constant 4 : index
    %c16_364 = arith.constant 16 : index
    %c0_365 = arith.constant 0 : index
    %708 = vector.load %arg1[%c4_363, %c16_364, %c0_365] : memref<6x112x40xf32, #tpu.memory_space<vmem>>, vector<1x40x10xf32>
    %709 = vector.shape_cast %708 : vector<1x40x10xf32> to vector<40x10xf32>
    %710 = arith.truncf %709 : vector<40x10xf32> to vector<40x10xbf16>
    %c4_366 = arith.constant 4 : index
    %c0_367 = arith.constant 0 : index
    %c0_368 = arith.constant 0 : index
    %c0_369 = arith.constant 0 : index
    %711 = vector.load %arg2[%c4_366, %c0_367, %c0_368, %c0_369] : memref<6x9x1x40xf32, #tpu.memory_space<vmem>>, vector<1x1x1x40xf32>
    %712 = vector.shape_cast %711 : vector<1x1x1x40xf32> to vector<1x40xf32>
    %713 = vector.extract_strided_slice %712 {offsets = [0, 0], sizes = [1, 10], strides = [1, 1]} : vector<1x40xf32> to vector<1x10xf32>
    %c4_370 = arith.constant 4 : index
    %c1_371 = arith.constant 1 : index
    %c0_372 = arith.constant 0 : index
    %c0_373 = arith.constant 0 : index
    %714 = vector.load %arg2[%c4_370, %c1_371, %c0_372, %c0_373] : memref<6x9x1x40xf32, #tpu.memory_space<vmem>>, vector<1x1x1x40xf32>
    %715 = vector.shape_cast %714 : vector<1x1x1x40xf32> to vector<1x40xf32>
    %716 = vector.extract_strided_slice %715 {offsets = [0, 0], sizes = [1, 10], strides = [1, 1]} : vector<1x40xf32> to vector<1x10xf32>
    %c4_374 = arith.constant 4 : index
    %c2_375 = arith.constant 2 : index
    %c0_376 = arith.constant 0 : index
    %c0_377 = arith.constant 0 : index
    %717 = vector.load %arg2[%c4_374, %c2_375, %c0_376, %c0_377] : memref<6x9x1x40xf32, #tpu.memory_space<vmem>>, vector<1x1x1x40xf32>
    %718 = vector.shape_cast %717 : vector<1x1x1x40xf32> to vector<1x40xf32>
    %719 = vector.extract_strided_slice %718 {offsets = [0, 0], sizes = [1, 20], strides = [1, 1]} : vector<1x40xf32> to vector<1x20xf32>
    %c4_378 = arith.constant 4 : index
    %c3_379 = arith.constant 3 : index
    %c0_380 = arith.constant 0 : index
    %c0_381 = arith.constant 0 : index
    %720 = vector.load %arg2[%c4_378, %c3_379, %c0_380, %c0_381] : memref<6x9x1x40xf32, #tpu.memory_space<vmem>>, vector<1x1x1x40xf32>
    %721 = vector.shape_cast %720 : vector<1x1x1x40xf32> to vector<1x40xf32>
    %722 = vector.extract_strided_slice %721 {offsets = [0, 0], sizes = [1, 20], strides = [1, 1]} : vector<1x40xf32> to vector<1x20xf32>
    %c4_382 = arith.constant 4 : index
    %c4_383 = arith.constant 4 : index
    %c0_384 = arith.constant 0 : index
    %c0_385 = arith.constant 0 : index
    %723 = vector.load %arg2[%c4_382, %c4_383, %c0_384, %c0_385] : memref<6x9x1x40xf32, #tpu.memory_space<vmem>>, vector<1x1x1x40xf32>
    %724 = vector.shape_cast %723 : vector<1x1x1x40xf32> to vector<1x40xf32>
    %725 = vector.extract_strided_slice %724 {offsets = [0, 0], sizes = [1, 10], strides = [1, 1]} : vector<1x40xf32> to vector<1x10xf32>
    %c4_386 = arith.constant 4 : index
    %c5_387 = arith.constant 5 : index
    %c0_388 = arith.constant 0 : index
    %c0_389 = arith.constant 0 : index
    %726 = vector.load %arg2[%c4_386, %c5_387, %c0_388, %c0_389] : memref<6x9x1x40xf32, #tpu.memory_space<vmem>>, vector<1x1x1x40xf32>
    %727 = vector.shape_cast %726 : vector<1x1x1x40xf32> to vector<1x40xf32>
    %728 = vector.extract_strided_slice %727 {offsets = [0, 0], sizes = [1, 10], strides = [1, 1]} : vector<1x40xf32> to vector<1x10xf32>
    %c4_390 = arith.constant 4 : index
    %c6_391 = arith.constant 6 : index
    %c0_392 = arith.constant 0 : index
    %c0_393 = arith.constant 0 : index
    %729 = vector.load %arg2[%c4_390, %c6_391, %c0_392, %c0_393] : memref<6x9x1x40xf32, #tpu.memory_space<vmem>>, vector<1x1x1x40xf32>
    %730 = vector.shape_cast %729 : vector<1x1x1x40xf32> to vector<1x40xf32>
    %731 = vector.extract_strided_slice %730 {offsets = [0, 0], sizes = [1, 10], strides = [1, 1]} : vector<1x40xf32> to vector<1x10xf32>
    %c4_394 = arith.constant 4 : index
    %c7_395 = arith.constant 7 : index
    %c0_396 = arith.constant 0 : index
    %c0_397 = arith.constant 0 : index
    %732 = vector.load %arg2[%c4_394, %c7_395, %c0_396, %c0_397] : memref<6x9x1x40xf32, #tpu.memory_space<vmem>>, vector<1x1x1x40xf32>
    %733 = vector.shape_cast %732 : vector<1x1x1x40xf32> to vector<1x40xf32>
    %c4_398 = arith.constant 4 : index
    %c8_399 = arith.constant 8 : index
    %c0_400 = arith.constant 0 : index
    %c0_401 = arith.constant 0 : index
    %734 = vector.load %arg2[%c4_398, %c8_399, %c0_400, %c0_401] : memref<6x9x1x40xf32, #tpu.memory_space<vmem>>, vector<1x1x1x40xf32>
    %735 = vector.shape_cast %734 : vector<1x1x1x40xf32> to vector<1x40xf32>
    %736 = vector.extract_strided_slice %735 {offsets = [0, 0], sizes = [1, 10], strides = [1, 1]} : vector<1x40xf32> to vector<1x10xf32>
    %cst_402 = arith.constant dense<0.000000e+00> : vector<10xf32>
    %737 = vector.multi_reduction <add>, %695, %cst_402 [1] : vector<10x10xf32> to vector<10xf32>
    %738 = vector.shape_cast %737 : vector<10xf32> to vector<10x1xf32>
    %cst_403 = arith.constant 1.000000e+01 : f32
    %739 = vector.broadcast %cst_403 : f32 to vector<10x1xf32>
    %740 = arith.divf %738, %739 : vector<10x1xf32>
    %741 = vector.broadcast %740 : vector<10x1xf32> to vector<10x10xf32>
    %742 = arith.subf %695, %741 : vector<10x10xf32>
    %743 = arith.mulf %742, %742 : vector<10x10xf32>
    %cst_404 = arith.constant dense<0.000000e+00> : vector<10xf32>
    %744 = vector.multi_reduction <add>, %743, %cst_404 [1] : vector<10x10xf32> to vector<10xf32>
    %745 = vector.shape_cast %744 : vector<10xf32> to vector<10x1xf32>
    %cst_405 = arith.constant 1.000000e+01 : f32
    %746 = vector.broadcast %cst_405 : f32 to vector<10x1xf32>
    %747 = arith.divf %745, %746 : vector<10x1xf32>
    %748 = vector.broadcast %740 : vector<10x1xf32> to vector<10x10xf32>
    %749 = arith.subf %695, %748 : vector<10x10xf32>
    %cst_406 = arith.constant 9.99999974E-6 : f32
    %750 = vector.broadcast %cst_406 : f32 to vector<10x1xf32>
    %751 = arith.addf %747, %750 : vector<10x1xf32>
    %752 = math.rsqrt %751 : vector<10x1xf32>
    %753 = vector.broadcast %752 : vector<10x1xf32> to vector<10x10xf32>
    %754 = arith.mulf %749, %753 : vector<10x10xf32>
    %755 = vector.broadcast %713 : vector<1x10xf32> to vector<10x10xf32>
    %756 = arith.mulf %754, %755 : vector<10x10xf32>
    %757 = vector.broadcast %716 : vector<1x10xf32> to vector<10x10xf32>
    %758 = arith.addf %756, %757 : vector<10x10xf32>
    %759 = arith.truncf %758 : vector<10x10xf32> to vector<10x10xbf16>
    %cst_407 = arith.constant dense<0.000000e+00> : vector<10x20xf32>
    %760 = tpu.matmul %759, %698, %cst_407 {dimension_numbers = #tpu.dot_dimension_numbers<[1], [0], [0], [1], [0, 0, 1, 1], [], []>} : vector<10x10xbf16>, vector<10x20xbf16>, vector<10x20xf32> -> vector<10x20xf32>
    %761 = vector.broadcast %719 : vector<1x20xf32> to vector<10x20xf32>
    %762 = arith.addf %760, %761 : vector<10x20xf32>
    %cst_408 = arith.constant dense<0.000000e+00> : vector<10x20xf32>
    %763 = tpu.matmul %759, %701, %cst_408 {dimension_numbers = #tpu.dot_dimension_numbers<[1], [0], [0], [1], [0, 0, 1, 1], [], []>} : vector<10x10xbf16>, vector<10x20xbf16>, vector<10x20xf32> -> vector<10x20xf32>
    %764 = vector.broadcast %722 : vector<1x20xf32> to vector<10x20xf32>
    %765 = arith.addf %763, %764 : vector<10x20xf32>
    %766 = arith.truncf %765 : vector<10x20xf32> to vector<10x20xbf16>
    %767 = arith.truncf %762 : vector<10x20xf32> to vector<10x20xbf16>
    %cst_409 = arith.constant dense<0.000000e+00> : vector<50x20xf32>
    %768 = tpu.matmul %9, %767, %cst_409 {dimension_numbers = #tpu.dot_dimension_numbers<[1], [0], [0], [1], [0, 0, 1, 1], [], []>} : vector<50x10xbf16>, vector<10x20xbf16>, vector<50x20xf32> -> vector<50x20xf32>
    %769 = arith.mulf %768, %12 : vector<50x20xf32>
    %770 = arith.truncf %769 : vector<50x20xf32> to vector<50x20xbf16>
    %cst_410 = arith.constant dense<0.000000e+00> : vector<50x10xf32>
    %771 = tpu.matmul %770, %766, %cst_410 {dimension_numbers = #tpu.dot_dimension_numbers<[1], [1], [0], [0], [0, 0, 1, 0], [], []>} : vector<50x20xbf16>, vector<10x20xbf16>, vector<50x10xf32> -> vector<50x10xf32>
    %772 = arith.addf %771, %14 : vector<50x10xf32>
    %cst_411 = arith.constant dense<0xFF800000> : vector<50xf32>
    %773 = vector.multi_reduction <maximumf>, %772, %cst_411 [1] : vector<50x10xf32> to vector<50xf32>
    %774 = vector.shape_cast %773 : vector<50xf32> to vector<50x1xf32>
    %775 = vector.broadcast %774 : vector<50x1xf32> to vector<50x10xf32>
    %776 = arith.subf %772, %775 : vector<50x10xf32>
    %777 = math.exp %776 : vector<50x10xf32>
    %cst_412 = arith.constant dense<0.000000e+00> : vector<50xf32>
    %778 = vector.multi_reduction <add>, %777, %cst_412 [1] : vector<50x10xf32> to vector<50xf32>
    %779 = vector.shape_cast %778 : vector<50xf32> to vector<50x1xf32>
    %780 = tpu.reciprocal %779 {approx = true} : vector<50x1xf32> -> vector<50x1xf32>
    %781 = vector.broadcast %780 : vector<50x1xf32> to vector<50x10xf32>
    %782 = arith.mulf %777, %781 : vector<50x10xf32>
    %783 = arith.truncf %782 : vector<50x10xf32> to vector<50x10xbf16>
    %cst_413 = arith.constant dense<0.000000e+00> : vector<50x20xf32>
    %784 = tpu.matmul %783, %766, %cst_413 {dimension_numbers = #tpu.dot_dimension_numbers<[1], [0], [0], [1], [0, 0, 1, 1], [], []>} : vector<50x10xbf16>, vector<10x20xbf16>, vector<50x20xf32> -> vector<50x20xf32>
    %785 = arith.mulf %784, %13 : vector<50x20xf32>
    %786 = arith.truncf %785 : vector<50x20xf32> to vector<50x20xbf16>
    %cst_414 = arith.constant dense<0.000000e+00> : vector<10x20xf32>
    %787 = tpu.matmul %11, %786, %cst_414 {dimension_numbers = #tpu.dot_dimension_numbers<[1], [0], [0], [1], [0, 0, 1, 1], [], []>} : vector<10x50xbf16>, vector<50x20xbf16>, vector<10x20xf32> -> vector<10x20xf32>
    %788 = arith.truncf %787 : vector<10x20xf32> to vector<10x20xbf16>
    %cst_415 = arith.constant dense<0.000000e+00> : vector<10x10xf32>
    %789 = tpu.matmul %788, %704, %cst_415 {dimension_numbers = #tpu.dot_dimension_numbers<[1], [0], [0], [1], [0, 0, 1, 1], [], []>} : vector<10x20xbf16>, vector<20x10xbf16>, vector<10x10xf32> -> vector<10x10xf32>
    %790 = arith.addf %695, %789 : vector<10x10xf32>
    %791 = vector.broadcast %725 : vector<1x10xf32> to vector<10x10xf32>
    %792 = arith.addf %790, %791 : vector<10x10xf32>
    %cst_416 = arith.constant dense<0.000000e+00> : vector<10xf32>
    %793 = vector.multi_reduction <add>, %792, %cst_416 [1] : vector<10x10xf32> to vector<10xf32>
    %794 = vector.shape_cast %793 : vector<10xf32> to vector<10x1xf32>
    %cst_417 = arith.constant 1.000000e+01 : f32
    %795 = vector.broadcast %cst_417 : f32 to vector<10x1xf32>
    %796 = arith.divf %794, %795 : vector<10x1xf32>
    %797 = vector.broadcast %796 : vector<10x1xf32> to vector<10x10xf32>
    %798 = arith.subf %792, %797 : vector<10x10xf32>
    %799 = arith.mulf %798, %798 : vector<10x10xf32>
    %cst_418 = arith.constant dense<0.000000e+00> : vector<10xf32>
    %800 = vector.multi_reduction <add>, %799, %cst_418 [1] : vector<10x10xf32> to vector<10xf32>
    %801 = vector.shape_cast %800 : vector<10xf32> to vector<10x1xf32>
    %cst_419 = arith.constant 1.000000e+01 : f32
    %802 = vector.broadcast %cst_419 : f32 to vector<10x1xf32>
    %803 = arith.divf %801, %802 : vector<10x1xf32>
    %804 = vector.broadcast %796 : vector<10x1xf32> to vector<10x10xf32>
    %805 = arith.subf %792, %804 : vector<10x10xf32>
    %cst_420 = arith.constant 9.99999974E-6 : f32
    %806 = vector.broadcast %cst_420 : f32 to vector<10x1xf32>
    %807 = arith.addf %803, %806 : vector<10x1xf32>
    %808 = math.rsqrt %807 : vector<10x1xf32>
    %809 = vector.broadcast %808 : vector<10x1xf32> to vector<10x10xf32>
    %810 = arith.mulf %805, %809 : vector<10x10xf32>
    %811 = vector.broadcast %728 : vector<1x10xf32> to vector<10x10xf32>
    %812 = arith.mulf %810, %811 : vector<10x10xf32>
    %813 = vector.broadcast %731 : vector<1x10xf32> to vector<10x10xf32>
    %814 = arith.addf %812, %813 : vector<10x10xf32>
    %815 = arith.truncf %814 : vector<10x10xf32> to vector<10x10xbf16>
    %cst_421 = arith.constant dense<0.000000e+00> : vector<10x40xf32>
    %816 = tpu.matmul %815, %707, %cst_421 {dimension_numbers = #tpu.dot_dimension_numbers<[1], [0], [0], [1], [0, 0, 1, 1], [], []>} : vector<10x10xbf16>, vector<10x40xbf16>, vector<10x40xf32> -> vector<10x40xf32>
    %817 = vector.broadcast %733 : vector<1x40xf32> to vector<10x40xf32>
    %818 = arith.addf %816, %817 : vector<10x40xf32>
    %cst_422 = arith.constant 5.000000e-01 : f32
    %819 = vector.broadcast %cst_422 : f32 to vector<10x40xf32>
    %820 = arith.mulf %819, %818 : vector<10x40xf32>
    %cst_423 = arith.constant 0.707106769 : f32
    %821 = vector.broadcast %cst_423 : f32 to vector<10x40xf32>
    %822 = arith.mulf %818, %821 : vector<10x40xf32>
    %823 = math.absf %822 : vector<10x40xf32>
    %cst_424 = arith.constant 0.327591091 : f32
    %824 = vector.broadcast %cst_424 : f32 to vector<10x40xf32>
    %825 = arith.mulf %824, %823 : vector<10x40xf32>
    %cst_425 = arith.constant 1.000000e+00 : f32
    %826 = vector.broadcast %cst_425 : f32 to vector<10x40xf32>
    %827 = arith.addf %826, %825 : vector<10x40xf32>
    %cst_426 = arith.constant 1.000000e+00 : f32
    %828 = vector.broadcast %cst_426 : f32 to vector<10x40xf32>
    %829 = arith.divf %828, %827 : vector<10x40xf32>
    %cst_427 = arith.constant 1.06140542 : f32
    %830 = vector.broadcast %cst_427 : f32 to vector<10x40xf32>
    %831 = arith.mulf %830, %829 : vector<10x40xf32>
    %cst_428 = arith.constant -1.45315206 : f32
    %832 = vector.broadcast %cst_428 : f32 to vector<10x40xf32>
    %833 = arith.addf %831, %832 : vector<10x40xf32>
    %834 = arith.mulf %833, %829 : vector<10x40xf32>
    %cst_429 = arith.constant 1.42141378 : f32
    %835 = vector.broadcast %cst_429 : f32 to vector<10x40xf32>
    %836 = arith.addf %834, %835 : vector<10x40xf32>
    %837 = arith.mulf %836, %829 : vector<10x40xf32>
    %cst_430 = arith.constant -0.284496725 : f32
    %838 = vector.broadcast %cst_430 : f32 to vector<10x40xf32>
    %839 = arith.addf %837, %838 : vector<10x40xf32>
    %840 = arith.mulf %839, %829 : vector<10x40xf32>
    %cst_431 = arith.constant 0.254829586 : f32
    %841 = vector.broadcast %cst_431 : f32 to vector<10x40xf32>
    %842 = arith.addf %840, %841 : vector<10x40xf32>
    %843 = arith.mulf %842, %829 : vector<10x40xf32>
    %cst_432 = arith.constant 0.000000e+00 : f32
    %844 = vector.broadcast %cst_432 : f32 to vector<10x40xf32>
    %845 = arith.subf %844, %823 : vector<10x40xf32>
    %846 = arith.mulf %845, %823 : vector<10x40xf32>
    %847 = math.exp %846 : vector<10x40xf32>
    %848 = arith.mulf %843, %847 : vector<10x40xf32>
    %cst_433 = arith.constant 1.000000e+00 : f32
    %849 = vector.broadcast %cst_433 : f32 to vector<10x40xf32>
    %850 = arith.subf %849, %848 : vector<10x40xf32>
    %cst_434 = arith.constant 0.000000e+00 : f32
    %851 = vector.broadcast %cst_434 : f32 to vector<10x40xf32>
    %852 = arith.cmpf oge, %822, %851 : vector<10x40xf32>
    %cst_435 = arith.constant 0.000000e+00 : f32
    %853 = vector.broadcast %cst_435 : f32 to vector<10x40xf32>
    %854 = arith.subf %853, %850 : vector<10x40xf32>
    %855 = arith.select %852, %850, %854 : vector<10x40xi1>, vector<10x40xf32>
    %cst_436 = arith.constant 1.000000e+00 : f32
    %856 = vector.broadcast %cst_436 : f32 to vector<10x40xf32>
    %857 = arith.addf %856, %855 : vector<10x40xf32>
    %858 = arith.mulf %820, %857 : vector<10x40xf32>
    %859 = arith.truncf %858 : vector<10x40xf32> to vector<10x40xbf16>
    %cst_437 = arith.constant dense<0.000000e+00> : vector<10x10xf32>
    %860 = tpu.matmul %859, %710, %cst_437 {dimension_numbers = #tpu.dot_dimension_numbers<[1], [0], [0], [1], [0, 0, 1, 1], [], []>} : vector<10x40xbf16>, vector<40x10xbf16>, vector<10x10xf32> -> vector<10x10xf32>
    %861 = arith.addf %792, %860 : vector<10x10xf32>
    %862 = vector.broadcast %736 : vector<1x10xf32> to vector<10x10xf32>
    %863 = arith.addf %861, %862 : vector<10x10xf32>
    %c5_438 = arith.constant 5 : index
    %c80_439 = arith.constant 80 : index
    %c0_440 = arith.constant 0 : index
    %864 = vector.load %arg1[%c5_438, %c80_439, %c0_440] : memref<6x112x40xf32, #tpu.memory_space<vmem>>, vector<1x10x20xf32>
    %865 = vector.shape_cast %864 : vector<1x10x20xf32> to vector<10x20xf32>
    %866 = arith.truncf %865 : vector<10x20xf32> to vector<10x20xbf16>
    %c5_441 = arith.constant 5 : index
    %c96_442 = arith.constant 96 : index
    %c0_443 = arith.constant 0 : index
    %867 = vector.load %arg1[%c5_441, %c96_442, %c0_443] : memref<6x112x40xf32, #tpu.memory_space<vmem>>, vector<1x10x20xf32>
    %868 = vector.shape_cast %867 : vector<1x10x20xf32> to vector<10x20xf32>
    %869 = arith.truncf %868 : vector<10x20xf32> to vector<10x20xbf16>
    %c5_444 = arith.constant 5 : index
    %c56_445 = arith.constant 56 : index
    %c0_446 = arith.constant 0 : index
    %870 = vector.load %arg1[%c5_444, %c56_445, %c0_446] : memref<6x112x40xf32, #tpu.memory_space<vmem>>, vector<1x20x10xf32>
    %871 = vector.shape_cast %870 : vector<1x20x10xf32> to vector<20x10xf32>
    %872 = arith.truncf %871 : vector<20x10xf32> to vector<20x10xbf16>
    %c5_447 = arith.constant 5 : index
    %c0_448 = arith.constant 0 : index
    %c0_449 = arith.constant 0 : index
    %873 = vector.load %arg1[%c5_447, %c0_448, %c0_449] : memref<6x112x40xf32, #tpu.memory_space<vmem>>, vector<1x10x40xf32>
    %874 = vector.shape_cast %873 : vector<1x10x40xf32> to vector<10x40xf32>
    %875 = arith.truncf %874 : vector<10x40xf32> to vector<10x40xbf16>
    %c5_450 = arith.constant 5 : index
    %c16_451 = arith.constant 16 : index
    %c0_452 = arith.constant 0 : index
    %876 = vector.load %arg1[%c5_450, %c16_451, %c0_452] : memref<6x112x40xf32, #tpu.memory_space<vmem>>, vector<1x40x10xf32>
    %877 = vector.shape_cast %876 : vector<1x40x10xf32> to vector<40x10xf32>
    %878 = arith.truncf %877 : vector<40x10xf32> to vector<40x10xbf16>
    %c5_453 = arith.constant 5 : index
    %c0_454 = arith.constant 0 : index
    %c0_455 = arith.constant 0 : index
    %c0_456 = arith.constant 0 : index
    %879 = vector.load %arg2[%c5_453, %c0_454, %c0_455, %c0_456] : memref<6x9x1x40xf32, #tpu.memory_space<vmem>>, vector<1x1x1x40xf32>
    %880 = vector.shape_cast %879 : vector<1x1x1x40xf32> to vector<1x40xf32>
    %881 = vector.extract_strided_slice %880 {offsets = [0, 0], sizes = [1, 10], strides = [1, 1]} : vector<1x40xf32> to vector<1x10xf32>
    %c5_457 = arith.constant 5 : index
    %c1_458 = arith.constant 1 : index
    %c0_459 = arith.constant 0 : index
    %c0_460 = arith.constant 0 : index
    %882 = vector.load %arg2[%c5_457, %c1_458, %c0_459, %c0_460] : memref<6x9x1x40xf32, #tpu.memory_space<vmem>>, vector<1x1x1x40xf32>
    %883 = vector.shape_cast %882 : vector<1x1x1x40xf32> to vector<1x40xf32>
    %884 = vector.extract_strided_slice %883 {offsets = [0, 0], sizes = [1, 10], strides = [1, 1]} : vector<1x40xf32> to vector<1x10xf32>
    %c5_461 = arith.constant 5 : index
    %c2_462 = arith.constant 2 : index
    %c0_463 = arith.constant 0 : index
    %c0_464 = arith.constant 0 : index
    %885 = vector.load %arg2[%c5_461, %c2_462, %c0_463, %c0_464] : memref<6x9x1x40xf32, #tpu.memory_space<vmem>>, vector<1x1x1x40xf32>
    %886 = vector.shape_cast %885 : vector<1x1x1x40xf32> to vector<1x40xf32>
    %887 = vector.extract_strided_slice %886 {offsets = [0, 0], sizes = [1, 20], strides = [1, 1]} : vector<1x40xf32> to vector<1x20xf32>
    %c5_465 = arith.constant 5 : index
    %c3_466 = arith.constant 3 : index
    %c0_467 = arith.constant 0 : index
    %c0_468 = arith.constant 0 : index
    %888 = vector.load %arg2[%c5_465, %c3_466, %c0_467, %c0_468] : memref<6x9x1x40xf32, #tpu.memory_space<vmem>>, vector<1x1x1x40xf32>
    %889 = vector.shape_cast %888 : vector<1x1x1x40xf32> to vector<1x40xf32>
    %890 = vector.extract_strided_slice %889 {offsets = [0, 0], sizes = [1, 20], strides = [1, 1]} : vector<1x40xf32> to vector<1x20xf32>
    %c5_469 = arith.constant 5 : index
    %c4_470 = arith.constant 4 : index
    %c0_471 = arith.constant 0 : index
    %c0_472 = arith.constant 0 : index
    %891 = vector.load %arg2[%c5_469, %c4_470, %c0_471, %c0_472] : memref<6x9x1x40xf32, #tpu.memory_space<vmem>>, vector<1x1x1x40xf32>
    %892 = vector.shape_cast %891 : vector<1x1x1x40xf32> to vector<1x40xf32>
    %893 = vector.extract_strided_slice %892 {offsets = [0, 0], sizes = [1, 10], strides = [1, 1]} : vector<1x40xf32> to vector<1x10xf32>
    %c5_473 = arith.constant 5 : index
    %c5_474 = arith.constant 5 : index
    %c0_475 = arith.constant 0 : index
    %c0_476 = arith.constant 0 : index
    %894 = vector.load %arg2[%c5_473, %c5_474, %c0_475, %c0_476] : memref<6x9x1x40xf32, #tpu.memory_space<vmem>>, vector<1x1x1x40xf32>
    %895 = vector.shape_cast %894 : vector<1x1x1x40xf32> to vector<1x40xf32>
    %896 = vector.extract_strided_slice %895 {offsets = [0, 0], sizes = [1, 10], strides = [1, 1]} : vector<1x40xf32> to vector<1x10xf32>
    %c5_477 = arith.constant 5 : index
    %c6_478 = arith.constant 6 : index
    %c0_479 = arith.constant 0 : index
    %c0_480 = arith.constant 0 : index
    %897 = vector.load %arg2[%c5_477, %c6_478, %c0_479, %c0_480] : memref<6x9x1x40xf32, #tpu.memory_space<vmem>>, vector<1x1x1x40xf32>
    %898 = vector.shape_cast %897 : vector<1x1x1x40xf32> to vector<1x40xf32>
    %899 = vector.extract_strided_slice %898 {offsets = [0, 0], sizes = [1, 10], strides = [1, 1]} : vector<1x40xf32> to vector<1x10xf32>
    %c5_481 = arith.constant 5 : index
    %c7_482 = arith.constant 7 : index
    %c0_483 = arith.constant 0 : index
    %c0_484 = arith.constant 0 : index
    %900 = vector.load %arg2[%c5_481, %c7_482, %c0_483, %c0_484] : memref<6x9x1x40xf32, #tpu.memory_space<vmem>>, vector<1x1x1x40xf32>
    %901 = vector.shape_cast %900 : vector<1x1x1x40xf32> to vector<1x40xf32>
    %c5_485 = arith.constant 5 : index
    %c8_486 = arith.constant 8 : index
    %c0_487 = arith.constant 0 : index
    %c0_488 = arith.constant 0 : index
    %902 = vector.load %arg2[%c5_485, %c8_486, %c0_487, %c0_488] : memref<6x9x1x40xf32, #tpu.memory_space<vmem>>, vector<1x1x1x40xf32>
    %903 = vector.shape_cast %902 : vector<1x1x1x40xf32> to vector<1x40xf32>
    %904 = vector.extract_strided_slice %903 {offsets = [0, 0], sizes = [1, 10], strides = [1, 1]} : vector<1x40xf32> to vector<1x10xf32>
    %cst_489 = arith.constant dense<0.000000e+00> : vector<10xf32>
    %905 = vector.multi_reduction <add>, %863, %cst_489 [1] : vector<10x10xf32> to vector<10xf32>
    %906 = vector.shape_cast %905 : vector<10xf32> to vector<10x1xf32>
    %cst_490 = arith.constant 1.000000e+01 : f32
    %907 = vector.broadcast %cst_490 : f32 to vector<10x1xf32>
    %908 = arith.divf %906, %907 : vector<10x1xf32>
    %909 = vector.broadcast %908 : vector<10x1xf32> to vector<10x10xf32>
    %910 = arith.subf %863, %909 : vector<10x10xf32>
    %911 = arith.mulf %910, %910 : vector<10x10xf32>
    %cst_491 = arith.constant dense<0.000000e+00> : vector<10xf32>
    %912 = vector.multi_reduction <add>, %911, %cst_491 [1] : vector<10x10xf32> to vector<10xf32>
    %913 = vector.shape_cast %912 : vector<10xf32> to vector<10x1xf32>
    %cst_492 = arith.constant 1.000000e+01 : f32
    %914 = vector.broadcast %cst_492 : f32 to vector<10x1xf32>
    %915 = arith.divf %913, %914 : vector<10x1xf32>
    %916 = vector.broadcast %908 : vector<10x1xf32> to vector<10x10xf32>
    %917 = arith.subf %863, %916 : vector<10x10xf32>
    %cst_493 = arith.constant 9.99999974E-6 : f32
    %918 = vector.broadcast %cst_493 : f32 to vector<10x1xf32>
    %919 = arith.addf %915, %918 : vector<10x1xf32>
    %920 = math.rsqrt %919 : vector<10x1xf32>
    %921 = vector.broadcast %920 : vector<10x1xf32> to vector<10x10xf32>
    %922 = arith.mulf %917, %921 : vector<10x10xf32>
    %923 = vector.broadcast %881 : vector<1x10xf32> to vector<10x10xf32>
    %924 = arith.mulf %922, %923 : vector<10x10xf32>
    %925 = vector.broadcast %884 : vector<1x10xf32> to vector<10x10xf32>
    %926 = arith.addf %924, %925 : vector<10x10xf32>
    %927 = arith.truncf %926 : vector<10x10xf32> to vector<10x10xbf16>
    %cst_494 = arith.constant dense<0.000000e+00> : vector<10x20xf32>
    %928 = tpu.matmul %927, %866, %cst_494 {dimension_numbers = #tpu.dot_dimension_numbers<[1], [0], [0], [1], [0, 0, 1, 1], [], []>} : vector<10x10xbf16>, vector<10x20xbf16>, vector<10x20xf32> -> vector<10x20xf32>
    %929 = vector.broadcast %887 : vector<1x20xf32> to vector<10x20xf32>
    %930 = arith.addf %928, %929 : vector<10x20xf32>
    %cst_495 = arith.constant dense<0.000000e+00> : vector<10x20xf32>
    %931 = tpu.matmul %927, %869, %cst_495 {dimension_numbers = #tpu.dot_dimension_numbers<[1], [0], [0], [1], [0, 0, 1, 1], [], []>} : vector<10x10xbf16>, vector<10x20xbf16>, vector<10x20xf32> -> vector<10x20xf32>
    %932 = vector.broadcast %890 : vector<1x20xf32> to vector<10x20xf32>
    %933 = arith.addf %931, %932 : vector<10x20xf32>
    %934 = arith.truncf %933 : vector<10x20xf32> to vector<10x20xbf16>
    %935 = arith.truncf %930 : vector<10x20xf32> to vector<10x20xbf16>
    %cst_496 = arith.constant dense<0.000000e+00> : vector<50x20xf32>
    %936 = tpu.matmul %9, %935, %cst_496 {dimension_numbers = #tpu.dot_dimension_numbers<[1], [0], [0], [1], [0, 0, 1, 1], [], []>} : vector<50x10xbf16>, vector<10x20xbf16>, vector<50x20xf32> -> vector<50x20xf32>
    %937 = arith.mulf %936, %12 : vector<50x20xf32>
    %938 = arith.truncf %937 : vector<50x20xf32> to vector<50x20xbf16>
    %cst_497 = arith.constant dense<0.000000e+00> : vector<50x10xf32>
    %939 = tpu.matmul %938, %934, %cst_497 {dimension_numbers = #tpu.dot_dimension_numbers<[1], [1], [0], [0], [0, 0, 1, 0], [], []>} : vector<50x20xbf16>, vector<10x20xbf16>, vector<50x10xf32> -> vector<50x10xf32>
    %940 = arith.addf %939, %14 : vector<50x10xf32>
    %cst_498 = arith.constant dense<0xFF800000> : vector<50xf32>
    %941 = vector.multi_reduction <maximumf>, %940, %cst_498 [1] : vector<50x10xf32> to vector<50xf32>
    %942 = vector.shape_cast %941 : vector<50xf32> to vector<50x1xf32>
    %943 = vector.broadcast %942 : vector<50x1xf32> to vector<50x10xf32>
    %944 = arith.subf %940, %943 : vector<50x10xf32>
    %945 = math.exp %944 : vector<50x10xf32>
    %cst_499 = arith.constant dense<0.000000e+00> : vector<50xf32>
    %946 = vector.multi_reduction <add>, %945, %cst_499 [1] : vector<50x10xf32> to vector<50xf32>
    %947 = vector.shape_cast %946 : vector<50xf32> to vector<50x1xf32>
    %948 = tpu.reciprocal %947 {approx = true} : vector<50x1xf32> -> vector<50x1xf32>
    %949 = vector.broadcast %948 : vector<50x1xf32> to vector<50x10xf32>
    %950 = arith.mulf %945, %949 : vector<50x10xf32>
    %951 = arith.truncf %950 : vector<50x10xf32> to vector<50x10xbf16>
    %cst_500 = arith.constant dense<0.000000e+00> : vector<50x20xf32>
    %952 = tpu.matmul %951, %934, %cst_500 {dimension_numbers = #tpu.dot_dimension_numbers<[1], [0], [0], [1], [0, 0, 1, 1], [], []>} : vector<50x10xbf16>, vector<10x20xbf16>, vector<50x20xf32> -> vector<50x20xf32>
    %953 = arith.mulf %952, %13 : vector<50x20xf32>
    %954 = arith.truncf %953 : vector<50x20xf32> to vector<50x20xbf16>
    %cst_501 = arith.constant dense<0.000000e+00> : vector<10x20xf32>
    %955 = tpu.matmul %11, %954, %cst_501 {dimension_numbers = #tpu.dot_dimension_numbers<[1], [0], [0], [1], [0, 0, 1, 1], [], []>} : vector<10x50xbf16>, vector<50x20xbf16>, vector<10x20xf32> -> vector<10x20xf32>
    %956 = arith.truncf %955 : vector<10x20xf32> to vector<10x20xbf16>
    %cst_502 = arith.constant dense<0.000000e+00> : vector<10x10xf32>
    %957 = tpu.matmul %956, %872, %cst_502 {dimension_numbers = #tpu.dot_dimension_numbers<[1], [0], [0], [1], [0, 0, 1, 1], [], []>} : vector<10x20xbf16>, vector<20x10xbf16>, vector<10x10xf32> -> vector<10x10xf32>
    %958 = arith.addf %863, %957 : vector<10x10xf32>
    %959 = vector.broadcast %893 : vector<1x10xf32> to vector<10x10xf32>
    %960 = arith.addf %958, %959 : vector<10x10xf32>
    %cst_503 = arith.constant dense<0.000000e+00> : vector<10xf32>
    %961 = vector.multi_reduction <add>, %960, %cst_503 [1] : vector<10x10xf32> to vector<10xf32>
    %962 = vector.shape_cast %961 : vector<10xf32> to vector<10x1xf32>
    %cst_504 = arith.constant 1.000000e+01 : f32
    %963 = vector.broadcast %cst_504 : f32 to vector<10x1xf32>
    %964 = arith.divf %962, %963 : vector<10x1xf32>
    %965 = vector.broadcast %964 : vector<10x1xf32> to vector<10x10xf32>
    %966 = arith.subf %960, %965 : vector<10x10xf32>
    %967 = arith.mulf %966, %966 : vector<10x10xf32>
    %cst_505 = arith.constant dense<0.000000e+00> : vector<10xf32>
    %968 = vector.multi_reduction <add>, %967, %cst_505 [1] : vector<10x10xf32> to vector<10xf32>
    %969 = vector.shape_cast %968 : vector<10xf32> to vector<10x1xf32>
    %cst_506 = arith.constant 1.000000e+01 : f32
    %970 = vector.broadcast %cst_506 : f32 to vector<10x1xf32>
    %971 = arith.divf %969, %970 : vector<10x1xf32>
    %972 = vector.broadcast %964 : vector<10x1xf32> to vector<10x10xf32>
    %973 = arith.subf %960, %972 : vector<10x10xf32>
    %cst_507 = arith.constant 9.99999974E-6 : f32
    %974 = vector.broadcast %cst_507 : f32 to vector<10x1xf32>
    %975 = arith.addf %971, %974 : vector<10x1xf32>
    %976 = math.rsqrt %975 : vector<10x1xf32>
    %977 = vector.broadcast %976 : vector<10x1xf32> to vector<10x10xf32>
    %978 = arith.mulf %973, %977 : vector<10x10xf32>
    %979 = vector.broadcast %896 : vector<1x10xf32> to vector<10x10xf32>
    %980 = arith.mulf %978, %979 : vector<10x10xf32>
    %981 = vector.broadcast %899 : vector<1x10xf32> to vector<10x10xf32>
    %982 = arith.addf %980, %981 : vector<10x10xf32>
    %983 = arith.truncf %982 : vector<10x10xf32> to vector<10x10xbf16>
    %cst_508 = arith.constant dense<0.000000e+00> : vector<10x40xf32>
    %984 = tpu.matmul %983, %875, %cst_508 {dimension_numbers = #tpu.dot_dimension_numbers<[1], [0], [0], [1], [0, 0, 1, 1], [], []>} : vector<10x10xbf16>, vector<10x40xbf16>, vector<10x40xf32> -> vector<10x40xf32>
    %985 = vector.broadcast %901 : vector<1x40xf32> to vector<10x40xf32>
    %986 = arith.addf %984, %985 : vector<10x40xf32>
    %cst_509 = arith.constant 5.000000e-01 : f32
    %987 = vector.broadcast %cst_509 : f32 to vector<10x40xf32>
    %988 = arith.mulf %987, %986 : vector<10x40xf32>
    %cst_510 = arith.constant 0.707106769 : f32
    %989 = vector.broadcast %cst_510 : f32 to vector<10x40xf32>
    %990 = arith.mulf %986, %989 : vector<10x40xf32>
    %991 = math.absf %990 : vector<10x40xf32>
    %cst_511 = arith.constant 0.327591091 : f32
    %992 = vector.broadcast %cst_511 : f32 to vector<10x40xf32>
    %993 = arith.mulf %992, %991 : vector<10x40xf32>
    %cst_512 = arith.constant 1.000000e+00 : f32
    %994 = vector.broadcast %cst_512 : f32 to vector<10x40xf32>
    %995 = arith.addf %994, %993 : vector<10x40xf32>
    %cst_513 = arith.constant 1.000000e+00 : f32
    %996 = vector.broadcast %cst_513 : f32 to vector<10x40xf32>
    %997 = arith.divf %996, %995 : vector<10x40xf32>
    %cst_514 = arith.constant 1.06140542 : f32
    %998 = vector.broadcast %cst_514 : f32 to vector<10x40xf32>
    %999 = arith.mulf %998, %997 : vector<10x40xf32>
    %cst_515 = arith.constant -1.45315206 : f32
    %1000 = vector.broadcast %cst_515 : f32 to vector<10x40xf32>
    %1001 = arith.addf %999, %1000 : vector<10x40xf32>
    %1002 = arith.mulf %1001, %997 : vector<10x40xf32>
    %cst_516 = arith.constant 1.42141378 : f32
    %1003 = vector.broadcast %cst_516 : f32 to vector<10x40xf32>
    %1004 = arith.addf %1002, %1003 : vector<10x40xf32>
    %1005 = arith.mulf %1004, %997 : vector<10x40xf32>
    %cst_517 = arith.constant -0.284496725 : f32
    %1006 = vector.broadcast %cst_517 : f32 to vector<10x40xf32>
    %1007 = arith.addf %1005, %1006 : vector<10x40xf32>
    %1008 = arith.mulf %1007, %997 : vector<10x40xf32>
    %cst_518 = arith.constant 0.254829586 : f32
    %1009 = vector.broadcast %cst_518 : f32 to vector<10x40xf32>
    %1010 = arith.addf %1008, %1009 : vector<10x40xf32>
    %1011 = arith.mulf %1010, %997 : vector<10x40xf32>
    %cst_519 = arith.constant 0.000000e+00 : f32
    %1012 = vector.broadcast %cst_519 : f32 to vector<10x40xf32>
    %1013 = arith.subf %1012, %991 : vector<10x40xf32>
    %1014 = arith.mulf %1013, %991 : vector<10x40xf32>
    %1015 = math.exp %1014 : vector<10x40xf32>
    %1016 = arith.mulf %1011, %1015 : vector<10x40xf32>
    %cst_520 = arith.constant 1.000000e+00 : f32
    %1017 = vector.broadcast %cst_520 : f32 to vector<10x40xf32>
    %1018 = arith.subf %1017, %1016 : vector<10x40xf32>
    %cst_521 = arith.constant 0.000000e+00 : f32
    %1019 = vector.broadcast %cst_521 : f32 to vector<10x40xf32>
    %1020 = arith.cmpf oge, %990, %1019 : vector<10x40xf32>
    %cst_522 = arith.constant 0.000000e+00 : f32
    %1021 = vector.broadcast %cst_522 : f32 to vector<10x40xf32>
    %1022 = arith.subf %1021, %1018 : vector<10x40xf32>
    %1023 = arith.select %1020, %1018, %1022 : vector<10x40xi1>, vector<10x40xf32>
    %cst_523 = arith.constant 1.000000e+00 : f32
    %1024 = vector.broadcast %cst_523 : f32 to vector<10x40xf32>
    %1025 = arith.addf %1024, %1023 : vector<10x40xf32>
    %1026 = arith.mulf %988, %1025 : vector<10x40xf32>
    %1027 = arith.truncf %1026 : vector<10x40xf32> to vector<10x40xbf16>
    %cst_524 = arith.constant dense<0.000000e+00> : vector<10x10xf32>
    %1028 = tpu.matmul %1027, %878, %cst_524 {dimension_numbers = #tpu.dot_dimension_numbers<[1], [0], [0], [1], [0, 0, 1, 1], [], []>} : vector<10x40xbf16>, vector<40x10xbf16>, vector<10x10xf32> -> vector<10x10xf32>
    %1029 = arith.addf %960, %1028 : vector<10x10xf32>
    %1030 = vector.broadcast %904 : vector<1x10xf32> to vector<10x10xf32>
    %1031 = arith.addf %1029, %1030 : vector<10x10xf32>
    %cst_525 = arith.constant dense<0.000000e+00> : vector<10xf32>
    %1032 = vector.multi_reduction <add>, %1031, %cst_525 [1] : vector<10x10xf32> to vector<10xf32>
    %1033 = vector.shape_cast %1032 : vector<10xf32> to vector<10x1xf32>
    %cst_526 = arith.constant 1.000000e+01 : f32
    %1034 = vector.broadcast %cst_526 : f32 to vector<10x1xf32>
    %1035 = arith.divf %1033, %1034 : vector<10x1xf32>
    %1036 = vector.broadcast %1035 : vector<10x1xf32> to vector<10x10xf32>
    %1037 = arith.subf %1031, %1036 : vector<10x10xf32>
    %1038 = arith.mulf %1037, %1037 : vector<10x10xf32>
    %cst_527 = arith.constant dense<0.000000e+00> : vector<10xf32>
    %1039 = vector.multi_reduction <add>, %1038, %cst_527 [1] : vector<10x10xf32> to vector<10xf32>
    %1040 = vector.shape_cast %1039 : vector<10xf32> to vector<10x1xf32>
    %cst_528 = arith.constant 1.000000e+01 : f32
    %1041 = vector.broadcast %cst_528 : f32 to vector<10x1xf32>
    %1042 = arith.divf %1040, %1041 : vector<10x1xf32>
    %1043 = vector.broadcast %1035 : vector<10x1xf32> to vector<10x10xf32>
    %1044 = arith.subf %1031, %1043 : vector<10x10xf32>
    %cst_529 = arith.constant 9.99999974E-6 : f32
    %1045 = vector.broadcast %cst_529 : f32 to vector<10x1xf32>
    %1046 = arith.addf %1042, %1045 : vector<10x1xf32>
    %1047 = math.rsqrt %1046 : vector<10x1xf32>
    %1048 = vector.broadcast %1047 : vector<10x1xf32> to vector<10x10xf32>
    %1049 = arith.mulf %1044, %1048 : vector<10x10xf32>
    %1050 = vector.broadcast %5 : vector<1x10xf32> to vector<10x10xf32>
    %1051 = arith.mulf %1049, %1050 : vector<10x10xf32>
    %1052 = vector.broadcast %6 : vector<1x10xf32> to vector<10x10xf32>
    %1053 = arith.addf %1051, %1052 : vector<10x10xf32>
    %1054 = arith.truncf %1053 : vector<10x10xf32> to vector<10x10xbf16>
    %cst_530 = arith.constant dense<0.000000e+00> : vector<10x10xf32>
    %1055 = tpu.matmul %1054, %4, %cst_530 {dimension_numbers = #tpu.dot_dimension_numbers<[1], [0], [0], [1], [0, 0, 1, 1], [], []>} : vector<10x10xbf16>, vector<10x10xbf16>, vector<10x10xf32> -> vector<10x10xf32>
    %1056 = vector.broadcast %7 : vector<1x10xf32> to vector<10x10xf32>
    %1057 = arith.addf %1055, %1056 : vector<10x10xf32>
    %c0_531 = arith.constant 0 : index
    %c0_532 = arith.constant 0 : index
    %1058 = vector.load %arg4[%c0_531, %c0_532] : memref<10x10xf32, #tpu.memory_space<vmem>>, vector<10x10xf32>
    tpu.vector_store %arg4[%c0_531, %c0_532], %1057 {strides = array<i32>} : memref<10x10xf32, #tpu.memory_space<vmem>>, vector<10x10xf32>,
    return
  }
}

</mosaic_0001>

<bundles_post_ra>
// kernel: tpu_custom_call.1
= control target key start
LH: loop header
LB: loop body
LE: loop exit
PB: predicated region body
PF: predicated region fallthrough
CT: control target
= control target key end

     0   :  { %v6547_v2 = vmov 0   ;;  %v6548_v3 = vmov 0.0   ;;  %vm86_vm0 = vcmask 1044480   ;;  %s8130_s0 = inlined_call_operand.vmem [shape: s32[10,1], index: 0, kind: input, shape index: {}]   ;;  %s8131_s1 = inlined_call_operand.vmem [shape: f32[6,112,40], index: 1, kind: input, shape index: {}]   ;;  %s8132_s2 = inlined_call_operand.vmem [shape: f32[6,9,1,40], index: 2, kind: input, shape index: {}]   ;;  %s8133_s3 = inlined_call_operand.vmem [shape: f32[312,50], index: 3, kind: input, shape index: {}]   ;;  %s8134_s4 = inlined_call_operand.hbm [shape: f32[10,10], index: 4, kind: output, shape index: {}]  }
   0x1   :  { %v65_v0 = vld [vmem:[%s8130_s0] sm:$0xff]  ;;  %6214 = vset.pattern.permute.xlu0 %v6547_v2  ;;  %5710 = vmatprep.subr.bf16.mxu0 %v6548_v3  ;;  %v20_v4 = vld [vmem:[%s8133_s3 + $0x8] sm:$0x3] }
   0x2   :  { %v19_v1 = vld [vmem:[%s8133_s3] sm:$0xff] }
   0x3   :  { %9 = vsyncpa [#allocation3], 0  ;;  %70 = vperm.xlu0 %6214, %v65_v0   ;;  %v21_v5 = vpack.c.bf16 %v20_v4, %v19_v1  ;;  %5716 = vmatprep.subr.bf16.mxu1 %v6548_v3  ;;  %v66_v6 = vld [vmem:[%s8130_s0 + $0x8] sm:$0x3]  ;;  %vm6549_vm1 = vmmov 0   ;;  %v67_v8 = vlaneseq  ;;  %vm82_vm4 = vcmask 80896  }
   0x4   :  { %5712 = vmatprep.mubr.msk.bf16.mxu0 %vm6549_vm1, %v6548_v3  ;;  %5718 = vmatprep.mubr.msk.bf16.mxu1 %vm6549_vm1, %v6548_v3  ;;  %v22_v15 = vld [vmem:[%s8133_s3 + $0x10] sm:$0xff]  ;;  %v23_v19 = vld [vmem:[%s8133_s3 + $0x18] sm:$0x3]  ;;  %vm173_vm5 = vcmask 74752   ;;  %v134_v37 = vld [vmem:[%s8131_s1 + $0x60] sm:$0xff]  ;;  %vm410_vm6 = vcmask 162816  }
   0x5   :  { %v88_v7 = vsel %vm86_vm0, %v21_v5, 0  ;;  %v68_v9 = vand.u32 127, %v67_v8  ;;  %v131_v35 = vld [vmem:[%s8131_s1 + $0x50] sm:$0xff]  ;;  %v132_v36 = vld [vmem:[%s8131_s1 + $0x58] sm:$0x3]  ;;  %v30_v60 = vld [vmem:[%s8133_s3 + $0x48] sm:$0xff] }
   0x6   :  { %5711 = vmatpush3.bf16.msra.mxu0 %v88_v7  ;;  %v133_v38 = vpack.c.bf16 %v132_v36, %v131_v35  ;;  %v135_v39 = vld [vmem:[%s8131_s1 + $0x68] sm:$0x3]  ;;  %v5227_v51 = vld [vmem:[%s8132_s2] ss:$0 sm:$0xff]  ;;  %v5228_v55 = vld [vmem:[%s8132_s2 + $0x1] ss:$0 sm:$0xff] }
   0x7   :  { %73 = vperm.xlu0 %6214, %v66_v6   ;;  %5722 = vmatprep.subr.bf16.mxu0 %v6548_v3  ;;  %v136_v40 = vpack.c.bf16 %v135_v39, %v134_v37  ;;  %v31_v61 = vld [vmem:[%s8133_s3 + $0x50] sm:$0xff]  ;;  %v5229_v1 = vld [vmem:[%s8132_s2 + $0x2] ss:$0 sm:$0xff]  ;;  %v5231_v2 = vld [vmem:[%s8132_s2 + $0x3] ss:$0 sm:$0xff]  ;;  %vm664_vm7 = vcmask 1040384  }
   0x8   :  { %v225_v41 = vsel %vm86_vm0, %v133_v38, 0  ;;  %v6649_v62 = vpack.c.bf16 %v31_v61, %v30_v60  ;;  %v6712_v35 = vld [vmem:[%s8133_s3 + $0xa0] sm:$0xff]  ;;  %vm660_vm8 = vcmask 408576   ;;  %vm713_vm9 = vcmask 1041408   ;;  %s6550_s0 = smov [#allocation2]  }
   0x9   :  { %5717 = vmatpush3.bf16.msra.mxu1 %v225_v41  ;;  %v275_v42 = vsel %vm86_vm0, %v136_v40, 0  ;;  %vm923_vm10 = vcmask 1043456   ;;  %vm919_vm13 = vcmask 326656   ;;  %s5205_s23 = sshll.u32 %s6550_s0, 4  ;;  %s5206_s23 = int_to_ptr.vmem [resolvable:$true] %s5205_s23 }
   0xa   :  { %s6525_s24 = scalar_lea.vmem %s5206_s23, 256  ;;  %p6530_p1 = scmp.lt.s32.totalorder %s5206_s23, %s5206_s23 }
   0xb   :  { %p6526_p0 = scmp.ne.s32.totalorder %s5206_s23, %s6525_s24  ;;  %p6531_p2 = scmp.lt.s32.totalorder %s6525_s24, %s6525_s24 }
   0xd   :  { %p6532_p3 = por %p6531_p2, %p6530_p1 }
   0xf   :  { %p6533_p4 = pnand %p6532_p3, %p6526_p0 }
  0x7e   :  { %v71_v10 = vpop.permute.xlu0 %70 }
  0x7f   :  { %vm75_vm2 = vcmp.eq.s32.totalorder %v71_v10, %v68_v9 }
  0x80   :  { %v5216_v12 = vsel %vm75_vm2, 1.0, %v6548_v3 }
  0x82   :  { %v74_v11 = vpop.permute.xlu0 %73 }
  0x83   :  { %vm76_vm3 = vcmp.eq.s32.totalorder %v74_v11, %v68_v9 }
  0x84   :  { %v5217_v13 = vsel %vm76_vm3, 1.0, %v6548_v3 }
  0x85   :  { %v81_v14 = vpack.c.bf16 %v5217_v13, %v5216_v12 }
  0x87   :  { %5713 = vmatmul.mubr.msk.bf16.vlgmr.msra.gmra.mxu0 %vm82_vm4, %v81_v14  ;;  %v32_v14 = vld [vmem:[%s8133_s3 + $0x58] sm:$0xff] }
  0x88   :  { %5724 = vmatprep.mubr.msk.bf16.mxu0 %vm6549_vm1, %v6548_v3  ;;  %5723 = vmatpush3.bf16.msra.mxu0 %v275_v42 }
 0x147   :  { %v124_v16 = vpop.f32.mrf.mxu0 }
 0x148   :  { %v6606_v17 = vadd.f32 %v124_v16, %v22_v15  ;;  %v33_v15 = vld [vmem:[%s8133_s3 + $0x60] sm:$0xff] }
 0x149   :  { %v5714_v18 = vpop.f32.mrf.mxu0 }
 0x14a   :  { %v170_v20 = vsel %vm82_vm4, %v6606_v17, 0.0 }
 0x14b   :  { %171 = vadd.xlane.f32.xlu1 %v170_v20  ;;  %v127_v21 = vpop.f32.mrf.mxu0  ;;  %v35_v20 = vld [vmem:[%s8133_s3 + $0x70] sm:$0xff] }
 0x14c   :  { %v6613_v22 = vadd.f32 %v127_v21, %v23_v19  ;;  %v34_v19 = vld [vmem:[%s8133_s3 + $0x68] sm:$0xff] }
 0x14d   :  { %v5715_v23 = vpop.f32.mrf.mxu0 }
 0x14e   :  { %v174_v24 = vsel %vm173_vm5, %v6613_v22, 0.0 }
 0x14f   :  { %175 = vadd.xlane.f32.xlu1 %v174_v24  ;;  %v6675_v24 = vpack.c.bf16 %v33_v15, %v32_v14  ;;  %v6779_v15 = vld [vmem:[%s8133_s3 + $0x128] sm:$0xff] }
 0x1d4   :  { %v172_v25 = vpop.xlane.xlu1 %171 }
 0x1d5   :  { %v178_v26 = vmul.f32 0.1, %v172_v25  ;;  %v6677_v25 = vpack.c.bf16 %v35_v20, %v34_v19  ;;  %v6786_v19 = vld [vmem:[%s8133_s3 + $0x130] sm:$0x3] }
 0x1d7   :  { %v180_v27 = vsub.f32 %v6606_v17, %v178_v26 }
 0x1d8   :  { %v176_v28 = vpop.xlane.xlu1 %175 }
 0x1d9   :  { %v179_v29 = vmul.f32 0.1, %v176_v28  ;;  %v182_v30 = vmul.f32 %v180_v27, %v180_v27 }
 0x1db   :  { %v181_v31 = vsub.f32 %v6613_v22, %v179_v29  ;;  %v184_v32 = vsel %vm82_vm4, %v182_v30, 0.0 }
 0x1dc   :  { %185 = vadd.xlane.f32.xlu0 %v184_v32  ;;  %v6702_v32 = vld [vmem:[%s8133_s3 + $0x90] sm:$0xff] }
 0x1dd   :  { %v183_v33 = vmul.f32 %v181_v31, %v181_v31 }
 0x1df   :  { %v187_v34 = vsel %vm173_vm5, %v183_v33, 0.0 }
 0x1e0   :  { %188 = vadd.xlane.f32.xlu1 %v187_v34  ;;  %v6707_v34 = vld [vmem:[%s8133_s3 + $0x98] sm:$0xff] }
 0x265   :  { %v186_v43 = vpop.xlane.xlu0 %185 }
 0x266   :  { %v190_v44 = vmul.f32 0.1, %v186_v43  ;;  %v6721_v43 = vld [vmem:[%s8133_s3 + $0xc0] sm:$0x3] }
 0x268   :  { %v192_v45 = vadd.f32 1e-05, %v190_v44 }
 0x269   :  { %v189_v46 = vpop.xlane.xlu1 %188 }
 0x26a   :  { %6215 = vrsqrt.f32 %v192_v45  ;;  %v191_v47 = vmul.f32 0.1, %v189_v46  ;;  %v6726_v45 = vld [vmem:[%s8133_s3 + $0xb0] sm:$0xff] }
 0x26c   :  { %v193_v48 = vadd.f32 1e-05, %v191_v47 }
 0x26e   :  { %6217 = vrsqrt.f32 %v193_v48 }
 0x277   :  { %v6216_v49 = vpop.eup %6215 }
 0x278   :  { %v196_v50 = vmul.f32 %v6216_v49, %v180_v27  ;;  %v36_v27 = vld [vmem:[%s8133_s3 + $0x78] sm:$0x3] }
 0x279   :  { %v6690_v28 = vpack.c.bf16 %v36_v27, %v36_v27  ;;  %v6734_v49 = vld [vmem:[%s8133_s3 + $0xb8] sm:$0xff] }
 0x27a   :  { %v204_v54 = vmul.f32 %v5227_v51, %v196_v50 }
 0x27b   :  { %v6218_v52 = vpop.eup %6217 }
 0x27c   :  { %v197_v53 = vmul.f32 %v6218_v52, %v181_v31  ;;  %v212_v57 = vadd.f32 %v5228_v55, %v204_v54  ;;  %v6697_v31 = vld [vmem:[%s8133_s3 + $0xa8] sm:$0xff] }
 0x27e   :  { %v205_v56 = vmul.f32 %v5227_v51, %v197_v53 }
 0x280   :  { %v213_v58 = vadd.f32 %v5228_v55, %v205_v56  ;;  %v6745_v55 = vld [vmem:[%s8133_s3 + $0x110] sm:$0xff] }
 0x282   :  { %v214_v59 = vpack.c.bf16 %v213_v58, %v212_v57  ;;  %v6750_v57 = vld [vmem:[%s8133_s3 + $0x100] sm:$0xff] }
 0x284   :  { %5719 = vmatmul.mubr.msk.bf16.vlgmr.msra.gmra.mxu1 %vm82_vm4, %v214_v59  ;;  %5725 = vmatmul.mubr.msk.bf16.vlgmr.msra.gmra.mxu0 %vm82_vm4, %v214_v59 }
 0x285   :  { %5730 = vmatprep.mubr.msk.bf16.mxu1 %vm82_vm4, %v6649_v62 }
 0x344   :  { %v261_v63 = vpop.f32.mrf.mxu1  ;;  %v311_v0 = vpop.f32.mrf.mxu0 }
 0x345   :  { %v262_v8 = vadd.f32 %v5229_v1, %v261_v63  ;;  %v312_v9 = vadd.f32 %v5231_v2, %v311_v0  ;;  %v6758_v63 = vld [vmem:[%s8133_s3 + $0x118] sm:$0xff] }
 0x346   :  { %v5720_v4 = vpop.f32.mrf.mxu1  ;;  %v5726_v5 = vpop.f32.mrf.mxu0 }
 0x347   :  { %v6765_v5 = vld [vmem:[%s8133_s3 + $0x108] sm:$0xff] }
 0x348   :  { %v264_v6 = vpop.f32.mrf.mxu1  ;;  %v314_v7 = vpop.f32.mrf.mxu0 }
 0x349   :  { %v265_v10 = vadd.f32 %v5229_v1, %v264_v6  ;;  %v315_v11 = vadd.f32 %v5231_v2, %v314_v7 }
 0x34a   :  { %v5721_v12 = vpop.f32.mrf.mxu1  ;;  %v5727_v13 = vpop.f32.mrf.mxu0 }
 0x34b   :  { %v319_v16 = vpack.c.bf16 %v265_v10, %v262_v8  ;;  %v318_v18 = vpack.c.bf16 %v315_v11, %v312_v9  ;;  %v6772_v10 = vld [vmem:[%s8133_s3 + $0x120] sm:$0xff] }
 0x34d   :  { %6190 = vmatprep.subr.msk.bf16.mxu1 %vm86_vm0, %v319_v16  ;;  %6191 = vmatprep.subr.msk.bf16.mxu0 %vm410_vm6, %v318_v18  ;;  %v333_v21 = vsel %vm86_vm0, %v319_v16, 0  ;;  %v424_v23 = vsel %vm410_vm6, %v318_v18, 0  ;;  %v583_v26 = vsel %vm86_vm0, %v318_v18, 0 }
 0x34e   :  { %5729 = vmatpush3.bf16.msra.mxu1 %v333_v21  ;;  %5739 = vmatpush3.bf16.xpose.msra.mxu0 %v424_v23 }
 0x34f   :  { %6192 = vmatprep.subr.msk.bf16.mxu1 %vm86_vm0, %v318_v18  ;;  %5758 = vmatprep.subr.bf16.mxu0 %v6548_v3 }
 0x351   :  { %5731 = vmatmul.mubr.msk.bf16.vlgmr.msra.gmra.mxu1 %vm82_vm4, %v6675_v24 }
 0x352   :  { %5749 = vmatpush3.bf16.msra.mxu1 %v583_v26  ;;  %5734 = vmatprep.mubr.msk.bf16.mxu1 %vm82_vm4, %v6677_v25 }
 0x353   :  { %5778 = vmatprep.subr.bf16.mxu1 %v6548_v3 }
 0x359   :  { %5735 = vmatmul.mubr.msk.bf16.gmra.mxu1 %vm82_vm4, %v6690_v28 }
 0x411   :  { %v5732_v29 = vpop.f32.mrf.mxu1 }
 0x412   :  { %v401_v40 = vmul.f32 %v5732_v29, %v6712_v35 }
 0x413   :  { %v369_v30 = vpop.f32.mrf.mxu1 }
 0x414   :  { %v399_v38 = vmul.f32 %v369_v30, %v6702_v32 }
 0x415   :  { %v5733_v33 = vpop.f32.mrf.mxu1 }
 0x416   :  { %v402_v36 = vmul.f32 %v5733_v33, %v6697_v31 }
 0x417   :  { %v372_v37 = vpop.f32.mrf.mxu1 }
 0x418   :  { %v400_v39 = vmul.f32 %v372_v37, %v6707_v34  ;;  %v407_v44 = vpack.c.bf16 %v402_v36, %v401_v40 }
 0x419   :  { %v5736_v41 = vpop.f32.mrf.mxu1 }
 0x41a   :  { %v406_v42 = vpack.c.bf16 %v400_v39, %v399_v38  ;;  %v405_v47 = vmul.f32 %v5736_v41, %v6721_v43 }
 0x41b   :  { %v385_v46 = vpop.f32.mrf.mxu1 }
 0x41c   :  { %5740 = vmatprep.mubr.msk.bf16.mxu0 %vm410_vm6, %v406_v42  ;;  %v403_v50 = vmul.f32 %v385_v46, %v6726_v45  ;;  %v409_v53 = vpack.c.bf16 %v405_v47, %v405_v47 }
 0x41d   :  { %v5737_v48 = vpop.f32.mrf.mxu1  ;;  %5741 = vmatmul.mubr.msk.bf16.vlgmr.msra.gmra.mxu0 %vm410_vm6, %v407_v44 }
 0x41f   :  { %v388_v51 = vpop.f32.mrf.mxu1 }
 0x420   :  { %v404_v52 = vmul.f32 %v388_v51, %v6734_v49 }
 0x422   :  { %v408_v54 = vpack.c.bf16 %v404_v52, %v403_v50 }
 0x424   :  { %5744 = vmatprep.mubr.msk.bf16.mxu0 %vm410_vm6, %v408_v54 }
 0x425   :  { %5745 = vmatmul.mubr.msk.bf16.gmra.mxu0 %vm410_vm6, %v409_v53 }
 0x426   :  { %5766 = vmatprep.mubr.msk.bf16.mxu0 %vm6549_vm1, %v6548_v3 }
 0x4dd   :  { %v5742_v56 = vpop.f32.mrf.mxu0 }
 0x4de   :  { %v469_v58 = vadd.f32 %v5742_v56, %v6745_v55 }
 0x4df   :  { %v460_v59 = vpop.f32.mrf.mxu0 }
 0x4e0   :  { %v461_v60 = vadd.f32 %v460_v59, %v6750_v57  ;;  %v496_v61 = vsel %vm82_vm4, %v469_v58, -inf }
 0x4e1   :  { %497 = vmax.xlane.f32.xlu1 %v496_v61  ;;  %v5743_v0 = vpop.f32.mrf.mxu0 }
 0x4e2   :  { %v472_v2 = vadd.f32 %v5743_v0, %v6758_v63  ;;  %v490_v4 = vsel %vm82_vm4, %v461_v60, -inf }
 0x4e3   :  { %v463_v1 = vpop.f32.mrf.mxu0 }
 0x4e4   :  { %v464_v8 = vadd.f32 %v463_v1, %v6765_v5  ;;  %v499_v9 = vsel %vm82_vm4, %v472_v2, -inf }
 0x4e5   :  { %v5746_v6 = vpop.f32.mrf.mxu0  ;;  %491 = vmax.xlane.f32.xlu1 %v490_v4 }
 0x4e6   :  { %v493_v13 = vsel %vm82_vm4, %v464_v8, -inf  ;;  %v485_v20 = vadd.f32 %v5746_v6, %v6786_v19 }
 0x4e7   :  { %v476_v7 = vpop.f32.mrf.mxu0 }
 0x4e8   :  { %v477_v12 = vadd.f32 %v476_v7, %v6772_v10  ;;  %v508_v23 = vsel %vm173_vm5, %v485_v20, -inf }
 0x4e9   :  { %v5747_v11 = vpop.f32.mrf.mxu0  ;;  %500 = vmax.xlane.f32.xlu1 %v499_v9 }
 0x4ea   :  { %v502_v18 = vsel %vm82_vm4, %v477_v12, -inf }
 0x4eb   :  { %v479_v14 = vpop.f32.mrf.mxu0 }
 0x4ec   :  { %v480_v16 = vadd.f32 %v479_v14, %v6779_v15 }
 0x4ed   :  { %494 = vmax.xlane.f32.xlu1 %v493_v13 }
 0x4ee   :  { %v505_v21 = vsel %vm82_vm4, %v480_v16, -inf }
 0x4f1   :  { %503 = vmax.xlane.f32.xlu1 %v502_v18 }
 0x4f5   :  { %506 = vmax.xlane.f32.xlu1 %v505_v21 }
 0x4f9   :  { %509 = vmax.xlane.f32.xlu1 %v508_v23 }
 0x56a   :  { %v498_v26 = vpop.xlane.xlu1 %497 }
 0x56b   :  { %v513_v27 = vsub.f32 %v469_v58, %v498_v26 }
 0x56d   :  { %v522_v33 = vmul.f32 1.442695, %v513_v27 }
 0x56e   :  { %v492_v29 = vpop.xlane.xlu1 %491 }
 0x56f   :  { %v511_v30 = vsub.f32 %v461_v60, %v492_v29 }
 0x571   :  { %v518_v36 = vmul.f32 1.442695, %v511_v30 }
 0x572   :  { %v501_v37 = vpop.xlane.xlu1 %500 }
 0x573   :  { %6219 = vpow2.f32 %v518_v36  ;;  %v514_v38 = vsub.f32 %v472_v2, %v501_v37 }
 0x574   :  { %6221 = vpow2.f32 %v522_v33 }
 0x575   :  { %v524_v41 = vmul.f32 1.442695, %v514_v38 }
 0x576   :  { %v495_v39 = vpop.xlane.xlu1 %494 }
 0x577   :  { %v512_v40 = vsub.f32 %v464_v8, %v495_v39 }
 0x579   :  { %v520_v42 = vmul.f32 1.442695, %v512_v40 }
 0x57a   :  { %v504_v44 = vpop.xlane.xlu1 %503 }
 0x57b   :  { %6223 = vpow2.f32 %v520_v42  ;;  %v515_v46 = vsub.f32 %v477_v12, %v504_v44 }
 0x57c   :  { %6225 = vpow2.f32 %v524_v41 }
 0x57d   :  { %v526_v47 = vmul.f32 1.442695, %v515_v46 }
 0x57e   :  { %v507_v48 = vpop.xlane.xlu1 %506 }
 0x57f   :  { %6227 = vpow2.f32 %v526_v47  ;;  %v516_v50 = vsub.f32 %v480_v16, %v507_v48 }
 0x580   :  { %v6220_v51 = vpop.eup %6219 }
 0x581   :  { %v528_v52 = vmul.f32 1.442695, %v516_v50  ;;  %v532_v53 = vsel %vm82_vm4, %v6220_v51, 0.0  ;;  %v6222_v54 = vpop.eup %6221 }
 0x582   :  { %533 = vadd.xlane.f32.xlu0 %v532_v53  ;;  %v510_v56 = vpop.xlane.xlu1 %509  ;;  %v538_v60 = vsel %vm82_vm4, %v6222_v54, 0.0 }
 0x583   :  { %6229 = vpow2.f32 %v528_v52  ;;  %v517_v58 = vsub.f32 %v485_v20, %v510_v56  ;;  %v6807_v56 = vld [vmem:[%s8133_s3 + $0xf8] sm:$0x3] }
 0x585   :  { %v530_v59 = vmul.f32 1.442695, %v517_v58 }
 0x586   :  { %539 = vadd.xlane.f32.xlu0 %v538_v60 }
 0x587   :  { %6231 = vpow2.f32 %v530_v59 }
 0x588   :  { %v6224_v61 = vpop.eup %6223 }
 0x589   :  { %v535_v0 = vsel %vm82_vm4, %v6224_v61, 0.0  ;;  %v6226_v1 = vpop.eup %6225 }
 0x58a   :  { %536 = vadd.xlane.f32.xlu1 %v535_v0  ;;  %v541_v4 = vsel %vm82_vm4, %v6226_v1, 0.0  ;;  %v6813_v0 = vld [vmem:[%s8133_s3 + $0xe8] sm:$0xff] }
 0x58c   :  { %v6228_v2 = vpop.eup %6227 }
 0x58d   :  { %v544_v6 = vsel %vm82_vm4, %v6228_v2, 0.0 }
 0x58e   :  { %542 = vadd.xlane.f32.xlu1 %v541_v4  ;;  %545 = vadd.xlane.f32.xlu0 %v544_v6  ;;  %v6824_v6 = vld [vmem:[%s8133_s3 + $0xe0] sm:$0xff] }
 0x590   :  { %v6230_v7 = vpop.eup %6229 }
 0x591   :  { %v547_v8 = vsel %vm82_vm4, %v6230_v7, 0.0 }
 0x592   :  { %548 = vadd.xlane.f32.xlu1 %v547_v8 }
 0x594   :  { %v6232_v9 = vpop.eup %6231 }
 0x595   :  { %v550_v11 = vsel %vm173_vm5, %v6232_v9, 0.0 }
 0x596   :  { %551 = vadd.xlane.f32.xlu0 %v550_v11  ;;  %v6832_v11 = vld [vmem:[%s8133_s3 + $0xd8] sm:$0xff] }
 0x60b   :  { %v534_v12 = vpop.xlane.xlu0 %533 }
 0x60c   :  { %6233 = vrcp.f32 %v534_v12 }
 0x60f   :  { %v540_v13 = vpop.xlane.xlu0 %539 }
 0x613   :  { %v537_v14 = vpop.xlane.xlu1 %536 }
 0x614   :  { %6235 = vrcp.f32 %v537_v14  ;;  %v6838_v14 = vld [vmem:[%s8133_s3 + $0xd0] sm:$0xff] }
 0x615   :  { %6237 = vrcp.f32 %v540_v13 }
 0x617   :  { %v546_v16 = vpop.xlane.xlu0 %545  ;;  %v543_v18 = vpop.xlane.xlu1 %542 }
 0x618   :  { %6239 = vrcp.f32 %v543_v18  ;;  %v6844_v18 = vld [vmem:[%s8133_s3 + $0xc8] sm:$0xff] }
 0x619   :  { %6241 = vrcp.f32 %v546_v16  ;;  %v6234_v21 = vpop.eup %6233 }
 0x61a   :  { %v560_v27 = vmul.f32 %v6234_v21, %v6220_v51 }
 0x61b   :  { %v549_v20 = vpop.xlane.xlu1 %548 }
 0x61c   :  { %6243 = vrcp.f32 %v549_v20 }
 0x61f   :  { %v552_v23 = vpop.xlane.xlu0 %551 }
 0x620   :  { %6245 = vrcp.f32 %v552_v23 }
 0x621   :  { %v6236_v26 = vpop.eup %6235 }
 0x622   :  { %v561_v29 = vmul.f32 %v6236_v26, %v6224_v61  ;;  %v6238_v30 = vpop.eup %6237  ;;  %v41_v26 = vld [vmem:[%s8133_s3 + $0x80] sm:$0xff] }
 0x623   :  { %v562_v38 = vmul.f32 %v6238_v30, %v6222_v54 }
 0x624   :  { %v567_v33 = vpack.c.bf16 %v561_v29, %v560_v27  ;;  %v42_v27 = vld [vmem:[%s8133_s3 + $0x88] sm:$0x3] }
 0x625   :  { %v6240_v36 = vpop.eup %6239  ;;  %v6856_v30 = vpack.c.bf16 %v42_v27, %v41_v26 }
 0x626   :  { %5750 = vmatprep.mubr.msk.bf16.mxu1 %vm82_vm4, %v567_v33  ;;  %v6242_v37 = vpop.eup %6241  ;;  %v563_v39 = vmul.f32 %v6240_v36, %v6226_v1  ;;  %v139_v33 = vld [vmem:[%s8131_s1 + $0x48] sm:$0xf] }
 0x627   :  { %v564_v42 = vmul.f32 %v6242_v37, %v6228_v2  ;;  %v6818_v2 = vld [vmem:[%s8133_s3 + $0xf0] sm:$0xff]  ;;  %v141_v36 = vpack.c.bf16 %v139_v33, %v139_v33 }
 0x628   :  { %v568_v41 = vpack.c.bf16 %v563_v39, %v562_v38  ;;  %v137_v38 = vld [vmem:[%s8131_s1 + $0x38] sm:$0xff]  ;;  %v138_v39 = vld [vmem:[%s8131_s1 + $0x40] sm:$0xff] }
 0x629   :  { %v6244_v40 = vpop.eup %6243  ;;  %v715_v37 = vsel %vm713_vm9, %v141_v36, 0 }
 0x62a   :  { %v565_v44 = vmul.f32 %v6244_v40, %v6230_v7  ;;  %5751 = vmatmul.mubr.msk.bf16.vlgmr.msra.gmra.mxu1 %vm82_vm4, %v568_v41  ;;  %v140_v40 = vpack.c.bf16 %v138_v39, %v137_v38 }
 0x62c   :  { %v569_v46 = vpack.c.bf16 %v565_v44, %v564_v42 }
 0x62d   :  { %v6246_v47 = vpop.eup %6245 }
 0x62e   :  { %5754 = vmatprep.mubr.msk.bf16.mxu1 %vm82_vm4, %v569_v46  ;;  %v566_v48 = vmul.f32 %v6246_v47, %v6232_v9 }
 0x630   :  { %v570_v50 = vpack.c.bf16 %v566_v48, %v566_v48  ;;  %v5247_v48 = vld [vmem:[%s8132_s2 + $0x4] ss:$0 sm:$0xff] }
 0x632   :  { %5755 = vmatmul.mubr.msk.bf16.gmra.mxu1 %vm82_vm4, %v570_v50 }
 0x633   :  { %5780 = vmatprep.mubr.msk.bf16.mxu1 %vm6549_vm1, %v6548_v3 }
 0x6ea   :  { %v5752_v51 = vpop.f32.mrf.mxu1 }
 0x6eb   :  { %v651_v16 = vmul.f32 %v5752_v51, %v6832_v11 }
 0x6ec   :  { %v619_v52 = vpop.f32.mrf.mxu1 }
 0x6ed   :  { %v649_v23 = vmul.f32 %v619_v52, %v6844_v18 }
 0x6ee   :  { %v5753_v53 = vpop.f32.mrf.mxu1 }
 0x6ef   :  { %v652_v12 = vmul.f32 %v5753_v53, %v6824_v6 }
 0x6f0   :  { %v622_v54 = vpop.f32.mrf.mxu1 }
 0x6f1   :  { %v657_v20 = vpack.c.bf16 %v652_v12, %v651_v16  ;;  %v650_v21 = vmul.f32 %v622_v54, %v6838_v14 }
 0x6f2   :  { %v5756_v58 = vpop.f32.mrf.mxu1 }
 0x6f3   :  { %v655_v59 = vmul.f32 %v5756_v58, %v6807_v56  ;;  %v656_v29 = vpack.c.bf16 %v650_v21, %v649_v23  ;;  %v142_v21 = vld [vmem:[%s8131_s1] sm:$0xff]  ;;  %v143_v23 = vld [vmem:[%s8131_s1 + $0x8] sm:$0x3] }
 0x6f4   :  { %v635_v60 = vpop.f32.mrf.mxu1  ;;  %v144_v26 = vpack.c.bf16 %v143_v23, %v142_v21 }
 0x6f5   :  { %v659_v61 = vpack.c.bf16 %v655_v59, %v655_v59  ;;  %v653_v8 = vmul.f32 %v635_v60, %v6813_v0 }
 0x6f6   :  { %v5757_v1 = vpop.f32.mrf.mxu1  ;;  %v821_v27 = vsel %vm86_vm0, %v144_v26, 0 }
 0x6f7   :  { %v666_v4 = vsel %vm664_vm7, %v659_v61, 0  ;;  %5779 = vmatpush3.bf16.msra.mxu1 %v821_v27 }
 0x6f8   :  { %v638_v7 = vpop.f32.mrf.mxu1  ;;  %5759 = vmatpush3.bf16.msra.mxu0 %v666_v4  ;;  %5794 = vmatprep.subr.bf16.mxu1 %v6548_v3 }
 0x6f9   :  { %v654_v9 = vmul.f32 %v638_v7, %v6818_v2  ;;  %5760 = vmatprep.subr.bf16.mxu0 %v6548_v3 }
 0x6fb   :  { %v658_v13 = vpack.c.bf16 %v654_v9, %v653_v8 }
 0x6fd   :  { %5761 = vmatpush3.bf16.msra.mxu0 %v658_v13 }
 0x6fe   :  { %5762 = vmatprep.subr.bf16.mxu0 %v6548_v3 }
 0x701   :  { %5763 = vmatpush3.bf16.msra.mxu0 %v657_v20 }
 0x702   :  { %5764 = vmatprep.subr.bf16.mxu0 %v6548_v3 }
 0x705   :  { %5765 = vmatpush3.bf16.msra.mxu0 %v656_v29 }
 0x706   :  { %5770 = vmatprep.subr.bf16.mxu0 %v6548_v3 }
 0x708   :  { %5767 = vmatmul.mubr.msk.bf16.vlgmr.msra.gmra.mxu0 %vm660_vm8, %v6856_v30 }
 0x709   :  { %5774 = vmatprep.mubr.msk.bf16.mxu0 %vm6549_vm1, %v6548_v3  ;;  %5771 = vmatpush3.bf16.msra.mxu0 %v715_v37 }
 0x70a   :  { %5772 = vmatprep.subr.bf16.mxu0 %v6548_v3 }
 0x70d   :  { %5773 = vmatpush3.bf16.msra.mxu0 %v140_v40 }
 0x70e   :  { %5784 = vmatprep.subr.bf16.mxu0 %v6548_v3 }
 0x7c8   :  { %v702_v41 = vpop.f32.mrf.mxu0 }
 0x7ca   :  { %v5768_v42 = vpop.f32.mrf.mxu0 }
 0x7cb   :  { %v5248_v42 = vld [vmem:[%s8132_s2 + $0x5] ss:$0 sm:$0xff] }
 0x7cc   :  { %v705_v44 = vpop.f32.mrf.mxu0 }
 0x7cd   :  { %v709_v46 = vpack.c.bf16 %v705_v44, %v702_v41 }
 0x7ce   :  { %v5769_v47 = vpop.f32.mrf.mxu0 }
 0x7cf   :  { %5775 = vmatmul.mubr.msk.bf16.vlgmr.msra.gmra.mxu0 %vm410_vm6, %v709_v46 }
 0x7d0   :  { %5790 = vmatprep.mubr.msk.bf16.mxu0 %vm6549_vm1, %v6548_v3 }
 0x88f   :  { %v751_v50 = vpop.f32.mrf.mxu0 }
 0x890   :  { %v758_v51 = vadd.f32 %v751_v50, %v6606_v17 }
 0x891   :  { %v5776_v52 = vpop.f32.mrf.mxu0 }
 0x892   :  { %v6882_v53 = vadd.f32 %v5247_v48, %v758_v51 }
 0x893   :  { %v754_v54 = vpop.f32.mrf.mxu0 }
 0x894   :  { %v759_v58 = vadd.f32 %v754_v54, %v6613_v22  ;;  %v768_v59 = vsel %vm82_vm4, %v6882_v53, 0.0 }
 0x895   :  { %769 = vadd.xlane.f32.xlu1 %v768_v59  ;;  %v5777_v60 = vpop.f32.mrf.mxu0 }
 0x896   :  { %v6887_v61 = vadd.f32 %v5247_v48, %v759_v58  ;;  %v5249_v48 = vld [vmem:[%s8132_s2 + $0x6] ss:$0 sm:$0xff]  ;;  %v149_v58 = vld [vmem:[%s8131_s1 + $0x30] sm:$0xff] }
 0x897   :  { %v152_v59 = vpack.c.bf16 %v149_v58, %v149_v58 }
 0x898   :  { %v771_v1 = vsel %vm173_vm5, %v6887_v61, 0.0 }
 0x899   :  { %772 = vadd.xlane.f32.xlu0 %v771_v1  ;;  %v925_v60 = vsel %vm923_vm10, %v152_v59, 0  ;;  %v147_v1 = vld [vmem:[%s8131_s1 + $0x20] sm:$0xff] }
 0x89a   :  { %5785 = vmatpush3.bf16.msra.mxu0 %v925_v60 }
 0x89b   :  { %5786 = vmatprep.subr.bf16.mxu0 %v6548_v3 }
 0x91e   :  { %v770_v4 = vpop.xlane.xlu1 %769 }
 0x91f   :  { %v774_v7 = vmul.f32 0.1, %v770_v4  ;;  %v148_v4 = vld [vmem:[%s8131_s1 + $0x28] sm:$0xff] }
 0x921   :  { %v776_v17 = vsub.f32 %v6882_v53, %v774_v7  ;;  %v151_v7 = vpack.c.bf16 %v148_v4, %v147_v1 }
 0x922   :  { %v773_v8 = vpop.xlane.xlu0 %772 }
 0x923   :  { %v775_v9 = vmul.f32 0.1, %v773_v8  ;;  %v778_v12 = vmul.f32 %v776_v17, %v776_v17  ;;  %5787 = vmatpush3.bf16.msra.mxu0 %v151_v7  ;;  %v146_v8 = vld [vmem:[%s8131_s1 + $0x18] sm:$0xff] }
 0x924   :  { %5788 = vmatprep.subr.bf16.mxu0 %v6548_v3 }
 0x925   :  { %v777_v22 = vsub.f32 %v6887_v61, %v775_v9  ;;  %v780_v13 = vsel %vm82_vm4, %v778_v12, 0.0  ;;  %v5250_v12 = vld [vmem:[%s8132_s2 + $0x7] ss:$0 sm:$0xff] }
 0x926   :  { %781 = vadd.xlane.f32.xlu1 %v780_v13 }
 0x927   :  { %v779_v16 = vmul.f32 %v777_v22, %v777_v22 }
 0x929   :  { %v783_v20 = vsel %vm173_vm5, %v779_v16, 0.0 }
 0x92a   :  { %784 = vadd.xlane.f32.xlu0 %v783_v20 }
 0x9af   :  { %v782_v29 = vpop.xlane.xlu1 %781 }
 0x9b0   :  { %v786_v33 = vmul.f32 0.1, %v782_v29 }
 0x9b2   :  { %v788_v36 = vadd.f32 1e-05, %v786_v33 }
 0x9b3   :  { %v785_v37 = vpop.xlane.xlu0 %784 }
 0x9b4   :  { %6247 = vrsqrt.f32 %v788_v36  ;;  %v787_v38 = vmul.f32 0.1, %v785_v37 }
 0x9b6   :  { %v789_v39 = vadd.f32 1e-05, %v787_v38 }
 0x9b8   :  { %6249 = vrsqrt.f32 %v789_v39 }
 0x9c1   :  { %v6248_v40 = vpop.eup %6247 }
 0x9c2   :  { %v792_v41 = vmul.f32 %v6248_v40, %v776_v17  ;;  %v145_v17 = vld [vmem:[%s8131_s1 + $0x10] sm:$0xff] }
 0x9c3   :  { %v150_v9 = vpack.c.bf16 %v146_v8, %v145_v17 }
 0x9c4   :  { %v800_v46 = vmul.f32 %v5248_v42, %v792_v41 }
 0x9c5   :  { %v6250_v44 = vpop.eup %6249  ;;  %5789 = vmatpush3.bf16.msra.mxu0 %v150_v9 }
 0x9c6   :  { %v793_v47 = vmul.f32 %v6250_v44, %v777_v22  ;;  %v808_v51 = vadd.f32 %v5249_v48, %v800_v46 }
 0x9c8   :  { %v801_v50 = vmul.f32 %v5248_v42, %v793_v47 }
 0x9ca   :  { %v809_v52 = vadd.f32 %v5249_v48, %v801_v50 }
 0x9cc   :  { %v810_v54 = vpack.c.bf16 %v809_v52, %v808_v51 }
 0x9ce   :  { %5781 = vmatmul.mubr.msk.bf16.vlgmr.msra.gmra.mxu1 %vm82_vm4, %v810_v54 }
 0x9cf   :  { %5796 = vmatprep.mubr.msk.bf16.mxu1 %vm6549_vm1, %v6548_v3 }
 0xa8e   :  { %v857_v22 = vpop.f32.mrf.mxu1 }
 0xa8f   :  { %v858_v13 = vadd.f32 %v5250_v12, %v857_v22 }
 0xa90   :  { %v5782_v16 = vpop.f32.mrf.mxu1 }
 0xa91   :  { %v866_v20 = vmul.f32 0.70710677, %v858_v13 }
 0xa92   :  { %v860_v21 = vpop.f32.mrf.mxu1 }
 0xa93   :  { %v868_v23 = vand.u32 2147483647, %v866_v20  ;;  %v861_v26 = vadd.f32 %v5250_v12, %v860_v21  ;;  %vm908_vm11 = vcmp.ge.f32.partialorder %v866_v20, 0.0  ;;  %v5253_v20 = vld [vmem:[%s8132_s2 + $0x8] ss:$0 sm:$0xff] }
 0xa94   :  { %v5783_v27 = vpop.f32.mrf.mxu1 }
 0xa95   :  { %v870_v29 = vmul.f32 0.3275911, %v868_v23  ;;  %v867_v33 = vmul.f32 0.70710677, %v861_v26  ;;  %v896_v40 = vsub.f32 0.0, %v868_v23 }
 0xa97   :  { %v872_v36 = vadd.f32 1.0, %v870_v29  ;;  %v869_v37 = vand.u32 2147483647, %v867_v33  ;;  %v898_v41 = vmul.f32 %v896_v40, %v868_v23  ;;  %vm909_vm12 = vcmp.ge.f32.partialorder %v867_v33, 0.0 }
 0xa99   :  { %6251 = vrcp.f32 %v872_v36  ;;  %v871_v38 = vmul.f32 0.3275911, %v869_v37  ;;  %v897_v42 = vsub.f32 0.0, %v869_v37  ;;  %v900_v47 = vmul.f32 1.442695, %v898_v41 }
 0xa9b   :  { %v873_v39 = vadd.f32 1.0, %v871_v38  ;;  %v899_v48 = vmul.f32 %v897_v42, %v869_v37 }
 0xa9d   :  { %6253 = vrcp.f32 %v873_v39  ;;  %v902_v58 = vmul.f32 1.442695, %v899_v48 }
 0xa9e   :  { %6255 = vpow2.f32 %v900_v47 }
 0xa9f   :  { %6257 = vpow2.f32 %v902_v58 }
 0xaa6   :  { %v6252_v44 = vpop.eup %6251 }
 0xaa7   :  { %v878_v46 = vmul.f32 1.0614054, %v6252_v44 }
 0xaa9   :  { %v880_v50 = vadd.f32 -1.4531521, %v878_v46 }
 0xaaa   :  { %v6254_v51 = vpop.eup %6253 }
 0xaab   :  { %v882_v52 = vmul.f32 %v6252_v44, %v880_v50  ;;  %v879_v54 = vmul.f32 1.0614054, %v6254_v51  ;;  %v6256_v23 = vpop.eup %6255  ;;  %v864_v50 = vmul.f32 0.5, %v858_v13 }
 0xaac   :  { %v6258_v38 = vpop.eup %6257 }
 0xaad   :  { %v884_v59 = vadd.f32 1.4214138, %v882_v52  ;;  %v881_v60 = vadd.f32 -1.4531521, %v879_v54  ;;  %v865_v52 = vmul.f32 0.5, %v861_v26 }
 0xaaf   :  { %v886_v1 = vmul.f32 %v6252_v44, %v884_v59  ;;  %v883_v4 = vmul.f32 %v6254_v51, %v881_v60 }
 0xab1   :  { %v888_v7 = vadd.f32 -0.28449672, %v886_v1  ;;  %v885_v17 = vadd.f32 1.4214138, %v883_v4 }
 0xab3   :  { %v890_v8 = vmul.f32 %v6252_v44, %v888_v7  ;;  %v887_v9 = vmul.f32 %v6254_v51, %v885_v17 }
 0xab5   :  { %v892_v12 = vadd.f32 0.2548296, %v890_v8  ;;  %v889_v22 = vadd.f32 -0.28449672, %v887_v9 }
 0xab7   :  { %v894_v16 = vmul.f32 %v6252_v44, %v892_v12  ;;  %v891_v21 = vmul.f32 %v6254_v51, %v889_v22 }
 0xab9   :  { %v904_v27 = vmul.f32 %v6256_v23, %v894_v16  ;;  %v893_v29 = vadd.f32 0.2548296, %v891_v21 }
 0xabb   :  { %v906_v36 = vsub.f32 1.0, %v904_v27  ;;  %v895_v37 = vmul.f32 %v6254_v51, %v893_v29 }
 0xabd   :  { %v910_v39 = vsub.f32 0.0, %v906_v36  ;;  %v905_v40 = vmul.f32 %v6258_v38, %v895_v37  ;;  %v5255_v37 = vld [vmem:[%s8131_s1 + $0xc8] sm:$0x3] }
 0xabf   :  { %v912_v41 = vsel %vm908_vm11, %v906_v36, %v910_v39  ;;  %v907_v42 = vsub.f32 1.0, %v905_v40  ;;  %v5254_v36 = vld [vmem:[%s8131_s1 + $0xc0] sm:$0xff] }
 0xac0   :  { %v914_v47 = vadd.f32 1.0, %v912_v41  ;;  %v981_v38 = vpack.c.bf16 %v5255_v37, %v5254_v36  ;;  %v5281_v36 = vld [vmem:[%s8132_s2 + $0xc] ss:$0 sm:$0xff] }
 0xac1   :  { %v911_v46 = vsub.f32 0.0, %v907_v42 }
 0xac2   :  { %v916_v44 = vmul.f32 %v914_v47, %v864_v50  ;;  %v1072_v39 = vsel %vm86_vm0, %v981_v38, 0 }
 0xac3   :  { %v913_v48 = vsel %vm909_vm12, %v907_v42, %v911_v46  ;;  %5795 = vmatpush3.bf16.msra.mxu1 %v1072_v39 }
 0xac4   :  { %v915_v54 = vadd.f32 1.0, %v913_v48  ;;  %5800 = vmatprep.subr.bf16.mxu1 %v6548_v3 }
 0xac6   :  { %v917_v58 = vmul.f32 %v915_v54, %v865_v52  ;;  %v5277_v54 = vld [vmem:[%s8132_s2 + $0x9] ss:$0 sm:$0xff] }
 0xac8   :  { %v918_v59 = vpack.c.bf16 %v917_v58, %v916_v44  ;;  %v5256_v58 = vld [vmem:[%s8131_s1 + $0xd0] sm:$0xff] }
 0xaca   :  { %5791 = vmatmul.mubr.msk.bf16.vlgmr.msra.gmra.mxu0 %vm919_vm13, %v918_v59  ;;  %v5257_v59 = vld [vmem:[%s8131_s1 + $0xd8] sm:$0x3] }
 0xacb   :  { %5808 = vmatprep.mubr.msk.bf16.mxu0 %vm82_vm4, %v6649_v62 }
 0xb8a   :  { %v961_v51 = vpop.f32.mrf.mxu0 }
 0xb8b   :  { %v968_v33 = vadd.f32 %v961_v51, %v6882_v53 }
 0xb8c   :  { %v5792_v60 = vpop.f32.mrf.mxu0 }
 0xb8d   :  { %v6940_v13 = vadd.f32 %v5253_v20, %v968_v33  ;;  %v5278_v33 = vld [vmem:[%s8132_s2 + $0xa] ss:$0 sm:$0xff] }
 0xb8e   :  { %v964_v26 = vpop.f32.mrf.mxu0 }
 0xb8f   :  { %v969_v1 = vadd.f32 %v964_v26, %v6887_v61  ;;  %v1019_v4 = vsel %vm82_vm4, %v6940_v13, 0.0  ;;  %v984_v26 = vpack.c.bf16 %v5257_v59, %v5256_v58 }
 0xb90   :  { %1020 = vadd.xlane.f32.xlu1 %v1019_v4  ;;  %v5793_v7 = vpop.f32.mrf.mxu0 }
 0xb91   :  { %v6945_v17 = vadd.f32 %v5253_v20, %v969_v1 }
 0xb93   :  { %v1022_v8 = vsel %vm173_vm5, %v6945_v17, 0.0 }
 0xb94   :  { %1023 = vadd.xlane.f32.xlu0 %v1022_v8  ;;  %v1122_v8 = vsel %vm86_vm0, %v984_v26, 0 }
 0xc19   :  { %v1021_v9 = vpop.xlane.xlu1 %1020 }
 0xc1a   :  { %v1025_v12 = vmul.f32 0.1, %v1021_v9 }
 0xc1c   :  { %v1027_v53 = vsub.f32 %v6940_v13, %v1025_v12  ;;  %v5279_v12 = vld [vmem:[%s8132_s2 + $0xb] ss:$0 sm:$0xff] }
 0xc1d   :  { %v1024_v22 = vpop.xlane.xlu0 %1023 }
 0xc1e   :  { %v1026_v16 = vmul.f32 0.1, %v1024_v22  ;;  %v1029_v21 = vmul.f32 %v1027_v53, %v1027_v53 }
 0xc20   :  { %v1028_v61 = vsub.f32 %v6945_v17, %v1026_v16  ;;  %v1031_v23 = vsel %vm82_vm4, %v1029_v21, 0.0 }
 0xc21   :  { %1032 = vadd.xlane.f32.xlu1 %v1031_v23 }
 0xc22   :  { %v1030_v27 = vmul.f32 %v1028_v61, %v1028_v61 }
 0xc24   :  { %v1034_v29 = vsel %vm173_vm5, %v1030_v27, 0.0 }
 0xc25   :  { %1035 = vadd.xlane.f32.xlu0 %v1034_v29 }
 0xcaa   :  { %v1033_v40 = vpop.xlane.xlu1 %1032 }
 0xcab   :  { %v1037_v41 = vmul.f32 0.1, %v1033_v40 }
 0xcad   :  { %v1039_v42 = vadd.f32 1e-05, %v1037_v41 }
 0xcae   :  { %v1036_v46 = vpop.xlane.xlu0 %1035 }
 0xcaf   :  { %6259 = vrsqrt.f32 %v1039_v42  ;;  %v1038_v47 = vmul.f32 0.1, %v1036_v46 }
 0xcb1   :  { %v1040_v48 = vadd.f32 1e-05, %v1038_v47 }
 0xcb3   :  { %6261 = vrsqrt.f32 %v1040_v48 }
 0xcbc   :  { %v6260_v50 = vpop.eup %6259 }
 0xcbd   :  { %v1043_v52 = vmul.f32 %v6260_v50, %v1027_v53 }
 0xcbf   :  { %v1051_v51 = vmul.f32 %v5277_v54, %v1043_v52 }
 0xcc0   :  { %v6262_v44 = vpop.eup %6261 }
 0xcc1   :  { %v1044_v20 = vmul.f32 %v6262_v44, %v1028_v61  ;;  %v1059_v1 = vadd.f32 %v5278_v33, %v1051_v51 }
 0xcc3   :  { %v1052_v60 = vmul.f32 %v5277_v54, %v1044_v20 }
 0xcc5   :  { %v1060_v4 = vadd.f32 %v5278_v33, %v1052_v60 }
 0xcc7   :  { %v1061_v7 = vpack.c.bf16 %v1060_v4, %v1059_v1 }
 0xcc9   :  { %5797 = vmatmul.mubr.msk.bf16.vlgmr.msra.gmra.mxu1 %vm82_vm4, %v1061_v7 }
 0xcca   :  { %5801 = vmatpush3.bf16.msra.mxu1 %v1122_v8  ;;  %5802 = vmatprep.mubr.msk.bf16.mxu1 %vm6549_vm1, %v6548_v3 }
 0xcd1   :  { %5803 = vmatmul.mubr.msk.bf16.vlgmr.msra.gmra.mxu1 %vm82_vm4, %v1061_v7 }
 0xd89   :  { %v1108_v9 = vpop.f32.mrf.mxu1 }
 0xd8a   :  { %v1109_v16 = vadd.f32 %v5279_v12, %v1108_v9 }
 0xd8b   :  { %v5798_v53 = vpop.f32.mrf.mxu1 }
 0xd8d   :  { %v1111_v22 = vpop.f32.mrf.mxu1 }
 0xd8e   :  { %v1112_v21 = vadd.f32 %v5279_v12, %v1111_v22 }
 0xd8f   :  { %v5799_v61 = vpop.f32.mrf.mxu1 }
 0xd90   :  { %v1166_v23 = vpack.c.bf16 %v1112_v21, %v1109_v16 }
 0xd91   :  { %v1158_v27 = vpop.f32.mrf.mxu1 }
 0xd92   :  { %6193 = vmatprep.subr.msk.bf16.mxu0 %vm86_vm0, %v1166_v23  ;;  %v1168_v29 = vsel %vm86_vm0, %v1166_v23, 0  ;;  %v1159_v39 = vadd.f32 %v5281_v36, %v1158_v27 }
 0xd93   :  { %v5804_v37 = vpop.f32.mrf.mxu1  ;;  %5807 = vmatpush3.bf16.msra.mxu0 %v1168_v29 }
 0xd95   :  { %v1161_v38 = vpop.f32.mrf.mxu1 }
 0xd96   :  { %v1162_v40 = vadd.f32 %v5281_v36, %v1161_v38  ;;  %5809 = vmatmul.mubr.msk.bf16.vlgmr.msra.gmra.mxu0 %vm82_vm4, %v6675_v24 }
 0xd97   :  { %v5805_v41 = vpop.f32.mrf.mxu1  ;;  %5812 = vmatprep.mubr.msk.bf16.mxu0 %vm82_vm4, %v6677_v25 }
 0xd98   :  { %v1165_v42 = vpack.c.bf16 %v1162_v40, %v1159_v39 }
 0xd9a   :  { %6194 = vmatprep.subr.msk.bf16.mxu1 %vm410_vm6, %v1165_v42  ;;  %6195 = vmatprep.subr.msk.bf16.mxu0 %vm86_vm0, %v1165_v42  ;;  %v1258_v46 = vsel %vm410_vm6, %v1165_v42, 0  ;;  %v1417_v47 = vsel %vm86_vm0, %v1165_v42, 0 }
 0xd9b   :  { %5817 = vmatpush3.bf16.xpose.msra.mxu1 %v1258_v46  ;;  %5827 = vmatpush3.bf16.msra.mxu0 %v1417_v47 }
 0xd9c   :  { %5836 = vmatprep.subr.bf16.mxu1 %v6548_v3  ;;  %5856 = vmatprep.subr.bf16.mxu0 %v6548_v3 }
 0xd9e   :  { %5813 = vmatmul.mubr.msk.bf16.gmra.mxu0 %vm82_vm4, %v6690_v28 }
 0xe56   :  { %v5810_v48 = vpop.f32.mrf.mxu0 }
 0xe57   :  { %v1236_v20 = vmul.f32 %v5810_v48, %v6712_v35 }
 0xe58   :  { %v1204_v50 = vpop.f32.mrf.mxu0 }
 0xe59   :  { %v1234_v58 = vmul.f32 %v1204_v50, %v6702_v32 }
 0xe5a   :  { %v5811_v52 = vpop.f32.mrf.mxu0 }
 0xe5b   :  { %v1237_v54 = vmul.f32 %v5811_v52, %v6697_v31 }
 0xe5c   :  { %v1207_v44 = vpop.f32.mrf.mxu0 }
 0xe5d   :  { %v1235_v59 = vmul.f32 %v1207_v44, %v6707_v34  ;;  %v1242_v60 = vpack.c.bf16 %v1237_v54, %v1236_v20 }
 0xe5e   :  { %v5814_v51 = vpop.f32.mrf.mxu0 }
 0xe5f   :  { %v1241_v33 = vpack.c.bf16 %v1235_v59, %v1234_v58  ;;  %v1240_v4 = vmul.f32 %v5814_v51, %v6721_v43 }
 0xe60   :  { %v1220_v26 = vpop.f32.mrf.mxu0 }
 0xe61   :  { %5818 = vmatprep.mubr.msk.bf16.mxu1 %vm410_vm6, %v1241_v33  ;;  %v1238_v31 = vmul.f32 %v1220_v26, %v6726_v45  ;;  %v1244_v34 = vpack.c.bf16 %v1240_v4, %v1240_v4 }
 0xe62   :  { %v5815_v1 = vpop.f32.mrf.mxu0  ;;  %5819 = vmatmul.mubr.msk.bf16.vlgmr.msra.gmra.mxu1 %vm410_vm6, %v1242_v60 }
 0xe64   :  { %v1223_v7 = vpop.f32.mrf.mxu0 }
 0xe65   :  { %v1239_v32 = vmul.f32 %v1223_v7, %v6734_v49 }
 0xe67   :  { %v1243_v8 = vpack.c.bf16 %v1239_v32, %v1238_v31 }
 0xe69   :  { %5822 = vmatprep.mubr.msk.bf16.mxu1 %vm410_vm6, %v1243_v8 }
 0xe6a   :  { %5823 = vmatmul.mubr.msk.bf16.gmra.mxu1 %vm410_vm6, %v1244_v34 }
 0xe6b   :  { %5844 = vmatprep.mubr.msk.bf16.mxu1 %vm6549_vm1, %v6548_v3 }
 0xf22   :  { %v5820_v35 = vpop.f32.mrf.mxu1 }
 0xf23   :  { %v1303_v43 = vadd.f32 %v5820_v35, %v6745_v55 }
 0xf24   :  { %v1294_v9 = vpop.f32.mrf.mxu1 }
 0xf25   :  { %v1295_v12 = vadd.f32 %v1294_v9, %v6750_v57  ;;  %v1330_v23 = vsel %vm82_vm4, %v1303_v43, -inf }
 0xf26   :  { %v5821_v53 = vpop.f32.mrf.mxu1 }
 0xf27   :  { %v1324_v45 = vsel %vm82_vm4, %v1295_v12, -inf  ;;  %v1306_v21 = vadd.f32 %v5821_v53, %v6758_v63 }
 0xf28   :  { %v1297_v22 = vpop.f32.mrf.mxu1  ;;  %1325 = vmax.xlane.f32.xlu1 %v1324_v45 }
 0xf29   :  { %v1298_v49 = vadd.f32 %v1297_v22, %v6765_v5  ;;  %v1333_v36 = vsel %vm82_vm4, %v1306_v21, -inf }
 0xf2a   :  { %v5824_v16 = vpop.f32.mrf.mxu1 }
 0xf2b   :  { %v1327_v61 = vsel %vm82_vm4, %v1298_v49, -inf  ;;  %v1319_v55 = vadd.f32 %v5824_v16, %v6786_v19 }
 0xf2c   :  { %1328 = vmax.xlane.f32.xlu0 %v1327_v61  ;;  %1331 = vmax.xlane.f32.xlu1 %v1330_v23  ;;  %v1310_v27 = vpop.f32.mrf.mxu1 }
 0xf2d   :  { %v1311_v57 = vadd.f32 %v1310_v27, %v6772_v10  ;;  %v1342_v39 = vsel %vm173_vm5, %v1319_v55, -inf }
 0xf2e   :  { %v5825_v29 = vpop.f32.mrf.mxu1 }
 0xf2f   :  { %v1336_v37 = vsel %vm82_vm4, %v1311_v57, -inf }
 0xf30   :  { %1334 = vmax.xlane.f32.xlu0 %v1333_v36  ;;  %v1313_v5 = vpop.f32.mrf.mxu1  ;;  %1337 = vmax.xlane.f32.xlu1 %v1336_v37 }
 0xf31   :  { %v1314_v63 = vadd.f32 %v1313_v5, %v6779_v15 }
 0xf33   :  { %v1339_v38 = vsel %vm82_vm4, %v1314_v63, -inf }
 0xf34   :  { %1340 = vmax.xlane.f32.xlu0 %v1339_v38  ;;  %1343 = vmax.xlane.f32.xlu1 %v1342_v39 }
 0xfb1   :  { %v1326_v40 = vpop.xlane.xlu1 %1325 }
 0xfb2   :  { %v1345_v10 = vsub.f32 %v1295_v12, %v1326_v40 }
 0xfb4   :  { %v1352_v41 = vmul.f32 1.442695, %v1345_v10 }
 0xfb5   :  { %v1329_v42 = vpop.xlane.xlu0 %1328  ;;  %v1332_v19 = vpop.xlane.xlu1 %1331 }
 0xfb6   :  { %6263 = vpow2.f32 %v1352_v41  ;;  %v1346_v46 = vsub.f32 %v1298_v49, %v1329_v42  ;;  %v1347_v47 = vsub.f32 %v1303_v43, %v1332_v19 }
 0xfb8   :  { %v1354_v48 = vmul.f32 1.442695, %v1346_v46  ;;  %v1356_v50 = vmul.f32 1.442695, %v1347_v47 }
 0xfb9   :  { %v1335_v52 = vpop.xlane.xlu0 %1334  ;;  %v1338_v54 = vpop.xlane.xlu1 %1337 }
 0xfba   :  { %6265 = vpow2.f32 %v1354_v48  ;;  %v1348_v15 = vsub.f32 %v1306_v21, %v1335_v52  ;;  %v1349_v44 = vsub.f32 %v1311_v57, %v1338_v54 }
 0xfbb   :  { %6267 = vpow2.f32 %v1356_v50 }
 0xfbc   :  { %v1358_v58 = vmul.f32 1.442695, %v1348_v15  ;;  %v1360_v59 = vmul.f32 1.442695, %v1349_v44 }
 0xfbd   :  { %v1341_v20 = vpop.xlane.xlu0 %1340  ;;  %v1344_v51 = vpop.xlane.xlu1 %1343 }
 0xfbe   :  { %6269 = vpow2.f32 %v1358_v58  ;;  %v1350_v33 = vsub.f32 %v1314_v63, %v1341_v20  ;;  %v1351_v60 = vsub.f32 %v1319_v55, %v1344_v51 }
 0xfbf   :  { %6271 = vpow2.f32 %v1360_v59 }
 0xfc0   :  { %v1362_v26 = vmul.f32 1.442695, %v1350_v33  ;;  %v1364_v1 = vmul.f32 1.442695, %v1351_v60 }
 0xfc2   :  { %6273 = vpow2.f32 %v1362_v26 }
 0xfc3   :  { %v6264_v4 = vpop.eup %6263  ;;  %6275 = vpow2.f32 %v1364_v1 }
 0xfc4   :  { %v1366_v7 = vsel %vm82_vm4, %v6264_v4, 0.0 }
 0xfc5   :  { %1367 = vadd.xlane.f32.xlu0 %v1366_v7 }
 0xfc7   :  { %v6266_v31 = vpop.eup %6265 }
 0xfc8   :  { %v6268_v32 = vpop.eup %6267  ;;  %v1369_v8 = vsel %vm82_vm4, %v6266_v31, 0.0 }
 0xfc9   :  { %v1372_v34 = vsel %vm82_vm4, %v6268_v32, 0.0  ;;  %1370 = vadd.xlane.f32.xlu1 %v1369_v8 }
 0xfca   :  { %1373 = vadd.xlane.f32.xlu0 %v1372_v34 }
 0xfcb   :  { %v6270_v35 = vpop.eup %6269 }
 0xfcc   :  { %v6272_v9 = vpop.eup %6271  ;;  %v1375_v12 = vsel %vm82_vm4, %v6270_v35, 0.0 }
 0xfcd   :  { %1376 = vadd.xlane.f32.xlu1 %v1375_v12  ;;  %v1378_v53 = vsel %vm82_vm4, %v6272_v9, 0.0 }
 0xfce   :  { %1379 = vadd.xlane.f32.xlu0 %v1378_v53 }
 0xfcf   :  { %v6274_v43 = vpop.eup %6273 }
 0xfd0   :  { %v6276_v45 = vpop.eup %6275  ;;  %v1381_v22 = vsel %vm82_vm4, %v6274_v43, 0.0 }
 0xfd1   :  { %1382 = vadd.xlane.f32.xlu1 %v1381_v22  ;;  %v1384_v49 = vsel %vm173_vm5, %v6276_v45, 0.0 }
 0xfd2   :  { %1385 = vadd.xlane.f32.xlu0 %v1384_v49 }
0x104e   :  { %v1368_v16 = vpop.xlane.xlu0 %1367 }
0x104f   :  { %6277 = vrcp.f32 %v1368_v16  ;;  %v5297_v16 = vld [vmem:[%s8132_s2 + $0xd] ss:$0 sm:$0xff] }
0x1052   :  { %v1371_v21 = vpop.xlane.xlu1 %1370 }
0x1053   :  { %v1374_v61 = vpop.xlane.xlu0 %1373  ;;  %6279 = vrcp.f32 %v1371_v21 }
0x1054   :  { %6281 = vrcp.f32 %v1374_v61 }
0x1056   :  { %v1377_v23 = vpop.xlane.xlu1 %1376 }
0x1057   :  { %v1380_v27 = vpop.xlane.xlu0 %1379  ;;  %6283 = vrcp.f32 %v1377_v23 }
0x1058   :  { %6285 = vrcp.f32 %v1380_v27 }
0x105a   :  { %v1383_v57 = vpop.xlane.xlu1 %1382 }
0x105b   :  { %v1386_v29 = vpop.xlane.xlu0 %1385  ;;  %6287 = vrcp.f32 %v1383_v57 }
0x105c   :  { %6289 = vrcp.f32 %v1386_v29  ;;  %v6278_v55 = vpop.eup %6277 }
0x105d   :  { %v1394_v37 = vmul.f32 %v6278_v55, %v6264_v4 }
0x1060   :  { %v6280_v36 = vpop.eup %6279 }
0x1061   :  { %v1395_v5 = vmul.f32 %v6280_v36, %v6266_v31  ;;  %v6282_v63 = vpop.eup %6281 }
0x1062   :  { %v1396_v40 = vmul.f32 %v6282_v63, %v6268_v32 }
0x1063   :  { %v1401_v38 = vpack.c.bf16 %v1395_v5, %v1394_v37 }
0x1064   :  { %v6284_v39 = vpop.eup %6283 }
0x1065   :  { %v1397_v10 = vmul.f32 %v6284_v39, %v6270_v35  ;;  %5828 = vmatprep.mubr.msk.bf16.mxu0 %vm82_vm4, %v1401_v38  ;;  %v6286_v41 = vpop.eup %6285 }
0x1066   :  { %v1398_v47 = vmul.f32 %v6286_v41, %v6272_v9 }
0x1067   :  { %v1402_v42 = vpack.c.bf16 %v1397_v10, %v1396_v40 }
0x1068   :  { %v6288_v19 = vpop.eup %6287 }
0x1069   :  { %v6290_v46 = vpop.eup %6289  ;;  %5829 = vmatmul.mubr.msk.bf16.vlgmr.msra.gmra.mxu0 %vm82_vm4, %v1402_v42  ;;  %v1399_v48 = vmul.f32 %v6288_v19, %v6274_v43 }
0x106a   :  { %v1400_v52 = vmul.f32 %v6290_v46, %v6276_v45  ;;  %v5261_v46 = vld [vmem:[%s8131_s1 + $0x70] sm:$0xff] }
0x106b   :  { %v1403_v50 = vpack.c.bf16 %v1399_v48, %v1398_v47  ;;  %v5262_v47 = vld [vmem:[%s8131_s1 + $0x78] sm:$0x3] }
0x106c   :  { %v1404_v54 = vpack.c.bf16 %v1400_v52, %v1400_v52  ;;  %v992_v48 = vpack.c.bf16 %v5262_v47, %v5261_v46 }
0x106d   :  { %5832 = vmatprep.mubr.msk.bf16.mxu0 %vm82_vm4, %v1403_v50 }
0x106e   :  { %v1649_v50 = vsel %vm86_vm0, %v992_v48, 0 }
0x106f   :  { %5857 = vmatpush3.bf16.msra.mxu0 %v1649_v50 }
0x1070   :  { %5872 = vmatprep.subr.bf16.mxu0 %v6548_v3 }
0x1071   :  { %5833 = vmatmul.mubr.msk.bf16.gmra.mxu0 %vm82_vm4, %v1404_v54 }
0x1072   :  { %5858 = vmatprep.mubr.msk.bf16.mxu0 %vm6549_vm1, %v6548_v3 }
0x1129   :  { %v5830_v15 = vpop.f32.mrf.mxu0 }
0x112a   :  { %v1485_v34 = vmul.f32 %v5830_v15, %v6832_v11 }
0x112b   :  { %v1453_v44 = vpop.f32.mrf.mxu0 }
0x112c   :  { %v1483_v9 = vmul.f32 %v1453_v44, %v6844_v18  ;;  %v5259_v18 = vld [vmem:[%s8131_s1 + $0xb0] sm:$0xff] }
0x112d   :  { %v5831_v58 = vpop.f32.mrf.mxu0 }
0x112e   :  { %v1486_v32 = vmul.f32 %v5831_v58, %v6824_v6 }
0x112f   :  { %v1456_v59 = vpop.f32.mrf.mxu0 }
0x1130   :  { %v1484_v35 = vmul.f32 %v1456_v59, %v6838_v14  ;;  %v5258_v14 = vld [vmem:[%s8131_s1 + $0xa8] sm:$0xff] }
0x1131   :  { %v5834_v20 = vpop.f32.mrf.mxu0  ;;  %v988_v12 = vpack.c.bf16 %v5259_v18, %v5258_v14  ;;  %v5300_v18 = vld [vmem:[%s8132_s2 + $0x10] ss:$0 sm:$0xff] }
0x1132   :  { %v1489_v51 = vmul.f32 %v5834_v20, %v6807_v56  ;;  %v1491_v56 = vpack.c.bf16 %v1486_v32, %v1485_v34  ;;  %v5267_v34 = vld [vmem:[%s8131_s1 + $0xa0] sm:$0xff] }
0x1133   :  { %v1469_v33 = vpop.f32.mrf.mxu0 }
0x1134   :  { %v1493_v60 = vpack.c.bf16 %v1489_v51, %v1489_v51  ;;  %v1487_v7 = vmul.f32 %v1469_v33, %v6813_v0  ;;  %v1490_v0 = vpack.c.bf16 %v1484_v35, %v1483_v9  ;;  %v5298_v33 = vld [vmem:[%s8132_s2 + $0xe] ss:$0 sm:$0xff]  ;;  %v5265_v9 = vld [vmem:[%s8131_s1 + $0x90] sm:$0xff] }
0x1135   :  { %v5835_v26 = vpop.f32.mrf.mxu0 }
0x1136   :  { %v1495_v1 = vsel %vm664_vm7, %v1493_v60, 0 }
0x1137   :  { %v1472_v4 = vpop.f32.mrf.mxu0  ;;  %5837 = vmatpush3.bf16.msra.mxu1 %v1495_v1 }
0x1138   :  { %v1488_v31 = vmul.f32 %v1472_v4, %v6818_v2  ;;  %5838 = vmatprep.subr.bf16.mxu1 %v6548_v3  ;;  %v5260_v2 = vld [vmem:[%s8131_s1 + $0xb8] sm:$0xf]  ;;  %v5299_v4 = vld [vmem:[%s8132_s2 + $0xf] ss:$0 sm:$0xff] }
0x1139   :  { %v989_v6 = vpack.c.bf16 %v5260_v2, %v5260_v2 }
0x113a   :  { %v1492_v8 = vpack.c.bf16 %v1488_v31, %v1487_v7 }
0x113b   :  { %v1543_v11 = vsel %vm713_vm9, %v989_v6, 0  ;;  %v5263_v6 = vld [vmem:[%s8131_s1 + $0x80] sm:$0xff] }
0x113c   :  { %5839 = vmatpush3.bf16.msra.mxu1 %v1492_v8 }
0x113d   :  { %5840 = vmatprep.subr.bf16.mxu1 %v6548_v3 }
0x1140   :  { %5841 = vmatpush3.bf16.msra.mxu1 %v1491_v56  ;;  %v1000_v56 = vpack.c.bf16 %v5267_v34, %v5267_v34 }
0x1141   :  { %5842 = vmatprep.subr.bf16.mxu1 %v6548_v3 }
0x1142   :  { %v1751_v35 = vsel %vm923_vm10, %v1000_v56, 0 }
0x1144   :  { %5843 = vmatpush3.bf16.msra.mxu1 %v1490_v0  ;;  %v5266_v0 = vld [vmem:[%s8131_s1 + $0x98] sm:$0xff] }
0x1145   :  { %5848 = vmatprep.subr.bf16.mxu1 %v6548_v3  ;;  %v999_v2 = vpack.c.bf16 %v5266_v0, %v5265_v9 }
0x1147   :  { %5845 = vmatmul.mubr.msk.bf16.vlgmr.msra.gmra.mxu1 %vm660_vm8, %v6856_v30 }
0x1148   :  { %5852 = vmatprep.mubr.msk.bf16.mxu1 %vm6549_vm1, %v6548_v3  ;;  %5849 = vmatpush3.bf16.msra.mxu1 %v1543_v11  ;;  %v5264_v11 = vld [vmem:[%s8131_s1 + $0x88] sm:$0xff] }
0x1149   :  { %5850 = vmatprep.subr.bf16.mxu1 %v6548_v3  ;;  %v998_v14 = vpack.c.bf16 %v5264_v11, %v5263_v6 }
0x114c   :  { %5851 = vmatpush3.bf16.msra.mxu1 %v988_v12 }
0x114d   :  { %5862 = vmatprep.subr.bf16.mxu1 %v6548_v3 }
0x1207   :  { %v1531_v53 = vpop.f32.mrf.mxu1 }
0x1209   :  { %v5846_v43 = vpop.f32.mrf.mxu1 }
0x120b   :  { %v1534_v45 = vpop.f32.mrf.mxu1 }
0x120c   :  { %v1538_v22 = vpack.c.bf16 %v1534_v45, %v1531_v53 }
0x120d   :  { %v5847_v49 = vpop.f32.mrf.mxu1 }
0x120e   :  { %5853 = vmatmul.mubr.msk.bf16.vlgmr.msra.gmra.mxu1 %vm410_vm6, %v1538_v22 }
0x120f   :  { %5868 = vmatprep.mubr.msk.bf16.mxu1 %vm6549_vm1, %v6548_v3  ;;  %5863 = vmatpush3.bf16.msra.mxu1 %v1751_v35 }
0x1210   :  { %5864 = vmatprep.subr.bf16.mxu1 %v6548_v3 }
0x1213   :  { %5865 = vmatpush3.bf16.msra.mxu1 %v999_v2 }
0x1214   :  { %5866 = vmatprep.subr.bf16.mxu1 %v6548_v3 }
0x1217   :  { %5867 = vmatpush3.bf16.msra.mxu1 %v998_v14 }
0x12ce   :  { %v1579_v21 = vpop.f32.mrf.mxu1 }
0x12cf   :  { %v1586_v61 = vadd.f32 %v1579_v21, %v6940_v13 }
0x12d0   :  { %v5854_v23 = vpop.f32.mrf.mxu1 }
0x12d1   :  { %v7073_v27 = vadd.f32 %v5297_v16, %v1586_v61 }
0x12d2   :  { %v1582_v57 = vpop.f32.mrf.mxu1 }
0x12d3   :  { %v1587_v29 = vadd.f32 %v1582_v57, %v6945_v17  ;;  %v1596_v55 = vsel %vm82_vm4, %v7073_v27, 0.0 }
0x12d4   :  { %1597 = vadd.xlane.f32.xlu1 %v1596_v55  ;;  %v5855_v36 = vpop.f32.mrf.mxu1 }
0x12d5   :  { %v7078_v37 = vadd.f32 %v5297_v16, %v1587_v29 }
0x12d7   :  { %v1599_v5 = vsel %vm173_vm5, %v7078_v37, 0.0 }
0x12d8   :  { %1600 = vadd.xlane.f32.xlu0 %v1599_v5 }
0x135d   :  { %v1598_v63 = vpop.xlane.xlu1 %1597 }
0x135e   :  { %v1602_v38 = vmul.f32 0.1, %v1598_v63 }
0x1360   :  { %v1604_v13 = vsub.f32 %v7073_v27, %v1602_v38 }
0x1361   :  { %v1601_v39 = vpop.xlane.xlu0 %1600 }
0x1362   :  { %v1603_v40 = vmul.f32 0.1, %v1601_v39  ;;  %v1606_v10 = vmul.f32 %v1604_v13, %v1604_v13 }
0x1364   :  { %v1605_v17 = vsub.f32 %v7078_v37, %v1603_v40  ;;  %v1608_v41 = vsel %vm82_vm4, %v1606_v10, 0.0 }
0x1365   :  { %1609 = vadd.xlane.f32.xlu1 %v1608_v41 }
0x1366   :  { %v1607_v42 = vmul.f32 %v1605_v17, %v1605_v17 }
0x1368   :  { %v1611_v19 = vsel %vm173_vm5, %v1607_v42, 0.0 }
0x1369   :  { %1612 = vadd.xlane.f32.xlu0 %v1611_v19 }
0x13ee   :  { %v1610_v52 = vpop.xlane.xlu1 %1609 }
0x13ef   :  { %v1614_v54 = vmul.f32 0.1, %v1610_v52 }
0x13f1   :  { %v1616_v15 = vadd.f32 1e-05, %v1614_v54 }
0x13f2   :  { %v1613_v44 = vpop.xlane.xlu0 %1612 }
0x13f3   :  { %6291 = vrsqrt.f32 %v1616_v15  ;;  %v1615_v58 = vmul.f32 0.1, %v1613_v44 }
0x13f5   :  { %v1617_v59 = vadd.f32 1e-05, %v1615_v58 }
0x13f7   :  { %6293 = vrsqrt.f32 %v1617_v59 }
0x1400   :  { %v6292_v20 = vpop.eup %6291 }
0x1401   :  { %v1620_v51 = vmul.f32 %v6292_v20, %v1604_v13 }
0x1403   :  { %v1628_v26 = vmul.f32 %v5298_v33, %v1620_v51 }
0x1404   :  { %v6294_v60 = vpop.eup %6293 }
0x1405   :  { %v1621_v1 = vmul.f32 %v6294_v60, %v1605_v17  ;;  %v1636_v31 = vadd.f32 %v5299_v4, %v1628_v26 }
0x1407   :  { %v1629_v7 = vmul.f32 %v5298_v33, %v1621_v1 }
0x1409   :  { %v1637_v32 = vadd.f32 %v5299_v4, %v1629_v7 }
0x140b   :  { %v1638_v8 = vpack.c.bf16 %v1637_v32, %v1636_v31 }
0x140d   :  { %5859 = vmatmul.mubr.msk.bf16.vlgmr.msra.gmra.mxu0 %vm82_vm4, %v1638_v8 }
0x140e   :  { %5874 = vmatprep.mubr.msk.bf16.mxu0 %vm6549_vm1, %v6548_v3 }
0x14cd   :  { %v1685_v12 = vpop.f32.mrf.mxu0 }
0x14ce   :  { %v1686_v53 = vadd.f32 %v5300_v18, %v1685_v12 }
0x14cf   :  { %v5860_v43 = vpop.f32.mrf.mxu0 }
0x14d0   :  { %v1694_v45 = vmul.f32 0.70710677, %v1686_v53  ;;  %v1692_v2 = vmul.f32 0.5, %v1686_v53  ;;  %v5303_v43 = vld [vmem:[%s8132_s2 + $0x11] ss:$0 sm:$0xff] }
0x14d1   :  { %v1688_v22 = vpop.f32.mrf.mxu0 }
0x14d2   :  { %v1696_v49 = vand.u32 2147483647, %v1694_v45  ;;  %v1689_v16 = vadd.f32 %v5300_v18, %v1688_v22  ;;  %vm1736_vm14 = vcmp.ge.f32.partialorder %v1694_v45, 0.0 }
0x14d3   :  { %v5861_v21 = vpop.f32.mrf.mxu0 }
0x14d4   :  { %v1698_v61 = vmul.f32 0.3275911, %v1696_v49  ;;  %v1695_v23 = vmul.f32 0.70710677, %v1689_v16  ;;  %v1724_v5 = vsub.f32 0.0, %v1696_v49  ;;  %v1693_v6 = vmul.f32 0.5, %v1689_v16 }
0x14d6   :  { %v1700_v57 = vadd.f32 1.0, %v1698_v61  ;;  %v1697_v29 = vand.u32 2147483647, %v1695_v23  ;;  %v1726_v63 = vmul.f32 %v1724_v5, %v1696_v49  ;;  %vm1737_vm15 = vcmp.ge.f32.partialorder %v1695_v23, 0.0 }
0x14d8   :  { %6295 = vrcp.f32 %v1700_v57  ;;  %v1699_v55 = vmul.f32 0.3275911, %v1697_v29  ;;  %v1725_v38 = vsub.f32 0.0, %v1697_v29  ;;  %v1728_v40 = vmul.f32 1.442695, %v1726_v63 }
0x14da   :  { %v1701_v36 = vadd.f32 1.0, %v1699_v55  ;;  %v1727_v10 = vmul.f32 %v1725_v38, %v1697_v29 }
0x14dc   :  { %6297 = vrcp.f32 %v1701_v36  ;;  %v1730_v46 = vmul.f32 1.442695, %v1727_v10  ;;  %v5304_v10 = vld [vmem:[%s8131_s1 + $0x130] sm:$0xff] }
0x14dd   :  { %6299 = vpow2.f32 %v1728_v40 }
0x14de   :  { %6301 = vpow2.f32 %v1730_v46 }
0x14e5   :  { %v6296_v13 = vpop.eup %6295 }
0x14e6   :  { %v1706_v39 = vmul.f32 1.0614054, %v6296_v13 }
0x14e8   :  { %v1708_v17 = vadd.f32 -1.4531521, %v1706_v39 }
0x14e9   :  { %v6298_v41 = vpop.eup %6297 }
0x14ea   :  { %v1710_v42 = vmul.f32 %v6296_v13, %v1708_v17  ;;  %v1707_v19 = vmul.f32 1.0614054, %v6298_v41  ;;  %v6300_v60 = vpop.eup %6299  ;;  %v5305_v17 = vld [vmem:[%s8131_s1 + $0x138] sm:$0x3] }
0x14eb   :  { %v6302_v31 = vpop.eup %6301 }
0x14ec   :  { %v1712_v47 = vadd.f32 1.4214138, %v1710_v42  ;;  %v1709_v48 = vadd.f32 -1.4531521, %v1707_v19 }
0x14ee   :  { %v1714_v50 = vmul.f32 %v6296_v13, %v1712_v47  ;;  %v1711_v52 = vmul.f32 %v6298_v41, %v1709_v48 }
0x14f0   :  { %v1716_v54 = vadd.f32 -0.28449672, %v1714_v50  ;;  %v1713_v15 = vadd.f32 1.4214138, %v1711_v52 }
0x14f2   :  { %v1718_v44 = vmul.f32 %v6296_v13, %v1716_v54  ;;  %v1715_v58 = vmul.f32 %v6298_v41, %v1713_v15 }
0x14f4   :  { %v1720_v59 = vadd.f32 0.2548296, %v1718_v44  ;;  %v1717_v20 = vadd.f32 -0.28449672, %v1715_v58  ;;  %v5327_v44 = vld [vmem:[%s8132_s2 + $0x12] ss:$0 sm:$0xff] }
0x14f6   :  { %v1722_v51 = vmul.f32 %v6296_v13, %v1720_v59  ;;  %v1719_v33 = vmul.f32 %v6298_v41, %v1717_v20  ;;  %v5306_v59 = vld [vmem:[%s8131_s1 + $0x140] sm:$0xff]  ;;  %v5307_v20 = vld [vmem:[%s8131_s1 + $0x148] sm:$0x3] }
0x14f8   :  { %v1732_v26 = vmul.f32 %v6300_v60, %v1722_v51  ;;  %v1721_v1 = vadd.f32 0.2548296, %v1719_v33  ;;  %v5328_v60 = vld [vmem:[%s8132_s2 + $0x13] ss:$0 sm:$0xff] }
0x14fa   :  { %v1734_v4 = vsub.f32 1.0, %v1732_v26  ;;  %v1723_v7 = vmul.f32 %v6298_v41, %v1721_v1  ;;  %v1807_v41 = vpack.c.bf16 %v5305_v17, %v5304_v10  ;;  %v1810_v1 = vpack.c.bf16 %v5307_v20, %v5306_v59 }
0x14fc   :  { %v1738_v32 = vsub.f32 0.0, %v1734_v4  ;;  %v1733_v8 = vmul.f32 %v6302_v31, %v1723_v7  ;;  %v1898_v42 = vsel %vm86_vm0, %v1807_v41, 0 }
0x14fd   :  { %5873 = vmatpush3.bf16.msra.mxu0 %v1898_v42 }
0x14fe   :  { %v1740_v34 = vsel %vm1736_vm14, %v1734_v4, %v1738_v32  ;;  %v1735_v56 = vsub.f32 1.0, %v1733_v8  ;;  %5878 = vmatprep.subr.bf16.mxu0 %v6548_v3  ;;  %v1948_v32 = vsel %vm86_vm0, %v1810_v1, 0 }
0x14ff   :  { %v1742_v9 = vadd.f32 1.0, %v1740_v34  ;;  %v5329_v34 = vld [vmem:[%s8132_s2 + $0x14] ss:$0 sm:$0xff] }
0x1500   :  { %v1739_v35 = vsub.f32 0.0, %v1735_v56 }
0x1501   :  { %v1744_v14 = vmul.f32 %v1742_v9, %v1692_v2 }
0x1502   :  { %v1741_v0 = vsel %vm1737_vm15, %v1735_v56, %v1739_v35 }
0x1503   :  { %v1743_v11 = vadd.f32 1.0, %v1741_v0 }
0x1505   :  { %v1745_v18 = vmul.f32 %v1743_v11, %v1693_v6 }
0x1507   :  { %v1746_v12 = vpack.c.bf16 %v1745_v18, %v1744_v14  ;;  %v5331_v18 = vld [vmem:[%s8132_s2 + $0x15] ss:$0 sm:$0xff] }
0x1509   :  { %5869 = vmatmul.mubr.msk.bf16.vlgmr.msra.gmra.mxu1 %vm919_vm13, %v1746_v12 }
0x150a   :  { %5886 = vmatprep.mubr.msk.bf16.mxu1 %vm82_vm4, %v6649_v62 }
0x15c9   :  { %v1787_v45 = vpop.f32.mrf.mxu1 }
0x15ca   :  { %v1794_v22 = vadd.f32 %v1787_v45, %v7073_v27 }
0x15cb   :  { %v5870_v49 = vpop.f32.mrf.mxu1 }
0x15cc   :  { %v7131_v21 = vadd.f32 %v5303_v43, %v1794_v22 }
0x15cd   :  { %v1790_v53 = vpop.f32.mrf.mxu1 }
0x15ce   :  { %v1795_v16 = vadd.f32 %v1790_v53, %v7078_v37  ;;  %v1845_v61 = vsel %vm82_vm4, %v7131_v21, 0.0 }
0x15cf   :  { %1846 = vadd.xlane.f32.xlu1 %v1845_v61  ;;  %v5871_v23 = vpop.f32.mrf.mxu1 }
0x15d0   :  { %v7136_v57 = vadd.f32 %v5303_v43, %v1795_v16 }
0x15d2   :  { %v1848_v29 = vsel %vm173_vm5, %v7136_v57, 0.0 }
0x15d3   :  { %1849 = vadd.xlane.f32.xlu0 %v1848_v29 }
0x1658   :  { %v1847_v55 = vpop.xlane.xlu1 %1846 }
0x1659   :  { %v1851_v36 = vmul.f32 0.1, %v1847_v55 }
0x165b   :  { %v1853_v27 = vsub.f32 %v7131_v21, %v1851_v36  ;;  %v7192_v36 = vld [vmem:[%s8133_s3 + $0xa8] sm:$0xff] }
0x165c   :  { %v1850_v5 = vpop.xlane.xlu0 %1849 }
0x165d   :  { %v1852_v63 = vmul.f32 0.1, %v1850_v5  ;;  %v1855_v38 = vmul.f32 %v1853_v27, %v1853_v27 }
0x165f   :  { %v1854_v37 = vsub.f32 %v7136_v57, %v1852_v63  ;;  %v1857_v13 = vsel %vm82_vm4, %v1855_v38, 0.0  ;;  %v7198_v63 = vld [vmem:[%s8133_s3 + $0x90] sm:$0xff] }
0x1660   :  { %1858 = vadd.xlane.f32.xlu1 %v1857_v13 }
0x1661   :  { %v1856_v39 = vmul.f32 %v1854_v37, %v1854_v37 }
0x1663   :  { %v1860_v40 = vsel %vm173_vm5, %v1856_v39, 0.0  ;;  %v7210_v39 = vld [vmem:[%s8133_s3 + $0xa0] sm:$0xff] }
0x1664   :  { %1861 = vadd.xlane.f32.xlu0 %v1860_v40 }
0x16e9   :  { %v1859_v19 = vpop.xlane.xlu1 %1858 }
0x16ea   :  { %v1863_v46 = vmul.f32 0.1, %v1859_v19 }
0x16ec   :  { %v1865_v47 = vadd.f32 1e-05, %v1863_v46  ;;  %v7218_v46 = vld [vmem:[%s8133_s3 + $0xc0] sm:$0x3] }
0x16ed   :  { %v1862_v48 = vpop.xlane.xlu0 %1861 }
0x16ee   :  { %6303 = vrsqrt.f32 %v1865_v47  ;;  %v1864_v50 = vmul.f32 0.1, %v1862_v48 }
0x16f0   :  { %v1866_v52 = vadd.f32 1e-05, %v1864_v50  ;;  %v7224_v50 = vld [vmem:[%s8133_s3 + $0xb0] sm:$0xff] }
0x16f2   :  { %6305 = vrsqrt.f32 %v1866_v52 }
0x16fb   :  { %v6304_v54 = vpop.eup %6303 }
0x16fc   :  { %v1869_v15 = vmul.f32 %v6304_v54, %v1853_v27  ;;  %v7230_v54 = vld [vmem:[%s8133_s3 + $0xb8] sm:$0xff] }
0x16fe   :  { %v1877_v33 = vmul.f32 %v5327_v44, %v1869_v15 }
0x16ff   :  { %v6306_v58 = vpop.eup %6305 }
0x1700   :  { %v1870_v51 = vmul.f32 %v6306_v58, %v1854_v37  ;;  %v1885_v4 = vadd.f32 %v5328_v60, %v1877_v33  ;;  %v7204_v37 = vld [vmem:[%s8133_s3 + $0x98] sm:$0xff] }
0x1702   :  { %v1878_v26 = vmul.f32 %v5327_v44, %v1870_v51  ;;  %v7240_v51 = vld [vmem:[%s8133_s3 + $0x100] sm:$0xff] }
0x1704   :  { %v1886_v7 = vadd.f32 %v5328_v60, %v1878_v26  ;;  %v7246_v26 = vld [vmem:[%s8133_s3 + $0x110] sm:$0xff] }
0x1706   :  { %v1887_v31 = vpack.c.bf16 %v1886_v7, %v1885_v4 }
0x1708   :  { %5875 = vmatmul.mubr.msk.bf16.vlgmr.msra.gmra.mxu0 %vm82_vm4, %v1887_v31 }
0x1709   :  { %5879 = vmatpush3.bf16.msra.mxu0 %v1948_v32  ;;  %5880 = vmatprep.mubr.msk.bf16.mxu0 %vm6549_vm1, %v6548_v3 }
0x1710   :  { %5881 = vmatmul.mubr.msk.bf16.vlgmr.msra.gmra.mxu0 %vm82_vm4, %v1887_v31  ;;  %v7253_v31 = vld [vmem:[%s8133_s3 + $0x108] sm:$0xff] }
0x17c8   :  { %v1934_v8 = vpop.f32.mrf.mxu0 }
0x17c9   :  { %v1935_v9 = vadd.f32 %v5329_v34, %v1934_v8 }
0x17ca   :  { %v5876_v56 = vpop.f32.mrf.mxu0 }
0x17cc   :  { %v1937_v35 = vpop.f32.mrf.mxu0 }
0x17cd   :  { %v1938_v0 = vadd.f32 %v5329_v34, %v1937_v35  ;;  %v7259_v34 = vld [vmem:[%s8133_s3 + $0x118] sm:$0xff] }
0x17ce   :  { %v5877_v2 = vpop.f32.mrf.mxu0 }
0x17cf   :  { %v1992_v6 = vpack.c.bf16 %v1938_v0, %v1935_v9  ;;  %v7267_v2 = vld [vmem:[%s8133_s3 + $0x120] sm:$0xff] }
0x17d0   :  { %v1984_v11 = vpop.f32.mrf.mxu0 }
0x17d1   :  { %6196 = vmatprep.subr.msk.bf16.mxu1 %vm86_vm0, %v1992_v6  ;;  %v1994_v14 = vsel %vm86_vm0, %v1992_v6, 0  ;;  %v1985_v45 = vadd.f32 %v5331_v18, %v1984_v11 }
0x17d2   :  { %v5882_v12 = vpop.f32.mrf.mxu0  ;;  %5885 = vmatpush3.bf16.msra.mxu1 %v1994_v14  ;;  %v7273_v14 = vld [vmem:[%s8133_s3 + $0x130] sm:$0x3] }
0x17d4   :  { %v1987_v43 = vpop.f32.mrf.mxu0 }
0x17d5   :  { %v1988_v22 = vadd.f32 %v5331_v18, %v1987_v43  ;;  %5887 = vmatmul.mubr.msk.bf16.vlgmr.msra.gmra.mxu1 %vm82_vm4, %v6675_v24 }
0x17d6   :  { %v5883_v49 = vpop.f32.mrf.mxu0  ;;  %5890 = vmatprep.mubr.msk.bf16.mxu1 %vm82_vm4, %v6677_v25 }
0x17d7   :  { %v1991_v53 = vpack.c.bf16 %v1988_v22, %v1985_v45  ;;  %v7281_v22 = vld [vmem:[%s8133_s3 + $0x128] sm:$0xff] }
0x17d9   :  { %6197 = vmatprep.subr.msk.bf16.mxu0 %vm410_vm6, %v1991_v53  ;;  %6198 = vmatprep.subr.msk.bf16.mxu1 %vm86_vm0, %v1991_v53  ;;  %v2084_v16 = vsel %vm410_vm6, %v1991_v53, 0  ;;  %v2243_v61 = vsel %vm86_vm0, %v1991_v53, 0 }
0x17da   :  { %5895 = vmatpush3.bf16.xpose.msra.mxu0 %v2084_v16  ;;  %5905 = vmatpush3.bf16.msra.mxu1 %v2243_v61 }
0x17db   :  { %5914 = vmatprep.subr.bf16.mxu0 %v6548_v3  ;;  %5934 = vmatprep.subr.bf16.mxu1 %v6548_v3 }
0x17dd   :  { %5891 = vmatmul.mubr.msk.bf16.gmra.mxu1 %vm82_vm4, %v6690_v28 }
0x1895   :  { %v5888_v23 = vpop.f32.mrf.mxu1 }
0x1896   :  { %v2062_v40 = vmul.f32 %v7210_v39, %v5888_v23 }
0x1897   :  { %v2030_v29 = vpop.f32.mrf.mxu1 }
0x1898   :  { %v2060_v38 = vmul.f32 %v7198_v63, %v2030_v29 }
0x1899   :  { %v5889_v55 = vpop.f32.mrf.mxu1 }
0x189a   :  { %v2063_v27 = vmul.f32 %v7192_v36, %v5889_v55 }
0x189b   :  { %v2033_v5 = vpop.f32.mrf.mxu1 }
0x189c   :  { %v2061_v13 = vmul.f32 %v7204_v37, %v2033_v5  ;;  %v2068_v41 = vpack.c.bf16 %v2063_v27, %v2062_v40 }
0x189d   :  { %v5892_v10 = vpop.f32.mrf.mxu1 }
0x189e   :  { %v2067_v17 = vpack.c.bf16 %v2061_v13, %v2060_v38  ;;  %v2066_v47 = vmul.f32 %v7218_v46, %v5892_v10 }
0x189f   :  { %v2046_v42 = vpop.f32.mrf.mxu1 }
0x18a0   :  { %5896 = vmatprep.mubr.msk.bf16.mxu0 %vm410_vm6, %v2067_v17  ;;  %v2064_v52 = vmul.f32 %v7224_v50, %v2046_v42  ;;  %v2070_v58 = vpack.c.bf16 %v2066_v47, %v2066_v47 }
0x18a1   :  { %v5893_v19 = vpop.f32.mrf.mxu1  ;;  %5897 = vmatmul.mubr.msk.bf16.vlgmr.msra.gmra.mxu0 %vm410_vm6, %v2068_v41 }
0x18a3   :  { %v2049_v48 = vpop.f32.mrf.mxu1 }
0x18a4   :  { %v2065_v15 = vmul.f32 %v7230_v54, %v2049_v48 }
0x18a6   :  { %v2069_v44 = vpack.c.bf16 %v2065_v15, %v2064_v52 }
0x18a8   :  { %5900 = vmatprep.mubr.msk.bf16.mxu0 %vm410_vm6, %v2069_v44 }
0x18a9   :  { %5901 = vmatmul.mubr.msk.bf16.gmra.mxu0 %vm410_vm6, %v2070_v58 }
0x18aa   :  { %5922 = vmatprep.mubr.msk.bf16.mxu0 %vm6549_vm1, %v6548_v3 }
0x1961   :  { %v5898_v59 = vpop.f32.mrf.mxu0 }
0x1962   :  { %v2129_v1 = vadd.f32 %v7246_v26, %v5898_v59 }
0x1963   :  { %v2120_v20 = vpop.f32.mrf.mxu0 }
0x1964   :  { %v2121_v33 = vadd.f32 %v7240_v51, %v2120_v20  ;;  %v2156_v9 = vsel %vm82_vm4, %v2129_v1, -inf }
0x1965   :  { %v5899_v60 = vpop.f32.mrf.mxu0 }
0x1966   :  { %v2150_v4 = vsel %vm82_vm4, %v2121_v33, -inf  ;;  %v2132_v56 = vadd.f32 %v7259_v34, %v5899_v60 }
0x1967   :  { %v2123_v7 = vpop.f32.mrf.mxu0  ;;  %2151 = vmax.xlane.f32.xlu1 %v2150_v4 }
0x1968   :  { %v2124_v32 = vadd.f32 %v7253_v31, %v2123_v7  ;;  %v2159_v12 = vsel %vm82_vm4, %v2132_v56, -inf }
0x1969   :  { %v5902_v8 = vpop.f32.mrf.mxu0 }
0x196a   :  { %v2153_v35 = vsel %vm82_vm4, %v2124_v32, -inf  ;;  %v2145_v18 = vadd.f32 %v7273_v14, %v5902_v8 }
0x196b   :  { %2154 = vmax.xlane.f32.xlu0 %v2153_v35  ;;  %2157 = vmax.xlane.f32.xlu1 %v2156_v9  ;;  %v2136_v0 = vpop.f32.mrf.mxu0 }
0x196c   :  { %v2137_v6 = vadd.f32 %v7267_v2, %v2136_v0  ;;  %v2168_v16 = vsel %vm173_vm5, %v2145_v18, -inf }
0x196d   :  { %v5903_v11 = vpop.f32.mrf.mxu0 }
0x196e   :  { %v2162_v43 = vsel %vm82_vm4, %v2137_v6, -inf }
0x196f   :  { %2160 = vmax.xlane.f32.xlu0 %v2159_v12  ;;  %v2139_v45 = vpop.f32.mrf.mxu0  ;;  %2163 = vmax.xlane.f32.xlu1 %v2162_v43 }
0x1970   :  { %v2140_v49 = vadd.f32 %v7281_v22, %v2139_v45 }
0x1972   :  { %v2165_v53 = vsel %vm82_vm4, %v2140_v49, -inf }
0x1973   :  { %2166 = vmax.xlane.f32.xlu0 %v2165_v53  ;;  %2169 = vmax.xlane.f32.xlu1 %v2168_v16 }
0x19f0   :  { %v2152_v61 = vpop.xlane.xlu1 %2151 }
0x19f1   :  { %v2171_v23 = vsub.f32 %v2121_v33, %v2152_v61 }
0x19f3   :  { %v2178_v29 = vmul.f32 1.442695, %v2171_v23 }
0x19f4   :  { %v2155_v55 = vpop.xlane.xlu0 %2154  ;;  %v2158_v27 = vpop.xlane.xlu1 %2157 }
0x19f5   :  { %6307 = vpow2.f32 %v2178_v29  ;;  %v2172_v5 = vsub.f32 %v2124_v32, %v2155_v55  ;;  %v2173_v38 = vsub.f32 %v2129_v1, %v2158_v27 }
0x19f7   :  { %v2180_v13 = vmul.f32 1.442695, %v2172_v5  ;;  %v2182_v40 = vmul.f32 1.442695, %v2173_v38 }
0x19f8   :  { %v2161_v10 = vpop.xlane.xlu0 %2160  ;;  %v2164_v17 = vpop.xlane.xlu1 %2163 }
0x19f9   :  { %6309 = vpow2.f32 %v2180_v13  ;;  %v2174_v41 = vsub.f32 %v2132_v56, %v2161_v10  ;;  %v2175_v42 = vsub.f32 %v2137_v6, %v2164_v17 }
0x19fa   :  { %6311 = vpow2.f32 %v2182_v40 }
0x19fb   :  { %v2184_v19 = vmul.f32 1.442695, %v2174_v41  ;;  %v2186_v47 = vmul.f32 1.442695, %v2175_v42 }
0x19fc   :  { %v2167_v48 = vpop.xlane.xlu0 %2166  ;;  %v2170_v52 = vpop.xlane.xlu1 %2169 }
0x19fd   :  { %6313 = vpow2.f32 %v2184_v19  ;;  %v2176_v15 = vsub.f32 %v2140_v49, %v2167_v48  ;;  %v2177_v44 = vsub.f32 %v2145_v18, %v2170_v52 }
0x19fe   :  { %6315 = vpow2.f32 %v2186_v47 }
0x19ff   :  { %v2188_v58 = vmul.f32 1.442695, %v2176_v15  ;;  %v2190_v59 = vmul.f32 1.442695, %v2177_v44 }
0x1a01   :  { %6317 = vpow2.f32 %v2188_v58 }
0x1a02   :  { %v6308_v20 = vpop.eup %6307  ;;  %6319 = vpow2.f32 %v2190_v59 }
0x1a03   :  { %v2192_v33 = vsel %vm82_vm4, %v6308_v20, 0.0 }
0x1a04   :  { %2193 = vadd.xlane.f32.xlu0 %v2192_v33 }
0x1a06   :  { %v6310_v60 = vpop.eup %6309 }
0x1a07   :  { %v6312_v1 = vpop.eup %6311  ;;  %v2195_v4 = vsel %vm82_vm4, %v6310_v60, 0.0 }
0x1a08   :  { %v2198_v7 = vsel %vm82_vm4, %v6312_v1, 0.0  ;;  %2196 = vadd.xlane.f32.xlu1 %v2195_v4 }
0x1a09   :  { %2199 = vadd.xlane.f32.xlu0 %v2198_v7 }
0x1a0a   :  { %v6314_v32 = vpop.eup %6313 }
0x1a0b   :  { %v6316_v8 = vpop.eup %6315  ;;  %v2201_v56 = vsel %vm82_vm4, %v6314_v32, 0.0 }
0x1a0c   :  { %2202 = vadd.xlane.f32.xlu1 %v2201_v56  ;;  %v2204_v35 = vsel %vm82_vm4, %v6316_v8, 0.0 }
0x1a0d   :  { %2205 = vadd.xlane.f32.xlu0 %v2204_v35  ;;  %v7309_v35 = vld [vmem:[%s8133_s3 + $0xe8] sm:$0xff] }
0x1a0e   :  { %v6318_v9 = vpop.eup %6317 }
0x1a0f   :  { %v6320_v0 = vpop.eup %6319  ;;  %v2207_v6 = vsel %vm82_vm4, %v6318_v9, 0.0 }
0x1a10   :  { %2208 = vadd.xlane.f32.xlu1 %v2207_v6  ;;  %v2210_v11 = vsel %vm173_vm5, %v6320_v0, 0.0 }
0x1a11   :  { %2211 = vadd.xlane.f32.xlu0 %v2210_v11  ;;  %v7322_v11 = vld [vmem:[%s8133_s3 + $0xe0] sm:$0xff] }
0x1a8d   :  { %v2194_v18 = vpop.xlane.xlu0 %2193 }
0x1a8e   :  { %6321 = vrcp.f32 %v2194_v18 }
0x1a91   :  { %v2197_v12 = vpop.xlane.xlu1 %2196 }
0x1a92   :  { %v2200_v43 = vpop.xlane.xlu0 %2199  ;;  %6323 = vrcp.f32 %v2197_v12 }
0x1a93   :  { %6325 = vrcp.f32 %v2200_v43  ;;  %v7328_v43 = vld [vmem:[%s8133_s3 + $0xd8] sm:$0xff] }
0x1a95   :  { %v2203_v45 = vpop.xlane.xlu1 %2202 }
0x1a96   :  { %v2206_v49 = vpop.xlane.xlu0 %2205  ;;  %6327 = vrcp.f32 %v2203_v45 }
0x1a97   :  { %6329 = vrcp.f32 %v2206_v49 }
0x1a99   :  { %v2209_v53 = vpop.xlane.xlu1 %2208 }
0x1a9a   :  { %v2212_v16 = vpop.xlane.xlu0 %2211  ;;  %6331 = vrcp.f32 %v2209_v53  ;;  %v7335_v53 = vld [vmem:[%s8133_s3 + $0xd0] sm:$0xff] }
0x1a9b   :  { %6333 = vrcp.f32 %v2212_v16  ;;  %v6322_v61 = vpop.eup %6321 }
0x1a9c   :  { %v2220_v29 = vmul.f32 %v6322_v61, %v6308_v20  ;;  %v7341_v61 = vld [vmem:[%s8133_s3 + $0xc8] sm:$0xff] }
0x1a9f   :  { %v6324_v23 = vpop.eup %6323 }
0x1aa0   :  { %v2221_v55 = vmul.f32 %v6324_v23, %v6310_v60  ;;  %v6326_v27 = vpop.eup %6325  ;;  %v7302_v60 = vld [vmem:[%s8133_s3 + $0xf8] sm:$0x3] }
0x1aa1   :  { %v2222_v13 = vmul.f32 %v6326_v27, %v6312_v1 }
0x1aa2   :  { %v2227_v5 = vpack.c.bf16 %v2221_v55, %v2220_v29  ;;  %v5310_v55 = vld [vmem:[%s8131_s1 + $0x128] sm:$0xf] }
0x1aa3   :  { %v6328_v38 = vpop.eup %6327  ;;  %v1815_v27 = vpack.c.bf16 %v5310_v55, %v5310_v55 }
0x1aa4   :  { %v2223_v40 = vmul.f32 %v6328_v38, %v6314_v32  ;;  %5906 = vmatprep.mubr.msk.bf16.mxu1 %vm82_vm4, %v2227_v5  ;;  %v6330_v10 = vpop.eup %6329  ;;  %v5308_v38 = vld [vmem:[%s8131_s1 + $0x118] sm:$0xff] }
0x1aa5   :  { %v2224_v19 = vmul.f32 %v6330_v10, %v6316_v8  ;;  %v2369_v5 = vsel %vm713_vm9, %v1815_v27, 0 }
0x1aa6   :  { %v2228_v17 = vpack.c.bf16 %v2223_v40, %v2222_v13  ;;  %v5309_v13 = vld [vmem:[%s8131_s1 + $0x120] sm:$0xff] }
0x1aa7   :  { %v6332_v41 = vpop.eup %6331  ;;  %v1814_v40 = vpack.c.bf16 %v5309_v13, %v5308_v38 }
0x1aa8   :  { %v6334_v42 = vpop.eup %6333  ;;  %5907 = vmatmul.mubr.msk.bf16.vlgmr.msra.gmra.mxu1 %vm82_vm4, %v2228_v17  ;;  %v2225_v47 = vmul.f32 %v6332_v41, %v6318_v9 }
0x1aa9   :  { %v2226_v52 = vmul.f32 %v6334_v42, %v6320_v0  ;;  %v7315_v0 = vld [vmem:[%s8133_s3 + $0xf0] sm:$0xff] }
0x1aaa   :  { %v2229_v48 = vpack.c.bf16 %v2225_v47, %v2224_v19  ;;  %v5347_v47 = vld [vmem:[%s8132_s2 + $0x16] ss:$0 sm:$0xff] }
0x1aab   :  { %v2230_v15 = vpack.c.bf16 %v2226_v52, %v2226_v52 }
0x1aac   :  { %5910 = vmatprep.mubr.msk.bf16.mxu1 %vm82_vm4, %v2229_v48 }
0x1ab0   :  { %5911 = vmatmul.mubr.msk.bf16.gmra.mxu1 %vm82_vm4, %v2230_v15 }
0x1ab1   :  { %5936 = vmatprep.mubr.msk.bf16.mxu1 %vm6549_vm1, %v6548_v3 }
0x1b68   :  { %v5908_v44 = vpop.f32.mrf.mxu1 }
0x1b69   :  { %v2311_v45 = vmul.f32 %v7328_v43, %v5908_v44 }
0x1b6a   :  { %v2279_v58 = vpop.f32.mrf.mxu1 }
0x1b6b   :  { %v2309_v23 = vmul.f32 %v7341_v61, %v2279_v58 }
0x1b6c   :  { %v5909_v59 = vpop.f32.mrf.mxu1 }
0x1b6d   :  { %v2312_v18 = vmul.f32 %v7322_v11, %v5909_v59 }
0x1b6e   :  { %v2282_v20 = vpop.f32.mrf.mxu1 }
0x1b6f   :  { %v2317_v49 = vpack.c.bf16 %v2312_v18, %v2311_v45  ;;  %v2310_v16 = vmul.f32 %v7335_v53, %v2282_v20  ;;  %v5311_v45 = vld [vmem:[%s8131_s1 + $0xe0] sm:$0xff] }
0x1b70   :  { %v5912_v33 = vpop.f32.mrf.mxu1 }
0x1b71   :  { %v2315_v1 = vmul.f32 %v7302_v60, %v5912_v33  ;;  %v2316_v29 = vpack.c.bf16 %v2310_v16, %v2309_v23 }
0x1b72   :  { %v2295_v4 = vpop.f32.mrf.mxu1 }
0x1b73   :  { %v2319_v7 = vpack.c.bf16 %v2315_v1, %v2315_v1  ;;  %v2313_v9 = vmul.f32 %v7309_v35, %v2295_v4 }
0x1b74   :  { %v5913_v32 = vpop.f32.mrf.mxu1 }
0x1b75   :  { %v2321_v8 = vsel %vm664_vm7, %v2319_v7, 0 }
0x1b76   :  { %v2298_v56 = vpop.f32.mrf.mxu1  ;;  %5915 = vmatpush3.bf16.msra.mxu0 %v2321_v8 }
0x1b77   :  { %v2314_v6 = vmul.f32 %v7315_v0, %v2298_v56  ;;  %5916 = vmatprep.subr.bf16.mxu0 %v6548_v3 }
0x1b79   :  { %v2318_v12 = vpack.c.bf16 %v2314_v6, %v2313_v9 }
0x1b7b   :  { %5917 = vmatpush3.bf16.msra.mxu0 %v2318_v12 }
0x1b7c   :  { %5918 = vmatprep.subr.bf16.mxu0 %v6548_v3 }
0x1b7f   :  { %5919 = vmatpush3.bf16.msra.mxu0 %v2317_v49  ;;  %v5312_v49 = vld [vmem:[%s8131_s1 + $0xe8] sm:$0x3] }
0x1b80   :  { %5920 = vmatprep.subr.bf16.mxu0 %v6548_v3  ;;  %v1818_v16 = vpack.c.bf16 %v5312_v49, %v5311_v45 }
0x1b82   :  { %v2475_v23 = vsel %vm86_vm0, %v1818_v16, 0 }
0x1b83   :  { %5921 = vmatpush3.bf16.msra.mxu0 %v2316_v29  ;;  %5935 = vmatpush3.bf16.msra.mxu1 %v2475_v23 }
0x1b84   :  { %5926 = vmatprep.subr.bf16.mxu0 %v6548_v3  ;;  %5950 = vmatprep.subr.bf16.mxu1 %v6548_v3 }
0x1b86   :  { %5923 = vmatmul.mubr.msk.bf16.vlgmr.msra.gmra.mxu0 %vm660_vm8, %v6856_v30 }
0x1b87   :  { %5930 = vmatprep.mubr.msk.bf16.mxu0 %vm6549_vm1, %v6548_v3  ;;  %5927 = vmatpush3.bf16.msra.mxu0 %v2369_v5 }
0x1b88   :  { %5928 = vmatprep.subr.bf16.mxu0 %v6548_v3 }
0x1b8b   :  { %5929 = vmatpush3.bf16.msra.mxu0 %v1814_v40 }
0x1b8c   :  { %5940 = vmatprep.subr.bf16.mxu0 %v6548_v3 }
0x1c46   :  { %v2357_v10 = vpop.f32.mrf.mxu0 }
0x1c48   :  { %v5924_v17 = vpop.f32.mrf.mxu0 }
0x1c49   :  { %v5348_v17 = vld [vmem:[%s8132_s2 + $0x17] ss:$0 sm:$0xff] }
0x1c4a   :  { %v2360_v41 = vpop.f32.mrf.mxu0 }
0x1c4b   :  { %v2364_v42 = vpack.c.bf16 %v2360_v41, %v2357_v10 }
0x1c4c   :  { %v5925_v19 = vpop.f32.mrf.mxu0 }
0x1c4d   :  { %5931 = vmatmul.mubr.msk.bf16.vlgmr.msra.gmra.mxu0 %vm410_vm6, %v2364_v42 }
0x1c4e   :  { %5946 = vmatprep.mubr.msk.bf16.mxu0 %vm6549_vm1, %v6548_v3 }
0x1d0d   :  { %v2405_v48 = vpop.f32.mrf.mxu0 }
0x1d0e   :  { %v2412_v52 = vadd.f32 %v2405_v48, %v7131_v21 }
0x1d0f   :  { %v5932_v15 = vpop.f32.mrf.mxu0 }
0x1d10   :  { %v7369_v44 = vadd.f32 %v5347_v47, %v2412_v52 }
0x1d11   :  { %v2408_v58 = vpop.f32.mrf.mxu0 }
0x1d12   :  { %v2413_v59 = vadd.f32 %v2408_v58, %v7136_v57  ;;  %v2422_v20 = vsel %vm82_vm4, %v7369_v44, 0.0 }
0x1d13   :  { %2423 = vadd.xlane.f32.xlu1 %v2422_v20  ;;  %v5933_v33 = vpop.f32.mrf.mxu0 }
0x1d14   :  { %v7374_v1 = vadd.f32 %v5347_v47, %v2413_v59  ;;  %v5349_v47 = vld [vmem:[%s8132_s2 + $0x18] ss:$0 sm:$0xff]  ;;  %v5317_v59 = vld [vmem:[%s8131_s1 + $0x110] sm:$0xff] }
0x1d15   :  { %v1826_v20 = vpack.c.bf16 %v5317_v59, %v5317_v59 }
0x1d16   :  { %v2425_v4 = vsel %vm173_vm5, %v7374_v1, 0.0 }
0x1d17   :  { %2426 = vadd.xlane.f32.xlu0 %v2425_v4  ;;  %v2577_v33 = vsel %vm923_vm10, %v1826_v20, 0  ;;  %v5315_v4 = vld [vmem:[%s8131_s1 + $0x100] sm:$0xff] }
0x1d18   :  { %5941 = vmatpush3.bf16.msra.mxu0 %v2577_v33 }
0x1d19   :  { %5942 = vmatprep.subr.bf16.mxu0 %v6548_v3 }
0x1d9c   :  { %v2424_v7 = vpop.xlane.xlu1 %2423 }
0x1d9d   :  { %v2428_v32 = vmul.f32 0.1, %v2424_v7  ;;  %v5316_v7 = vld [vmem:[%s8131_s1 + $0x108] sm:$0xff] }
0x1d9f   :  { %v2430_v21 = vsub.f32 %v7369_v44, %v2428_v32  ;;  %v1825_v32 = vpack.c.bf16 %v5316_v7, %v5315_v4 }
0x1da0   :  { %v2427_v8 = vpop.xlane.xlu0 %2426 }
0x1da1   :  { %v2429_v56 = vmul.f32 0.1, %v2427_v8  ;;  %v2432_v9 = vmul.f32 %v2430_v21, %v2430_v21  ;;  %5943 = vmatpush3.bf16.msra.mxu0 %v1825_v32  ;;  %v5314_v8 = vld [vmem:[%s8131_s1 + $0xf8] sm:$0xff] }
0x1da2   :  { %5944 = vmatprep.subr.bf16.mxu0 %v6548_v3 }
0x1da3   :  { %v2431_v57 = vsub.f32 %v7374_v1, %v2429_v56  ;;  %v2434_v6 = vsel %vm82_vm4, %v2432_v9, 0.0  ;;  %v5350_v9 = vld [vmem:[%s8132_s2 + $0x19] ss:$0 sm:$0xff] }
0x1da4   :  { %2435 = vadd.xlane.f32.xlu1 %v2434_v6 }
0x1da5   :  { %v2433_v18 = vmul.f32 %v2431_v57, %v2431_v57 }
0x1da7   :  { %v2437_v12 = vsel %vm173_vm5, %v2433_v18, 0.0 }
0x1da8   :  { %2438 = vadd.xlane.f32.xlu0 %v2437_v12 }
0x1e2d   :  { %v2436_v29 = vpop.xlane.xlu1 %2435 }
0x1e2e   :  { %v2440_v55 = vmul.f32 0.1, %v2436_v29 }
0x1e30   :  { %v2442_v27 = vadd.f32 1e-05, %v2440_v55 }
0x1e31   :  { %v2439_v5 = vpop.xlane.xlu0 %2438 }
0x1e32   :  { %6335 = vrsqrt.f32 %v2442_v27  ;;  %v2441_v38 = vmul.f32 0.1, %v2439_v5 }
0x1e34   :  { %v2443_v13 = vadd.f32 1e-05, %v2441_v38 }
0x1e36   :  { %6337 = vrsqrt.f32 %v2443_v13 }
0x1e3f   :  { %v6336_v40 = vpop.eup %6335 }
0x1e40   :  { %v2446_v10 = vmul.f32 %v6336_v40, %v2430_v21  ;;  %v5313_v21 = vld [vmem:[%s8131_s1 + $0xf0] sm:$0xff] }
0x1e41   :  { %v1824_v56 = vpack.c.bf16 %v5314_v8, %v5313_v21 }
0x1e42   :  { %v2454_v42 = vmul.f32 %v5348_v17, %v2446_v10 }
0x1e43   :  { %v6338_v41 = vpop.eup %6337  ;;  %5945 = vmatpush3.bf16.msra.mxu0 %v1824_v56 }
0x1e44   :  { %v2447_v19 = vmul.f32 %v6338_v41, %v2431_v57  ;;  %v2462_v52 = vadd.f32 %v5349_v47, %v2454_v42 }
0x1e46   :  { %v2455_v48 = vmul.f32 %v5348_v17, %v2447_v19 }
0x1e48   :  { %v2463_v15 = vadd.f32 %v5349_v47, %v2455_v48 }
0x1e4a   :  { %v2464_v58 = vpack.c.bf16 %v2463_v15, %v2462_v52 }
0x1e4c   :  { %5937 = vmatmul.mubr.msk.bf16.vlgmr.msra.gmra.mxu1 %vm82_vm4, %v2464_v58 }
0x1e4d   :  { %5952 = vmatprep.mubr.msk.bf16.mxu1 %vm6549_vm1, %v6548_v3 }
0x1f0c   :  { %v2511_v57 = vpop.f32.mrf.mxu1 }
0x1f0d   :  { %v2512_v6 = vadd.f32 %v5350_v9, %v2511_v57 }
0x1f0e   :  { %v5938_v18 = vpop.f32.mrf.mxu1 }
0x1f0f   :  { %v2520_v12 = vmul.f32 0.70710677, %v2512_v6 }
0x1f10   :  { %v2514_v45 = vpop.f32.mrf.mxu1 }
0x1f11   :  { %v2522_v49 = vand.u32 2147483647, %v2520_v12  ;;  %v2515_v16 = vadd.f32 %v5350_v9, %v2514_v45  ;;  %vm2562_vm2 = vcmp.ge.f32.partialorder %v2520_v12, 0.0  ;;  %v5353_v12 = vld [vmem:[%s8132_s2 + $0x1a] ss:$0 sm:$0xff] }
0x1f12   :  { %v5939_v23 = vpop.f32.mrf.mxu1 }
0x1f13   :  { %v2524_v29 = vmul.f32 0.3275911, %v2522_v49  ;;  %v2521_v55 = vmul.f32 0.70710677, %v2515_v16  ;;  %v2550_v40 = vsub.f32 0.0, %v2522_v49 }
0x1f15   :  { %v2526_v27 = vadd.f32 1.0, %v2524_v29  ;;  %v2523_v5 = vand.u32 2147483647, %v2521_v55  ;;  %v2552_v10 = vmul.f32 %v2550_v40, %v2522_v49  ;;  %vm2563_vm3 = vcmp.ge.f32.partialorder %v2521_v55, 0.0 }
0x1f17   :  { %6339 = vrcp.f32 %v2526_v27  ;;  %v2525_v38 = vmul.f32 0.3275911, %v2523_v5  ;;  %v2551_v17 = vsub.f32 0.0, %v2523_v5  ;;  %v2554_v19 = vmul.f32 1.442695, %v2552_v10 }
0x1f19   :  { %v2527_v13 = vadd.f32 1.0, %v2525_v38  ;;  %v2553_v47 = vmul.f32 %v2551_v17, %v2523_v5 }
0x1f1b   :  { %6341 = vrcp.f32 %v2527_v13  ;;  %v2556_v59 = vmul.f32 1.442695, %v2553_v47 }
0x1f1c   :  { %6343 = vpow2.f32 %v2554_v19 }
0x1f1d   :  { %6345 = vpow2.f32 %v2556_v59 }
0x1f24   :  { %v6340_v41 = vpop.eup %6339 }
0x1f25   :  { %v2532_v42 = vmul.f32 1.0614054, %v6340_v41 }
0x1f27   :  { %v2534_v48 = vadd.f32 -1.4531521, %v2532_v42 }
0x1f28   :  { %v6342_v52 = vpop.eup %6341 }
0x1f29   :  { %v2536_v15 = vmul.f32 %v6340_v41, %v2534_v48  ;;  %v2533_v58 = vmul.f32 1.0614054, %v6342_v52  ;;  %v6344_v49 = vpop.eup %6343  ;;  %v2518_v48 = vmul.f32 0.5, %v2512_v6 }
0x1f2a   :  { %v6346_v38 = vpop.eup %6345 }
0x1f2b   :  { %v2538_v20 = vadd.f32 1.4214138, %v2536_v15  ;;  %v2535_v33 = vadd.f32 -1.4531521, %v2533_v58  ;;  %v2519_v15 = vmul.f32 0.5, %v2515_v16 }
0x1f2d   :  { %v2540_v4 = vmul.f32 %v6340_v41, %v2538_v20  ;;  %v2537_v7 = vmul.f32 %v6342_v52, %v2535_v33 }
0x1f2f   :  { %v2542_v32 = vadd.f32 -0.28449672, %v2540_v4  ;;  %v2539_v21 = vadd.f32 1.4214138, %v2537_v7 }
0x1f31   :  { %v2544_v8 = vmul.f32 %v6340_v41, %v2542_v32  ;;  %v2541_v56 = vmul.f32 %v6342_v52, %v2539_v21 }
0x1f33   :  { %v2546_v9 = vadd.f32 0.2548296, %v2544_v8  ;;  %v2543_v57 = vadd.f32 -0.28449672, %v2541_v56 }
0x1f35   :  { %v2548_v18 = vmul.f32 %v6340_v41, %v2546_v9  ;;  %v2545_v45 = vmul.f32 %v6342_v52, %v2543_v57 }
0x1f37   :  { %v2558_v23 = vmul.f32 %v6344_v49, %v2548_v18  ;;  %v2547_v29 = vadd.f32 0.2548296, %v2545_v45 }
0x1f39   :  { %v2560_v27 = vsub.f32 1.0, %v2558_v23  ;;  %v2549_v5 = vmul.f32 %v6342_v52, %v2547_v29 }
0x1f3b   :  { %v2564_v13 = vsub.f32 0.0, %v2560_v27  ;;  %v2559_v40 = vmul.f32 %v6346_v38, %v2549_v5  ;;  %v5355_v5 = vld [vmem:[%s8131_s1 + $0x1a8] sm:$0x3] }
0x1f3d   :  { %v2566_v10 = vsel %vm2562_vm2, %v2560_v27, %v2564_v13  ;;  %v2561_v17 = vsub.f32 1.0, %v2559_v40  ;;  %v5354_v27 = vld [vmem:[%s8131_s1 + $0x1a0] sm:$0xff] }
0x1f3e   :  { %v2568_v19 = vadd.f32 1.0, %v2566_v10  ;;  %v2633_v38 = vpack.c.bf16 %v5355_v5, %v5354_v27  ;;  %v5381_v27 = vld [vmem:[%s8132_s2 + $0x1e] ss:$0 sm:$0xff] }
0x1f3f   :  { %v2565_v42 = vsub.f32 0.0, %v2561_v17 }
0x1f40   :  { %v2570_v41 = vmul.f32 %v2568_v19, %v2518_v48  ;;  %v2724_v13 = vsel %vm86_vm0, %v2633_v38, 0 }
0x1f41   :  { %v2567_v47 = vsel %vm2563_vm3, %v2561_v17, %v2565_v42  ;;  %5951 = vmatpush3.bf16.msra.mxu1 %v2724_v13 }
0x1f42   :  { %v2569_v58 = vadd.f32 1.0, %v2567_v47  ;;  %5956 = vmatprep.subr.bf16.mxu1 %v6548_v3 }
0x1f44   :  { %v2571_v59 = vmul.f32 %v2569_v58, %v2519_v15  ;;  %v5377_v58 = vld [vmem:[%s8132_s2 + $0x1b] ss:$0 sm:$0xff] }
0x1f46   :  { %v2572_v20 = vpack.c.bf16 %v2571_v59, %v2570_v41  ;;  %v5356_v59 = vld [vmem:[%s8131_s1 + $0x1b0] sm:$0xff] }
0x1f48   :  { %5947 = vmatmul.mubr.msk.bf16.vlgmr.msra.gmra.mxu0 %vm919_vm13, %v2572_v20  ;;  %v5357_v20 = vld [vmem:[%s8131_s1 + $0x1b8] sm:$0x3] }
0x1f49   :  { %5964 = vmatprep.mubr.msk.bf16.mxu0 %vm82_vm4, %v6649_v62 }
0x2008   :  { %v2613_v52 = vpop.f32.mrf.mxu0 }
0x2009   :  { %v2620_v33 = vadd.f32 %v2613_v52, %v7369_v44 }
0x200a   :  { %v5948_v55 = vpop.f32.mrf.mxu0 }
0x200b   :  { %v7427_v4 = vadd.f32 %v5353_v12, %v2620_v33  ;;  %v5378_v33 = vld [vmem:[%s8132_s2 + $0x1c] ss:$0 sm:$0xff] }
0x200c   :  { %v2616_v6 = vpop.f32.mrf.mxu0 }
0x200d   :  { %v2621_v16 = vadd.f32 %v2616_v6, %v7374_v1  ;;  %v2671_v7 = vsel %vm82_vm4, %v7427_v4, 0.0  ;;  %v2636_v6 = vpack.c.bf16 %v5357_v20, %v5356_v59 }
0x200e   :  { %2672 = vadd.xlane.f32.xlu1 %v2671_v7  ;;  %v5949_v32 = vpop.f32.mrf.mxu0 }
0x200f   :  { %v7432_v21 = vadd.f32 %v5353_v12, %v2621_v16 }
0x2011   :  { %v2674_v8 = vsel %vm173_vm5, %v7432_v21, 0.0 }
0x2012   :  { %2675 = vadd.xlane.f32.xlu0 %v2674_v8  ;;  %v2774_v8 = vsel %vm86_vm0, %v2636_v6, 0 }
0x2097   :  { %v2673_v56 = vpop.xlane.xlu1 %2672 }
0x2098   :  { %v2677_v9 = vmul.f32 0.1, %v2673_v56 }
0x209a   :  { %v2679_v44 = vsub.f32 %v7427_v4, %v2677_v9  ;;  %v5379_v9 = vld [vmem:[%s8132_s2 + $0x1d] ss:$0 sm:$0xff] }
0x209b   :  { %v2676_v57 = vpop.xlane.xlu0 %2675 }
0x209c   :  { %v2678_v18 = vmul.f32 0.1, %v2676_v57  ;;  %v2681_v45 = vmul.f32 %v2679_v44, %v2679_v44 }
0x209e   :  { %v2680_v1 = vsub.f32 %v7432_v21, %v2678_v18  ;;  %v2683_v49 = vsel %vm82_vm4, %v2681_v45, 0.0 }
0x209f   :  { %2684 = vadd.xlane.f32.xlu1 %v2683_v49 }
0x20a0   :  { %v2682_v23 = vmul.f32 %v2680_v1, %v2680_v1 }
0x20a2   :  { %v2686_v29 = vsel %vm173_vm5, %v2682_v23, 0.0 }
0x20a3   :  { %2687 = vadd.xlane.f32.xlu0 %v2686_v29 }
0x2128   :  { %v2685_v40 = vpop.xlane.xlu1 %2684 }
0x2129   :  { %v2689_v10 = vmul.f32 0.1, %v2685_v40 }
0x212b   :  { %v2691_v17 = vadd.f32 1e-05, %v2689_v10 }
0x212c   :  { %v2688_v42 = vpop.xlane.xlu0 %2687 }
0x212d   :  { %6347 = vrsqrt.f32 %v2691_v17  ;;  %v2690_v19 = vmul.f32 0.1, %v2688_v42 }
0x212f   :  { %v2692_v47 = vadd.f32 1e-05, %v2690_v19 }
0x2131   :  { %6349 = vrsqrt.f32 %v2692_v47 }
0x213a   :  { %v6348_v48 = vpop.eup %6347 }
0x213b   :  { %v2695_v15 = vmul.f32 %v6348_v48, %v2679_v44 }
0x213d   :  { %v2703_v52 = vmul.f32 %v5377_v58, %v2695_v15 }
0x213e   :  { %v6350_v41 = vpop.eup %6349 }
0x213f   :  { %v2696_v12 = vmul.f32 %v6350_v41, %v2680_v1  ;;  %v2711_v16 = vadd.f32 %v5378_v33, %v2703_v52 }
0x2141   :  { %v2704_v55 = vmul.f32 %v5377_v58, %v2696_v12 }
0x2143   :  { %v2712_v7 = vadd.f32 %v5378_v33, %v2704_v55 }
0x2145   :  { %v2713_v32 = vpack.c.bf16 %v2712_v7, %v2711_v16 }
0x2147   :  { %5953 = vmatmul.mubr.msk.bf16.vlgmr.msra.gmra.mxu1 %vm82_vm4, %v2713_v32 }
0x2148   :  { %5957 = vmatpush3.bf16.msra.mxu1 %v2774_v8  ;;  %5958 = vmatprep.mubr.msk.bf16.mxu1 %vm6549_vm1, %v6548_v3 }
0x214f   :  { %5959 = vmatmul.mubr.msk.bf16.vlgmr.msra.gmra.mxu1 %vm82_vm4, %v2713_v32 }
0x2207   :  { %v2760_v56 = vpop.f32.mrf.mxu1 }
0x2208   :  { %v2761_v18 = vadd.f32 %v5379_v9, %v2760_v56 }
0x2209   :  { %v5954_v44 = vpop.f32.mrf.mxu1 }
0x220b   :  { %v2763_v57 = vpop.f32.mrf.mxu1 }
0x220c   :  { %v2764_v45 = vadd.f32 %v5379_v9, %v2763_v57 }
0x220d   :  { %v5955_v1 = vpop.f32.mrf.mxu1 }
0x220e   :  { %v2818_v49 = vpack.c.bf16 %v2764_v45, %v2761_v18 }
0x220f   :  { %v2810_v23 = vpop.f32.mrf.mxu1 }
0x2210   :  { %6199 = vmatprep.subr.msk.bf16.mxu0 %vm86_vm0, %v2818_v49  ;;  %v2820_v29 = vsel %vm86_vm0, %v2818_v49, 0  ;;  %v2811_v13 = vadd.f32 %v5381_v27, %v2810_v23 }
0x2211   :  { %v5960_v5 = vpop.f32.mrf.mxu1  ;;  %5963 = vmatpush3.bf16.msra.mxu0 %v2820_v29 }
0x2213   :  { %v2813_v38 = vpop.f32.mrf.mxu1 }
0x2214   :  { %v2814_v40 = vadd.f32 %v5381_v27, %v2813_v38  ;;  %5965 = vmatmul.mubr.msk.bf16.vlgmr.msra.gmra.mxu0 %vm82_vm4, %v6675_v24 }
0x2215   :  { %v5961_v10 = vpop.f32.mrf.mxu1  ;;  %5968 = vmatprep.mubr.msk.bf16.mxu0 %vm82_vm4, %v6677_v25 }
0x2216   :  { %v2817_v17 = vpack.c.bf16 %v2814_v40, %v2811_v13 }
0x2218   :  { %6200 = vmatprep.subr.msk.bf16.mxu1 %vm410_vm6, %v2817_v17  ;;  %6201 = vmatprep.subr.msk.bf16.mxu0 %vm86_vm0, %v2817_v17  ;;  %v2910_v42 = vsel %vm410_vm6, %v2817_v17, 0  ;;  %v3069_v19 = vsel %vm86_vm0, %v2817_v17, 0 }
0x2219   :  { %5973 = vmatpush3.bf16.xpose.msra.mxu1 %v2910_v42  ;;  %5983 = vmatpush3.bf16.msra.mxu0 %v3069_v19 }
0x221a   :  { %5992 = vmatprep.subr.bf16.mxu1 %v6548_v3  ;;  %6012 = vmatprep.subr.bf16.mxu0 %v6548_v3 }
0x221c   :  { %5969 = vmatmul.mubr.msk.bf16.gmra.mxu0 %vm82_vm4, %v6690_v28 }
0x22d4   :  { %v5966_v47 = vpop.f32.mrf.mxu0 }
0x22d5   :  { %v2888_v12 = vmul.f32 %v7210_v39, %v5966_v47 }
0x22d6   :  { %v2856_v48 = vpop.f32.mrf.mxu0 }
0x22d7   :  { %v2886_v59 = vmul.f32 %v7198_v63, %v2856_v48 }
0x22d8   :  { %v5967_v15 = vpop.f32.mrf.mxu0 }
0x22d9   :  { %v2889_v58 = vmul.f32 %v7192_v36, %v5967_v15 }
0x22da   :  { %v2859_v41 = vpop.f32.mrf.mxu0 }
0x22db   :  { %v2887_v20 = vmul.f32 %v7204_v37, %v2859_v41  ;;  %v2894_v55 = vpack.c.bf16 %v2889_v58, %v2888_v12 }
0x22dc   :  { %v5970_v52 = vpop.f32.mrf.mxu0 }
0x22dd   :  { %v2893_v33 = vpack.c.bf16 %v2887_v20, %v2886_v59  ;;  %v2892_v7 = vmul.f32 %v7218_v46, %v5970_v52 }
0x22de   :  { %v2872_v6 = vpop.f32.mrf.mxu0 }
0x22df   :  { %5974 = vmatprep.mubr.msk.bf16.mxu1 %vm410_vm6, %v2893_v33  ;;  %v2890_v36 = vmul.f32 %v7224_v50, %v2872_v6  ;;  %v2896_v37 = vpack.c.bf16 %v2892_v7, %v2892_v7 }
0x22e0   :  { %v5971_v16 = vpop.f32.mrf.mxu0  ;;  %5975 = vmatmul.mubr.msk.bf16.vlgmr.msra.gmra.mxu1 %vm410_vm6, %v2894_v55 }
0x22e2   :  { %v2875_v32 = vpop.f32.mrf.mxu0 }
0x22e3   :  { %v2891_v63 = vmul.f32 %v7230_v54, %v2875_v32 }
0x22e5   :  { %v2895_v8 = vpack.c.bf16 %v2891_v63, %v2890_v36 }
0x22e7   :  { %5978 = vmatprep.mubr.msk.bf16.mxu1 %vm410_vm6, %v2895_v8 }
0x22e8   :  { %5979 = vmatmul.mubr.msk.bf16.gmra.mxu1 %vm410_vm6, %v2896_v37 }
0x22e9   :  { %6000 = vmatprep.mubr.msk.bf16.mxu1 %vm6549_vm1, %v6548_v3 }
0x23a0   :  { %v5976_v39 = vpop.f32.mrf.mxu1 }
0x23a1   :  { %v2955_v46 = vadd.f32 %v7246_v26, %v5976_v39 }
0x23a2   :  { %v2946_v56 = vpop.f32.mrf.mxu1 }
0x23a3   :  { %v2947_v9 = vadd.f32 %v7240_v51, %v2946_v56  ;;  %v2982_v49 = vsel %vm82_vm4, %v2955_v46, -inf }
0x23a4   :  { %v5977_v44 = vpop.f32.mrf.mxu1 }
0x23a5   :  { %v2976_v50 = vsel %vm82_vm4, %v2947_v9, -inf  ;;  %v2958_v45 = vadd.f32 %v7259_v34, %v5977_v44 }
0x23a6   :  { %v2949_v57 = vpop.f32.mrf.mxu1  ;;  %2977 = vmax.xlane.f32.xlu1 %v2976_v50 }
0x23a7   :  { %v2950_v54 = vadd.f32 %v7253_v31, %v2949_v57  ;;  %v2985_v27 = vsel %vm82_vm4, %v2958_v45, -inf }
0x23a8   :  { %v5980_v18 = vpop.f32.mrf.mxu1 }
0x23a9   :  { %v2979_v1 = vsel %vm82_vm4, %v2950_v54, -inf  ;;  %v2971_v26 = vadd.f32 %v7273_v14, %v5980_v18 }
0x23aa   :  { %2980 = vmax.xlane.f32.xlu0 %v2979_v1  ;;  %2983 = vmax.xlane.f32.xlu1 %v2982_v49  ;;  %v2962_v23 = vpop.f32.mrf.mxu1 }
0x23ab   :  { %v2963_v51 = vadd.f32 %v7267_v2, %v2962_v23  ;;  %v2994_v13 = vsel %vm173_vm5, %v2971_v26, -inf }
0x23ac   :  { %v5981_v29 = vpop.f32.mrf.mxu1 }
0x23ad   :  { %v2988_v5 = vsel %vm82_vm4, %v2963_v51, -inf }
0x23ae   :  { %2986 = vmax.xlane.f32.xlu0 %v2985_v27  ;;  %v2965_v31 = vpop.f32.mrf.mxu1  ;;  %2989 = vmax.xlane.f32.xlu1 %v2988_v5 }
0x23af   :  { %v2966_v34 = vadd.f32 %v7281_v22, %v2965_v31 }
0x23b1   :  { %v2991_v38 = vsel %vm82_vm4, %v2966_v34, -inf }
0x23b2   :  { %2992 = vmax.xlane.f32.xlu0 %v2991_v38  ;;  %2995 = vmax.xlane.f32.xlu1 %v2994_v13 }
0x242f   :  { %v2978_v40 = vpop.xlane.xlu1 %2977 }
0x2430   :  { %v2997_v2 = vsub.f32 %v2947_v9, %v2978_v40 }
0x2432   :  { %v3004_v10 = vmul.f32 1.442695, %v2997_v2 }
0x2433   :  { %v2981_v17 = vpop.xlane.xlu0 %2980  ;;  %v2984_v14 = vpop.xlane.xlu1 %2983 }
0x2434   :  { %6351 = vpow2.f32 %v3004_v10  ;;  %v2998_v42 = vsub.f32 %v2950_v54, %v2981_v17  ;;  %v2999_v19 = vsub.f32 %v2955_v46, %v2984_v14 }
0x2436   :  { %v3006_v47 = vmul.f32 1.442695, %v2998_v42  ;;  %v3008_v48 = vmul.f32 1.442695, %v2999_v19 }
0x2437   :  { %v2987_v15 = vpop.xlane.xlu0 %2986  ;;  %v2990_v58 = vpop.xlane.xlu1 %2989 }
0x2438   :  { %6353 = vpow2.f32 %v3006_v47  ;;  %v3000_v22 = vsub.f32 %v2958_v45, %v2987_v15  ;;  %v3001_v41 = vsub.f32 %v2963_v51, %v2990_v58 }
0x2439   :  { %6355 = vpow2.f32 %v3008_v48 }
0x243a   :  { %v3010_v59 = vmul.f32 1.442695, %v3000_v22  ;;  %v3012_v20 = vmul.f32 1.442695, %v3001_v41 }
0x243b   :  { %v2993_v12 = vpop.xlane.xlu0 %2992  ;;  %v2996_v52 = vpop.xlane.xlu1 %2995 }
0x243c   :  { %6357 = vpow2.f32 %v3010_v59  ;;  %v3002_v33 = vsub.f32 %v2966_v34, %v2993_v12  ;;  %v3003_v55 = vsub.f32 %v2971_v26, %v2996_v52 }
0x243d   :  { %6359 = vpow2.f32 %v3012_v20 }
0x243e   :  { %v3014_v6 = vmul.f32 1.442695, %v3002_v33  ;;  %v3016_v16 = vmul.f32 1.442695, %v3003_v55 }
0x2440   :  { %6361 = vpow2.f32 %v3014_v6 }
0x2441   :  { %v6352_v7 = vpop.eup %6351  ;;  %6363 = vpow2.f32 %v3016_v16 }
0x2442   :  { %v3018_v32 = vsel %vm82_vm4, %v6352_v7, 0.0 }
0x2443   :  { %3019 = vadd.xlane.f32.xlu0 %v3018_v32 }
0x2445   :  { %v6354_v36 = vpop.eup %6353 }
0x2446   :  { %v6356_v63 = vpop.eup %6355  ;;  %v3021_v8 = vsel %vm82_vm4, %v6354_v36, 0.0 }
0x2447   :  { %v3024_v37 = vsel %vm82_vm4, %v6356_v63, 0.0  ;;  %3022 = vadd.xlane.f32.xlu1 %v3021_v8 }
0x2448   :  { %3025 = vadd.xlane.f32.xlu0 %v3024_v37 }
0x2449   :  { %v6358_v39 = vpop.eup %6357 }
0x244a   :  { %v6360_v56 = vpop.eup %6359  ;;  %v3027_v9 = vsel %vm82_vm4, %v6358_v39, 0.0 }
0x244b   :  { %3028 = vadd.xlane.f32.xlu1 %v3027_v9  ;;  %v3030_v44 = vsel %vm82_vm4, %v6360_v56, 0.0 }
0x244c   :  { %3031 = vadd.xlane.f32.xlu0 %v3030_v44 }
0x244d   :  { %v6362_v46 = vpop.eup %6361 }
0x244e   :  { %v6364_v50 = vpop.eup %6363  ;;  %v3033_v57 = vsel %vm82_vm4, %v6362_v46, 0.0 }
0x244f   :  { %3034 = vadd.xlane.f32.xlu1 %v3033_v57  ;;  %v3036_v54 = vsel %vm173_vm5, %v6364_v50, 0.0 }
0x2450   :  { %3037 = vadd.xlane.f32.xlu0 %v3036_v54 }
0x24cc   :  { %v3020_v18 = vpop.xlane.xlu0 %3019 }
0x24cd   :  { %6365 = vrcp.f32 %v3020_v18  ;;  %v5397_v18 = vld [vmem:[%s8132_s2 + $0x1f] ss:$0 sm:$0xff] }
0x24d0   :  { %v3023_v45 = vpop.xlane.xlu1 %3022 }
0x24d1   :  { %v3026_v1 = vpop.xlane.xlu0 %3025  ;;  %6367 = vrcp.f32 %v3023_v45 }
0x24d2   :  { %6369 = vrcp.f32 %v3026_v1 }
0x24d4   :  { %v3029_v49 = vpop.xlane.xlu1 %3028 }
0x24d5   :  { %v3032_v23 = vpop.xlane.xlu0 %3031  ;;  %6371 = vrcp.f32 %v3029_v49 }
0x24d6   :  { %6373 = vrcp.f32 %v3032_v23 }
0x24d8   :  { %v3035_v51 = vpop.xlane.xlu1 %3034 }
0x24d9   :  { %v3038_v29 = vpop.xlane.xlu0 %3037  ;;  %6375 = vrcp.f32 %v3035_v51 }
0x24da   :  { %6377 = vrcp.f32 %v3038_v29  ;;  %v6366_v26 = vpop.eup %6365 }
0x24db   :  { %v3046_v5 = vmul.f32 %v6366_v26, %v6352_v7 }
0x24de   :  { %v6368_v27 = vpop.eup %6367 }
0x24df   :  { %v3047_v31 = vmul.f32 %v6368_v27, %v6354_v36  ;;  %v6370_v34 = vpop.eup %6369 }
0x24e0   :  { %v3048_v40 = vmul.f32 %v6370_v34, %v6356_v63 }
0x24e1   :  { %v3053_v38 = vpack.c.bf16 %v3047_v31, %v3046_v5 }
0x24e2   :  { %v6372_v13 = vpop.eup %6371 }
0x24e3   :  { %v3049_v2 = vmul.f32 %v6372_v13, %v6358_v39  ;;  %5984 = vmatprep.mubr.msk.bf16.mxu0 %vm82_vm4, %v3053_v38  ;;  %v6374_v10 = vpop.eup %6373 }
0x24e4   :  { %v3050_v19 = vmul.f32 %v6374_v10, %v6360_v56 }
0x24e5   :  { %v3054_v17 = vpack.c.bf16 %v3049_v2, %v3048_v40 }
0x24e6   :  { %v6376_v14 = vpop.eup %6375 }
0x24e7   :  { %v6378_v42 = vpop.eup %6377  ;;  %5985 = vmatmul.mubr.msk.bf16.vlgmr.msra.gmra.mxu0 %vm82_vm4, %v3054_v17  ;;  %v3051_v47 = vmul.f32 %v6376_v14, %v6362_v46 }
0x24e8   :  { %v3052_v15 = vmul.f32 %v6378_v42, %v6364_v50  ;;  %v5361_v42 = vld [vmem:[%s8131_s1 + $0x150] sm:$0xff] }
0x24e9   :  { %v3055_v48 = vpack.c.bf16 %v3051_v47, %v3050_v19  ;;  %v5362_v19 = vld [vmem:[%s8131_s1 + $0x158] sm:$0x3] }
0x24ea   :  { %v3056_v58 = vpack.c.bf16 %v3052_v15, %v3052_v15  ;;  %v2644_v47 = vpack.c.bf16 %v5362_v19, %v5361_v42 }
0x24eb   :  { %5988 = vmatprep.mubr.msk.bf16.mxu0 %vm82_vm4, %v3055_v48 }
0x24ec   :  { %v3301_v48 = vsel %vm86_vm0, %v2644_v47, 0 }
0x24ed   :  { %6013 = vmatpush3.bf16.msra.mxu0 %v3301_v48 }
0x24ee   :  { %6028 = vmatprep.subr.bf16.mxu0 %v6548_v3 }
0x24ef   :  { %5989 = vmatmul.mubr.msk.bf16.gmra.mxu0 %vm82_vm4, %v3056_v58 }
0x24f0   :  { %6014 = vmatprep.mubr.msk.bf16.mxu0 %vm6549_vm1, %v6548_v3 }
0x25a7   :  { %v5986_v22 = vpop.f32.mrf.mxu0 }
0x25a8   :  { %v3137_v37 = vmul.f32 %v7328_v43, %v5986_v22 }
0x25a9   :  { %v3105_v41 = vpop.f32.mrf.mxu0 }
0x25aa   :  { %v3135_v56 = vmul.f32 %v7341_v61, %v3105_v41  ;;  %v5359_v61 = vld [vmem:[%s8131_s1 + $0x190] sm:$0xff] }
0x25ab   :  { %v5987_v59 = vpop.f32.mrf.mxu0 }
0x25ac   :  { %v3138_v63 = vmul.f32 %v7322_v11, %v5987_v59 }
0x25ad   :  { %v3108_v20 = vpop.f32.mrf.mxu0 }
0x25ae   :  { %v3136_v39 = vmul.f32 %v7335_v53, %v3108_v20  ;;  %v5358_v53 = vld [vmem:[%s8131_s1 + $0x188] sm:$0xff] }
0x25af   :  { %v5990_v12 = vpop.f32.mrf.mxu0  ;;  %v2640_v9 = vpack.c.bf16 %v5359_v61, %v5358_v53  ;;  %v5400_v61 = vld [vmem:[%s8132_s2 + $0x22] ss:$0 sm:$0xff] }
0x25b0   :  { %v3141_v52 = vmul.f32 %v7302_v60, %v5990_v12  ;;  %v3143_v60 = vpack.c.bf16 %v3138_v63, %v3137_v37  ;;  %v5367_v37 = vld [vmem:[%s8131_s1 + $0x180] sm:$0xff] }
0x25b1   :  { %v3121_v33 = vpop.f32.mrf.mxu0 }
0x25b2   :  { %v3145_v55 = vpack.c.bf16 %v3141_v52, %v3141_v52  ;;  %v3139_v32 = vmul.f32 %v7309_v35, %v3121_v33  ;;  %v3142_v35 = vpack.c.bf16 %v3136_v39, %v3135_v56  ;;  %v5398_v33 = vld [vmem:[%s8132_s2 + $0x20] ss:$0 sm:$0xff]  ;;  %v5365_v56 = vld [vmem:[%s8131_s1 + $0x170] sm:$0xff] }
0x25b3   :  { %v5991_v6 = vpop.f32.mrf.mxu0 }
0x25b4   :  { %v3147_v16 = vsel %vm664_vm7, %v3145_v55, 0 }
0x25b5   :  { %v3124_v7 = vpop.f32.mrf.mxu0  ;;  %5993 = vmatpush3.bf16.msra.mxu1 %v3147_v16 }
0x25b6   :  { %v3140_v36 = vmul.f32 %v7315_v0, %v3124_v7  ;;  %5994 = vmatprep.subr.bf16.mxu1 %v6548_v3  ;;  %v5360_v0 = vld [vmem:[%s8131_s1 + $0x198] sm:$0xf]  ;;  %v5399_v7 = vld [vmem:[%s8132_s2 + $0x21] ss:$0 sm:$0xff] }
0x25b7   :  { %v2641_v11 = vpack.c.bf16 %v5360_v0, %v5360_v0 }
0x25b8   :  { %v3144_v8 = vpack.c.bf16 %v3140_v36, %v3139_v32 }
0x25b9   :  { %v3195_v43 = vsel %vm713_vm9, %v2641_v11, 0  ;;  %v5363_v11 = vld [vmem:[%s8131_s1 + $0x160] sm:$0xff] }
0x25ba   :  { %5995 = vmatpush3.bf16.msra.mxu1 %v3144_v8 }
0x25bb   :  { %5996 = vmatprep.subr.bf16.mxu1 %v6548_v3 }
0x25be   :  { %5997 = vmatpush3.bf16.msra.mxu1 %v3143_v60  ;;  %v2652_v60 = vpack.c.bf16 %v5367_v37, %v5367_v37 }
0x25bf   :  { %5998 = vmatprep.subr.bf16.mxu1 %v6548_v3 }
0x25c0   :  { %v3403_v39 = vsel %vm923_vm10, %v2652_v60, 0 }
0x25c2   :  { %5999 = vmatpush3.bf16.msra.mxu1 %v3142_v35  ;;  %v5366_v35 = vld [vmem:[%s8131_s1 + $0x178] sm:$0xff] }
0x25c3   :  { %6004 = vmatprep.subr.bf16.mxu1 %v6548_v3  ;;  %v2651_v0 = vpack.c.bf16 %v5366_v35, %v5365_v56 }
0x25c5   :  { %6001 = vmatmul.mubr.msk.bf16.vlgmr.msra.gmra.mxu1 %vm660_vm8, %v6856_v30 }
0x25c6   :  { %6008 = vmatprep.mubr.msk.bf16.mxu1 %vm6549_vm1, %v6548_v3  ;;  %6005 = vmatpush3.bf16.msra.mxu1 %v3195_v43  ;;  %v5364_v43 = vld [vmem:[%s8131_s1 + $0x168] sm:$0xff] }
0x25c7   :  { %6006 = vmatprep.subr.bf16.mxu1 %v6548_v3  ;;  %v2650_v53 = vpack.c.bf16 %v5364_v43, %v5363_v11 }
0x25ca   :  { %6007 = vmatpush3.bf16.msra.mxu1 %v2640_v9 }
0x25cb   :  { %6018 = vmatprep.subr.bf16.mxu1 %v6548_v3 }
0x2685   :  { %v3183_v44 = vpop.f32.mrf.mxu1 }
0x2687   :  { %v6002_v46 = vpop.f32.mrf.mxu1 }
0x2689   :  { %v3186_v50 = vpop.f32.mrf.mxu1 }
0x268a   :  { %v3190_v57 = vpack.c.bf16 %v3186_v50, %v3183_v44 }
0x268b   :  { %v6003_v54 = vpop.f32.mrf.mxu1 }
0x268c   :  { %6009 = vmatmul.mubr.msk.bf16.vlgmr.msra.gmra.mxu1 %vm410_vm6, %v3190_v57 }
0x268d   :  { %6024 = vmatprep.mubr.msk.bf16.mxu1 %vm6549_vm1, %v6548_v3  ;;  %6019 = vmatpush3.bf16.msra.mxu1 %v3403_v39 }
0x268e   :  { %6020 = vmatprep.subr.bf16.mxu1 %v6548_v3 }
0x2691   :  { %6021 = vmatpush3.bf16.msra.mxu1 %v2651_v0 }
0x2692   :  { %6022 = vmatprep.subr.bf16.mxu1 %v6548_v3 }
0x2695   :  { %6023 = vmatpush3.bf16.msra.mxu1 %v2650_v53 }
0x274c   :  { %v3231_v45 = vpop.f32.mrf.mxu1 }
0x274d   :  { %v3238_v1 = vadd.f32 %v3231_v45, %v7427_v4 }
0x274e   :  { %v6010_v49 = vpop.f32.mrf.mxu1 }
0x274f   :  { %v7560_v23 = vadd.f32 %v5397_v18, %v3238_v1 }
0x2750   :  { %v3234_v51 = vpop.f32.mrf.mxu1 }
0x2751   :  { %v3239_v29 = vadd.f32 %v3234_v51, %v7432_v21  ;;  %v3248_v26 = vsel %vm82_vm4, %v7560_v23, 0.0 }
0x2752   :  { %3249 = vadd.xlane.f32.xlu1 %v3248_v26  ;;  %v6011_v27 = vpop.f32.mrf.mxu1 }
0x2753   :  { %v7565_v5 = vadd.f32 %v5397_v18, %v3239_v29 }
0x2755   :  { %v3251_v31 = vsel %vm173_vm5, %v7565_v5, 0.0 }
0x2756   :  { %3252 = vadd.xlane.f32.xlu0 %v3251_v31 }
0x27db   :  { %v3250_v34 = vpop.xlane.xlu1 %3249 }
0x27dc   :  { %v3254_v38 = vmul.f32 0.1, %v3250_v34 }
0x27de   :  { %v3256_v4 = vsub.f32 %v7560_v23, %v3254_v38 }
0x27df   :  { %v3253_v13 = vpop.xlane.xlu0 %3252 }
0x27e0   :  { %v3255_v40 = vmul.f32 0.1, %v3253_v13  ;;  %v3258_v2 = vmul.f32 %v3256_v4, %v3256_v4 }
0x27e2   :  { %v3257_v21 = vsub.f32 %v7565_v5, %v3255_v40  ;;  %v3260_v10 = vsel %vm82_vm4, %v3258_v2, 0.0 }
0x27e3   :  { %3261 = vadd.xlane.f32.xlu1 %v3260_v10 }
0x27e4   :  { %v3259_v17 = vmul.f32 %v3257_v21, %v3257_v21 }
0x27e6   :  { %v3263_v14 = vsel %vm173_vm5, %v3259_v17, 0.0 }
0x27e7   :  { %3264 = vadd.xlane.f32.xlu0 %v3263_v14 }
0x286c   :  { %v3262_v15 = vpop.xlane.xlu1 %3261 }
0x286d   :  { %v3266_v58 = vmul.f32 0.1, %v3262_v15 }
0x286f   :  { %v3268_v22 = vadd.f32 1e-05, %v3266_v58 }
0x2870   :  { %v3265_v41 = vpop.xlane.xlu0 %3264 }
0x2871   :  { %6379 = vrsqrt.f32 %v3268_v22  ;;  %v3267_v59 = vmul.f32 0.1, %v3265_v41 }
0x2873   :  { %v3269_v20 = vadd.f32 1e-05, %v3267_v59 }
0x2875   :  { %6381 = vrsqrt.f32 %v3269_v20 }
0x287e   :  { %v6380_v12 = vpop.eup %6379 }
0x287f   :  { %v3272_v52 = vmul.f32 %v6380_v12, %v3256_v4 }
0x2881   :  { %v3280_v6 = vmul.f32 %v5398_v33, %v3272_v52 }
0x2882   :  { %v6382_v55 = vpop.eup %6381 }
0x2883   :  { %v3273_v16 = vmul.f32 %v6382_v55, %v3257_v21  ;;  %v3288_v36 = vadd.f32 %v5399_v7, %v3280_v6 }
0x2885   :  { %v3281_v32 = vmul.f32 %v5398_v33, %v3273_v16 }
0x2887   :  { %v3289_v63 = vadd.f32 %v5399_v7, %v3281_v32 }
0x2889   :  { %v3290_v8 = vpack.c.bf16 %v3289_v63, %v3288_v36 }
0x288b   :  { %6015 = vmatmul.mubr.msk.bf16.vlgmr.msra.gmra.mxu0 %vm82_vm4, %v3290_v8 }
0x288c   :  { %6030 = vmatprep.mubr.msk.bf16.mxu0 %vm6549_vm1, %v6548_v3 }
0x294b   :  { %v3337_v9 = vpop.f32.mrf.mxu0 }
0x294c   :  { %v3338_v44 = vadd.f32 %v5400_v61, %v3337_v9 }
0x294d   :  { %v6016_v46 = vpop.f32.mrf.mxu0 }
0x294e   :  { %v3346_v50 = vmul.f32 0.70710677, %v3338_v44  ;;  %v3344_v0 = vmul.f32 0.5, %v3338_v44  ;;  %v5403_v46 = vld [vmem:[%s8132_s2 + $0x23] ss:$0 sm:$0xff] }
0x294f   :  { %v3340_v57 = vpop.f32.mrf.mxu0 }
0x2950   :  { %v3348_v54 = vand.u32 2147483647, %v3346_v50  ;;  %v3341_v18 = vadd.f32 %v5400_v61, %v3340_v57  ;;  %vm3388_vm11 = vcmp.ge.f32.partialorder %v3346_v50, 0.0 }
0x2951   :  { %v6017_v45 = vpop.f32.mrf.mxu0 }
0x2952   :  { %v3350_v1 = vmul.f32 0.3275911, %v3348_v54  ;;  %v3347_v49 = vmul.f32 0.70710677, %v3341_v18  ;;  %v3376_v31 = vsub.f32 0.0, %v3348_v54  ;;  %v3345_v11 = vmul.f32 0.5, %v3341_v18 }
0x2954   :  { %v3352_v51 = vadd.f32 1.0, %v3350_v1  ;;  %v3349_v29 = vand.u32 2147483647, %v3347_v49  ;;  %v3378_v34 = vmul.f32 %v3376_v31, %v3348_v54  ;;  %vm3389_vm12 = vcmp.ge.f32.partialorder %v3347_v49, 0.0 }
0x2956   :  { %6383 = vrcp.f32 %v3352_v51  ;;  %v3351_v26 = vmul.f32 0.3275911, %v3349_v29  ;;  %v3377_v38 = vsub.f32 0.0, %v3349_v29  ;;  %v3380_v40 = vmul.f32 1.442695, %v3378_v34 }
0x2958   :  { %v3353_v27 = vadd.f32 1.0, %v3351_v26  ;;  %v3379_v2 = vmul.f32 %v3377_v38, %v3349_v29 }
0x295a   :  { %6385 = vrcp.f32 %v3353_v27  ;;  %v3382_v42 = vmul.f32 1.442695, %v3379_v2  ;;  %v5404_v2 = vld [vmem:[%s8131_s1 + $0x210] sm:$0xff] }
0x295b   :  { %6387 = vpow2.f32 %v3380_v40 }
0x295c   :  { %6389 = vpow2.f32 %v3382_v42 }
0x2963   :  { %v6384_v4 = vpop.eup %6383 }
0x2964   :  { %v3358_v13 = vmul.f32 1.0614054, %v6384_v4 }
0x2966   :  { %v3360_v21 = vadd.f32 -1.4531521, %v3358_v13 }
0x2967   :  { %v6386_v10 = vpop.eup %6385 }
0x2968   :  { %v3362_v17 = vmul.f32 %v6384_v4, %v3360_v21  ;;  %v3359_v14 = vmul.f32 1.0614054, %v6386_v10  ;;  %v6388_v55 = vpop.eup %6387  ;;  %v5405_v21 = vld [vmem:[%s8131_s1 + $0x218] sm:$0x3] }
0x2969   :  { %v6390_v36 = vpop.eup %6389 }
0x296a   :  { %v3364_v19 = vadd.f32 1.4214138, %v3362_v17  ;;  %v3361_v47 = vadd.f32 -1.4531521, %v3359_v14 }
0x296c   :  { %v3366_v48 = vmul.f32 %v6384_v4, %v3364_v19  ;;  %v3363_v15 = vmul.f32 %v6386_v10, %v3361_v47 }
0x296e   :  { %v3368_v58 = vadd.f32 -0.28449672, %v3366_v48  ;;  %v3365_v22 = vadd.f32 1.4214138, %v3363_v15 }
0x2970   :  { %v3370_v41 = vmul.f32 %v6384_v4, %v3368_v58  ;;  %v3367_v59 = vmul.f32 %v6386_v10, %v3365_v22 }
0x2972   :  { %v3372_v20 = vadd.f32 0.2548296, %v3370_v41  ;;  %v3369_v12 = vadd.f32 -0.28449672, %v3367_v59  ;;  %v5427_v41 = vld [vmem:[%s8132_s2 + $0x24] ss:$0 sm:$0xff] }
0x2974   :  { %v3374_v52 = vmul.f32 %v6384_v4, %v3372_v20  ;;  %v3371_v33 = vmul.f32 %v6386_v10, %v3369_v12  ;;  %v5406_v20 = vld [vmem:[%s8131_s1 + $0x220] sm:$0xff]  ;;  %v5407_v12 = vld [vmem:[%s8131_s1 + $0x228] sm:$0x3] }
0x2976   :  { %v3384_v6 = vmul.f32 %v6388_v55, %v3374_v52  ;;  %v3373_v16 = vadd.f32 0.2548296, %v3371_v33  ;;  %v5428_v55 = vld [vmem:[%s8132_s2 + $0x25] ss:$0 sm:$0xff] }
0x2978   :  { %v3386_v7 = vsub.f32 1.0, %v3384_v6  ;;  %v3375_v32 = vmul.f32 %v6386_v10, %v3373_v16  ;;  %v3459_v10 = vpack.c.bf16 %v5405_v21, %v5404_v2  ;;  %v3462_v16 = vpack.c.bf16 %v5407_v12, %v5406_v20 }
0x297a   :  { %v3390_v63 = vsub.f32 0.0, %v3386_v7  ;;  %v3385_v8 = vmul.f32 %v6390_v36, %v3375_v32  ;;  %v3550_v17 = vsel %vm86_vm0, %v3459_v10, 0 }
0x297b   :  { %6029 = vmatpush3.bf16.msra.mxu0 %v3550_v17 }
0x297c   :  { %v3392_v37 = vsel %vm3388_vm11, %v3386_v7, %v3390_v63  ;;  %v3387_v60 = vsub.f32 1.0, %v3385_v8  ;;  %6034 = vmatprep.subr.bf16.mxu0 %v6548_v3  ;;  %v3600_v63 = vsel %vm86_vm0, %v3462_v16, 0 }
0x297d   :  { %v3394_v56 = vadd.f32 1.0, %v3392_v37  ;;  %v5429_v37 = vld [vmem:[%s8132_s2 + $0x26] ss:$0 sm:$0xff] }
0x297e   :  { %v3391_v39 = vsub.f32 0.0, %v3387_v60 }
0x297f   :  { %v3396_v53 = vmul.f32 %v3394_v56, %v3344_v0 }
0x2980   :  { %v3393_v35 = vsel %vm3389_vm12, %v3387_v60, %v3391_v39 }
0x2981   :  { %v3395_v43 = vadd.f32 1.0, %v3393_v35 }
0x2983   :  { %v3397_v61 = vmul.f32 %v3395_v43, %v3345_v11 }
0x2985   :  { %v3398_v9 = vpack.c.bf16 %v3397_v61, %v3396_v53  ;;  %v5431_v61 = vld [vmem:[%s8132_s2 + $0x27] ss:$0 sm:$0xff] }
0x2987   :  { %6025 = vmatmul.mubr.msk.bf16.vlgmr.msra.gmra.mxu1 %vm919_vm13, %v3398_v9 }
0x2988   :  { %6042 = vmatprep.mubr.msk.bf16.mxu1 %vm82_vm4, %v6649_v62 }
0x2a47   :  { %v3439_v50 = vpop.f32.mrf.mxu1 }
0x2a48   :  { %v3446_v57 = vadd.f32 %v3439_v50, %v7560_v23 }
0x2a49   :  { %v6026_v54 = vpop.f32.mrf.mxu1 }
0x2a4a   :  { %v7618_v45 = vadd.f32 %v5403_v46, %v3446_v57 }
0x2a4b   :  { %v3442_v44 = vpop.f32.mrf.mxu1 }
0x2a4c   :  { %v3447_v18 = vadd.f32 %v3442_v44, %v7565_v5  ;;  %v3497_v1 = vsel %vm82_vm4, %v7618_v45, 0.0 }
0x2a4d   :  { %3498 = vadd.xlane.f32.xlu1 %v3497_v1  ;;  %v6027_v49 = vpop.f32.mrf.mxu1 }
0x2a4e   :  { %v7623_v51 = vadd.f32 %v5403_v46, %v3447_v18 }
0x2a50   :  { %v3500_v29 = vsel %vm173_vm5, %v7623_v51, 0.0 }
0x2a51   :  { %3501 = vadd.xlane.f32.xlu0 %v3500_v29 }
0x2ad6   :  { %v3499_v26 = vpop.xlane.xlu1 %3498 }
0x2ad7   :  { %v3503_v27 = vmul.f32 0.1, %v3499_v26 }
0x2ad9   :  { %v3505_v23 = vsub.f32 %v7618_v45, %v3503_v27  ;;  %v7679_v27 = vld [vmem:[%s8133_s3 + $0xa8] sm:$0xff] }
0x2ada   :  { %v3502_v31 = vpop.xlane.xlu0 %3501 }
0x2adb   :  { %v3504_v34 = vmul.f32 0.1, %v3502_v31  ;;  %v3507_v38 = vmul.f32 %v3505_v23, %v3505_v23 }
0x2add   :  { %v3506_v5 = vsub.f32 %v7623_v51, %v3504_v34  ;;  %v3509_v4 = vsel %vm82_vm4, %v3507_v38, 0.0  ;;  %v7685_v34 = vld [vmem:[%s8133_s3 + $0x90] sm:$0xff] }
0x2ade   :  { %3510 = vadd.xlane.f32.xlu1 %v3509_v4 }
0x2adf   :  { %v3508_v13 = vmul.f32 %v3506_v5, %v3506_v5 }
0x2ae1   :  { %v3512_v40 = vsel %vm173_vm5, %v3508_v13, 0.0  ;;  %v7697_v13 = vld [vmem:[%s8133_s3 + $0xa0] sm:$0xff] }
0x2ae2   :  { %3513 = vadd.xlane.f32.xlu0 %v3512_v40 }
0x2b67   :  { %v3511_v14 = vpop.xlane.xlu1 %3510 }
0x2b68   :  { %v3515_v42 = vmul.f32 0.1, %v3511_v14 }
0x2b6a   :  { %v3517_v19 = vadd.f32 1e-05, %v3515_v42  ;;  %v7705_v42 = vld [vmem:[%s8133_s3 + $0xc0] sm:$0x3] }
0x2b6b   :  { %v3514_v47 = vpop.xlane.xlu0 %3513 }
0x2b6c   :  { %6391 = vrsqrt.f32 %v3517_v19  ;;  %v3516_v48 = vmul.f32 0.1, %v3514_v47 }
0x2b6e   :  { %v3518_v15 = vadd.f32 1e-05, %v3516_v48  ;;  %v7711_v48 = vld [vmem:[%s8133_s3 + $0xb0] sm:$0xff] }
0x2b70   :  { %6393 = vrsqrt.f32 %v3518_v15 }
0x2b79   :  { %v6392_v58 = vpop.eup %6391 }
0x2b7a   :  { %v3521_v22 = vmul.f32 %v6392_v58, %v3505_v23  ;;  %v7717_v58 = vld [vmem:[%s8133_s3 + $0xb8] sm:$0xff] }
0x2b7c   :  { %v3529_v33 = vmul.f32 %v5427_v41, %v3521_v22 }
0x2b7d   :  { %v6394_v59 = vpop.eup %6393 }
0x2b7e   :  { %v3522_v52 = vmul.f32 %v6394_v59, %v3506_v5  ;;  %v3537_v7 = vadd.f32 %v5428_v55, %v3529_v33  ;;  %v7691_v5 = vld [vmem:[%s8133_s3 + $0x98] sm:$0xff] }
0x2b80   :  { %v3530_v6 = vmul.f32 %v5427_v41, %v3522_v52  ;;  %v7727_v52 = vld [vmem:[%s8133_s3 + $0x100] sm:$0xff] }
0x2b82   :  { %v3538_v32 = vadd.f32 %v5428_v55, %v3530_v6  ;;  %v7733_v6 = vld [vmem:[%s8133_s3 + $0x110] sm:$0xff] }
0x2b84   :  { %v3539_v36 = vpack.c.bf16 %v3538_v32, %v3537_v7 }
0x2b86   :  { %6031 = vmatmul.mubr.msk.bf16.vlgmr.msra.gmra.mxu0 %vm82_vm4, %v3539_v36 }
0x2b87   :  { %6035 = vmatpush3.bf16.msra.mxu0 %v3600_v63  ;;  %6036 = vmatprep.mubr.msk.bf16.mxu0 %vm6549_vm1, %v6548_v3 }
0x2b8e   :  { %6037 = vmatmul.mubr.msk.bf16.vlgmr.msra.gmra.mxu0 %vm82_vm4, %v3539_v36  ;;  %v7740_v36 = vld [vmem:[%s8133_s3 + $0x108] sm:$0xff] }
0x2c46   :  { %v3586_v8 = vpop.f32.mrf.mxu0 }
0x2c47   :  { %v3587_v56 = vadd.f32 %v5429_v37, %v3586_v8 }
0x2c48   :  { %v6032_v60 = vpop.f32.mrf.mxu0 }
0x2c4a   :  { %v3589_v39 = vpop.f32.mrf.mxu0 }
0x2c4b   :  { %v3590_v35 = vadd.f32 %v5429_v37, %v3589_v39  ;;  %v7746_v37 = vld [vmem:[%s8133_s3 + $0x118] sm:$0xff] }
0x2c4c   :  { %v6033_v0 = vpop.f32.mrf.mxu0 }
0x2c4d   :  { %v3644_v11 = vpack.c.bf16 %v3590_v35, %v3587_v56  ;;  %v7754_v0 = vld [vmem:[%s8133_s3 + $0x120] sm:$0xff] }
0x2c4e   :  { %v3636_v43 = vpop.f32.mrf.mxu0 }
0x2c4f   :  { %6202 = vmatprep.subr.msk.bf16.mxu1 %vm86_vm0, %v3644_v11  ;;  %v3646_v53 = vsel %vm86_vm0, %v3644_v11, 0  ;;  %v3637_v50 = vadd.f32 %v5431_v61, %v3636_v43 }
0x2c50   :  { %v6038_v9 = vpop.f32.mrf.mxu0  ;;  %6041 = vmatpush3.bf16.msra.mxu1 %v3646_v53  ;;  %v7760_v53 = vld [vmem:[%s8133_s3 + $0x130] sm:$0x3] }
0x2c52   :  { %v3639_v46 = vpop.f32.mrf.mxu0 }
0x2c53   :  { %v3640_v57 = vadd.f32 %v5431_v61, %v3639_v46  ;;  %6043 = vmatmul.mubr.msk.bf16.vlgmr.msra.gmra.mxu1 %vm82_vm4, %v6675_v24 }
0x2c54   :  { %v6039_v54 = vpop.f32.mrf.mxu0  ;;  %6046 = vmatprep.mubr.msk.bf16.mxu1 %vm82_vm4, %v6677_v25 }
0x2c55   :  { %v3643_v44 = vpack.c.bf16 %v3640_v57, %v3637_v50  ;;  %v7768_v57 = vld [vmem:[%s8133_s3 + $0x128] sm:$0xff] }
0x2c57   :  { %6203 = vmatprep.subr.msk.bf16.mxu0 %vm410_vm6, %v3643_v44  ;;  %6204 = vmatprep.subr.msk.bf16.mxu1 %vm86_vm0, %v3643_v44  ;;  %v3736_v18 = vsel %vm410_vm6, %v3643_v44, 0  ;;  %v3895_v1 = vsel %vm86_vm0, %v3643_v44, 0 }
0x2c58   :  { %6051 = vmatpush3.bf16.xpose.msra.mxu0 %v3736_v18  ;;  %6061 = vmatpush3.bf16.msra.mxu1 %v3895_v1 }
0x2c59   :  { %6070 = vmatprep.subr.bf16.mxu0 %v6548_v3  ;;  %6090 = vmatprep.subr.bf16.mxu1 %v6548_v3 }
0x2c5b   :  { %6047 = vmatmul.mubr.msk.bf16.gmra.mxu1 %vm82_vm4, %v6690_v28 }
0x2d13   :  { %v6044_v49 = vpop.f32.mrf.mxu1 }
0x2d14   :  { %v3714_v40 = vmul.f32 %v7697_v13, %v6044_v49 }
0x2d15   :  { %v3682_v29 = vpop.f32.mrf.mxu1 }
0x2d16   :  { %v3712_v38 = vmul.f32 %v7685_v34, %v3682_v29 }
0x2d17   :  { %v6045_v26 = vpop.f32.mrf.mxu1 }
0x2d18   :  { %v3715_v23 = vmul.f32 %v7679_v27, %v6045_v26 }
0x2d19   :  { %v3685_v31 = vpop.f32.mrf.mxu1 }
0x2d1a   :  { %v3713_v4 = vmul.f32 %v7691_v5, %v3685_v31  ;;  %v3720_v10 = vpack.c.bf16 %v3715_v23, %v3714_v40 }
0x2d1b   :  { %v6048_v2 = vpop.f32.mrf.mxu1 }
0x2d1c   :  { %v3719_v21 = vpack.c.bf16 %v3713_v4, %v3712_v38  ;;  %v3718_v19 = vmul.f32 %v7705_v42, %v6048_v2 }
0x2d1d   :  { %v3698_v17 = vpop.f32.mrf.mxu1 }
0x2d1e   :  { %6052 = vmatprep.mubr.msk.bf16.mxu0 %vm410_vm6, %v3719_v21  ;;  %v3716_v15 = vmul.f32 %v7711_v48, %v3698_v17  ;;  %v3722_v59 = vpack.c.bf16 %v3718_v19, %v3718_v19 }
0x2d1f   :  { %v6049_v14 = vpop.f32.mrf.mxu1  ;;  %6053 = vmatmul.mubr.msk.bf16.vlgmr.msra.gmra.mxu0 %vm410_vm6, %v3720_v10 }
0x2d21   :  { %v3701_v47 = vpop.f32.mrf.mxu1 }
0x2d22   :  { %v3717_v22 = vmul.f32 %v7717_v58, %v3701_v47 }
0x2d24   :  { %v3721_v41 = vpack.c.bf16 %v3717_v22, %v3716_v15 }
0x2d26   :  { %6056 = vmatprep.mubr.msk.bf16.mxu0 %vm410_vm6, %v3721_v41 }
0x2d27   :  { %6057 = vmatmul.mubr.msk.bf16.gmra.mxu0 %vm410_vm6, %v3722_v59 }
0x2d28   :  { %6078 = vmatprep.mubr.msk.bf16.mxu0 %vm6549_vm1, %v6548_v3 }
0x2ddf   :  { %v6054_v20 = vpop.f32.mrf.mxu0 }
0x2de0   :  { %v3781_v16 = vadd.f32 %v7733_v6, %v6054_v20 }
0x2de1   :  { %v3772_v12 = vpop.f32.mrf.mxu0 }
0x2de2   :  { %v3773_v33 = vadd.f32 %v7727_v52, %v3772_v12  ;;  %v3808_v56 = vsel %vm82_vm4, %v3781_v16, -inf }
0x2de3   :  { %v6055_v55 = vpop.f32.mrf.mxu0 }
0x2de4   :  { %v3802_v7 = vsel %vm82_vm4, %v3773_v33, -inf  ;;  %v3784_v60 = vadd.f32 %v7746_v37, %v6055_v55 }
0x2de5   :  { %v3775_v32 = vpop.f32.mrf.mxu0  ;;  %3803 = vmax.xlane.f32.xlu1 %v3802_v7 }
0x2de6   :  { %v3776_v63 = vadd.f32 %v7740_v36, %v3775_v32  ;;  %v3811_v9 = vsel %vm82_vm4, %v3784_v60, -inf }
0x2de7   :  { %v6058_v8 = vpop.f32.mrf.mxu0 }
0x2de8   :  { %v3805_v39 = vsel %vm82_vm4, %v3776_v63, -inf  ;;  %v3797_v61 = vadd.f32 %v7760_v53, %v6058_v8 }
0x2de9   :  { %3806 = vmax.xlane.f32.xlu0 %v3805_v39  ;;  %3809 = vmax.xlane.f32.xlu1 %v3808_v56  ;;  %v3788_v35 = vpop.f32.mrf.mxu0 }
0x2dea   :  { %v3789_v11 = vadd.f32 %v7754_v0, %v3788_v35  ;;  %v3820_v18 = vsel %vm173_vm5, %v3797_v61, -inf }
0x2deb   :  { %v6059_v43 = vpop.f32.mrf.mxu0 }
0x2dec   :  { %v3814_v46 = vsel %vm82_vm4, %v3789_v11, -inf }
0x2ded   :  { %3812 = vmax.xlane.f32.xlu0 %v3811_v9  ;;  %v3791_v50 = vpop.f32.mrf.mxu0  ;;  %3815 = vmax.xlane.f32.xlu1 %v3814_v46 }
0x2dee   :  { %v3792_v54 = vadd.f32 %v7768_v57, %v3791_v50 }
0x2df0   :  { %v3817_v44 = vsel %vm82_vm4, %v3792_v54, -inf }
0x2df1   :  { %3818 = vmax.xlane.f32.xlu0 %v3817_v44  ;;  %3821 = vmax.xlane.f32.xlu1 %v3820_v18 }
0x2e6e   :  { %v3804_v1 = vpop.xlane.xlu1 %3803 }
0x2e6f   :  { %v3823_v49 = vsub.f32 %v3773_v33, %v3804_v1 }
0x2e71   :  { %v3830_v29 = vmul.f32 1.442695, %v3823_v49 }
0x2e72   :  { %v3807_v26 = vpop.xlane.xlu0 %3806  ;;  %v3810_v23 = vpop.xlane.xlu1 %3809 }
0x2e73   :  { %6395 = vpow2.f32 %v3830_v29  ;;  %v3824_v31 = vsub.f32 %v3776_v63, %v3807_v26  ;;  %v3825_v38 = vsub.f32 %v3781_v16, %v3810_v23 }
0x2e75   :  { %v3832_v4 = vmul.f32 1.442695, %v3824_v31  ;;  %v3834_v40 = vmul.f32 1.442695, %v3825_v38 }
0x2e76   :  { %v3813_v2 = vpop.xlane.xlu0 %3812  ;;  %v3816_v21 = vpop.xlane.xlu1 %3815 }
0x2e77   :  { %6397 = vpow2.f32 %v3832_v4  ;;  %v3826_v10 = vsub.f32 %v3784_v60, %v3813_v2  ;;  %v3827_v17 = vsub.f32 %v3789_v11, %v3816_v21 }
0x2e78   :  { %6399 = vpow2.f32 %v3834_v40 }
0x2e79   :  { %v3836_v14 = vmul.f32 1.442695, %v3826_v10  ;;  %v3838_v19 = vmul.f32 1.442695, %v3827_v17 }
0x2e7a   :  { %v3819_v47 = vpop.xlane.xlu0 %3818  ;;  %v3822_v15 = vpop.xlane.xlu1 %3821 }
0x2e7b   :  { %6401 = vpow2.f32 %v3836_v14  ;;  %v3828_v22 = vsub.f32 %v3792_v54, %v3819_v47  ;;  %v3829_v41 = vsub.f32 %v3797_v61, %v3822_v15 }
0x2e7c   :  { %6403 = vpow2.f32 %v3838_v19 }
0x2e7d   :  { %v3840_v59 = vmul.f32 1.442695, %v3828_v22  ;;  %v3842_v20 = vmul.f32 1.442695, %v3829_v41 }
0x2e7f   :  { %6405 = vpow2.f32 %v3840_v59 }
0x2e80   :  { %v6396_v12 = vpop.eup %6395  ;;  %6407 = vpow2.f32 %v3842_v20 }
0x2e81   :  { %v3844_v33 = vsel %vm82_vm4, %v6396_v12, 0.0 }
0x2e82   :  { %3845 = vadd.xlane.f32.xlu0 %v3844_v33 }
0x2e84   :  { %v6398_v55 = vpop.eup %6397 }
0x2e85   :  { %v6400_v16 = vpop.eup %6399  ;;  %v3847_v7 = vsel %vm82_vm4, %v6398_v55, 0.0 }
0x2e86   :  { %v3850_v32 = vsel %vm82_vm4, %v6400_v16, 0.0  ;;  %3848 = vadd.xlane.f32.xlu1 %v3847_v7 }
0x2e87   :  { %3851 = vadd.xlane.f32.xlu0 %v3850_v32 }
0x2e88   :  { %v6402_v63 = vpop.eup %6401 }
0x2e89   :  { %v6404_v8 = vpop.eup %6403  ;;  %v3853_v60 = vsel %vm82_vm4, %v6402_v63, 0.0 }
0x2e8a   :  { %3854 = vadd.xlane.f32.xlu1 %v3853_v60  ;;  %v3856_v39 = vsel %vm82_vm4, %v6404_v8, 0.0 }
0x2e8b   :  { %3857 = vadd.xlane.f32.xlu0 %v3856_v39  ;;  %v7796_v39 = vld [vmem:[%s8133_s3 + $0xe8] sm:$0xff] }
0x2e8c   :  { %v6406_v56 = vpop.eup %6405 }
0x2e8d   :  { %v6408_v35 = vpop.eup %6407  ;;  %v3859_v11 = vsel %vm82_vm4, %v6406_v56, 0.0 }
0x2e8e   :  { %3860 = vadd.xlane.f32.xlu1 %v3859_v11  ;;  %v3862_v43 = vsel %vm173_vm5, %v6408_v35, 0.0 }
0x2e8f   :  { %3863 = vadd.xlane.f32.xlu0 %v3862_v43  ;;  %v7809_v43 = vld [vmem:[%s8133_s3 + $0xe0] sm:$0xff] }
0x2f0b   :  { %v3846_v61 = vpop.xlane.xlu0 %3845 }
0x2f0c   :  { %6409 = vrcp.f32 %v3846_v61 }
0x2f0f   :  { %v3849_v9 = vpop.xlane.xlu1 %3848 }
0x2f10   :  { %v3852_v46 = vpop.xlane.xlu0 %3851  ;;  %6411 = vrcp.f32 %v3849_v9 }
0x2f11   :  { %6413 = vrcp.f32 %v3852_v46  ;;  %v7815_v46 = vld [vmem:[%s8133_s3 + $0xd8] sm:$0xff] }
0x2f13   :  { %v3855_v50 = vpop.xlane.xlu1 %3854 }
0x2f14   :  { %v3858_v54 = vpop.xlane.xlu0 %3857  ;;  %6415 = vrcp.f32 %v3855_v50 }
0x2f15   :  { %6417 = vrcp.f32 %v3858_v54 }
0x2f17   :  { %v3861_v44 = vpop.xlane.xlu1 %3860 }
0x2f18   :  { %v3864_v18 = vpop.xlane.xlu0 %3863  ;;  %6419 = vrcp.f32 %v3861_v44  ;;  %v7822_v44 = vld [vmem:[%s8133_s3 + $0xd0] sm:$0xff] }
0x2f19   :  { %6421 = vrcp.f32 %v3864_v18  ;;  %v6410_v1 = vpop.eup %6409 }
0x2f1a   :  { %v3872_v29 = vmul.f32 %v6410_v1, %v6396_v12  ;;  %v7828_v1 = vld [vmem:[%s8133_s3 + $0xc8] sm:$0xff] }
0x2f1d   :  { %v6412_v49 = vpop.eup %6411 }
0x2f1e   :  { %v3873_v26 = vmul.f32 %v6412_v49, %v6398_v55  ;;  %v6414_v23 = vpop.eup %6413  ;;  %v7789_v55 = vld [vmem:[%s8133_s3 + $0xf8] sm:$0x3] }
0x2f1f   :  { %v3874_v4 = vmul.f32 %v6414_v23, %v6400_v16 }
0x2f20   :  { %v3879_v31 = vpack.c.bf16 %v3873_v26, %v3872_v29  ;;  %v5410_v26 = vld [vmem:[%s8131_s1 + $0x208] sm:$0xf] }
0x2f21   :  { %v6416_v38 = vpop.eup %6415  ;;  %v3467_v23 = vpack.c.bf16 %v5410_v26, %v5410_v26 }
0x2f22   :  { %v3875_v40 = vmul.f32 %v6416_v38, %v6402_v63  ;;  %6062 = vmatprep.mubr.msk.bf16.mxu1 %vm82_vm4, %v3879_v31  ;;  %v6418_v2 = vpop.eup %6417  ;;  %v5408_v38 = vld [vmem:[%s8131_s1 + $0x1f8] sm:$0xff] }
0x2f23   :  { %v3876_v14 = vmul.f32 %v6418_v2, %v6404_v8  ;;  %v4021_v31 = vsel %vm713_vm9, %v3467_v23, 0 }
0x2f24   :  { %v3880_v21 = vpack.c.bf16 %v3875_v40, %v3874_v4  ;;  %v5409_v4 = vld [vmem:[%s8131_s1 + $0x200] sm:$0xff] }
0x2f25   :  { %v6420_v10 = vpop.eup %6419  ;;  %v3466_v40 = vpack.c.bf16 %v5409_v4, %v5408_v38 }
0x2f26   :  { %v6422_v17 = vpop.eup %6421  ;;  %6063 = vmatmul.mubr.msk.bf16.vlgmr.msra.gmra.mxu1 %vm82_vm4, %v3880_v21  ;;  %v3877_v19 = vmul.f32 %v6420_v10, %v6406_v56 }
0x2f27   :  { %v3878_v15 = vmul.f32 %v6422_v17, %v6408_v35  ;;  %v7802_v35 = vld [vmem:[%s8133_s3 + $0xf0] sm:$0xff] }
0x2f28   :  { %v3881_v47 = vpack.c.bf16 %v3877_v19, %v3876_v14  ;;  %v5447_v19 = vld [vmem:[%s8132_s2 + $0x28] ss:$0 sm:$0xff] }
0x2f29   :  { %v3882_v22 = vpack.c.bf16 %v3878_v15, %v3878_v15 }
0x2f2a   :  { %6066 = vmatprep.mubr.msk.bf16.mxu1 %vm82_vm4, %v3881_v47 }
0x2f2e   :  { %6067 = vmatmul.mubr.msk.bf16.gmra.mxu1 %vm82_vm4, %v3882_v22 }
0x2f2f   :  { %6092 = vmatprep.mubr.msk.bf16.mxu1 %vm6549_vm1, %v6548_v3 }
0x2fe6   :  { %v6064_v41 = vpop.f32.mrf.mxu1 }
0x2fe7   :  { %v3963_v50 = vmul.f32 %v7815_v46, %v6064_v41 }
0x2fe8   :  { %v3931_v59 = vpop.f32.mrf.mxu1 }
0x2fe9   :  { %v3961_v49 = vmul.f32 %v7828_v1, %v3931_v59 }
0x2fea   :  { %v6065_v20 = vpop.f32.mrf.mxu1 }
0x2feb   :  { %v3964_v61 = vmul.f32 %v7809_v43, %v6065_v20 }
0x2fec   :  { %v3934_v12 = vpop.f32.mrf.mxu1 }
0x2fed   :  { %v3969_v54 = vpack.c.bf16 %v3964_v61, %v3963_v50  ;;  %v3962_v18 = vmul.f32 %v7822_v44, %v3934_v12  ;;  %v5411_v50 = vld [vmem:[%s8131_s1 + $0x1c0] sm:$0xff] }
0x2fee   :  { %v6068_v33 = vpop.f32.mrf.mxu1 }
0x2fef   :  { %v3967_v16 = vmul.f32 %v7789_v55, %v6068_v33  ;;  %v3968_v29 = vpack.c.bf16 %v3962_v18, %v3961_v49 }
0x2ff0   :  { %v3947_v7 = vpop.f32.mrf.mxu1 }
0x2ff1   :  { %v3971_v32 = vpack.c.bf16 %v3967_v16, %v3967_v16  ;;  %v3965_v56 = vmul.f32 %v7796_v39, %v3947_v7 }
0x2ff2   :  { %v6069_v63 = vpop.f32.mrf.mxu1 }
0x2ff3   :  { %v3973_v8 = vsel %vm664_vm7, %v3971_v32, 0 }
0x2ff4   :  { %v3950_v60 = vpop.f32.mrf.mxu1  ;;  %6071 = vmatpush3.bf16.msra.mxu0 %v3973_v8 }
0x2ff5   :  { %v3966_v11 = vmul.f32 %v7802_v35, %v3950_v60  ;;  %6072 = vmatprep.subr.bf16.mxu0 %v6548_v3 }
0x2ff7   :  { %v3970_v9 = vpack.c.bf16 %v3966_v11, %v3965_v56 }
0x2ff9   :  { %6073 = vmatpush3.bf16.msra.mxu0 %v3970_v9 }
0x2ffa   :  { %6074 = vmatprep.subr.bf16.mxu0 %v6548_v3 }
0x2ffd   :  { %6075 = vmatpush3.bf16.msra.mxu0 %v3969_v54  ;;  %v5412_v54 = vld [vmem:[%s8131_s1 + $0x1c8] sm:$0x3] }
0x2ffe   :  { %6076 = vmatprep.subr.bf16.mxu0 %v6548_v3  ;;  %v3470_v18 = vpack.c.bf16 %v5412_v54, %v5411_v50 }
0x3000   :  { %v4127_v49 = vsel %vm86_vm0, %v3470_v18, 0 }
0x3001   :  { %6077 = vmatpush3.bf16.msra.mxu0 %v3968_v29  ;;  %6091 = vmatpush3.bf16.msra.mxu1 %v4127_v49 }
0x3002   :  { %6082 = vmatprep.subr.bf16.mxu0 %v6548_v3  ;;  %6106 = vmatprep.subr.bf16.mxu1 %v6548_v3 }
0x3004   :  { %6079 = vmatmul.mubr.msk.bf16.vlgmr.msra.gmra.mxu0 %vm660_vm8, %v6856_v30 }
0x3005   :  { %6086 = vmatprep.mubr.msk.bf16.mxu0 %vm6549_vm1, %v6548_v3  ;;  %6083 = vmatpush3.bf16.msra.mxu0 %v4021_v31 }
0x3006   :  { %6084 = vmatprep.subr.bf16.mxu0 %v6548_v3 }
0x3009   :  { %6085 = vmatpush3.bf16.msra.mxu0 %v3466_v40 }
0x300a   :  { %6096 = vmatprep.subr.bf16.mxu0 %v6548_v3 }
0x30c4   :  { %v4009_v2 = vpop.f32.mrf.mxu0 }
0x30c6   :  { %v6080_v21 = vpop.f32.mrf.mxu0 }
0x30c7   :  { %v5448_v21 = vld [vmem:[%s8132_s2 + $0x29] ss:$0 sm:$0xff] }
0x30c8   :  { %v4012_v10 = vpop.f32.mrf.mxu0 }
0x30c9   :  { %v4016_v17 = vpack.c.bf16 %v4012_v10, %v4009_v2 }
0x30ca   :  { %v6081_v14 = vpop.f32.mrf.mxu0 }
0x30cb   :  { %6087 = vmatmul.mubr.msk.bf16.vlgmr.msra.gmra.mxu0 %vm410_vm6, %v4016_v17 }
0x30cc   :  { %6102 = vmatprep.mubr.msk.bf16.mxu0 %vm6549_vm1, %v6548_v3 }
0x318b   :  { %v4057_v47 = vpop.f32.mrf.mxu0 }
0x318c   :  { %v4064_v15 = vadd.f32 %v4057_v47, %v7618_v45 }
0x318d   :  { %v6088_v22 = vpop.f32.mrf.mxu0 }
0x318e   :  { %v7856_v41 = vadd.f32 %v5447_v19, %v4064_v15 }
0x318f   :  { %v4060_v59 = vpop.f32.mrf.mxu0 }
0x3190   :  { %v4065_v20 = vadd.f32 %v4060_v59, %v7623_v51  ;;  %v4074_v12 = vsel %vm82_vm4, %v7856_v41, 0.0 }
0x3191   :  { %4075 = vadd.xlane.f32.xlu1 %v4074_v12  ;;  %v6089_v33 = vpop.f32.mrf.mxu0 }
0x3192   :  { %v7861_v16 = vadd.f32 %v5447_v19, %v4065_v20  ;;  %v5449_v19 = vld [vmem:[%s8132_s2 + $0x2a] ss:$0 sm:$0xff]  ;;  %v5417_v20 = vld [vmem:[%s8131_s1 + $0x1f0] sm:$0xff] }
0x3193   :  { %v3478_v12 = vpack.c.bf16 %v5417_v20, %v5417_v20 }
0x3194   :  { %v4077_v7 = vsel %vm173_vm5, %v7861_v16, 0.0 }
0x3195   :  { %4078 = vadd.xlane.f32.xlu0 %v4077_v7  ;;  %v4229_v33 = vsel %vm923_vm10, %v3478_v12, 0  ;;  %v5415_v7 = vld [vmem:[%s8131_s1 + $0x1e0] sm:$0xff] }
0x3196   :  { %6097 = vmatpush3.bf16.msra.mxu0 %v4229_v33 }
0x3197   :  { %6098 = vmatprep.subr.bf16.mxu0 %v6548_v3 }
0x321a   :  { %v4076_v32 = vpop.xlane.xlu1 %4075 }
0x321b   :  { %v4080_v63 = vmul.f32 0.1, %v4076_v32  ;;  %v5416_v32 = vld [vmem:[%s8131_s1 + $0x1e8] sm:$0xff] }
0x321d   :  { %v4082_v45 = vsub.f32 %v7856_v41, %v4080_v63  ;;  %v3477_v63 = vpack.c.bf16 %v5416_v32, %v5415_v7 }
0x321e   :  { %v4079_v8 = vpop.xlane.xlu0 %4078 }
0x321f   :  { %v4081_v60 = vmul.f32 0.1, %v4079_v8  ;;  %v4084_v56 = vmul.f32 %v4082_v45, %v4082_v45  ;;  %6099 = vmatpush3.bf16.msra.mxu0 %v3477_v63  ;;  %v5414_v8 = vld [vmem:[%s8131_s1 + $0x1d8] sm:$0xff] }
0x3220   :  { %6100 = vmatprep.subr.bf16.mxu0 %v6548_v3 }
0x3221   :  { %v4083_v51 = vsub.f32 %v7861_v16, %v4081_v60  ;;  %v4086_v11 = vsel %vm82_vm4, %v4084_v56, 0.0  ;;  %v5450_v56 = vld [vmem:[%s8132_s2 + $0x2b] ss:$0 sm:$0xff] }
0x3222   :  { %4087 = vadd.xlane.f32.xlu1 %v4086_v11 }
0x3223   :  { %v4085_v61 = vmul.f32 %v4083_v51, %v4083_v51 }
0x3225   :  { %v4089_v9 = vsel %vm173_vm5, %v4085_v61, 0.0 }
0x3226   :  { %4090 = vadd.xlane.f32.xlu0 %v4089_v9 }
0x32ab   :  { %v4088_v29 = vpop.xlane.xlu1 %4087 }
0x32ac   :  { %v4092_v26 = vmul.f32 0.1, %v4088_v29 }
0x32ae   :  { %v4094_v23 = vadd.f32 1e-05, %v4092_v26 }
0x32af   :  { %v4091_v31 = vpop.xlane.xlu0 %4090 }
0x32b0   :  { %6423 = vrsqrt.f32 %v4094_v23  ;;  %v4093_v38 = vmul.f32 0.1, %v4091_v31 }
0x32b2   :  { %v4095_v4 = vadd.f32 1e-05, %v4093_v38 }
0x32b4   :  { %6425 = vrsqrt.f32 %v4095_v4 }
0x32bd   :  { %v6424_v40 = vpop.eup %6423 }
0x32be   :  { %v4098_v2 = vmul.f32 %v6424_v40, %v4082_v45  ;;  %v5413_v45 = vld [vmem:[%s8131_s1 + $0x1d0] sm:$0xff] }
0x32bf   :  { %v3476_v60 = vpack.c.bf16 %v5414_v8, %v5413_v45 }
0x32c0   :  { %v4106_v17 = vmul.f32 %v5448_v21, %v4098_v2 }
0x32c1   :  { %v6426_v10 = vpop.eup %6425  ;;  %6101 = vmatpush3.bf16.msra.mxu0 %v3476_v60 }
0x32c2   :  { %v4099_v14 = vmul.f32 %v6426_v10, %v4083_v51  ;;  %v4114_v15 = vadd.f32 %v5449_v19, %v4106_v17 }
0x32c4   :  { %v4107_v47 = vmul.f32 %v5448_v21, %v4099_v14 }
0x32c6   :  { %v4115_v22 = vadd.f32 %v5449_v19, %v4107_v47 }
0x32c8   :  { %v4116_v59 = vpack.c.bf16 %v4115_v22, %v4114_v15 }
0x32ca   :  { %6093 = vmatmul.mubr.msk.bf16.vlgmr.msra.gmra.mxu1 %vm82_vm4, %v4116_v59 }
0x32cb   :  { %6108 = vmatprep.mubr.msk.bf16.mxu1 %vm6549_vm1, %v6548_v3 }
0x338a   :  { %v4163_v51 = vpop.f32.mrf.mxu1 }
0x338b   :  { %v4164_v11 = vadd.f32 %v5450_v56, %v4163_v51 }
0x338c   :  { %v6094_v61 = vpop.f32.mrf.mxu1 }
0x338d   :  { %v4172_v9 = vmul.f32 0.70710677, %v4164_v11 }
0x338e   :  { %v4166_v50 = vpop.f32.mrf.mxu1 }
0x338f   :  { %v4174_v54 = vand.u32 2147483647, %v4172_v9  ;;  %v4167_v18 = vadd.f32 %v5450_v56, %v4166_v50  ;;  %vm4214_vm14 = vcmp.ge.f32.partialorder %v4172_v9, 0.0  ;;  %v5453_v9 = vld [vmem:[%s8132_s2 + $0x2c] ss:$0 sm:$0xff] }
0x3390   :  { %v6095_v49 = vpop.f32.mrf.mxu1 }
0x3391   :  { %v4176_v29 = vmul.f32 0.3275911, %v4174_v54  ;;  %v4173_v26 = vmul.f32 0.70710677, %v4167_v18  ;;  %v4202_v40 = vsub.f32 0.0, %v4174_v54 }
0x3393   :  { %v4178_v23 = vadd.f32 1.0, %v4176_v29  ;;  %v4175_v31 = vand.u32 2147483647, %v4173_v26  ;;  %v4204_v2 = vmul.f32 %v4202_v40, %v4174_v54  ;;  %vm4215_vm15 = vcmp.ge.f32.partialorder %v4173_v26, 0.0 }
0x3395   :  { %6427 = vrcp.f32 %v4178_v23  ;;  %v4177_v38 = vmul.f32 0.3275911, %v4175_v31  ;;  %v4203_v21 = vsub.f32 0.0, %v4175_v31  ;;  %v4206_v14 = vmul.f32 1.442695, %v4204_v2 }
0x3397   :  { %v4179_v4 = vadd.f32 1.0, %v4177_v38  ;;  %v4205_v19 = vmul.f32 %v4203_v21, %v4175_v31 }
0x3399   :  { %6429 = vrcp.f32 %v4179_v4  ;;  %v4208_v20 = vmul.f32 1.442695, %v4205_v19 }
0x339a   :  { %6431 = vpow2.f32 %v4206_v14 }
0x339b   :  { %6433 = vpow2.f32 %v4208_v20 }
0x33a2   :  { %v6428_v10 = vpop.eup %6427 }
0x33a3   :  { %v4184_v17 = vmul.f32 1.0614054, %v6428_v10 }
0x33a5   :  { %v4186_v47 = vadd.f32 -1.4531521, %v4184_v17 }
0x33a6   :  { %v6430_v15 = vpop.eup %6429 }
0x33a7   :  { %v4188_v22 = vmul.f32 %v6428_v10, %v4186_v47  ;;  %v4185_v59 = vmul.f32 1.0614054, %v6430_v15  ;;  %v6432_v54 = vpop.eup %6431  ;;  %v4170_v47 = vmul.f32 0.5, %v4164_v11 }
0x33a8   :  { %v6434_v38 = vpop.eup %6433 }
0x33a9   :  { %v4190_v12 = vadd.f32 1.4214138, %v4188_v22  ;;  %v4187_v33 = vadd.f32 -1.4531521, %v4185_v59  ;;  %v4171_v22 = vmul.f32 0.5, %v4167_v18 }
0x33ab   :  { %v4192_v7 = vmul.f32 %v6428_v10, %v4190_v12  ;;  %v4189_v32 = vmul.f32 %v6430_v15, %v4187_v33 }
0x33ad   :  { %v4194_v63 = vadd.f32 -0.28449672, %v4192_v7  ;;  %v4191_v45 = vadd.f32 1.4214138, %v4189_v32 }
0x33af   :  { %v4196_v8 = vmul.f32 %v6428_v10, %v4194_v63  ;;  %v4193_v60 = vmul.f32 %v6430_v15, %v4191_v45 }
0x33b1   :  { %v4198_v56 = vadd.f32 0.2548296, %v4196_v8  ;;  %v4195_v51 = vadd.f32 -0.28449672, %v4193_v60 }
0x33b3   :  { %v4200_v61 = vmul.f32 %v6428_v10, %v4198_v56  ;;  %v4197_v50 = vmul.f32 %v6430_v15, %v4195_v51 }
0x33b5   :  { %v4210_v49 = vmul.f32 %v6432_v54, %v4200_v61  ;;  %v4199_v29 = vadd.f32 0.2548296, %v4197_v50 }
0x33b7   :  { %v4212_v23 = vsub.f32 1.0, %v4210_v49  ;;  %v4201_v31 = vmul.f32 %v6430_v15, %v4199_v29  ;;  %v5454_v29 = vld [vmem:[%s8131_s1 + $0x280] sm:$0xff] }
0x33b9   :  { %v4216_v4 = vsub.f32 0.0, %v4212_v23  ;;  %v4211_v40 = vmul.f32 %v6434_v38, %v4201_v31 }
0x33bb   :  { %v4218_v2 = vsel %vm4214_vm14, %v4212_v23, %v4216_v4  ;;  %v4213_v21 = vsub.f32 1.0, %v4211_v40  ;;  %v5455_v23 = vld [vmem:[%s8131_s1 + $0x288] sm:$0x3] }
0x33bc   :  { %v4220_v14 = vadd.f32 1.0, %v4218_v2  ;;  %v4285_v31 = vpack.c.bf16 %v5455_v23, %v5454_v29 }
0x33bd   :  { %v4217_v17 = vsub.f32 0.0, %v4213_v21 }
0x33be   :  { %v4222_v10 = vmul.f32 %v4220_v14, %v4170_v47  ;;  %v4376_v38 = vsel %vm86_vm0, %v4285_v31, 0 }
0x33bf   :  { %v4219_v19 = vsel %vm4215_vm15, %v4213_v21, %v4217_v17  ;;  %6107 = vmatpush3.bf16.msra.mxu1 %v4376_v38 }
0x33c0   :  { %v4221_v59 = vadd.f32 1.0, %v4219_v19  ;;  %6112 = vmatprep.subr.bf16.mxu1 %v6548_v3 }
0x33c2   :  { %v4223_v20 = vmul.f32 %v4221_v59, %v4171_v22  ;;  %v5477_v22 = vld [vmem:[%s8132_s2 + $0x2d] ss:$0 sm:$0xff] }
0x33c4   :  { %v4224_v12 = vpack.c.bf16 %v4223_v20, %v4222_v10  ;;  %v5456_v10 = vld [vmem:[%s8131_s1 + $0x290] sm:$0xff]  ;;  %v5457_v20 = vld [vmem:[%s8131_s1 + $0x298] sm:$0x3] }
0x33c6   :  { %6103 = vmatmul.mubr.msk.bf16.vlgmr.msra.gmra.mxu0 %vm919_vm13, %v4224_v12 }
0x33c7   :  { %6120 = vmatprep.mubr.msk.bf16.mxu0 %vm82_vm4, %v6649_v62 }
0x3486   :  { %v4265_v15 = vpop.f32.mrf.mxu0 }
0x3487   :  { %v4272_v33 = vadd.f32 %v4265_v15, %v7856_v41  ;;  %v5478_v15 = vld [vmem:[%s8132_s2 + $0x2e] ss:$0 sm:$0xff] }
0x3488   :  { %v6104_v26 = vpop.f32.mrf.mxu0 }
0x3489   :  { %v7914_v7 = vadd.f32 %v5453_v9, %v4272_v33  ;;  %v4288_v26 = vpack.c.bf16 %v5457_v20, %v5456_v10 }
0x348a   :  { %v4268_v11 = vpop.f32.mrf.mxu0 }
0x348b   :  { %v4273_v18 = vadd.f32 %v4268_v11, %v7861_v16  ;;  %v4323_v32 = vsel %vm82_vm4, %v7914_v7, 0.0 }
0x348c   :  { %4324 = vadd.xlane.f32.xlu1 %v4323_v32  ;;  %v6105_v63 = vpop.f32.mrf.mxu0 }
0x348d   :  { %v7919_v45 = vadd.f32 %v5453_v9, %v4273_v18  ;;  %v4426_v63 = vsel %vm86_vm0, %v4288_v26, 0 }
0x348f   :  { %v4326_v62 = vsel %vm173_vm5, %v7919_v45, 0.0 }
0x3490   :  { %4327 = vadd.xlane.f32.xlu0 %v4326_v62 }
0x3515   :  { %v4325_v8 = vpop.xlane.xlu1 %4324 }
0x3516   :  { %v4329_v60 = vmul.f32 0.1, %v4325_v8  ;;  %v5479_v8 = vld [vmem:[%s8132_s2 + $0x2f] ss:$0 sm:$0xff] }
0x3518   :  { %v4331_v41 = vsub.f32 %v7914_v7, %v4329_v60 }
0x3519   :  { %v4328_v56 = vpop.xlane.xlu0 %4327 }
0x351a   :  { %v4330_v51 = vmul.f32 0.1, %v4328_v56  ;;  %v4333_v61 = vmul.f32 %v4331_v41, %v4331_v41 }
0x351c   :  { %v4332_v16 = vsub.f32 %v7919_v45, %v4330_v51  ;;  %v4335_v50 = vsel %vm82_vm4, %v4333_v61, 0.0 }
0x351d   :  { %4336 = vadd.xlane.f32.xlu1 %v4335_v50 }
0x351e   :  { %v4334_v54 = vmul.f32 %v4332_v16, %v4332_v16 }
0x3520   :  { %v4338_v49 = vsel %vm173_vm5, %v4334_v54, 0.0 }
0x3521   :  { %4339 = vadd.xlane.f32.xlu0 %v4338_v49  ;;  %v5481_v49 = vld [vmem:[%s8132_s2 + $0x30] ss:$0 sm:$0xff] }
0x35a6   :  { %v4337_v4 = vpop.xlane.xlu1 %4336 }
0x35a7   :  { %v4341_v40 = vmul.f32 0.1, %v4337_v4 }
0x35a9   :  { %v4343_v2 = vadd.f32 1e-05, %v4341_v40 }
0x35aa   :  { %v4340_v21 = vpop.xlane.xlu0 %4339 }
0x35ab   :  { %6435 = vrsqrt.f32 %v4343_v2  ;;  %v4342_v17 = vmul.f32 0.1, %v4340_v21 }
0x35ad   :  { %v4344_v14 = vadd.f32 1e-05, %v4342_v17 }
0x35af   :  { %6437 = vrsqrt.f32 %v4344_v14 }
0x35b8   :  { %v6436_v19 = vpop.eup %6435 }
0x35b9   :  { %v4347_v47 = vmul.f32 %v6436_v19, %v4331_v41 }
0x35bb   :  { %v4355_v12 = vmul.f32 %v5477_v22, %v4347_v47 }
0x35bc   :  { %v6438_v59 = vpop.eup %6437 }
0x35bd   :  { %v4348_v9 = vmul.f32 %v6438_v59, %v4332_v16  ;;  %v4363_v11 = vadd.f32 %v5478_v15, %v4355_v12 }
0x35bf   :  { %v4356_v33 = vmul.f32 %v5477_v22, %v4348_v9 }
0x35c1   :  { %v4364_v18 = vadd.f32 %v5478_v15, %v4356_v33 }
0x35c3   :  { %v4365_v32 = vpack.c.bf16 %v4364_v18, %v4363_v11 }
0x35c5   :  { %6109 = vmatmul.mubr.msk.bf16.vlgmr.msra.gmra.mxu1 %vm82_vm4, %v4365_v32 }
0x35c6   :  { %6113 = vmatpush3.bf16.msra.mxu1 %v4426_v63  ;;  %6114 = vmatprep.mubr.msk.bf16.mxu1 %vm6549_vm1, %v6548_v3 }
0x35cd   :  { %6115 = vmatmul.mubr.msk.bf16.vlgmr.msra.gmra.mxu1 %vm82_vm4, %v4365_v32 }
0x3685   :  { %v4412_v62 = vpop.f32.mrf.mxu1 }
0x3686   :  { %v4413_v56 = vadd.f32 %v5479_v8, %v4412_v62 }
0x3687   :  { %v6110_v60 = vpop.f32.mrf.mxu1 }
0x3689   :  { %v4415_v41 = vpop.f32.mrf.mxu1 }
0x368a   :  { %v4416_v51 = vadd.f32 %v5479_v8, %v4415_v41 }
0x368b   :  { %v6111_v61 = vpop.f32.mrf.mxu1 }
0x368c   :  { %v4470_v16 = vpack.c.bf16 %v4416_v51, %v4413_v56 }
0x368d   :  { %v4462_v50 = vpop.f32.mrf.mxu1 }
0x368e   :  { %6205 = vmatprep.subr.msk.bf16.mxu0 %vm86_vm0, %v4470_v16  ;;  %v4472_v54 = vsel %vm86_vm0, %v4470_v16, 0  ;;  %v4463_v31 = vadd.f32 %v5481_v49, %v4462_v50 }
0x368f   :  { %v6116_v29 = vpop.f32.mrf.mxu1  ;;  %6119 = vmatpush3.bf16.msra.mxu0 %v4472_v54 }
0x3691   :  { %v4465_v23 = vpop.f32.mrf.mxu1 }
0x3692   :  { %v4466_v38 = vadd.f32 %v5481_v49, %v4465_v23  ;;  %6121 = vmatmul.mubr.msk.bf16.vlgmr.msra.gmra.mxu0 %vm82_vm4, %v6675_v24 }
0x3693   :  { %v6117_v4 = vpop.f32.mrf.mxu1  ;;  %6124 = vmatprep.mubr.msk.bf16.mxu0 %vm82_vm4, %v6677_v25 }
0x3694   :  { %v4469_v40 = vpack.c.bf16 %v4466_v38, %v4463_v31 }
0x3696   :  { %6206 = vmatprep.subr.msk.bf16.mxu1 %vm410_vm6, %v4469_v40  ;;  %6207 = vmatprep.subr.msk.bf16.mxu0 %vm86_vm0, %v4469_v40  ;;  %v4562_v2 = vsel %vm410_vm6, %v4469_v40, 0  ;;  %v4721_v21 = vsel %vm86_vm0, %v4469_v40, 0 }
0x3697   :  { %6129 = vmatpush3.bf16.xpose.msra.mxu1 %v4562_v2  ;;  %6139 = vmatpush3.bf16.msra.mxu0 %v4721_v21 }
0x3698   :  { %6148 = vmatprep.subr.bf16.mxu1 %v6548_v3  ;;  %6168 = vmatprep.subr.bf16.mxu0 %v6548_v3 }
0x369a   :  { %6125 = vmatmul.mubr.msk.bf16.gmra.mxu0 %vm82_vm4, %v6690_v28 }
0x3752   :  { %v6122_v24 = vpop.f32.mrf.mxu0 }
0x3753   :  { %v4540_v59 = vmul.f32 %v7697_v13, %v6122_v24 }
0x3754   :  { %v4508_v25 = vpop.f32.mrf.mxu0 }
0x3755   :  { %v4538_v47 = vmul.f32 %v7685_v34, %v4508_v25 }
0x3756   :  { %v6123_v17 = vpop.f32.mrf.mxu0 }
0x3757   :  { %v4541_v14 = vmul.f32 %v7679_v27, %v6123_v17 }
0x3758   :  { %v4511_v19 = vpop.f32.mrf.mxu0 }
0x3759   :  { %v4539_v22 = vmul.f32 %v7691_v5, %v4511_v19  ;;  %v4546_v12 = vpack.c.bf16 %v4541_v14, %v4540_v59 }
0x375a   :  { %v6126_v10 = vpop.f32.mrf.mxu0 }
0x375b   :  { %v4545_v20 = vpack.c.bf16 %v4539_v22, %v4538_v47  ;;  %v4544_v28 = vmul.f32 %v7705_v42, %v6126_v10 }
0x375c   :  { %v4524_v9 = vpop.f32.mrf.mxu0 }
0x375d   :  { %6130 = vmatprep.mubr.msk.bf16.mxu1 %vm410_vm6, %v4545_v20  ;;  %v4542_v27 = vmul.f32 %v7711_v48, %v4524_v9  ;;  %v4548_v5 = vpack.c.bf16 %v4544_v28, %v4544_v28 }
0x375e   :  { %v6127_v15 = vpop.f32.mrf.mxu0  ;;  %6131 = vmatmul.mubr.msk.bf16.vlgmr.msra.gmra.mxu1 %vm410_vm6, %v4546_v12 }
0x3760   :  { %v4527_v33 = vpop.f32.mrf.mxu0 }
0x3761   :  { %v4543_v34 = vmul.f32 %v7717_v58, %v4527_v33 }
0x3763   :  { %v4547_v26 = vpack.c.bf16 %v4543_v34, %v4542_v27 }
0x3765   :  { %6134 = vmatprep.mubr.msk.bf16.mxu1 %vm410_vm6, %v4547_v26 }
0x3766   :  { %6135 = vmatmul.mubr.msk.bf16.gmra.mxu1 %vm410_vm6, %v4548_v5 }
0x3767   :  { %6156 = vmatprep.mubr.msk.bf16.mxu1 %vm6549_vm1, %v6548_v3 }
0x381e   :  { %v6132_v13 = vpop.f32.mrf.mxu1 }
0x381f   :  { %v4607_v42 = vadd.f32 %v7733_v6, %v6132_v13 }
0x3820   :  { %v4598_v11 = vpop.f32.mrf.mxu1 }
0x3821   :  { %v4599_v18 = vadd.f32 %v7727_v52, %v4598_v11  ;;  %v4634_v41 = vsel %vm82_vm4, %v4607_v42, -inf }
0x3822   :  { %v6133_v32 = vpop.f32.mrf.mxu1 }
0x3823   :  { %v4628_v48 = vsel %vm82_vm4, %v4599_v18, -inf  ;;  %v4610_v8 = vadd.f32 %v7746_v37, %v6133_v32 }
0x3824   :  { %v4601_v63 = vpop.f32.mrf.mxu1  ;;  %4629 = vmax.xlane.f32.xlu1 %v4628_v48 }
0x3825   :  { %v4602_v58 = vadd.f32 %v7740_v36, %v4601_v63  ;;  %v4637_v61 = vsel %vm82_vm4, %v4610_v8, -inf }
0x3826   :  { %v6136_v62 = vpop.f32.mrf.mxu1 }
0x3827   :  { %v4631_v60 = vsel %vm82_vm4, %v4602_v58, -inf  ;;  %v4623_v6 = vadd.f32 %v7760_v53, %v6136_v62 }
0x3828   :  { %4632 = vmax.xlane.f32.xlu0 %v4631_v60  ;;  %4635 = vmax.xlane.f32.xlu1 %v4634_v41  ;;  %v4614_v56 = vpop.f32.mrf.mxu1 }
0x3829   :  { %v4615_v52 = vadd.f32 %v7754_v0, %v4614_v56  ;;  %v4646_v54 = vsel %vm173_vm5, %v4623_v6, -inf }
0x382a   :  { %v6137_v51 = vpop.f32.mrf.mxu1 }
0x382b   :  { %v4640_v16 = vsel %vm82_vm4, %v4615_v52, -inf }
0x382c   :  { %4638 = vmax.xlane.f32.xlu0 %v4637_v61  ;;  %v4617_v36 = vpop.f32.mrf.mxu1  ;;  %4641 = vmax.xlane.f32.xlu1 %v4640_v16 }
0x382d   :  { %v4618_v37 = vadd.f32 %v7768_v57, %v4617_v36 }
0x382f   :  { %v4643_v50 = vsel %vm82_vm4, %v4618_v37, -inf }
0x3830   :  { %4644 = vmax.xlane.f32.xlu0 %v4643_v50  ;;  %4647 = vmax.xlane.f32.xlu1 %v4646_v54 }
0x38ad   :  { %v4630_v49 = vpop.xlane.xlu1 %4629 }
0x38ae   :  { %v4649_v0 = vsub.f32 %v4599_v18, %v4630_v49 }
0x38b0   :  { %v4656_v29 = vmul.f32 1.442695, %v4649_v0 }
0x38b1   :  { %v4633_v23 = vpop.xlane.xlu0 %4632  ;;  %v4636_v53 = vpop.xlane.xlu1 %4635 }
0x38b2   :  { %6439 = vpow2.f32 %v4656_v29  ;;  %v4650_v31 = vsub.f32 %v4602_v58, %v4633_v23  ;;  %v4651_v38 = vsub.f32 %v4607_v42, %v4636_v53 }
0x38b4   :  { %v4658_v4 = vmul.f32 1.442695, %v4650_v31  ;;  %v4660_v40 = vmul.f32 1.442695, %v4651_v38 }
0x38b5   :  { %v4639_v2 = vpop.xlane.xlu0 %4638  ;;  %v4642_v21 = vpop.xlane.xlu1 %4641 }
0x38b6   :  { %6441 = vpow2.f32 %v4658_v4  ;;  %v4652_v57 = vsub.f32 %v4610_v8, %v4639_v2  ;;  %v4653_v24 = vsub.f32 %v4615_v52, %v4642_v21 }
0x38b7   :  { %6443 = vpow2.f32 %v4660_v40 }
0x38b8   :  { %v4662_v25 = vmul.f32 1.442695, %v4652_v57  ;;  %v4664_v17 = vmul.f32 1.442695, %v4653_v24 }
0x38b9   :  { %v4645_v14 = vpop.xlane.xlu0 %4644  ;;  %v4648_v19 = vpop.xlane.xlu1 %4647 }
0x38ba   :  { %6445 = vpow2.f32 %v4662_v25  ;;  %v4654_v47 = vsub.f32 %v4618_v37, %v4645_v14  ;;  %v4655_v22 = vsub.f32 %v4623_v6, %v4648_v19 }
0x38bb   :  { %6447 = vpow2.f32 %v4664_v17 }
0x38bc   :  { %v4666_v59 = vmul.f32 1.442695, %v4654_v47  ;;  %v4668_v10 = vmul.f32 1.442695, %v4655_v22 }
0x38be   :  { %6449 = vpow2.f32 %v4666_v59 }
0x38bf   :  { %v6440_v20 = vpop.eup %6439  ;;  %6451 = vpow2.f32 %v4668_v10 }
0x38c0   :  { %v4670_v12 = vsel %vm82_vm4, %v6440_v20, 0.0 }
0x38c1   :  { %4671 = vadd.xlane.f32.xlu0 %v4670_v12 }
0x38c3   :  { %v6442_v9 = vpop.eup %6441 }
0x38c4   :  { %v6444_v15 = vpop.eup %6443  ;;  %v4673_v28 = vsel %vm82_vm4, %v6442_v9, 0.0 }
0x38c5   :  { %v4676_v33 = vsel %vm82_vm4, %v6444_v15, 0.0  ;;  %4674 = vadd.xlane.f32.xlu1 %v4673_v28 }
0x38c6   :  { %4677 = vadd.xlane.f32.xlu0 %v4676_v33 }
0x38c7   :  { %v6446_v27 = vpop.eup %6445 }
0x38c8   :  { %v6448_v34 = vpop.eup %6447  ;;  %v4679_v26 = vsel %vm82_vm4, %v6446_v27, 0.0 }
0x38c9   :  { %4680 = vadd.xlane.f32.xlu1 %v4679_v26  ;;  %v4682_v5 = vsel %vm82_vm4, %v6448_v34, 0.0 }
0x38ca   :  { %4683 = vadd.xlane.f32.xlu0 %v4682_v5  ;;  %v5497_v5 = vld [vmem:[%s8132_s2 + $0x31] ss:$0 sm:$0xff] }
0x38cb   :  { %v6450_v13 = vpop.eup %6449 }
0x38cc   :  { %v6452_v11 = vpop.eup %6451  ;;  %v4685_v18 = vsel %vm82_vm4, %v6450_v13, 0.0 }
0x38cd   :  { %4686 = vadd.xlane.f32.xlu1 %v4685_v18  ;;  %v4688_v32 = vsel %vm173_vm5, %v6452_v11, 0.0 }
0x38ce   :  { %4689 = vadd.xlane.f32.xlu0 %v4688_v32 }
0x394a   :  { %v4672_v42 = vpop.xlane.xlu0 %4671 }
0x394b   :  { %6453 = vrcp.f32 %v4672_v42 }
0x394e   :  { %v4675_v48 = vpop.xlane.xlu1 %4674 }
0x394f   :  { %v4678_v63 = vpop.xlane.xlu0 %4677  ;;  %6455 = vrcp.f32 %v4675_v48 }
0x3950   :  { %6457 = vrcp.f32 %v4678_v63 }
0x3952   :  { %v4681_v58 = vpop.xlane.xlu1 %4680 }
0x3953   :  { %v4684_v62 = vpop.xlane.xlu0 %4683  ;;  %6459 = vrcp.f32 %v4681_v58 }
0x3954   :  { %6461 = vrcp.f32 %v4684_v62 }
0x3956   :  { %v4687_v8 = vpop.xlane.xlu1 %4686 }
0x3957   :  { %v4690_v60 = vpop.xlane.xlu0 %4689  ;;  %6463 = vrcp.f32 %v4687_v8 }
0x3958   :  { %6465 = vrcp.f32 %v4690_v60  ;;  %v6454_v41 = vpop.eup %6453 }
0x3959   :  { %v4698_v52 = vmul.f32 %v6454_v41, %v6440_v20 }
0x395c   :  { %v6456_v56 = vpop.eup %6455 }
0x395d   :  { %v4699_v51 = vmul.f32 %v6456_v56, %v6442_v9  ;;  %v6458_v6 = vpop.eup %6457 }
0x395e   :  { %v4700_v36 = vmul.f32 %v6458_v6, %v6444_v15 }
0x395f   :  { %v4705_v61 = vpack.c.bf16 %v4699_v51, %v4698_v52 }
0x3960   :  { %v6460_v16 = vpop.eup %6459 }
0x3961   :  { %v4701_v37 = vmul.f32 %v6460_v16, %v6446_v27  ;;  %6140 = vmatprep.mubr.msk.bf16.mxu0 %vm82_vm4, %v4705_v61  ;;  %v6462_v50 = vpop.eup %6461 }
0x3962   :  { %v4702_v29 = vmul.f32 %v6462_v50, %v6448_v34 }
0x3963   :  { %v4706_v54 = vpack.c.bf16 %v4701_v37, %v4700_v36  ;;  %v5461_v36 = vld [vmem:[%s8131_s1 + $0x230] sm:$0xff]  ;;  %v5462_v37 = vld [vmem:[%s8131_s1 + $0x238] sm:$0x3] }
0x3964   :  { %v6464_v49 = vpop.eup %6463  ;;  %v4296_v50 = vpack.c.bf16 %v5462_v37, %v5461_v36 }
0x3965   :  { %v6466_v0 = vpop.eup %6465  ;;  %6141 = vmatmul.mubr.msk.bf16.vlgmr.msra.gmra.mxu0 %vm82_vm4, %v4706_v54  ;;  %v4703_v23 = vmul.f32 %v6464_v49, %v6450_v13 }
0x3966   :  { %v4704_v31 = vmul.f32 %v6466_v0, %v6452_v11  ;;  %v4953_v54 = vsel %vm86_vm0, %v4296_v50, 0 }
0x3967   :  { %v4707_v53 = vpack.c.bf16 %v4703_v23, %v4702_v29  ;;  %6169 = vmatpush3.bf16.msra.mxu0 %v4953_v54 }
0x3968   :  { %v4708_v38 = vpack.c.bf16 %v4704_v31, %v4704_v31  ;;  %6184 = vmatprep.subr.bf16.mxu0 %v6548_v3 }
0x3969   :  { %6144 = vmatprep.mubr.msk.bf16.mxu0 %vm82_vm4, %v4707_v53 }
0x396d   :  { %6145 = vmatmul.mubr.msk.bf16.gmra.mxu0 %vm82_vm4, %v4708_v38 }
0x396e   :  { %6170 = vmatprep.mubr.msk.bf16.mxu0 %vm6549_vm1, %v6548_v3 }
0x3a25   :  { %v6142_v4 = vpop.f32.mrf.mxu0 }
0x3a26   :  { %v4789_v12 = vmul.f32 %v7815_v46, %v6142_v4 }
0x3a27   :  { %v4757_v40 = vpop.f32.mrf.mxu0 }
0x3a28   :  { %v4787_v15 = vmul.f32 %v7828_v1, %v4757_v40  ;;  %v5498_v40 = vld [vmem:[%s8132_s2 + $0x32] ss:$0 sm:$0xff] }
0x3a29   :  { %v6143_v2 = vpop.f32.mrf.mxu0 }
0x3a2a   :  { %v4790_v10 = vmul.f32 %v7809_v43, %v6143_v2 }
0x3a2b   :  { %v4760_v21 = vpop.f32.mrf.mxu0 }
0x3a2c   :  { %v4788_v9 = vmul.f32 %v7822_v44, %v4760_v21  ;;  %v5458_v44 = vld [vmem:[%s8131_s1 + $0x268] sm:$0xff] }
0x3a2d   :  { %v6146_v57 = vpop.f32.mrf.mxu0 }
0x3a2e   :  { %v4793_v24 = vmul.f32 %v7789_v55, %v6146_v57  ;;  %v4795_v55 = vpack.c.bf16 %v4790_v10, %v4789_v12  ;;  %v5465_v10 = vld [vmem:[%s8131_s1 + $0x250] sm:$0xff] }
0x3a2f   :  { %v4773_v25 = vpop.f32.mrf.mxu0 }
0x3a30   :  { %v4797_v17 = vpack.c.bf16 %v4793_v24, %v4793_v24  ;;  %v4791_v22 = vmul.f32 %v7796_v39, %v4773_v25  ;;  %v4794_v39 = vpack.c.bf16 %v4788_v9, %v4787_v15  ;;  %v5499_v24 = vld [vmem:[%s8132_s2 + $0x33] ss:$0 sm:$0xff]  ;;  %v5464_v9 = vld [vmem:[%s8131_s1 + $0x248] sm:$0xff] }
0x3a31   :  { %v6147_v14 = vpop.f32.mrf.mxu0 }
0x3a32   :  { %v4799_v19 = vsel %vm664_vm7, %v4797_v17, 0 }
0x3a33   :  { %v4776_v47 = vpop.f32.mrf.mxu0  ;;  %6149 = vmatpush3.bf16.msra.mxu1 %v4799_v19 }
0x3a34   :  { %v4792_v59 = vmul.f32 %v7802_v35, %v4776_v47  ;;  %6150 = vmatprep.subr.bf16.mxu1 %v6548_v3  ;;  %v5460_v35 = vld [vmem:[%s8131_s1 + $0x278] sm:$0xf]  ;;  %v5467_v47 = vld [vmem:[%s8131_s1 + $0x260] sm:$0xff] }
0x3a35   :  { %v4293_v43 = vpack.c.bf16 %v5460_v35, %v5460_v35 }
0x3a36   :  { %v4796_v20 = vpack.c.bf16 %v4792_v59, %v4791_v22  ;;  %v4304_v22 = vpack.c.bf16 %v5467_v47, %v5467_v47 }
0x3a37   :  { %v4847_v46 = vsel %vm713_vm9, %v4293_v43, 0 }
0x3a38   :  { %6151 = vmatpush3.bf16.msra.mxu1 %v4796_v20  ;;  %v5055_v59 = vsel %vm923_vm10, %v4304_v22, 0  ;;  %v5466_v20 = vld [vmem:[%s8131_s1 + $0x258] sm:$0xff] }
0x3a39   :  { %6152 = vmatprep.subr.bf16.mxu1 %v6548_v3  ;;  %v4303_v12 = vpack.c.bf16 %v5466_v20, %v5465_v10 }
0x3a3c   :  { %6153 = vmatpush3.bf16.msra.mxu1 %v4795_v55  ;;  %v5463_v55 = vld [vmem:[%s8131_s1 + $0x240] sm:$0xff] }
0x3a3d   :  { %6154 = vmatprep.subr.bf16.mxu1 %v6548_v3  ;;  %v4302_v15 = vpack.c.bf16 %v5464_v9, %v5463_v55 }
0x3a40   :  { %6155 = vmatpush3.bf16.msra.mxu1 %v4794_v39  ;;  %v5500_v39 = vld [vmem:[%s8132_s2 + $0x34] ss:$0 sm:$0xff] }
0x3a41   :  { %6160 = vmatprep.subr.bf16.mxu1 %v6548_v3 }
0x3a43   :  { %6157 = vmatmul.mubr.msk.bf16.vlgmr.msra.gmra.mxu1 %vm660_vm8, %v6856_v30  ;;  %v5459_v30 = vld [vmem:[%s8131_s1 + $0x270] sm:$0xff] }
0x3a44   :  { %6164 = vmatprep.mubr.msk.bf16.mxu1 %vm6549_vm1, %v6548_v3  ;;  %6161 = vmatpush3.bf16.msra.mxu1 %v4847_v46  ;;  %v4292_v1 = vpack.c.bf16 %v5459_v30, %v5458_v44 }
0x3a45   :  { %6162 = vmatprep.subr.bf16.mxu1 %v6548_v3 }
0x3a48   :  { %6163 = vmatpush3.bf16.msra.mxu1 %v4292_v1 }
0x3a49   :  { %6174 = vmatprep.subr.bf16.mxu1 %v6548_v3 }
0x3b03   :  { %v4835_v28 = vpop.f32.mrf.mxu1 }
0x3b05   :  { %v6158_v33 = vpop.f32.mrf.mxu1 }
0x3b07   :  { %v4838_v27 = vpop.f32.mrf.mxu1 }
0x3b08   :  { %v4842_v34 = vpack.c.bf16 %v4838_v27, %v4835_v28 }
0x3b09   :  { %v6159_v26 = vpop.f32.mrf.mxu1 }
0x3b0a   :  { %6165 = vmatmul.mubr.msk.bf16.vlgmr.msra.gmra.mxu1 %vm410_vm6, %v4842_v34 }
0x3b0b   :  { %6180 = vmatprep.mubr.msk.bf16.mxu1 %vm6549_vm1, %v6548_v3  ;;  %6175 = vmatpush3.bf16.msra.mxu1 %v5055_v59 }
0x3b0c   :  { %6176 = vmatprep.subr.bf16.mxu1 %v6548_v3 }
0x3b0f   :  { %6177 = vmatpush3.bf16.msra.mxu1 %v4303_v12  ;;  %v5503_v12 = vld [vmem:[%s8132_s2 + $0x35] ss:$0 sm:$0xff] }
0x3b10   :  { %6178 = vmatprep.subr.bf16.mxu1 %v6548_v3 }
0x3b13   :  { %6179 = vmatpush3.bf16.msra.mxu1 %v4302_v15 }
0x3bca   :  { %v4883_v13 = vpop.f32.mrf.mxu1 }
0x3bcb   :  { %v4890_v11 = vadd.f32 %v4883_v13, %v7914_v7 }
0x3bcc   :  { %v6166_v18 = vpop.f32.mrf.mxu1 }
0x3bcd   :  { %v8047_v32 = vadd.f32 %v5497_v5, %v4890_v11 }
0x3bce   :  { %v4886_v42 = vpop.f32.mrf.mxu1 }
0x3bcf   :  { %v4891_v48 = vadd.f32 %v4886_v42, %v7919_v45  ;;  %v4900_v63 = vsel %vm82_vm4, %v8047_v32, 0.0 }
0x3bd0   :  { %4901 = vadd.xlane.f32.xlu1 %v4900_v63  ;;  %v6167_v58 = vpop.f32.mrf.mxu1 }
0x3bd1   :  { %v8052_v62 = vadd.f32 %v5497_v5, %v4891_v48 }
0x3bd3   :  { %v4903_v8 = vsel %vm173_vm5, %v8052_v62, 0.0 }
0x3bd4   :  { %4904 = vadd.xlane.f32.xlu0 %v4903_v8 }
0x3c59   :  { %v4902_v60 = vpop.xlane.xlu1 %4901 }
0x3c5a   :  { %v4906_v41 = vmul.f32 0.1, %v4902_v60 }
0x3c5c   :  { %v4908_v7 = vsub.f32 %v8047_v32, %v4906_v41 }
0x3c5d   :  { %v4905_v56 = vpop.xlane.xlu0 %4904 }
0x3c5e   :  { %v4907_v52 = vmul.f32 0.1, %v4905_v56  ;;  %v4910_v51 = vmul.f32 %v4908_v7, %v4908_v7 }
0x3c60   :  { %v4909_v45 = vsub.f32 %v8052_v62, %v4907_v52  ;;  %v4912_v6 = vsel %vm82_vm4, %v4910_v51, 0.0 }
0x3c61   :  { %4913 = vadd.xlane.f32.xlu1 %v4912_v6 }
0x3c62   :  { %v4911_v61 = vmul.f32 %v4909_v45, %v4909_v45 }
0x3c64   :  { %v4915_v16 = vsel %vm173_vm5, %v4911_v61, 0.0 }
0x3c65   :  { %4916 = vadd.xlane.f32.xlu0 %v4915_v16 }
0x3cea   :  { %v4914_v49 = vpop.xlane.xlu1 %4913 }
0x3ceb   :  { %v4918_v0 = vmul.f32 0.1, %v4914_v49 }
0x3ced   :  { %v4920_v29 = vadd.f32 1e-05, %v4918_v0 }
0x3cee   :  { %v4917_v23 = vpop.xlane.xlu0 %4916 }
0x3cef   :  { %6467 = vrsqrt.f32 %v4920_v29  ;;  %v4919_v53 = vmul.f32 0.1, %v4917_v23 }
0x3cf1   :  { %v4921_v31 = vadd.f32 1e-05, %v4919_v53 }
0x3cf3   :  { %6469 = vrsqrt.f32 %v4921_v31 }
0x3cfc   :  { %v6468_v38 = vpop.eup %6467 }
0x3cfd   :  { %v4924_v4 = vmul.f32 %v6468_v38, %v4908_v7 }
0x3cff   :  { %v4932_v21 = vmul.f32 %v5498_v40, %v4924_v4 }
0x3d00   :  { %v6470_v2 = vpop.eup %6469 }
0x3d01   :  { %v4925_v57 = vmul.f32 %v6470_v2, %v4909_v45  ;;  %v4940_v17 = vadd.f32 %v5499_v24, %v4932_v21 }
0x3d03   :  { %v4933_v25 = vmul.f32 %v5498_v40, %v4925_v57 }
0x3d05   :  { %v4941_v14 = vadd.f32 %v5499_v24, %v4933_v25 }
0x3d07   :  { %v4942_v19 = vpack.c.bf16 %v4941_v14, %v4940_v17 }
0x3d09   :  { %6171 = vmatmul.mubr.msk.bf16.vlgmr.msra.gmra.mxu0 %vm82_vm4, %v4942_v19 }
0x3d0a   :  { %6186 = vmatprep.mubr.msk.bf16.mxu0 %vm6549_vm1, %v6548_v3 }
0x3dc9   :  { %v4989_v35 = vpop.f32.mrf.mxu0 }
0x3dca   :  { %v4990_v43 = vadd.f32 %v5500_v39, %v4989_v35 }
0x3dcb   :  { %v6172_v46 = vpop.f32.mrf.mxu0 }
0x3dcc   :  { %v4998_v44 = vmul.f32 0.70710677, %v4990_v43  ;;  %v4996_v19 = vmul.f32 0.5, %v4990_v43 }
0x3dcd   :  { %v4992_v30 = vpop.f32.mrf.mxu0 }
0x3dce   :  { %v5000_v3 = vand.u32 2147483647, %v4998_v44  ;;  %v4993_v1 = vadd.f32 %v5500_v39, %v4992_v30  ;;  %vm5040_vm1 = vcmp.ge.f32.partialorder %v4998_v44, 0.0 }
0x3dcf   :  { %v6173_v28 = vpop.f32.mrf.mxu0 }
0x3dd0   :  { %v5002_v33 = vmul.f32 0.3275911, %v5000_v3  ;;  %v4999_v27 = vmul.f32 0.70710677, %v4993_v1  ;;  %v5028_v11 = vsub.f32 0.0, %v5000_v3  ;;  %v4997_v47 = vmul.f32 0.5, %v4993_v1 }
0x3dd2   :  { %v5004_v34 = vadd.f32 1.0, %v5002_v33  ;;  %v5001_v26 = vand.u32 2147483647, %v4999_v27  ;;  %v5030_v18 = vmul.f32 %v5028_v11, %v5000_v3  ;;  %vm5041_vm6 = vcmp.ge.f32.partialorder %v4999_v27, 0.0  ;;  %v24_v11 = vld [vmem:[%s8133_s3 + $0x20] sm:$0xff] }
0x3dd4   :  { %6471 = vrcp.f32 %v5004_v34  ;;  %v5003_v5 = vmul.f32 0.3275911, %v5001_v26  ;;  %v5029_v42 = vsub.f32 0.0, %v5001_v26  ;;  %v5032_v58 = vmul.f32 1.442695, %v5030_v18 }
0x3dd5   :  { %v25_v18 = vld [vmem:[%s8133_s3 + $0x28] sm:$0x3] }
0x3dd6   :  { %v5005_v13 = vadd.f32 1.0, %v5003_v5  ;;  %v5031_v8 = vmul.f32 %v5029_v42, %v5001_v26  ;;  %v26_v42 = vpack.c.bf16 %v25_v18, %v24_v11 }
0x3dd8   :  { %6473 = vrcp.f32 %v5005_v13  ;;  %v5034_v52 = vmul.f32 1.442695, %v5031_v8 }
0x3dd9   :  { %6475 = vpow2.f32 %v5032_v58 }
0x3dda   :  { %6477 = vpow2.f32 %v5034_v52 }
0x3de1   :  { %v6472_v48 = vpop.eup %6471 }
0x3de2   :  { %v5010_v63 = vmul.f32 1.0614054, %v6472_v48 }
0x3de4   :  { %v5012_v60 = vadd.f32 -1.4531521, %v5010_v63 }
0x3de5   :  { %v6474_v41 = vpop.eup %6473 }
0x3de6   :  { %v5014_v7 = vmul.f32 %v6472_v48, %v5012_v60  ;;  %v5011_v56 = vmul.f32 1.0614054, %v6474_v41  ;;  %v6476_v23 = vpop.eup %6475 }
0x3de7   :  { %v6478_v40 = vpop.eup %6477 }
0x3de8   :  { %v5016_v51 = vadd.f32 1.4214138, %v5014_v7  ;;  %v5013_v45 = vadd.f32 -1.4531521, %v5011_v56 }
0x3dea   :  { %v5018_v6 = vmul.f32 %v6472_v48, %v5016_v51  ;;  %v5015_v61 = vmul.f32 %v6474_v41, %v5013_v45  ;;  %v5504_v51 = vld [vmem:[%s8133_s3 + $0x30] ss:$0 sm:$0xff] }
0x3dec   :  { %v5020_v16 = vadd.f32 -0.28449672, %v5018_v6  ;;  %v5017_v36 = vadd.f32 1.4214138, %v5015_v61 }
0x3dee   :  { %v5022_v37 = vmul.f32 %v6472_v48, %v5020_v16  ;;  %v5019_v50 = vmul.f32 %v6474_v41, %v5017_v36  ;;  %v5505_v16 = vld [vmem:[%s8133_s3 + $0x38] ss:$0 sm:$0xff] }
0x3df0   :  { %v5024_v54 = vadd.f32 0.2548296, %v5022_v37  ;;  %v5021_v49 = vadd.f32 -0.28449672, %v5019_v50 }
0x3df2   :  { %v5026_v0 = vmul.f32 %v6472_v48, %v5024_v54  ;;  %v5023_v29 = vmul.f32 %v6474_v41, %v5021_v49  ;;  %v5155_v48 = vsel %vm86_vm0, %v26_v42, 0  ;;  %v5506_v49 = vld [vmem:[%s8133_s3 + $0x40] ss:$0 sm:$0xff] }
0x3df3   :  { %6185 = vmatpush3.bf16.msra.mxu0 %v5155_v48 }
0x3df4   :  { %v5036_v53 = vmul.f32 %v6476_v23, %v5026_v0  ;;  %v5025_v31 = vadd.f32 0.2548296, %v5023_v29 }
0x3df6   :  { %v5038_v38 = vsub.f32 1.0, %v5036_v53  ;;  %v5027_v4 = vmul.f32 %v6474_v41, %v5025_v31 }
0x3df8   :  { %v5042_v2 = vsub.f32 0.0, %v5038_v38  ;;  %v5037_v21 = vmul.f32 %v6478_v40, %v5027_v4 }
0x3dfa   :  { %v5044_v57 = vsel %vm5040_vm1, %v5038_v38, %v5042_v2  ;;  %v5039_v24 = vsub.f32 1.0, %v5037_v21 }
0x3dfb   :  { %v5046_v17 = vadd.f32 1.0, %v5044_v57 }
0x3dfc   :  { %v5043_v25 = vsub.f32 0.0, %v5039_v24 }
0x3dfd   :  { %v5048_v59 = vmul.f32 %v5046_v17, %v4996_v19 }
0x3dfe   :  { %v5045_v14 = vsel %vm5041_vm6, %v5039_v24, %v5043_v25 }
0x3dff   :  { %v5047_v22 = vadd.f32 1.0, %v5045_v14 }
0x3e01   :  { %v5049_v10 = vmul.f32 %v5047_v22, %v4997_v47 }
0x3e03   :  { %v5050_v20 = vpack.c.bf16 %v5049_v10, %v5048_v59 }
0x3e05   :  { %6181 = vmatmul.mubr.msk.bf16.vlgmr.msra.gmra.mxu1 %vm919_vm13, %v5050_v20 }
0x3ec5   :  { %v5091_v55 = vpop.f32.mrf.mxu1 }
0x3ec6   :  { %v5098_v9 = vadd.f32 %v5091_v55, %v8047_v32 }
0x3ec7   :  { %v6182_v15 = vpop.f32.mrf.mxu1 }
0x3ec8   :  { %v5106_v39 = vadd.f32 %v5503_v12, %v5098_v9 }
0x3ec9   :  { %v5094_v35 = vpop.f32.mrf.mxu1 }
0x3eca   :  { %v5099_v46 = vadd.f32 %v5094_v35, %v8052_v62  ;;  %v5108_v43 = vsel %vm82_vm4, %v5106_v39, 0.0 }
0x3ecb   :  { %5109 = vadd.xlane.f32.xlu1 %v5108_v43  ;;  %v6183_v44 = vpop.f32.mrf.mxu1 }
0x3ecc   :  { %v5107_v30 = vadd.f32 %v5503_v12, %v5099_v46 }
0x3ece   :  { %v5111_v3 = vsel %vm173_vm5, %v5107_v30, 0.0 }
0x3ecf   :  { %5112 = vadd.xlane.f32.xlu0 %v5111_v3 }
0x3f54   :  { %v5110_v1 = vpop.xlane.xlu1 %5109 }
0x3f55   :  { %v5114_v28 = vmul.f32 0.1, %v5110_v1 }
0x3f57   :  { %v5116_v33 = vsub.f32 %v5106_v39, %v5114_v28 }
0x3f58   :  { %v5113_v27 = vpop.xlane.xlu0 %5112 }
0x3f59   :  { %v5115_v34 = vmul.f32 0.1, %v5113_v27  ;;  %v5118_v26 = vmul.f32 %v5116_v33, %v5116_v33 }
0x3f5b   :  { %v5117_v32 = vsub.f32 %v5107_v30, %v5115_v34  ;;  %v5120_v5 = vsel %vm82_vm4, %v5118_v26, 0.0 }
0x3f5c   :  { %5121 = vadd.xlane.f32.xlu1 %v5120_v5 }
0x3f5d   :  { %v5119_v13 = vmul.f32 %v5117_v32, %v5117_v32 }
0x3f5f   :  { %v5123_v62 = vsel %vm173_vm5, %v5119_v13, 0.0 }
0x3f60   :  { %5124 = vadd.xlane.f32.xlu0 %v5123_v62 }
0x3fe5   :  { %v5122_v63 = vpop.xlane.xlu1 %5121 }
0x3fe6   :  { %v5126_v58 = vmul.f32 0.1, %v5122_v63 }
0x3fe8   :  { %v5128_v8 = vadd.f32 1e-05, %v5126_v58 }
0x3fe9   :  { %v5125_v60 = vpop.xlane.xlu0 %5124 }
0x3fea   :  { %6479 = vrsqrt.f32 %v5128_v8  ;;  %v5127_v41 = vmul.f32 0.1, %v5125_v60 }
0x3fec   :  { %v5129_v7 = vadd.f32 1e-05, %v5127_v41 }
0x3fee   :  { %6481 = vrsqrt.f32 %v5129_v7 }
0x3ff7   :  { %v6480_v56 = vpop.eup %6479 }
0x3ff8   :  { %v5132_v52 = vmul.f32 %v6480_v56, %v5116_v33 }
0x3ffa   :  { %v5138_v6 = vmul.f32 %v5504_v51, %v5132_v52 }
0x3ffb   :  { %v6482_v45 = vpop.eup %6481 }
0x3ffc   :  { %v5133_v61 = vmul.f32 %v6482_v45, %v5117_v32  ;;  %v5144_v37 = vadd.f32 %v5505_v16, %v5138_v6 }
0x3ffe   :  { %v5139_v36 = vmul.f32 %v5504_v51, %v5133_v61 }
0x4000   :  { %v5145_v50 = vadd.f32 %v5505_v16, %v5139_v36 }
0x4002   :  { %v5146_v54 = vpack.c.bf16 %v5145_v50, %v5144_v37 }
0x4004   :  { %6187 = vmatmul.mubr.msk.bf16.vlgmr.msra.gmra.mxu0 %vm82_vm4, %v5146_v54 }
0x40c4   :  { %v5191_v0 = vpop.f32.mrf.mxu0 }
0x40c5   :  { %v5192_v29 = vadd.f32 %v5506_v49, %v5191_v0 }
0x40c6   :  { %v6188_v23 = vpop.f32.mrf.mxu0 }
0x40c7   :  { %5198 = vst.msk [vmem:[#allocation2] sm:$0xff] %vm82_vm4, %v5192_v29 }
0x40c8   :  { %v5194_v53 = vpop.f32.mrf.mxu0 }
0x40c9   :  { %v5195_v31 = vadd.f32 %v5506_v49, %v5194_v53 }
0x40ca   :  { %v6189_v38 = vpop.f32.mrf.mxu0 }
0x40cb   :  { %5199 = vst.msk [vmem:[#allocation2 + $0x8] sm:$0x3] %vm173_vm5, %v5195_v31 }
0x40cc   :  { %6536 = shalt.err (!%p6533_p4)
}
0x40cd   :  { %s6551_s3 = smov 128   ;;  %s6552_s25 = smov 8  }
0x40ce   :  { %5211 = dma.vmem_to_hbm [thread:$0]  %s5206_s23, 256, %s8134_s4, [#allocation3], %s6551_s3, %s6551_s3, %s6552_s25  }
0x40cf   :  { %6545 = dma.done.wait [#allocation3], 256  }
0x40d0   :  { %6546 = vsyncadd [#allocation3], 4294967040 }
0x40d1   :  { %5215 = vsyncpa [#allocation3], 1 }

</bundles_post_ra>
